<compile_context>
chip_gen: v5e
topology: v5e:2x2
jax: 0.10.0
libtpu: 0.0.40
codegen_flags: <defaults>
</compile_context>

<pallas_src>
import math

import numpy as np
import jax
import jax.numpy as jnp
from jax import lax
from jax.experimental import pallas as pl
from jax.experimental.pallas import tpu as pltpu

K_DB = 50.0       # DBHead k
BN_EPS = 1e-5     # torch BatchNorm2d default eps

# --- tiling knobs (trace-time constants) -----------------------------------
# Production sizing (per perf review):
#   v7x  (64 MiB VMEM, 2 TCs): M-tiles of ~1-2K rows at Cin=256; "parallel" axes
#                              below feed both TensorCores.
#   v6e/v5e (128 MiB VMEM):    use the largest tile that fits; on v5e consider
#                              pipeline_mode=pl.Buffered(3) on the conv1 inputs.
# Kept small here so the toy test shape still exercises multi-tile grids and the
# cross-tile BatchNorm-stats accumulators.
_ROW_TILE_PX = 128               # conv1 tile target, in output pixels (tile_h * W)
_M_TILE = 256                    # conv2 / conv3 tile, in pixels
_VMEM_LIMIT = 48 * 1024 * 1024   # <= v7x's 64 MiB physical; raise on v5e/v6e.


# ----------------------------- Pallas kernels ------------------------------ #

def _conv1_kernel(x0_ref, x1_ref, x2_ref, w1_ref, y1_ref, st1_ref):
    """3x3 conv (pad=1), both heads fused on output channels, + BN1 batch stats.

    x{0,1,2}_ref : (1, tile_h, W+2, Ci) bf16   rows shifted by dh = 0,1,2 (conv halo)
    w1_ref       : (9, Ci, 2*Cm)        bf16   tap-major fused weights
    y1_ref       : (2, tile_h*W, Cm)    f32    pre-BN conv1 output, per head
    st1_ref      : (1, 2, 2*Cm)         f32    [sum, sum-of-squares] accumulator
    """
    j = pl.program_id(1)
    _, tile_h, wp, ci = x0_ref.shape
    w = wp - 2
    c2 = w1_ref.shape[2]
    cm = c2 // 2
    mt = tile_h * w

    xs = (x0_ref[0], x1_ref[0], x2_ref[0])           # bf16, loaded once
    acc = jnp.zeros((mt, c2), jnp.float32)
    for dh in range(3):                               # 9-tap accumulation: no im2col slab
        for dw in range(3):
            tap = xs[dh][:, dw:dw + w, :].reshape(mt, ci)
            acc += jnp.dot(tap, w1_ref[dh * 3 + dw],
                           preferred_element_type=jnp.float32)
    # conv1 bias omitted: it cancels exactly under training-mode BatchNorm.

    y1_ref[0] = acc[:, :cm]
    y1_ref[1] = acc[:, cm:]

    @pl.when(j == 0)
    def _():
        st1_ref[...] = jnp.zeros_like(st1_ref)
    s = jnp.sum(acc, axis=0, keepdims=True).reshape(1, 1, c2)
    q = jnp.sum(acc * acc, axis=0, keepdims=True).reshape(1, 1, c2)
    st1_ref[...] += jnp.concatenate([s, q], axis=1)


def _conv2_kernel(y1_ref, a1_ref, c1_ref, w2_ref, z2_ref, st2_ref):
    """BN1(+ReLU) -> ConvTranspose2d(k=2, s=2) as one dense matmul per head,
    + BN2 batch-stat accumulation.  Grid = (head, m_tile)."""
    i = pl.program_id(1)
    c4 = z2_ref.shape[2]
    y = jnp.maximum(y1_ref[0] * a1_ref[0] + c1_ref[0], 0.0)          # f32
    z = jnp.dot(y.astype(jnp.bfloat16), w2_ref[0],
                preferred_element_type=jnp.float32)                  # (tile_m, 4*Cm)
    # conv2 bias omitted: it cancels exactly under training-mode BatchNorm.
    z2_ref[0] = z

    @pl.when(i == 0)
    def _():
        st2_ref[...] = jnp.zeros_like(st2_ref)
    s = jnp.sum(z, axis=0, keepdims=True).reshape(1, 1, c4)
    q = jnp.sum(z * z, axis=0, keepdims=True).reshape(1, 1, c4)
    st2_ref[...] += jnp.concatenate([s, q], axis=1)


def _conv3_kernel(z2_ref, a2_ref, c2_ref, w3_ref, b3_ref, out_ref):
    """BN2(+ReLU) -> ConvTranspose2d(k=2, s=2, 1ch) -> sigmoid for both heads,
    DB step function, one coalesced lane-dense (tile_m, 48) store."""
    zb = jnp.maximum(z2_ref[0] * a2_ref[0] + c2_ref[0], 0.0)
    zt = jnp.maximum(z2_ref[1] * a2_ref[1] + c2_ref[1], 0.0)
    lb = jnp.dot(zb.astype(jnp.bfloat16), w3_ref[0],
                 preferred_element_type=jnp.float32) + b3_ref[0]
    lt = jnp.dot(zt.astype(jnp.bfloat16), w3_ref[1],
                 preferred_element_type=jnp.float32) + b3_ref[1]
    shrink = 1.0 / (1.0 + jnp.exp(-lb))                  # exp on the EUP
    thresh = 1.0 / (1.0 + jnp.exp(-lt))
    binary = pl.reciprocal(1.0 + jnp.exp(-K_DB * (shrink - thresh)), approx=True)
    out_ref[...] = jnp.concatenate([shrink, thresh, binary], axis=-1)


# ----------------------- parameter prep (trace time) ----------------------- #

def _prep_params(pb, pt, ci, cm):
    w1b, b1b, g1b, be1b, w2b, b2b, g2b, be2b, w3b, b3b = pb
    w1t, b1t, g1t, be1t, w2t, b2t, g2t, be2t, w3t, b3t = pt
    c2 = 2 * cm
    del b1b, b1t, b2b, b2t   # conv1/conv2 biases cancel in training-mode BN

    # conv1: both heads stacked on the output-channel axis; tap-major (9, Ci, 2*Cm).
    w1f = jnp.concatenate([w1b, w1t], axis=-1).reshape(9, ci, c2).astype(jnp.bfloat16)
    g1s = jnp.stack([g1b.reshape(cm), g1t.reshape(cm)])
    be1s = jnp.stack([be1b.reshape(cm), be1t.reshape(cm)])

    # conv2: dense per-head weight (Cm, 4*Cm), column = (2*d1 + d2)*Cm + c.
    # (no block-diagonal zero fill -> no wasted MXU K; head is a grid axis instead)
    def w2_dense(w2):   # (2, 2, Cm, Cm) -> (Cm, 4*Cm)
        return jnp.concatenate([w2[d1, d2] for d1 in range(2) for d2 in range(2)], axis=1)
    w2f = jnp.stack([w2_dense(w2b), w2_dense(w2t)]).astype(jnp.bfloat16)
    g2s = jnp.stack([g2b.reshape(cm), g2t.reshape(cm)])
    be2s = jnp.stack([be2b.reshape(cm), be2t.reshape(cm)])

    # conv3: per-head block-diagonal across the 4 z-taps;
    # column = (2*d1 + d2)*4 + 2*kh + kw.  The zero fill here is ~1% of MXU work.
    def w3_blockdiag(w3):   # (2, 2, Cm, 1) -> (4*Cm, 16)
        m = w3[..., 0].reshape(4, cm).T                # (Cm, 4), col = 2*kh + kw
        out = jnp.zeros((4 * cm, 16), jnp.float32)
        for t in range(4):
            out = out.at[t * cm:(t + 1) * cm, 4 * t:4 * (t + 1)].set(m)
        return out
    w3f = jnp.stack([w3_blockdiag(w3b), w3_blockdiag(w3t)]).astype(jnp.bfloat16)
    b3s = jnp.stack([jnp.broadcast_to(b3b.reshape(1, 1), (1, 16)),
                     jnp.broadcast_to(b3t.reshape(1, 1), (1, 16))])      # (2, 1, 16)
    return w1f, g1s, be1s, w2f, g2s, be2s, w3f, b3s


def _pick_row_tile(h, w, target_px):
    best = None
    for cand in range(1, h + 1):
        if h % cand == 0 and (cand * w) % 8 == 0:
            if cand * w <= target_px or best is None:
                best = cand
    return best if best is not None else h


def _pick_m_tile(m, target):
    best = None
    for cand in range(1, m + 1):
        if m % cand == 0 and cand % 8 == 0:
            if cand <= target or best is None:
                best = cand
    return best if best is not None else m


# ------------------------------ JAX wrapper -------------------------------- #

@jax.jit
def db_head_forward(x_nchw, params_bin, params_thr):
    N, Ci, H, W = x_nchw.shape
    Cm = Ci // 4
    C2 = 2 * Cm
    M = N * H * W
    Wp = W + 2

    # Input staging: NHWC, zero-pad for the 3x3 conv, cast to bf16 ONCE.
    x_nhwc = jnp.transpose(x_nchw, (0, 2, 3, 1)).astype(jnp.float32)
    xp = jnp.pad(x_nhwc, ((0, 0), (1, 1), (1, 1), (0, 0))).astype(jnp.bfloat16)
    # Row-shifted views give each row tile its 2-row conv halo with plain Blocked
    # (auto-pipelined) BlockSpecs.
    xr0 = xp[:, 0:H, :, :]
    xr1 = xp[:, 1:H + 1, :, :]
    xr2 = xp[:, 2:H + 2, :, :]

    (w1f, g1s, be1s, w2f, g2s, be2s, w3f, b3s) = _prep_params(
        params_bin, params_thr, Ci, Cm)

    tile_h = _pick_row_tile(H, W, _ROW_TILE_PX)
    n_j = H // tile_h
    tile_m = _pick_m_tile(M, _M_TILE)
    n_m = M // tile_m

    # -------- pass 1: conv1 (both heads fused) + BN1 batch statistics -------- #
    flops1 = 2 * M * 9 * Ci * C2
    bytes1 = int(3 * xr0.size * 2 + w1f.size * 2 + 2 * M * Cm * 4 + N * 2 * C2 * 4)
    y1, st1 = pl.pallas_call(
        _conv1_kernel,
        grid=(N, n_j),
        in_specs=[
            pl.BlockSpec((1, tile_h, Wp, Ci), lambda n, j: (n, j, 0, 0)),
            pl.BlockSpec((1, tile_h, Wp, Ci), lambda n, j: (n, j, 0, 0)),
            pl.BlockSpec((1, tile_h, Wp, Ci), lambda n, j: (n, j, 0, 0)),
            pl.BlockSpec((9, Ci, C2), lambda n, j: (0, 0, 0)),
        ],
        out_specs=(
            pl.BlockSpec((2, tile_h * W, Cm), lambda n, j: (0, n * n_j + j, 0)),
            pl.BlockSpec((1, 2, C2), lambda n, j: (n, 0, 0)),
        ),
        out_shape=(
            jax.ShapeDtypeStruct((2, M, Cm), jnp.float32),
            jax.ShapeDtypeStruct((N, 2, C2), jnp.float32),
        ),
        compiler_params=pltpu.CompilerParams(
            dimension_semantics=("parallel", "arbitrary"),
            vmem_limit_bytes=_VMEM_LIMIT),
        cost_estimate=pl.CostEstimate(flops=flops1, transcendentals=0,
                                      bytes_accessed=bytes1),
    )(xr0, xr1, xr2, w1f)

    # BN1 fold (tiny XLA ops): clamped single-pass variance -> per-channel affine.
    s1 = jnp.sum(st1[:, 0, :], axis=0)
    q1 = jnp.sum(st1[:, 1, :], axis=0)
    mean1 = s1 / M
    var1 = jnp.maximum(q1 / M - mean1 * mean1, 0.0)
    sc1 = lax.rsqrt(var1 + BN_EPS) * g1s.reshape(C2)
    sh1 = be1s.reshape(C2) - mean1 * sc1
    a1 = sc1.reshape(2, 1, Cm)
    c1 = sh1.reshape(2, 1, Cm)

    # -------- pass 2: BN1+ReLU -> conv2 (dense, per head) + BN2 stats -------- #
    flops2 = 2 * 2 * M * Cm * (4 * Cm)
    bytes2 = int(y1.size * 4 + w2f.size * 2 + 2 * M * 4 * Cm * 4 + 2 * 2 * 4 * Cm * 4)
    z2, st2 = pl.pallas_call(
        _conv2_kernel,
        grid=(2, n_m),
        in_specs=[
            pl.BlockSpec((1, tile_m, Cm), lambda h, i: (h, i, 0)),
            pl.BlockSpec((1, 1, Cm), lambda h, i: (h, 0, 0)),
            pl.BlockSpec((1, 1, Cm), lambda h, i: (h, 0, 0)),
            pl.BlockSpec((1, Cm, 4 * Cm), lambda h, i: (h, 0, 0)),
        ],
        out_specs=(
            pl.BlockSpec((1, tile_m, 4 * Cm), lambda h, i: (h, i, 0)),
            pl.BlockSpec((1, 2, 4 * Cm), lambda h, i: (h, 0, 0)),
        ),
        out_shape=(
            jax.ShapeDtypeStruct((2, M, 4 * Cm), jnp.float32),
            jax.ShapeDtypeStruct((2, 2, 4 * Cm), jnp.float32),
        ),
        compiler_params=pltpu.CompilerParams(
            dimension_semantics=("parallel", "arbitrary"),
            vmem_limit_bytes=_VMEM_LIMIT),
        cost_estimate=pl.CostEstimate(flops=flops2, transcendentals=0,
                                      bytes_accessed=bytes2),
    )(y1, a1, c1, w2f)

    # BN2 fold: reduce the 4 up-sample taps, clamp variance, tile per tap.
    s2 = jnp.sum(st2[:, 0, :].reshape(2, 4, Cm), axis=1)
    q2 = jnp.sum(st2[:, 1, :].reshape(2, 4, Cm), axis=1)
    mean2 = s2 / (4 * M)
    var2 = jnp.maximum(q2 / (4 * M) - mean2 * mean2, 0.0)
    sc2 = lax.rsqrt(var2 + BN_EPS) * g2s
    sh2 = be2s - mean2 * sc2
    a2 = jnp.tile(sc2, (1, 4)).reshape(2, 1, 4 * Cm)
    c2 = jnp.tile(sh2, (1, 4)).reshape(2, 1, 4 * Cm)

    # ---- pass 3: BN2+ReLU -> conv3 -> sigmoid -> DB step, coalesced store ---- #
    flops3 = 2 * 2 * M * (4 * Cm) * 16
    bytes3 = int(z2.size * 4 + w3f.size * 2 + M * 48 * 4)
    out = pl.pallas_call(
        _conv3_kernel,
        grid=(n_m,),
        in_specs=[
            pl.BlockSpec((2, tile_m, 4 * Cm), lambda i: (0, i, 0)),
            pl.BlockSpec((2, 1, 4 * Cm), lambda i: (0, 0, 0)),
            pl.BlockSpec((2, 1, 4 * Cm), lambda i: (0, 0, 0)),
            pl.BlockSpec((2, 4 * Cm, 16), lambda i: (0, 0, 0)),
            pl.BlockSpec((2, 1, 16), lambda i: (0, 0, 0)),
        ],
        out_specs=pl.BlockSpec((tile_m, 48), lambda i: (i, 0)),
        out_shape=jax.ShapeDtypeStruct((M, 48), jnp.float32),
        compiler_params=pltpu.CompilerParams(
            dimension_semantics=("parallel",),
            vmem_limit_bytes=_VMEM_LIMIT),
        cost_estimate=pl.CostEstimate(flops=flops3, transcendentals=48 * M,
                                      bytes_accessed=bytes3),
    )(z2, a2, c2, w3f, b3s)

    # lane index t = d1*8 + d2*4 + kh*2 + kw within each 16-group maps to full-res
    # pixel (4h + 2*d1 + kh, 4w + 2*d2 + kw).  Pure layout glue (XLA side).
    maps = (out.reshape(N, H, W, 3, 2, 2, 2, 2)
               .transpose(0, 3, 1, 4, 6, 2, 5, 7)   # (n, c, h, d1, kh, w, d2, kw)
               .reshape(N, 3, 4 * H, 4 * W))
    return {'maps': maps}


# --------------------- deterministic parameter init ------------------------ #

def init_head_params(key, cin):
    cm = cin // 4
    k1, k2, k3, k4, k5 = jax.random.split(key, 5)

    def uni(k, shape, bound):
        return jax.random.uniform(k, shape, jnp.float32, -bound, bound)

    # conv1 (Conv2d): kaiming_uniform(relu) weight, zero bias (as in Head.__init__)
    w1 = uni(k1, (3, 3, cin, cm), math.sqrt(6.0 / (cin * 9)))   # HWIO
    b1 = jnp.zeros((1, cm), jnp.float32)
    g1 = jnp.ones((1, cm), jnp.float32)     # BN gamma
    be1 = jnp.zeros((1, cm), jnp.float32)   # BN beta
    # conv2 (ConvTranspose2d): default-style uniform init
    w2 = uni(k2, (2, 2, cm, cm), 1.0 / math.sqrt(cm * 4))       # (kh, kw, ci, co)
    b2 = uni(k3, (1, cm), 1.0 / math.sqrt(cm * 4))
    g2 = jnp.ones((1, cm), jnp.float32)
    be2 = jnp.zeros((1, cm), jnp.float32)
    # conv3 (ConvTranspose2d -> 1 channel)
    w3 = uni(k4, (2, 2, cm, 1), 1.0 / math.sqrt(cm * 4))
    b3 = uni(k5, (1, 1), 1.0 / math.sqrt(cm * 4))
    return (w1, b1, g1, be1, w2, b2, g2, be2, w3, b3)


# ------------------------ pure-JAX reference (check) ----------------------- #
# Matches the kernel's MXU numerics: conv operands in bf16, f32 accumulation,
# BN / sigmoids / k=50 step in f32.

def _bn_relu_ref(y, g, be):  # NCHW, training-mode BN (batch stats)
    m = jnp.mean(y, axis=(0, 2, 3), keepdims=True)
    v = jnp.mean((y - m) ** 2, axis=(0, 2, 3), keepdims=True)
    return jnp.maximum((y - m) * lax.rsqrt(v + BN_EPS) * g.reshape(1, -1, 1, 1)
                       + be.reshape(1, -1, 1, 1), 0.0)


def _convT_ref(x, w, b):  # x NCHW, w (kh, kw, ci, co), stride == kernel == 2
    N, Ci, H, W = x.shape
    Co = w.shape[-1]
    y = jnp.einsum('nchw,ijcd->ndhiwj',
                   x.astype(jnp.bfloat16), w.astype(jnp.bfloat16),
                   preferred_element_type=jnp.float32)
    return y.reshape(N, Co, 2 * H, 2 * W) + b.reshape(1, -1, 1, 1)


def _head_ref(x, p):
    w1, b1, g1, be1, w2, b2, g2, be2, w3, b3 = p
    y = lax.conv_general_dilated(
        x.astype(jnp.bfloat16),
        jnp.transpose(w1, (3, 2, 0, 1)).astype(jnp.bfloat16),
        (1, 1), [(1, 1), (1, 1)],
        dimension_numbers=('NCHW', 'OIHW', 'NCHW'),
        preferred_element_type=jnp.float32) + b1.reshape(1, -1, 1, 1)
    y = _bn_relu_ref(y, g1, be1)
    y = _convT_ref(y, w2, b2)
    y = _bn_relu_ref(y, g2, be2)
    y = _convT_ref(y, w3, b3)
    return 1.0 / (1.0 + jnp.exp(-y))


def dbhead_ref(x, pb, pt):
    shrink = _head_ref(x, pb)
    thresh = _head_ref(x, pt)
    binary = 1.0 / (1.0 + jnp.exp(-K_DB * (shrink - thresh)))
    return jnp.concatenate([shrink, thresh, binary], axis=1)


# --------------------------------- main ------------------------------------ #

if __name__ == "__main__":
    key = jax.random.PRNGKey(0)
    kx, kb, kt = jax.random.split(key, 3)

    N, C, H, W = 2, 8, 16, 16          # in_channels=8 -> mid channels = 2
    x = jax.random.normal(kx, (N, C, H, W), jnp.float32)
    pb = init_head_params(kb, C)       # binarize head
    pt = init_head_params(kt, C)       # threshold head

    out = db_head_forward(x, pb, pt)['maps']
    out = jax.block_until_ready(out)

    ref = dbhead_ref(x, pb, pt)
    assert out.shape == (N, 3, 4 * H, 4 * W), out.shape
    np.testing.assert_allclose(np.asarray(out), np.asarray(ref),
                               atol=5e-3, rtol=1e-2)
    print("KERNEL_OK")
</pallas_src>

<mosaic_0001>
module attributes {stable_mosaic.version = 11 : i64} {
  func.func @_conv1_kernel(%arg0: i32, %arg1: i32, %arg2: memref<1x8x18x8xbf16, #tpu.memory_space<vmem>>, %arg3: memref<1x8x18x8xbf16, #tpu.memory_space<vmem>>, %arg4: memref<1x8x18x8xbf16, #tpu.memory_space<vmem>>, %arg5: memref<9x8x4xbf16, #tpu.memory_space<vmem>>, %arg6: memref<2x128x2xf32, #tpu.memory_space<vmem>>, %arg7: memref<1x2x4xf32, #tpu.memory_space<vmem>>) attributes {dimension_semantics = [#tpu.dimension_semantics<parallel>, #tpu.dimension_semantics<arbitrary>], iteration_bounds = array<i64: 2, 2>, scalar_prefetch = 0 : i64, scratch_operands = 0 : i64, tpu.core_type = #tpu.core_type<tc>, window_params = [{transform_indices = @transform_0, window_bounds = array<i64: 1, 8, 18, 8>}, {transform_indices = @transform_1, window_bounds = array<i64: 1, 8, 18, 8>}, {transform_indices = @transform_2, window_bounds = array<i64: 1, 8, 18, 8>}, {pipeline_mode = #tpu.pipeline_mode<synchronous>, transform_indices = @transform_3, window_bounds = array<i64: 9, 8, 4>}, {transform_indices = @transform_4, window_bounds = array<i64: 2, 128, 2>}, {transform_indices = @transform_5, window_bounds = array<i64: 1, 2, 4>}]} {
    %c0 = arith.constant 0 : index
    %c0_0 = arith.constant 0 : index
    %c0_1 = arith.constant 0 : index
    %c0_2 = arith.constant 0 : index
    %0 = vector.load %arg2[%c0, %c0_0, %c0_1, %c0_2] : memref<1x8x18x8xbf16, #tpu.memory_space<vmem>>, vector<1x8x18x8xbf16>
    %1 = vector.shape_cast %0 : vector<1x8x18x8xbf16> to vector<8x18x8xbf16>
    %c0_3 = arith.constant 0 : index
    %c0_4 = arith.constant 0 : index
    %c0_5 = arith.constant 0 : index
    %c0_6 = arith.constant 0 : index
    %2 = vector.load %arg3[%c0_3, %c0_4, %c0_5, %c0_6] : memref<1x8x18x8xbf16, #tpu.memory_space<vmem>>, vector<1x8x18x8xbf16>
    %3 = vector.shape_cast %2 : vector<1x8x18x8xbf16> to vector<8x18x8xbf16>
    %c0_7 = arith.constant 0 : index
    %c0_8 = arith.constant 0 : index
    %c0_9 = arith.constant 0 : index
    %c0_10 = arith.constant 0 : index
    %4 = vector.load %arg4[%c0_7, %c0_8, %c0_9, %c0_10] : memref<1x8x18x8xbf16, #tpu.memory_space<vmem>>, vector<1x8x18x8xbf16>
    %5 = vector.shape_cast %4 : vector<1x8x18x8xbf16> to vector<8x18x8xbf16>
    %cst = arith.constant 0.000000e+00 : f32
    %6 = vector.broadcast %cst : f32 to vector<128x4xf32>
    %7 = vector.extract_strided_slice %1 {offsets = [0, 0, 0], sizes = [8, 16, 8], strides = [1, 1, 1]} : vector<8x18x8xbf16> to vector<8x16x8xbf16>
    %8 = vector.shape_cast %7 : vector<8x16x8xbf16> to vector<128x8xbf16>
    %c0_11 = arith.constant 0 : index
    %c0_12 = arith.constant 0 : index
    %c0_13 = arith.constant 0 : index
    %9 = vector.load %arg5[%c0_11, %c0_12, %c0_13] : memref<9x8x4xbf16, #tpu.memory_space<vmem>>, vector<1x8x4xbf16>
    %10 = vector.shape_cast %9 : vector<1x8x4xbf16> to vector<8x4xbf16>
    %cst_14 = arith.constant dense<0.000000e+00> : vector<128x4xf32>
    %11 = tpu.matmul %8, %10, %cst_14 {dimension_numbers = #tpu.dot_dimension_numbers<[1], [0], [0], [1], [0, 0, 1, 1], [], []>} : vector<128x8xbf16>, vector<8x4xbf16>, vector<128x4xf32> -> vector<128x4xf32>
    %12 = arith.addf %6, %11 : vector<128x4xf32>
    %13 = vector.extract_strided_slice %1 {offsets = [0, 1, 0], sizes = [8, 16, 8], strides = [1, 1, 1]} : vector<8x18x8xbf16> to vector<8x16x8xbf16>
    %14 = vector.shape_cast %13 : vector<8x16x8xbf16> to vector<128x8xbf16>
    %c1 = arith.constant 1 : index
    %c0_15 = arith.constant 0 : index
    %c0_16 = arith.constant 0 : index
    %15 = vector.load %arg5[%c1, %c0_15, %c0_16] : memref<9x8x4xbf16, #tpu.memory_space<vmem>>, vector<1x8x4xbf16>
    %16 = vector.shape_cast %15 : vector<1x8x4xbf16> to vector<8x4xbf16>
    %cst_17 = arith.constant dense<0.000000e+00> : vector<128x4xf32>
    %17 = tpu.matmul %14, %16, %cst_17 {dimension_numbers = #tpu.dot_dimension_numbers<[1], [0], [0], [1], [0, 0, 1, 1], [], []>} : vector<128x8xbf16>, vector<8x4xbf16>, vector<128x4xf32> -> vector<128x4xf32>
    %18 = arith.addf %12, %17 : vector<128x4xf32>
    %19 = vector.extract_strided_slice %1 {offsets = [0, 2, 0], sizes = [8, 16, 8], strides = [1, 1, 1]} : vector<8x18x8xbf16> to vector<8x16x8xbf16>
    %20 = vector.shape_cast %19 : vector<8x16x8xbf16> to vector<128x8xbf16>
    %c2 = arith.constant 2 : index
    %c0_18 = arith.constant 0 : index
    %c0_19 = arith.constant 0 : index
    %21 = vector.load %arg5[%c2, %c0_18, %c0_19] : memref<9x8x4xbf16, #tpu.memory_space<vmem>>, vector<1x8x4xbf16>
    %22 = vector.shape_cast %21 : vector<1x8x4xbf16> to vector<8x4xbf16>
    %cst_20 = arith.constant dense<0.000000e+00> : vector<128x4xf32>
    %23 = tpu.matmul %20, %22, %cst_20 {dimension_numbers = #tpu.dot_dimension_numbers<[1], [0], [0], [1], [0, 0, 1, 1], [], []>} : vector<128x8xbf16>, vector<8x4xbf16>, vector<128x4xf32> -> vector<128x4xf32>
    %24 = arith.addf %18, %23 : vector<128x4xf32>
    %25 = vector.extract_strided_slice %3 {offsets = [0, 0, 0], sizes = [8, 16, 8], strides = [1, 1, 1]} : vector<8x18x8xbf16> to vector<8x16x8xbf16>
    %26 = vector.shape_cast %25 : vector<8x16x8xbf16> to vector<128x8xbf16>
    %c3 = arith.constant 3 : index
    %c0_21 = arith.constant 0 : index
    %c0_22 = arith.constant 0 : index
    %27 = vector.load %arg5[%c3, %c0_21, %c0_22] : memref<9x8x4xbf16, #tpu.memory_space<vmem>>, vector<1x8x4xbf16>
    %28 = vector.shape_cast %27 : vector<1x8x4xbf16> to vector<8x4xbf16>
    %cst_23 = arith.constant dense<0.000000e+00> : vector<128x4xf32>
    %29 = tpu.matmul %26, %28, %cst_23 {dimension_numbers = #tpu.dot_dimension_numbers<[1], [0], [0], [1], [0, 0, 1, 1], [], []>} : vector<128x8xbf16>, vector<8x4xbf16>, vector<128x4xf32> -> vector<128x4xf32>
    %30 = arith.addf %24, %29 : vector<128x4xf32>
    %31 = vector.extract_strided_slice %3 {offsets = [0, 1, 0], sizes = [8, 16, 8], strides = [1, 1, 1]} : vector<8x18x8xbf16> to vector<8x16x8xbf16>
    %32 = vector.shape_cast %31 : vector<8x16x8xbf16> to vector<128x8xbf16>
    %c4 = arith.constant 4 : index
    %c0_24 = arith.constant 0 : index
    %c0_25 = arith.constant 0 : index
    %33 = vector.load %arg5[%c4, %c0_24, %c0_25] : memref<9x8x4xbf16, #tpu.memory_space<vmem>>, vector<1x8x4xbf16>
    %34 = vector.shape_cast %33 : vector<1x8x4xbf16> to vector<8x4xbf16>
    %cst_26 = arith.constant dense<0.000000e+00> : vector<128x4xf32>
    %35 = tpu.matmul %32, %34, %cst_26 {dimension_numbers = #tpu.dot_dimension_numbers<[1], [0], [0], [1], [0, 0, 1, 1], [], []>} : vector<128x8xbf16>, vector<8x4xbf16>, vector<128x4xf32> -> vector<128x4xf32>
    %36 = arith.addf %30, %35 : vector<128x4xf32>
    %37 = vector.extract_strided_slice %3 {offsets = [0, 2, 0], sizes = [8, 16, 8], strides = [1, 1, 1]} : vector<8x18x8xbf16> to vector<8x16x8xbf16>
    %38 = vector.shape_cast %37 : vector<8x16x8xbf16> to vector<128x8xbf16>
    %c5 = arith.constant 5 : index
    %c0_27 = arith.constant 0 : index
    %c0_28 = arith.constant 0 : index
    %39 = vector.load %arg5[%c5, %c0_27, %c0_28] : memref<9x8x4xbf16, #tpu.memory_space<vmem>>, vector<1x8x4xbf16>
    %40 = vector.shape_cast %39 : vector<1x8x4xbf16> to vector<8x4xbf16>
    %cst_29 = arith.constant dense<0.000000e+00> : vector<128x4xf32>
    %41 = tpu.matmul %38, %40, %cst_29 {dimension_numbers = #tpu.dot_dimension_numbers<[1], [0], [0], [1], [0, 0, 1, 1], [], []>} : vector<128x8xbf16>, vector<8x4xbf16>, vector<128x4xf32> -> vector<128x4xf32>
    %42 = arith.addf %36, %41 : vector<128x4xf32>
    %43 = vector.extract_strided_slice %5 {offsets = [0, 0, 0], sizes = [8, 16, 8], strides = [1, 1, 1]} : vector<8x18x8xbf16> to vector<8x16x8xbf16>
    %44 = vector.shape_cast %43 : vector<8x16x8xbf16> to vector<128x8xbf16>
    %c6 = arith.constant 6 : index
    %c0_30 = arith.constant 0 : index
    %c0_31 = arith.constant 0 : index
    %45 = vector.load %arg5[%c6, %c0_30, %c0_31] : memref<9x8x4xbf16, #tpu.memory_space<vmem>>, vector<1x8x4xbf16>
    %46 = vector.shape_cast %45 : vector<1x8x4xbf16> to vector<8x4xbf16>
    %cst_32 = arith.constant dense<0.000000e+00> : vector<128x4xf32>
    %47 = tpu.matmul %44, %46, %cst_32 {dimension_numbers = #tpu.dot_dimension_numbers<[1], [0], [0], [1], [0, 0, 1, 1], [], []>} : vector<128x8xbf16>, vector<8x4xbf16>, vector<128x4xf32> -> vector<128x4xf32>
    %48 = arith.addf %42, %47 : vector<128x4xf32>
    %49 = vector.extract_strided_slice %5 {offsets = [0, 1, 0], sizes = [8, 16, 8], strides = [1, 1, 1]} : vector<8x18x8xbf16> to vector<8x16x8xbf16>
    %50 = vector.shape_cast %49 : vector<8x16x8xbf16> to vector<128x8xbf16>
    %c7 = arith.constant 7 : index
    %c0_33 = arith.constant 0 : index
    %c0_34 = arith.constant 0 : index
    %51 = vector.load %arg5[%c7, %c0_33, %c0_34] : memref<9x8x4xbf16, #tpu.memory_space<vmem>>, vector<1x8x4xbf16>
    %52 = vector.shape_cast %51 : vector<1x8x4xbf16> to vector<8x4xbf16>
    %cst_35 = arith.constant dense<0.000000e+00> : vector<128x4xf32>
    %53 = tpu.matmul %50, %52, %cst_35 {dimension_numbers = #tpu.dot_dimension_numbers<[1], [0], [0], [1], [0, 0, 1, 1], [], []>} : vector<128x8xbf16>, vector<8x4xbf16>, vector<128x4xf32> -> vector<128x4xf32>
    %54 = arith.addf %48, %53 : vector<128x4xf32>
    %55 = vector.extract_strided_slice %5 {offsets = [0, 2, 0], sizes = [8, 16, 8], strides = [1, 1, 1]} : vector<8x18x8xbf16> to vector<8x16x8xbf16>
    %56 = vector.shape_cast %55 : vector<8x16x8xbf16> to vector<128x8xbf16>
    %c8 = arith.constant 8 : index
    %c0_36 = arith.constant 0 : index
    %c0_37 = arith.constant 0 : index
    %57 = vector.load %arg5[%c8, %c0_36, %c0_37] : memref<9x8x4xbf16, #tpu.memory_space<vmem>>, vector<1x8x4xbf16>
    %58 = vector.shape_cast %57 : vector<1x8x4xbf16> to vector<8x4xbf16>
    %cst_38 = arith.constant dense<0.000000e+00> : vector<128x4xf32>
    %59 = tpu.matmul %56, %58, %cst_38 {dimension_numbers = #tpu.dot_dimension_numbers<[1], [0], [0], [1], [0, 0, 1, 1], [], []>} : vector<128x8xbf16>, vector<8x4xbf16>, vector<128x4xf32> -> vector<128x4xf32>
    %60 = arith.addf %54, %59 : vector<128x4xf32>
    %61 = vector.extract_strided_slice %60 {offsets = [0, 0], sizes = [128, 2], strides = [1, 1]} : vector<128x4xf32> to vector<128x2xf32>
    %c0_39 = arith.constant 0 : index
    %c0_40 = arith.constant 0 : index
    %c0_41 = arith.constant 0 : index
    %62 = vector.load %arg6[%c0_39, %c0_40, %c0_41] : memref<2x128x2xf32, #tpu.memory_space<vmem>>, vector<1x128x2xf32>
    %63 = vector.shape_cast %62 : vector<1x128x2xf32> to vector<128x2xf32>
    %64 = vector.shape_cast %61 : vector<128x2xf32> to vector<1x128x2xf32>
    tpu.vector_store %arg6[%c0_39, %c0_40, %c0_41], %64 {strides = array<i32>} : memref<2x128x2xf32, #tpu.memory_space<vmem>>, vector<1x128x2xf32>,
    %65 = vector.extract_strided_slice %60 {offsets = [0, 2], sizes = [128, 2], strides = [1, 1]} : vector<128x4xf32> to vector<128x2xf32>
    %c1_42 = arith.constant 1 : index
    %c0_43 = arith.constant 0 : index
    %c0_44 = arith.constant 0 : index
    %66 = vector.load %arg6[%c1_42, %c0_43, %c0_44] : memref<2x128x2xf32, #tpu.memory_space<vmem>>, vector<1x128x2xf32>
    %67 = vector.shape_cast %66 : vector<1x128x2xf32> to vector<128x2xf32>
    %68 = vector.shape_cast %65 : vector<128x2xf32> to vector<1x128x2xf32>
    tpu.vector_store %arg6[%c1_42, %c0_43, %c0_44], %68 {strides = array<i32>} : memref<2x128x2xf32, #tpu.memory_space<vmem>>, vector<1x128x2xf32>,
    %c0_i32 = arith.constant 0 : i32
    %69 = arith.cmpi eq, %arg1, %c0_i32 : i32
    %70 = arith.extui %69 : i1 to i32
    %c0_i32_45 = arith.constant 0 : i32
    %71 = arith.cmpi ne, %70, %c0_i32_45 : i32
    scf.if %71 {
      %cst_54 = arith.constant 0.000000e+00 : f32
      %83 = vector.broadcast %cst_54 : f32 to vector<1x2x4xf32>
      %c0_55 = arith.constant 0 : index
      %c0_56 = arith.constant 0 : index
      %c0_57 = arith.constant 0 : index
      %84 = vector.load %arg7[%c0_55, %c0_56, %c0_57] : memref<1x2x4xf32, #tpu.memory_space<vmem>>, vector<1x2x4xf32>
      tpu.vector_store %arg7[%c0_55, %c0_56, %c0_57], %83 {strides = array<i32>} : memref<1x2x4xf32, #tpu.memory_space<vmem>>, vector<1x2x4xf32>,
    } else {
    }
    %cst_46 = arith.constant dense<0.000000e+00> : vector<4xf32>
    %72 = vector.multi_reduction <add>, %60, %cst_46 [0] : vector<128x4xf32> to vector<4xf32>
    %73 = vector.shape_cast %72 : vector<4xf32> to vector<1x4xf32>
    %74 = vector.shape_cast %73 : vector<1x4xf32> to vector<1x1x4xf32>
    %75 = arith.mulf %60, %60 : vector<128x4xf32>
    %cst_47 = arith.constant dense<0.000000e+00> : vector<4xf32>
    %76 = vector.multi_reduction <add>, %75, %cst_47 [0] : vector<128x4xf32> to vector<4xf32>
    %77 = vector.shape_cast %76 : vector<4xf32> to vector<1x4xf32>
    %78 = vector.shape_cast %77 : vector<1x4xf32> to vector<1x1x4xf32>
    %c0_48 = arith.constant 0 : index
    %c0_49 = arith.constant 0 : index
    %c0_50 = arith.constant 0 : index
    %79 = vector.load %arg7[%c0_48, %c0_49, %c0_50] : memref<1x2x4xf32, #tpu.memory_space<vmem>>, vector<1x2x4xf32>
    %80 = tpu.concatenate %74, %78 in 1 : vector<1x1x4xf32>, vector<1x1x4xf32> -> vector<1x2x4xf32>
    %81 = arith.addf %79, %80 : vector<1x2x4xf32>
    %c0_51 = arith.constant 0 : index
    %c0_52 = arith.constant 0 : index
    %c0_53 = arith.constant 0 : index
    %82 = vector.load %arg7[%c0_51, %c0_52, %c0_53] : memref<1x2x4xf32, #tpu.memory_space<vmem>>, vector<1x2x4xf32>
    tpu.vector_store %arg7[%c0_51, %c0_52, %c0_53], %81 {strides = array<i32>} : memref<1x2x4xf32, #tpu.memory_space<vmem>>, vector<1x2x4xf32>,
    return
  }
  func.func @transform_0(%arg0: i32, %arg1: i32) -> (i32, i32, i32, i32) {
    %c0_i32 = arith.constant 0 : i32
    %c0_i32_0 = arith.constant 0 : i32
    %c0_i32_1 = arith.constant 0 : i32
    return %arg0, %arg1, %c0_i32, %c0_i32_0 : i32, i32, i32, i32
  }
  func.func @transform_1(%arg0: i32, %arg1: i32) -> (i32, i32, i32, i32) {
    %c0_i32 = arith.constant 0 : i32
    %c0_i32_0 = arith.constant 0 : i32
    %c0_i32_1 = arith.constant 0 : i32
    return %arg0, %arg1, %c0_i32, %c0_i32_0 : i32, i32, i32, i32
  }
  func.func @transform_2(%arg0: i32, %arg1: i32) -> (i32, i32, i32, i32) {
    %c0_i32 = arith.constant 0 : i32
    %c0_i32_0 = arith.constant 0 : i32
    %c0_i32_1 = arith.constant 0 : i32
    return %arg0, %arg1, %c0_i32, %c0_i32_0 : i32, i32, i32, i32
  }
  func.func @transform_3(%arg0: i32, %arg1: i32) -> (i32, i32, i32) {
    %c0_i32 = arith.constant 0 : i32
    %c0_i32_0 = arith.constant 0 : i32
    %c0_i32_1 = arith.constant 0 : i32
    %c0_i32_2 = arith.constant 0 : i32
    return %c0_i32, %c0_i32_0, %c0_i32_1 : i32, i32, i32
  }
  func.func @transform_4(%arg0: i32, %arg1: i32) -> (i32, i32, i32) {
    %c2_i32 = arith.constant 2 : i32
    %0 = arith.muli %arg0, %c2_i32 : i32
    %1 = arith.addi %0, %arg1 : i32
    %c0_i32 = arith.constant 0 : i32
    %c0_i32_0 = arith.constant 0 : i32
    %c0_i32_1 = arith.constant 0 : i32
    return %c0_i32, %1, %c0_i32_0 : i32, i32, i32
  }
  func.func @transform_5(%arg0: i32, %arg1: i32) -> (i32, i32, i32) {
    %c0_i32 = arith.constant 0 : i32
    %c0_i32_0 = arith.constant 0 : i32
    %c0_i32_1 = arith.constant 0 : i32
    return %arg0, %c0_i32, %c0_i32_0 : i32, i32, i32
  }
}

module attributes {stable_mosaic.version = 11 : i64} {
  func.func @_conv2_kernel(%arg0: i32, %arg1: i32, %arg2: memref<1x256x2xf32, #tpu.memory_space<vmem>>, %arg3: memref<1x1x2xf32, #tpu.memory_space<vmem>>, %arg4: memref<1x1x2xf32, #tpu.memory_space<vmem>>, %arg5: memref<1x2x8xbf16, #tpu.memory_space<vmem>>, %arg6: memref<1x256x8xf32, #tpu.memory_space<vmem>>, %arg7: memref<1x2x8xf32, #tpu.memory_space<vmem>>) attributes {dimension_semantics = [#tpu.dimension_semantics<parallel>, #tpu.dimension_semantics<arbitrary>], iteration_bounds = array<i64: 2, 2>, scalar_prefetch = 0 : i64, scratch_operands = 0 : i64, tpu.core_type = #tpu.core_type<tc>, window_params = [{transform_indices = @transform_0, window_bounds = array<i64: 1, 256, 2>}, {transform_indices = @transform_1, window_bounds = array<i64: 1, 1, 2>}, {transform_indices = @transform_2, window_bounds = array<i64: 1, 1, 2>}, {transform_indices = @transform_3, window_bounds = array<i64: 1, 2, 8>}, {transform_indices = @transform_4, window_bounds = array<i64: 1, 256, 8>}, {transform_indices = @transform_5, window_bounds = array<i64: 1, 2, 8>}]} {
    %c0 = arith.constant 0 : index
    %c0_0 = arith.constant 0 : index
    %c0_1 = arith.constant 0 : index
    %0 = vector.load %arg2[%c0, %c0_0, %c0_1] : memref<1x256x2xf32, #tpu.memory_space<vmem>>, vector<1x256x2xf32>
    %1 = vector.shape_cast %0 : vector<1x256x2xf32> to vector<256x2xf32>
    %c0_2 = arith.constant 0 : index
    %c0_3 = arith.constant 0 : index
    %c0_4 = arith.constant 0 : index
    %2 = vector.load %arg3[%c0_2, %c0_3, %c0_4] : memref<1x1x2xf32, #tpu.memory_space<vmem>>, vector<1x1x2xf32>
    %3 = vector.shape_cast %2 : vector<1x1x2xf32> to vector<1x2xf32>
    %4 = vector.broadcast %3 : vector<1x2xf32> to vector<256x2xf32>
    %5 = arith.mulf %1, %4 : vector<256x2xf32>
    %c0_5 = arith.constant 0 : index
    %c0_6 = arith.constant 0 : index
    %c0_7 = arith.constant 0 : index
    %6 = vector.load %arg4[%c0_5, %c0_6, %c0_7] : memref<1x1x2xf32, #tpu.memory_space<vmem>>, vector<1x1x2xf32>
    %7 = vector.shape_cast %6 : vector<1x1x2xf32> to vector<1x2xf32>
    %8 = vector.broadcast %7 : vector<1x2xf32> to vector<256x2xf32>
    %9 = arith.addf %5, %8 : vector<256x2xf32>
    %cst = arith.constant 0.000000e+00 : f32
    %10 = vector.broadcast %cst : f32 to vector<256x2xf32>
    %11 = arith.maximumf %9, %10 : vector<256x2xf32>
    %12 = arith.truncf %11 : vector<256x2xf32> to vector<256x2xbf16>
    %c0_8 = arith.constant 0 : index
    %c0_9 = arith.constant 0 : index
    %c0_10 = arith.constant 0 : index
    %13 = vector.load %arg5[%c0_8, %c0_9, %c0_10] : memref<1x2x8xbf16, #tpu.memory_space<vmem>>, vector<1x2x8xbf16>
    %14 = vector.shape_cast %13 : vector<1x2x8xbf16> to vector<2x8xbf16>
    %cst_11 = arith.constant dense<0.000000e+00> : vector<256x8xf32>
    %15 = tpu.matmul %12, %14, %cst_11 {dimension_numbers = #tpu.dot_dimension_numbers<[1], [0], [0], [1], [0, 0, 1, 1], [], []>} : vector<256x2xbf16>, vector<2x8xbf16>, vector<256x8xf32> -> vector<256x8xf32>
    %c0_12 = arith.constant 0 : index
    %c0_13 = arith.constant 0 : index
    %c0_14 = arith.constant 0 : index
    %16 = vector.load %arg6[%c0_12, %c0_13, %c0_14] : memref<1x256x8xf32, #tpu.memory_space<vmem>>, vector<1x256x8xf32>
    %17 = vector.shape_cast %16 : vector<1x256x8xf32> to vector<256x8xf32>
    %18 = vector.shape_cast %15 : vector<256x8xf32> to vector<1x256x8xf32>
    tpu.vector_store %arg6[%c0_12, %c0_13, %c0_14], %18 {strides = array<i32>} : memref<1x256x8xf32, #tpu.memory_space<vmem>>, vector<1x256x8xf32>,
    %c0_i32 = arith.constant 0 : i32
    %19 = arith.cmpi eq, %arg1, %c0_i32 : i32
    %20 = arith.extui %19 : i1 to i32
    %c0_i32_15 = arith.constant 0 : i32
    %21 = arith.cmpi ne, %20, %c0_i32_15 : i32
    scf.if %21 {
      %cst_24 = arith.constant 0.000000e+00 : f32
      %33 = vector.broadcast %cst_24 : f32 to vector<1x2x8xf32>
      %c0_25 = arith.constant 0 : index
      %c0_26 = arith.constant 0 : index
      %c0_27 = arith.constant 0 : index
      %34 = vector.load %arg7[%c0_25, %c0_26, %c0_27] : memref<1x2x8xf32, #tpu.memory_space<vmem>>, vector<1x2x8xf32>
      tpu.vector_store %arg7[%c0_25, %c0_26, %c0_27], %33 {strides = array<i32>} : memref<1x2x8xf32, #tpu.memory_space<vmem>>, vector<1x2x8xf32>,
    } else {
    }
    %cst_16 = arith.constant dense<0.000000e+00> : vector<8xf32>
    %22 = vector.multi_reduction <add>, %15, %cst_16 [0] : vector<256x8xf32> to vector<8xf32>
    %23 = vector.shape_cast %22 : vector<8xf32> to vector<1x8xf32>
    %24 = vector.shape_cast %23 : vector<1x8xf32> to vector<1x1x8xf32>
    %25 = arith.mulf %15, %15 : vector<256x8xf32>
    %cst_17 = arith.constant dense<0.000000e+00> : vector<8xf32>
    %26 = vector.multi_reduction <add>, %25, %cst_17 [0] : vector<256x8xf32> to vector<8xf32>
    %27 = vector.shape_cast %26 : vector<8xf32> to vector<1x8xf32>
    %28 = vector.shape_cast %27 : vector<1x8xf32> to vector<1x1x8xf32>
    %c0_18 = arith.constant 0 : index
    %c0_19 = arith.constant 0 : index
    %c0_20 = arith.constant 0 : index
    %29 = vector.load %arg7[%c0_18, %c0_19, %c0_20] : memref<1x2x8xf32, #tpu.memory_space<vmem>>, vector<1x2x8xf32>
    %30 = tpu.concatenate %24, %28 in 1 : vector<1x1x8xf32>, vector<1x1x8xf32> -> vector<1x2x8xf32>
    %31 = arith.addf %29, %30 : vector<1x2x8xf32>
    %c0_21 = arith.constant 0 : index
    %c0_22 = arith.constant 0 : index
    %c0_23 = arith.constant 0 : index
    %32 = vector.load %arg7[%c0_21, %c0_22, %c0_23] : memref<1x2x8xf32, #tpu.memory_space<vmem>>, vector<1x2x8xf32>
    tpu.vector_store %arg7[%c0_21, %c0_22, %c0_23], %31 {strides = array<i32>} : memref<1x2x8xf32, #tpu.memory_space<vmem>>, vector<1x2x8xf32>,
    return
  }
  func.func @transform_0(%arg0: i32, %arg1: i32) -> (i32, i32, i32) {
    %c0_i32 = arith.constant 0 : i32
    %c0_i32_0 = arith.constant 0 : i32
    return %arg0, %arg1, %c0_i32 : i32, i32, i32
  }
  func.func @transform_1(%arg0: i32, %arg1: i32) -> (i32, i32, i32) {
    %c0_i32 = arith.constant 0 : i32
    %c0_i32_0 = arith.constant 0 : i32
    %c0_i32_1 = arith.constant 0 : i32
    return %arg0, %c0_i32, %c0_i32_0 : i32, i32, i32
  }
  func.func @transform_2(%arg0: i32, %arg1: i32) -> (i32, i32, i32) {
    %c0_i32 = arith.constant 0 : i32
    %c0_i32_0 = arith.constant 0 : i32
    %c0_i32_1 = arith.constant 0 : i32
    return %arg0, %c0_i32, %c0_i32_0 : i32, i32, i32
  }
  func.func @transform_3(%arg0: i32, %arg1: i32) -> (i32, i32, i32) {
    %c0_i32 = arith.constant 0 : i32
    %c0_i32_0 = arith.constant 0 : i32
    %c0_i32_1 = arith.constant 0 : i32
    return %arg0, %c0_i32, %c0_i32_0 : i32, i32, i32
  }
  func.func @transform_4(%arg0: i32, %arg1: i32) -> (i32, i32, i32) {
    %c0_i32 = arith.constant 0 : i32
    %c0_i32_0 = arith.constant 0 : i32
    return %arg0, %arg1, %c0_i32 : i32, i32, i32
  }
  func.func @transform_5(%arg0: i32, %arg1: i32) -> (i32, i32, i32) {
    %c0_i32 = arith.constant 0 : i32
    %c0_i32_0 = arith.constant 0 : i32
    %c0_i32_1 = arith.constant 0 : i32
    return %arg0, %c0_i32, %c0_i32_0 : i32, i32, i32
  }
}

module attributes {stable_mosaic.version = 11 : i64} {
  func.func @_conv3_kernel(%arg0: i32, %arg1: memref<2x256x8xf32, #tpu.memory_space<vmem>>, %arg2: memref<2x1x8xf32, #tpu.memory_space<vmem>>, %arg3: memref<2x1x8xf32, #tpu.memory_space<vmem>>, %arg4: memref<2x8x16xbf16, #tpu.memory_space<vmem>>, %arg5: memref<2x1x16xf32, #tpu.memory_space<vmem>>, %arg6: memref<256x48xf32, #tpu.memory_space<vmem>>) attributes {dimension_semantics = [#tpu.dimension_semantics<parallel>], iteration_bounds = array<i64: 2>, scalar_prefetch = 0 : i64, scratch_operands = 0 : i64, tpu.core_type = #tpu.core_type<tc>, window_params = [{transform_indices = @transform_0, window_bounds = array<i64: 2, 256, 8>}, {pipeline_mode = #tpu.pipeline_mode<synchronous>, transform_indices = @transform_1, window_bounds = array<i64: 2, 1, 8>}, {pipeline_mode = #tpu.pipeline_mode<synchronous>, transform_indices = @transform_2, window_bounds = array<i64: 2, 1, 8>}, {pipeline_mode = #tpu.pipeline_mode<synchronous>, transform_indices = @transform_3, window_bounds = array<i64: 2, 8, 16>}, {pipeline_mode = #tpu.pipeline_mode<synchronous>, transform_indices = @transform_4, window_bounds = array<i64: 2, 1, 16>}, {transform_indices = @transform_5, window_bounds = array<i64: 256, 48>}]} {
    %c0 = arith.constant 0 : index
    %c0_0 = arith.constant 0 : index
    %c0_1 = arith.constant 0 : index
    %0 = vector.load %arg1[%c0, %c0_0, %c0_1] : memref<2x256x8xf32, #tpu.memory_space<vmem>>, vector<1x256x8xf32>
    %1 = vector.shape_cast %0 : vector<1x256x8xf32> to vector<256x8xf32>
    %c0_2 = arith.constant 0 : index
    %c0_3 = arith.constant 0 : index
    %c0_4 = arith.constant 0 : index
    %2 = vector.load %arg2[%c0_2, %c0_3, %c0_4] : memref<2x1x8xf32, #tpu.memory_space<vmem>>, vector<1x1x8xf32>
    %3 = vector.shape_cast %2 : vector<1x1x8xf32> to vector<1x8xf32>
    %4 = vector.broadcast %3 : vector<1x8xf32> to vector<256x8xf32>
    %5 = arith.mulf %1, %4 : vector<256x8xf32>
    %c0_5 = arith.constant 0 : index
    %c0_6 = arith.constant 0 : index
    %c0_7 = arith.constant 0 : index
    %6 = vector.load %arg3[%c0_5, %c0_6, %c0_7] : memref<2x1x8xf32, #tpu.memory_space<vmem>>, vector<1x1x8xf32>
    %7 = vector.shape_cast %6 : vector<1x1x8xf32> to vector<1x8xf32>
    %8 = vector.broadcast %7 : vector<1x8xf32> to vector<256x8xf32>
    %9 = arith.addf %5, %8 : vector<256x8xf32>
    %cst = arith.constant 0.000000e+00 : f32
    %10 = vector.broadcast %cst : f32 to vector<256x8xf32>
    %11 = arith.maximumf %9, %10 : vector<256x8xf32>
    %c1 = arith.constant 1 : index
    %c0_8 = arith.constant 0 : index
    %c0_9 = arith.constant 0 : index
    %12 = vector.load %arg1[%c1, %c0_8, %c0_9] : memref<2x256x8xf32, #tpu.memory_space<vmem>>, vector<1x256x8xf32>
    %13 = vector.shape_cast %12 : vector<1x256x8xf32> to vector<256x8xf32>
    %c1_10 = arith.constant 1 : index
    %c0_11 = arith.constant 0 : index
    %c0_12 = arith.constant 0 : index
    %14 = vector.load %arg2[%c1_10, %c0_11, %c0_12] : memref<2x1x8xf32, #tpu.memory_space<vmem>>, vector<1x1x8xf32>
    %15 = vector.shape_cast %14 : vector<1x1x8xf32> to vector<1x8xf32>
    %16 = vector.broadcast %15 : vector<1x8xf32> to vector<256x8xf32>
    %17 = arith.mulf %13, %16 : vector<256x8xf32>
    %c1_13 = arith.constant 1 : index
    %c0_14 = arith.constant 0 : index
    %c0_15 = arith.constant 0 : index
    %18 = vector.load %arg3[%c1_13, %c0_14, %c0_15] : memref<2x1x8xf32, #tpu.memory_space<vmem>>, vector<1x1x8xf32>
    %19 = vector.shape_cast %18 : vector<1x1x8xf32> to vector<1x8xf32>
    %20 = vector.broadcast %19 : vector<1x8xf32> to vector<256x8xf32>
    %21 = arith.addf %17, %20 : vector<256x8xf32>
    %cst_16 = arith.constant 0.000000e+00 : f32
    %22 = vector.broadcast %cst_16 : f32 to vector<256x8xf32>
    %23 = arith.maximumf %21, %22 : vector<256x8xf32>
    %24 = arith.truncf %11 : vector<256x8xf32> to vector<256x8xbf16>
    %c0_17 = arith.constant 0 : index
    %c0_18 = arith.constant 0 : index
    %c0_19 = arith.constant 0 : index
    %25 = vector.load %arg4[%c0_17, %c0_18, %c0_19] : memref<2x8x16xbf16, #tpu.memory_space<vmem>>, vector<1x8x16xbf16>
    %26 = vector.shape_cast %25 : vector<1x8x16xbf16> to vector<8x16xbf16>
    %cst_20 = arith.constant dense<0.000000e+00> : vector<256x16xf32>
    %27 = tpu.matmul %24, %26, %cst_20 {dimension_numbers = #tpu.dot_dimension_numbers<[1], [0], [0], [1], [0, 0, 1, 1], [], []>} : vector<256x8xbf16>, vector<8x16xbf16>, vector<256x16xf32> -> vector<256x16xf32>
    %c0_21 = arith.constant 0 : index
    %c0_22 = arith.constant 0 : index
    %c0_23 = arith.constant 0 : index
    %28 = vector.load %arg5[%c0_21, %c0_22, %c0_23] : memref<2x1x16xf32, #tpu.memory_space<vmem>>, vector<1x1x16xf32>
    %29 = vector.shape_cast %28 : vector<1x1x16xf32> to vector<1x16xf32>
    %30 = vector.broadcast %29 : vector<1x16xf32> to vector<256x16xf32>
    %31 = arith.addf %27, %30 : vector<256x16xf32>
    %32 = arith.truncf %23 : vector<256x8xf32> to vector<256x8xbf16>
    %c1_24 = arith.constant 1 : index
    %c0_25 = arith.constant 0 : index
    %c0_26 = arith.constant 0 : index
    %33 = vector.load %arg4[%c1_24, %c0_25, %c0_26] : memref<2x8x16xbf16, #tpu.memory_space<vmem>>, vector<1x8x16xbf16>
    %34 = vector.shape_cast %33 : vector<1x8x16xbf16> to vector<8x16xbf16>
    %cst_27 = arith.constant dense<0.000000e+00> : vector<256x16xf32>
    %35 = tpu.matmul %32, %34, %cst_27 {dimension_numbers = #tpu.dot_dimension_numbers<[1], [0], [0], [1], [0, 0, 1, 1], [], []>} : vector<256x8xbf16>, vector<8x16xbf16>, vector<256x16xf32> -> vector<256x16xf32>
    %c1_28 = arith.constant 1 : index
    %c0_29 = arith.constant 0 : index
    %c0_30 = arith.constant 0 : index
    %36 = vector.load %arg5[%c1_28, %c0_29, %c0_30] : memref<2x1x16xf32, #tpu.memory_space<vmem>>, vector<1x1x16xf32>
    %37 = vector.shape_cast %36 : vector<1x1x16xf32> to vector<1x16xf32>
    %38 = vector.broadcast %37 : vector<1x16xf32> to vector<256x16xf32>
    %39 = arith.addf %35, %38 : vector<256x16xf32>
    %cst_31 = arith.constant 0.000000e+00 : f32
    %40 = vector.broadcast %cst_31 : f32 to vector<256x16xf32>
    %41 = arith.subf %40, %31 : vector<256x16xf32>
    %42 = math.exp %41 : vector<256x16xf32>
    %cst_32 = arith.constant 1.000000e+00 : f32
    %43 = vector.broadcast %cst_32 : f32 to vector<256x16xf32>
    %44 = arith.addf %43, %42 : vector<256x16xf32>
    %cst_33 = arith.constant 1.000000e+00 : f32
    %45 = vector.broadcast %cst_33 : f32 to vector<256x16xf32>
    %46 = arith.divf %45, %44 : vector<256x16xf32>
    %cst_34 = arith.constant 0.000000e+00 : f32
    %47 = vector.broadcast %cst_34 : f32 to vector<256x16xf32>
    %48 = arith.subf %47, %39 : vector<256x16xf32>
    %49 = math.exp %48 : vector<256x16xf32>
    %cst_35 = arith.constant 1.000000e+00 : f32
    %50 = vector.broadcast %cst_35 : f32 to vector<256x16xf32>
    %51 = arith.addf %50, %49 : vector<256x16xf32>
    %cst_36 = arith.constant 1.000000e+00 : f32
    %52 = vector.broadcast %cst_36 : f32 to vector<256x16xf32>
    %53 = arith.divf %52, %51 : vector<256x16xf32>
    %54 = arith.subf %46, %53 : vector<256x16xf32>
    %cst_37 = arith.constant -5.000000e+01 : f32
    %55 = vector.broadcast %cst_37 : f32 to vector<256x16xf32>
    %56 = arith.mulf %55, %54 : vector<256x16xf32>
    %57 = math.exp %56 : vector<256x16xf32>
    %cst_38 = arith.constant 1.000000e+00 : f32
    %58 = vector.broadcast %cst_38 : f32 to vector<256x16xf32>
    %59 = arith.addf %58, %57 : vector<256x16xf32>
    %60 = tpu.reciprocal %59 {approx = true} : vector<256x16xf32> -> vector<256x16xf32>
    %61 = tpu.concatenate %46, %53, %60 in 1 : vector<256x16xf32>, vector<256x16xf32>, vector<256x16xf32> -> vector<256x48xf32>
    %c0_39 = arith.constant 0 : index
    %c0_40 = arith.constant 0 : index
    %62 = vector.load %arg6[%c0_39, %c0_40] : memref<256x48xf32, #tpu.memory_space<vmem>>, vector<256x48xf32>
    tpu.vector_store %arg6[%c0_39, %c0_40], %61 {strides = array<i32>} : memref<256x48xf32, #tpu.memory_space<vmem>>, vector<256x48xf32>,
    return
  }
  func.func @transform_0(%arg0: i32) -> (i32, i32, i32) {
    %c0_i32 = arith.constant 0 : i32
    %c0_i32_0 = arith.constant 0 : i32
    %c0_i32_1 = arith.constant 0 : i32
    return %c0_i32, %arg0, %c0_i32_0 : i32, i32, i32
  }
  func.func @transform_1(%arg0: i32) -> (i32, i32, i32) {
    %c0_i32 = arith.constant 0 : i32
    %c0_i32_0 = arith.constant 0 : i32
    %c0_i32_1 = arith.constant 0 : i32
    %c0_i32_2 = arith.constant 0 : i32
    return %c0_i32, %c0_i32_0, %c0_i32_1 : i32, i32, i32
  }
  func.func @transform_2(%arg0: i32) -> (i32, i32, i32) {
    %c0_i32 = arith.constant 0 : i32
    %c0_i32_0 = arith.constant 0 : i32
    %c0_i32_1 = arith.constant 0 : i32
    %c0_i32_2 = arith.constant 0 : i32
    return %c0_i32, %c0_i32_0, %c0_i32_1 : i32, i32, i32
  }
  func.func @transform_3(%arg0: i32) -> (i32, i32, i32) {
    %c0_i32 = arith.constant 0 : i32
    %c0_i32_0 = arith.constant 0 : i32
    %c0_i32_1 = arith.constant 0 : i32
    %c0_i32_2 = arith.constant 0 : i32
    return %c0_i32, %c0_i32_0, %c0_i32_1 : i32, i32, i32
  }
  func.func @transform_4(%arg0: i32) -> (i32, i32, i32) {
    %c0_i32 = arith.constant 0 : i32
    %c0_i32_0 = arith.constant 0 : i32
    %c0_i32_1 = arith.constant 0 : i32
    %c0_i32_2 = arith.constant 0 : i32
    return %c0_i32, %c0_i32_0, %c0_i32_1 : i32, i32, i32
  }
  func.func @transform_5(%arg0: i32) -> (i32, i32) {
    %c0_i32 = arith.constant 0 : i32
    %c0_i32_0 = arith.constant 0 : i32
    return %arg0, %c0_i32 : i32, i32
  }
}

</mosaic_0001>

<bundles_post_ra>
// kernel: mul.0
= control target key start
LH: loop header
LB: loop body
LE: loop exit
PB: predicated region body
PF: predicated region fallthrough
CT: control target
= control target key end

     0   :  { %s34_s0 = inlined_call_operand.vmem [shape: f32[2,1,2], index: 0, kind: input, shape index: {}, may-alias: {0,1}]   ;;  %s35_s1 = inlined_call_operand.vmem [shape: f32[2,1,2], index: 1, kind: input, shape index: {}, may-alias: {0,1}]   ;;  %s36_s2 = inlined_call_operand.vmem [shape: f32[2,1,2], index: 2, kind: output, shape index: {}]  }
   0x1   :  { %v3_v0 = vld [vmem:[%s34_s0] sm:$0x3] }
   0x2   :  { %v4_v1 = vld [vmem:[%s35_s1] sm:$0x3] }
   0x3   :  { %v7_v2 = vmul.f32 %v4_v1, %v3_v0 }
   0x5   :  { %9 = vst [vmem:[%s36_s2] sm:$0x3] %v7_v2 }

// kernel: squeeze.26
= control target key start
LH: loop header
LB: loop body
LE: loop exit
PB: predicated region body
PF: predicated region fallthrough
CT: control target
= control target key end

     0   :  { %s44_s8 = smov 122   ;;  %s45_s9 = smov 124   ;;  %vm7_vm0 = vcmask 15360   ;;  %s65_s0 = inlined_call_operand.vmem [shape: f32[2,8], index: 0, kind: input, shape index: {}]   ;;  %s66_s1 = inlined_call_operand.vmem [shape: f32[2,4,2], index: 1, kind: output, shape index: {}]  }
   0x1   :  { %v4_v0 = vld [vmem:[%s65_s0] sm:$0x3]  ;;  %s43_s0 = smov 126  }
   0x2   :  { %5 = vst [vmem:[#allocation1] sm:$0x3] %v4_v0 }
   0x9   :  { %v9_v1 = vld [vmem:[#allocation1] sm:$0x3]  }
   0xa   :  { %v21_v2 = vld [vmem:[#allocation1] sm:$0x3]   ;;  %10 = vrot.lane.b32.xlu0 %v9_v1, %s43_s0 }
   0xb   :  { %22 = vrot.lane.b32.xlu1 %v21_v2, %s44_s8  ;;  %v15_v3 = vld [vmem:[#allocation1] sm:$0x3]  }
   0xc   :  { %v6_v4 = vld [vmem:[#allocation1] sm:$0x3]  }
   0xd   :  { %8 = vst.msk [vmem:[#allocation0] ss:$8 sm:$0x3] %vm7_vm0, %v6_v4  }
  0x12   :  { %16 = vrot.lane.b32.xlu0 %v15_v3, %s45_s9 }
  0x7c   :  { %v11_v5 = vpop.permute.xlu0 %10  }
  0x7d   :  { %v23_v6 = vpop.permute.xlu1 %22   ;;  %14 = vst.msk [vmem:[#allocation0 + $0x1] ss:$8 sm:$0x3] %vm7_vm0, %v11_v5  }
  0x7e   :  { %26 = vst.msk [vmem:[#allocation0 + $0x3] ss:$8 sm:$0x3] %vm7_vm0, %v23_v6  }
  0x84   :  { %v17_v7 = vpop.permute.xlu0 %16  }
  0x85   :  { %20 = vst.msk [vmem:[#allocation0 + $0x2] ss:$8 sm:$0x3] %vm7_vm0, %v17_v7  }
  0x8c   :  { %v29_v8 = vld [vmem:[#allocation0] sm:$0xf]  ;;  %v34_v9 = vld [vmem:[#allocation0 + $0x8] sm:$0xf] }
  0x8d   :  { %32 = vst [vmem:[%s66_s1] sm:$0xf] %v29_v8 }
  0x8e   :  { %39 = vst [vmem:[%s66_s1 + $0x4] sm:$0xf] %v34_v9 }

// kernel: db_head_forward.4
= control target key start
LH: loop header
LB: loop body
LE: loop exit
PB: predicated region body
PF: predicated region fallthrough
CT: control target
= control target key end

     0   :  { %s1123_s18 = smov 0   ;;  %s1125_s19 = smov 0   ;;  %s1620_s0 = inlined_call_operand.vmem [shape: f32[2,512,2], index: 0, kind: input, shape index: {}]   ;;  %s1621_s1 = inlined_call_operand.vmem [shape: f32[2,1,2], index: 1, kind: input, shape index: {}]   ;;  %s1622_s2 = inlined_call_operand.vmem [shape: f32[2,1,2], index: 2, kind: input, shape index: {}]   ;;  %s1623_s3 = inlined_call_operand.vmem [shape: bf16[2,2,8], index: 3, kind: input, shape index: {}]   ;;  %s1624_s4 = inlined_call_operand.vmem [shape: f32[2,512,8], index: 4, kind: output, shape index: {0}]   ;;  %s1625_s5 = inlined_call_operand.vmem [shape: f32[2,2,8], index: 5, kind: output, shape index: {1}]  }
   0x1   :  { %s1127_s20 = smov 0   ;;  %s1129_s21 = smov 0  }
   0x2   :  { %s1131_s22 = smov 0  }
   0x3 LB: > { %s25_s23 = sadd.s32 1, %s1082_s20  ;;  %s28_s24 = sadd.s32 1, %s1086_s21  ;;  %s1090_s22 = sphi %s1131_s22, %s16_s22   ;;  %s1086_s21 = sphi %s1129_s21, %s1629_s21   ;;  %s1082_s20 = sphi %s1127_s20, %s1628_s20   ;;  %s1078_s19 = sphi %s1125_s19, %s1627_s19   ;;  %s1074_s18 = sphi %s1123_s18, %s1626_s18  }
   0x4   : > { %p26_p0 = scmp.ge.s32.totalorder %s25_s23, 2  ;;  %p979_p1 = scmp.ge.s32.totalorder %s1090_s22, 1 }
   0x5   : > { %p235_p2 = scmp.lt.s32.totalorder %s1090_s22, 5 }
   0x6   : > { %s1631_s23 = smov (%p26_p0, %s25_s23), 0  ;;  %s1633_s24 = smov (!%p26_p0, %s28_s24), %s1086_s21 }
   0x7   : > { %p236_p3 = pnand %p979_p1, %p235_p2  ;;  %p30_p4 = scmp.ge.s32.totalorder %s1633_s24, 2 }
   0x8   : > { %s980_s25 = sshll.u32 (!%p236_p3), %s1074_s18, 5  ;;  %p285_p5 = scmp.lt.s32.totalorder (!%p236_p3), %s1078_s19, 1 }
   0x9   : > { %s1635_s24 = smov (%p30_p4, %s1633_s24), 0  ;;  %239 = sbr.rel (%p236_p3) target bundleno = 305 (0x131), region = 36 }
   0xa   : > { %p287_p6 = scmp.lt.s32.totalorder (!%p236_p3), %s980_s25, 63  ;;  %p1003_p7 = scmp.ne.s32.totalorder (!%p236_p3), %s1074_s18, 0 }
   0xe   : > { %s1637_s19 = smov (!%p285_p5, %s1078_s19), 1  ;;  %s1639_s25 = smov (!%p287_p6, %s980_s25), 63  ;;  %vm520_vm0 = vcmask 1040384   ;;  %vm471_vm1 = vcmask 15360   ;;  %vm613_vm2 = vcmask 64512  }
   0xf   : > { %s981_s26 = sshll.u32 %s1637_s19, 6  ;;  %s296_s29 = scalar_lea.vmem %s1621_s1, %s1637_s19 }
  0x10   : > { %s1159_s30 = sadd.s32 %s981_s26, %s1639_s25  ;;  %s299_s8 = scalar_lea.vmem %s1622_s2, %s1637_s19  ;;  %v1164_v0 = vld [vmem:[%s296_s29] ss:$0 sm:$0xff] }
  0x11   : > { %s982_s9 = sshll.u32 %s1159_s30, 3  ;;  %s302_s12 = scalar_lea.vmem %s1623_s3, %s1637_s19  ;;  %v1177_v1 = vld [vmem:[%s299_s8] ss:$0 sm:$0xff] }
  0x12   : > { %s1175_s15 = scalar_lea.vmem %s1620_s0, %s982_s9  ;;  %v470_v2 = vld [vmem:[%s302_s12] sm:$0x1]  ;;  %s986_s16 = sshll.u32 %s1637_s19, 1 }
  0x13   : > { %v522_v3 = vsel %vm520_vm0, %v470_v2, 0  ;;  %v318_v4 = vld [vmem:[%s1175_s15] sm:$0xff]  ;;  %v319_v5 = vld [vmem:[%s1175_s15 + $0x8] sm:$0xff]  ;;  %s1186_s26 = scalar_lea.vmem %s1625_s5, %s986_s16  ;;  %v320_v30 = vld [vmem:[%s1175_s15 + $0x10] sm:$0xff]  ;;  %s1302_s28 = scalar_lea.vmem %s1624_s4, %s982_s9 }
  0x14   : > { %v326_v6 = vld [vmem:[%s1175_s15 + $0x40] sm:$0xff]  ;;  %531 = vmatpush.bf16.msra.mxu0 %v522_v3  ;;  %1006 = vmatpush.bf16.msra.mxu1 %v522_v3  ;;  %v354_v7 = vmul.f32 %v1164_v0, %v318_v4  ;;  %v355_v8 = vmul.f32 %v1164_v0, %v319_v5  ;;  %v327_v9 = vld [vmem:[%s1175_s15 + $0x48] sm:$0xff]  ;;  %v321_v35 = vld [vmem:[%s1175_s15 + $0x18] sm:$0xff]  ;;  %v356_v45 = vmul.f32 %v1164_v0, %v320_v30 }
  0x15   : > { %v362_v10 = vmul.f32 %v1164_v0, %v326_v6  ;;  %v334_v11 = vld [vmem:[%s1175_s15 + $0x80] sm:$0xff]  ;;  %v335_v12 = vld [vmem:[%s1175_s15 + $0x88] sm:$0xff]  ;;  %1007 = vmatpush.bf16.msra.mxu2 %v522_v3  ;;  %1008 = vmatpush.bf16.msra.mxu3 %v522_v3  ;;  %v363_v13 = vmul.f32 %v1164_v0, %v327_v9  ;;  %v328_v36 = vld [vmem:[%s1175_s15 + $0x50] sm:$0xff]  ;;  %v357_v46 = vmul.f32 %v1164_v0, %v321_v35 }
  0x16   : > { %v370_v14 = vmul.f32 %v1164_v0, %v334_v11  ;;  %v371_v15 = vmul.f32 %v1164_v0, %v335_v12  ;;  %v342_v16 = vld [vmem:[%s1175_s15 + $0xc0] sm:$0xff]  ;;  %v343_v17 = vld [vmem:[%s1175_s15 + $0xc8] sm:$0xff]  ;;  %v390_v18 = vadd.f32 %v1177_v1, %v354_v7  ;;  %v391_v19 = vadd.f32 %v1177_v1, %v355_v8  ;;  %v329_v37 = vld [vmem:[%s1175_s15 + $0x58] sm:$0xff] }
  0x17   : > { %v398_v20 = vadd.f32 %v1177_v1, %v362_v10  ;;  %v378_v21 = vmul.f32 %v1164_v0, %v342_v16  ;;  %v399_v22 = vadd.f32 %v1177_v1, %v363_v13  ;;  %v379_v25 = vmul.f32 %v1164_v0, %v343_v17  ;;  %v336_v40 = vld [vmem:[%s1175_s15 + $0x90] sm:$0xff]  ;;  %v337_v41 = vld [vmem:[%s1175_s15 + $0x98] sm:$0xff]  ;;  %v322_v13 = vld [vmem:[%s1175_s15 + $0x20] sm:$0xff] }
  0x18   : > { %v406_v23 = vadd.f32 %v1177_v1, %v370_v14  ;;  %v407_v24 = vadd.f32 %v1177_v1, %v371_v15  ;;  %v422_v26 = vmax.f32 %v390_v18, 0.0  ;;  %v423_v27 = vmax.f32 %v391_v19, 0.0  ;;  %v344_v49 = vld [vmem:[%s1175_s15 + $0xd0] sm:$0xff]  ;;  %v345_v50 = vld [vmem:[%s1175_s15 + $0xd8] sm:$0xff]  ;;  %v323_v14 = vld [vmem:[%s1175_s15 + $0x28] sm:$0xff] }
  0x19   : > { %v430_v28 = vmax.f32 %v398_v20, 0.0  ;;  %v414_v29 = vadd.f32 %v1177_v1, %v378_v21  ;;  %v431_v31 = vmax.f32 %v399_v22, 0.0  ;;  %v415_v34 = vadd.f32 %v1177_v1, %v379_v25  ;;  %v330_v15 = vld [vmem:[%s1175_s15 + $0x60] sm:$0xff]  ;;  %v331_v16 = vld [vmem:[%s1175_s15 + $0x68] sm:$0xff] }
  0x1a   : > { %v438_v32 = vmax.f32 %v406_v23, 0.0  ;;  %v439_v33 = vmax.f32 %v407_v24, 0.0  ;;  %v454_v38 = vpack.c.bf16 %v423_v27, %v422_v26  ;;  %v364_v47 = vmul.f32 %v1164_v0, %v328_v36  ;;  %v338_v17 = vld [vmem:[%s1175_s15 + $0xa0] sm:$0xff]  ;;  %v339_v18 = vld [vmem:[%s1175_s15 + $0xa8] sm:$0xff] }
  0x1b   : > { %v446_v39 = vmax.f32 %v414_v29, 0.0  ;;  %v458_v42 = vpack.c.bf16 %v431_v31, %v430_v28  ;;  %v447_v44 = vmax.f32 %v415_v34, 0.0  ;;  %v365_v48 = vmul.f32 %v1164_v0, %v329_v37  ;;  %v346_v23 = vld [vmem:[%s1175_s15 + $0xe0] sm:$0xff]  ;;  %v347_v24 = vld [vmem:[%s1175_s15 + $0xe8] sm:$0xff] }
  0x1c   : > { %v462_v43 = vpack.c.bf16 %v439_v33, %v438_v32  ;;  %987 = vmatmul.msk.bf16.vlgmr.msra.gmra.mxu0 %vm471_vm1, %v454_v38  ;;  %v372_v52 = vmul.f32 %v1164_v0, %v336_v40  ;;  %v373_v53 = vmul.f32 %v1164_v0, %v337_v41  ;;  %v380_v54 = vmul.f32 %v1164_v0, %v344_v49  ;;  %v324_v49 = vld [vmem:[%s1175_s15 + $0x30] sm:$0xff] }
  0x1d   : > { %991 = vmatmul.msk.bf16.vlgmr.msra.gmra.mxu1 %vm471_vm1, %v458_v42  ;;  %v466_v51 = vpack.c.bf16 %v447_v44, %v446_v39  ;;  %v381_v55 = vmul.f32 %v1164_v0, %v345_v50  ;;  %v392_v56 = vadd.f32 %v1177_v1, %v356_v45  ;;  %v393_v57 = vadd.f32 %v1177_v1, %v357_v46  ;;  %v325_v50 = vld [vmem:[%s1175_s15 + $0x38] sm:$0xff] }
  0x1e   : > { %995 = vmatmul.msk.bf16.vlgmr.msra.gmra.mxu2 %vm471_vm1, %v462_v43  ;;  %v400_v58 = vadd.f32 %v1177_v1, %v364_v47  ;;  %v401_v59 = vadd.f32 %v1177_v1, %v365_v48  ;;  %v408_v60 = vadd.f32 %v1177_v1, %v372_v52  ;;  %v409_v61 = vadd.f32 %v1177_v1, %v373_v53  ;;  %v333_v52 = vld [vmem:[%s1175_s15 + $0x78] sm:$0xff]  ;;  %v340_v53 = vld [vmem:[%s1175_s15 + $0xb0] sm:$0xff] }
  0x1f   : > { %999 = vmatmul.msk.bf16.vlgmr.msra.gmra.mxu3 %vm471_vm1, %v466_v51  ;;  %v416_v62 = vadd.f32 %v1177_v1, %v380_v54  ;;  %v417_v63 = vadd.f32 %v1177_v1, %v381_v55  ;;  %v424_v2 = vmax.f32 %v392_v56, 0.0  ;;  %v425_v3 = vmax.f32 %v393_v57, 0.0  ;;  %v332_v51 = vld [vmem:[%s1175_s15 + $0x70] sm:$0xff]  ;;  %v341_v54 = vld [vmem:[%s1175_s15 + $0xb8] sm:$0xff] }
  0x20   : > { %v432_v4 = vmax.f32 %v400_v58, 0.0  ;;  %v433_v5 = vmax.f32 %v401_v59, 0.0  ;;  %v440_v6 = vmax.f32 %v408_v60, 0.0  ;;  %v441_v7 = vmax.f32 %v409_v61, 0.0  ;;  %v348_v59 = vld [vmem:[%s1175_s15 + $0xf0] sm:$0xff]  ;;  %v349_v60 = vld [vmem:[%s1175_s15 + $0xf8] sm:$0xff] }
  0x21   : > { %v448_v8 = vmax.f32 %v416_v62, 0.0  ;;  %v449_v9 = vmax.f32 %v417_v63, 0.0  ;;  %v455_v10 = vpack.c.bf16 %v425_v3, %v424_v2  ;;  %v358_v20 = vmul.f32 %v1164_v0, %v322_v13 }
  0x22   : > { %v459_v11 = vpack.c.bf16 %v433_v5, %v432_v4  ;;  %v463_v12 = vpack.c.bf16 %v441_v7, %v440_v6  ;;  %v359_v21 = vmul.f32 %v1164_v0, %v323_v14  ;;  %v366_v22 = vmul.f32 %v1164_v0, %v330_v15 }
  0x23   : > { %v467_v19 = vpack.c.bf16 %v449_v9, %v448_v8  ;;  %v367_v25 = vmul.f32 %v1164_v0, %v331_v16  ;;  %v374_v26 = vmul.f32 %v1164_v0, %v338_v17  ;;  %v375_v27 = vmul.f32 %v1164_v0, %v339_v18 }
  0x24   : > { %v382_v28 = vmul.f32 %v1164_v0, %v346_v23  ;;  %v383_v29 = vmul.f32 %v1164_v0, %v347_v24  ;;  %v394_v30 = vadd.f32 %v1177_v1, %v358_v20  ;;  %v395_v31 = vadd.f32 %v1177_v1, %v359_v21 }
  0x25   : > { %v402_v32 = vadd.f32 %v1177_v1, %v366_v22  ;;  %v403_v33 = vadd.f32 %v1177_v1, %v367_v25  ;;  %v410_v34 = vadd.f32 %v1177_v1, %v374_v26  ;;  %v411_v35 = vadd.f32 %v1177_v1, %v375_v27 }
  0x26   : > { %v418_v36 = vadd.f32 %v1177_v1, %v382_v28  ;;  %v419_v37 = vadd.f32 %v1177_v1, %v383_v29  ;;  %v426_v38 = vmax.f32 %v394_v30, 0.0  ;;  %v427_v39 = vmax.f32 %v395_v31, 0.0 }
  0x27   : > { %v434_v40 = vmax.f32 %v402_v32, 0.0  ;;  %v435_v41 = vmax.f32 %v403_v33, 0.0  ;;  %v442_v42 = vmax.f32 %v410_v34, 0.0  ;;  %v443_v43 = vmax.f32 %v411_v35, 0.0 }
  0x28   : > { %v450_v44 = vmax.f32 %v418_v36, 0.0  ;;  %v451_v45 = vmax.f32 %v419_v37, 0.0  ;;  %v456_v46 = vpack.c.bf16 %v427_v39, %v426_v38  ;;  %v360_v56 = vmul.f32 %v1164_v0, %v324_v49 }
  0x29   : > { %v460_v47 = vpack.c.bf16 %v435_v41, %v434_v40  ;;  %v464_v48 = vpack.c.bf16 %v443_v43, %v442_v42  ;;  %v361_v57 = vmul.f32 %v1164_v0, %v325_v50  ;;  %v368_v58 = vmul.f32 %v1164_v0, %v332_v51 }
  0x2a   : > { %v468_v55 = vpack.c.bf16 %v451_v45, %v450_v44  ;;  %v369_v61 = vmul.f32 %v1164_v0, %v333_v52  ;;  %v376_v62 = vmul.f32 %v1164_v0, %v340_v53  ;;  %v377_v63 = vmul.f32 %v1164_v0, %v341_v54 }
  0x2b   : > { %v384_v2 = vmul.f32 %v1164_v0, %v348_v59  ;;  %v385_v3 = vmul.f32 %v1164_v0, %v349_v60  ;;  %v396_v4 = vadd.f32 %v1177_v1, %v360_v56  ;;  %v397_v5 = vadd.f32 %v1177_v1, %v361_v57 }
  0x2c   : > { %988 = vmatmul.msk.bf16.gmra.mxu0 %vm471_vm1, %v455_v10  ;;  %v404_v6 = vadd.f32 %v1177_v1, %v368_v58  ;;  %v405_v7 = vadd.f32 %v1177_v1, %v369_v61  ;;  %v412_v8 = vadd.f32 %v1177_v1, %v376_v62  ;;  %v413_v9 = vadd.f32 %v1177_v1, %v377_v63 }
  0x2d   : > { %992 = vmatmul.msk.bf16.gmra.mxu1 %vm471_vm1, %v459_v11  ;;  %v420_v10 = vadd.f32 %v1177_v1, %v384_v2  ;;  %v421_v11 = vadd.f32 %v1177_v1, %v385_v3  ;;  %v429_v13 = vmax.f32 %v397_v5, 0.0 }
  0x2e   : > { %996 = vmatmul.msk.bf16.gmra.mxu2 %vm471_vm1, %v463_v12  ;;  %v428_v12 = vmax.f32 %v396_v4, 0.0  ;;  %v436_v0 = vmax.f32 %v404_v6, 0.0  ;;  %v437_v14 = vmax.f32 %v405_v7, 0.0  ;;  %v444_v15 = vmax.f32 %v412_v8, 0.0 }
  0x2f   : > { %1000 = vmatmul.msk.bf16.gmra.mxu3 %vm471_vm1, %v467_v19  ;;  %v445_v16 = vmax.f32 %v413_v9, 0.0  ;;  %v452_v17 = vmax.f32 %v420_v10, 0.0  ;;  %v453_v18 = vmax.f32 %v421_v11, 0.0 }
  0x30   : > { %v457_v19 = vpack.c.bf16 %v429_v13, %v428_v12  ;;  %v461_v20 = vpack.c.bf16 %v437_v14, %v436_v0 }
  0x31   : > { %v465_v21 = vpack.c.bf16 %v445_v16, %v444_v15  ;;  %v469_v22 = vpack.c.bf16 %v453_v18, %v452_v17 }
  0x3c   : > { %989 = vmatmul.msk.bf16.gmra.mxu0 %vm471_vm1, %v456_v46 }
  0x3d   : > { %993 = vmatmul.msk.bf16.gmra.mxu1 %vm471_vm1, %v460_v47 }
  0x3e   : > { %997 = vmatmul.msk.bf16.gmra.mxu2 %vm471_vm1, %v464_v48 }
  0x3f   : > { %1001 = vmatmul.msk.bf16.gmra.mxu3 %vm471_vm1, %v468_v55 }
  0x4c   : > { %990 = vmatmul.msk.bf16.gmra.mxu0 %vm471_vm1, %v457_v19 }
  0x4d   : > { %994 = vmatmul.msk.bf16.gmra.mxu1 %vm471_vm1, %v461_v20 }
  0x4e   : > { %998 = vmatmul.msk.bf16.gmra.mxu2 %vm471_vm1, %v465_v21 }
  0x4f   : > { %1002 = vmatmul.msk.bf16.gmra.mxu3 %vm471_vm1, %v469_v22 }
  0x99   : > { %v1304_v1 = vpop.f32.mrf.mxu0 }
  0x9a   : > { %614 = vst.msk [vmem:[%s1302_s28] sm:$0xff] %vm613_vm2, %v1304_v1  ;;  %v1309_v23 = vpop.f32.mrf.mxu1 }
  0x9b   : > { %622 = vst.msk [vmem:[%s1302_s28 + $0x40] sm:$0xff] %vm613_vm2, %v1309_v23 }
  0xa1   : > { %v1314_v24 = vpop.f32.mrf.mxu2  ;;  %v1319_v25 = vpop.f32.mrf.mxu0 }
  0xa2   : > { %630 = vst.msk [vmem:[%s1302_s28 + $0x80] sm:$0xff] %vm613_vm2, %v1314_v24  ;;  %v1321_v26 = vpop.f32.mrf.mxu3  ;;  %v1326_v27 = vpop.f32.mrf.mxu1 }
  0xa3   : > { %615 = vst.msk [vmem:[%s1302_s28 + $0x8] sm:$0xff] %vm613_vm2, %v1319_v25 }
  0xa4   : > { %638 = vst.msk [vmem:[%s1302_s28 + $0xc0] sm:$0xff] %vm613_vm2, %v1321_v26 }
  0xa5   : > { %623 = vst.msk [vmem:[%s1302_s28 + $0x48] sm:$0xff] %vm613_vm2, %v1326_v27 }
  0xa9   : > { %v1334_v28 = vpop.f32.mrf.mxu2  ;;  %v1339_v29 = vpop.f32.mrf.mxu0 }
  0xaa   : > { %631 = vst.msk [vmem:[%s1302_s28 + $0x88] sm:$0xff] %vm613_vm2, %v1334_v28  ;;  %v1341_v30 = vpop.f32.mrf.mxu3  ;;  %v1346_v31 = vpop.f32.mrf.mxu1 }
  0xab   : > { %616 = vst.msk [vmem:[%s1302_s28 + $0x10] sm:$0xff] %vm613_vm2, %v1339_v29 }
  0xac   : > { %639 = vst.msk [vmem:[%s1302_s28 + $0xc8] sm:$0xff] %vm613_vm2, %v1341_v30 }
  0xad   : > { %624 = vst.msk [vmem:[%s1302_s28 + $0x50] sm:$0xff] %vm613_vm2, %v1346_v31 }
  0xb1   : > { %v1354_v32 = vpop.f32.mrf.mxu2  ;;  %v1359_v33 = vpop.f32.mrf.mxu0 }
  0xb2   : > { %632 = vst.msk [vmem:[%s1302_s28 + $0x90] sm:$0xff] %vm613_vm2, %v1354_v32  ;;  %v1361_v34 = vpop.f32.mrf.mxu3  ;;  %v1366_v35 = vpop.f32.mrf.mxu1 }
  0xb3   : > { %617 = vst.msk [vmem:[%s1302_s28 + $0x18] sm:$0xff] %vm613_vm2, %v1359_v33 }
  0xb4   : > { %640 = vst.msk [vmem:[%s1302_s28 + $0xd0] sm:$0xff] %vm613_vm2, %v1361_v34 }
  0xb5   : > { %625 = vst.msk [vmem:[%s1302_s28 + $0x58] sm:$0xff] %vm613_vm2, %v1366_v35 }
  0xb9   : > { %v1374_v36 = vpop.f32.mrf.mxu2  ;;  %v543_v37 = vpop.f32.mrf.mxu0 }
  0xba   : > { %633 = vst.msk [vmem:[%s1302_s28 + $0x98] sm:$0xff] %vm613_vm2, %v1374_v36  ;;  %v1379_v38 = vpop.f32.mrf.mxu3  ;;  %v1383_v39 = vpop.f32.mrf.mxu1 }
  0xbb   : > { %618 = vst.msk [vmem:[%s1302_s28 + $0x20] sm:$0xff] %vm613_vm2, %v543_v37 }
  0xbc   : > { %641 = vst.msk [vmem:[%s1302_s28 + $0xd8] sm:$0xff] %vm613_vm2, %v1379_v38 }
  0xbd   : > { %626 = vst.msk [vmem:[%s1302_s28 + $0x60] sm:$0xff] %vm613_vm2, %v1383_v39 }
  0xc1   : > { %v1391_v40 = vpop.f32.mrf.mxu2  ;;  %v545_v41 = vpop.f32.mrf.mxu0 }
  0xc2   : > { %634 = vst.msk [vmem:[%s1302_s28 + $0xa0] sm:$0xff] %vm613_vm2, %v1391_v40  ;;  %v1396_v42 = vpop.f32.mrf.mxu3  ;;  %v1400_v43 = vpop.f32.mrf.mxu1 }
  0xc3   : > { %619 = vst.msk [vmem:[%s1302_s28 + $0x28] sm:$0xff] %vm613_vm2, %v545_v41 }
  0xc4   : > { %642 = vst.msk [vmem:[%s1302_s28 + $0xe0] sm:$0xff] %vm613_vm2, %v1396_v42 }
  0xc5   : > { %627 = vst.msk [vmem:[%s1302_s28 + $0x68] sm:$0xff] %vm613_vm2, %v1400_v43 }
  0xc9   : > { %v1408_v44 = vpop.f32.mrf.mxu2  ;;  %v548_v45 = vpop.f32.mrf.mxu0 }
  0xca   : > { %635 = vst.msk [vmem:[%s1302_s28 + $0xa8] sm:$0xff] %vm613_vm2, %v1408_v44  ;;  %v1413_v46 = vpop.f32.mrf.mxu3  ;;  %v1417_v47 = vpop.f32.mrf.mxu1 }
  0xcb   : > { %620 = vst.msk [vmem:[%s1302_s28 + $0x30] sm:$0xff] %vm613_vm2, %v548_v45 }
  0xcc   : > { %643 = vst.msk [vmem:[%s1302_s28 + $0xe8] sm:$0xff] %vm613_vm2, %v1413_v46 }
  0xcd   : > { %628 = vst.msk [vmem:[%s1302_s28 + $0x70] sm:$0xff] %vm613_vm2, %v1417_v47 }
  0xd1   : > { %v1425_v48 = vpop.f32.mrf.mxu2  ;;  %v550_v49 = vpop.f32.mrf.mxu0 }
  0xd2   : > { %636 = vst.msk [vmem:[%s1302_s28 + $0xb0] sm:$0xff] %vm613_vm2, %v1425_v48  ;;  %v1430_v50 = vpop.f32.mrf.mxu3  ;;  %v1434_v51 = vpop.f32.mrf.mxu1 }
  0xd3   : > { %621 = vst.msk [vmem:[%s1302_s28 + $0x38] sm:$0xff] %vm613_vm2, %v550_v49 }
  0xd4   : > { %644 = vst.msk [vmem:[%s1302_s28 + $0xf0] sm:$0xff] %vm613_vm2, %v1430_v50 }
  0xd5   : > { %629 = vst.msk [vmem:[%s1302_s28 + $0x78] sm:$0xff] %vm613_vm2, %v1434_v51 }
  0xd7   : > { %649 = sbr.rel (%p1003_p7) target bundleno = 222 (0xde), region = 40 }
  0xd9   : > { %v1442_v52 = vpop.f32.mrf.mxu2 }
  0xda   : > { %637 = vst.msk [vmem:[%s1302_s28 + $0xb8] sm:$0xff] %vm613_vm2, %v1442_v52  ;;  %v1447_v53 = vpop.f32.mrf.mxu3 }
  0xdb   : > { %645 = vst.msk [vmem:[%s1302_s28 + $0xf8] sm:$0xff] %vm613_vm2, %v1447_v53 }
  0xdc   : > { %vm650_vm3 = vcmask 58368   ;;  %v1092_v54 = vmov 0.0  }
  0xdd   : > { %651 = vst.msk [vmem:[%s1186_s26] sm:$0x3] %vm650_vm3, %v1092_v54 }
  0xde PF: > { %v652_v55 = vsel %vm613_vm2, %v1304_v1, 0.0  ;;  %v653_v56 = vsel %vm613_vm2, %v1319_v25, 0.0  ;;  %v655_v57 = vsel %vm613_vm2, %v1339_v29, 0.0  ;;  %v657_v59 = vsel %vm613_vm2, %v1359_v33, 0.0 }
  0xdf   : > { %v654_v58 = vadd.f32 %v653_v56, %v652_v55  ;;  %v659_v61 = vsel %vm613_vm2, %v543_v37, 0.0  ;;  %v661_v63 = vsel %vm613_vm2, %v545_v41, 0.0  ;;  %v663_v3 = vsel %vm613_vm2, %v548_v45, 0.0 }
  0xe0   : > { %v721_v4 = vmul.f32 %v1304_v1, %v1304_v1  ;;  %v722_v6 = vmul.f32 %v1319_v25, %v1319_v25  ;;  %v723_v7 = vmul.f32 %v1339_v29, %v1339_v29  ;;  %v665_v8 = vsel %vm613_vm2, %v550_v49, 0.0 }
  0xe1   : > { %v656_v60 = vadd.f32 %v655_v57, %v654_v58  ;;  %v724_v10 = vmul.f32 %v1359_v33, %v1359_v33  ;;  %v667_v11 = vsel %vm613_vm2, %v1309_v23, 0.0  ;;  %v725_v0 = vmul.f32 %v543_v37, %v543_v37 }
  0xe2   : > { %v753_v12 = vsel %vm613_vm2, %v721_v4, 0.0  ;;  %v754_v14 = vsel %vm613_vm2, %v722_v6, 0.0  ;;  %v756_v15 = vsel %vm613_vm2, %v723_v7, 0.0  ;;  %v669_v16 = vsel %vm613_vm2, %v1326_v27, 0.0 }
  0xe3   : > { %v658_v62 = vadd.f32 %v657_v59, %v656_v60  ;;  %v755_v17 = vadd.f32 %v754_v14, %v753_v12  ;;  %v726_v19 = vmul.f32 %v545_v41, %v545_v41  ;;  %v758_v20 = vsel %vm613_vm2, %v724_v10, 0.0 }
  0xe4   : > { %v671_v21 = vsel %vm613_vm2, %v1346_v31, 0.0  ;;  %v727_v25 = vmul.f32 %v548_v45, %v548_v45  ;;  %v760_v29 = vsel %vm613_vm2, %v725_v0, 0.0  ;;  %v673_v33 = vsel %vm613_vm2, %v1366_v35, 0.0 }
  0xe5   : > { %v660_v2 = vadd.f32 %v659_v61, %v658_v62  ;;  %v757_v22 = vadd.f32 %v756_v15, %v755_v17  ;;  %v728_v55 = vmul.f32 %v550_v49, %v550_v49  ;;  %v762_v56 = vsel %vm613_vm2, %v726_v19, 0.0 }
  0xe6   : > { %v675_v41 = vsel %vm613_vm2, %v1383_v39, 0.0  ;;  %v729_v59 = vmul.f32 %v1309_v23, %v1309_v23  ;;  %v764_v45 = vsel %vm613_vm2, %v727_v25, 0.0  ;;  %v677_v60 = vsel %vm613_vm2, %v1400_v43, 0.0 }
  0xe7   : > { %v662_v5 = vadd.f32 %v661_v63, %v660_v2  ;;  %v759_v37 = vadd.f32 %v758_v20, %v757_v22  ;;  %v730_v49 = vmul.f32 %v1326_v27, %v1326_v27  ;;  %v766_v63 = vsel %vm613_vm2, %v728_v55, 0.0 }
  0xe8   : > { %v679_v2 = vsel %vm613_vm2, %v1417_v47, 0.0  ;;  %v731_v23 = vmul.f32 %v1346_v31, %v1346_v31  ;;  %v681_v6 = vsel %vm613_vm2, %v1434_v51, 0.0  ;;  %v732_v27 = vmul.f32 %v1366_v35, %v1366_v35 }
  0xe9   : > { %v664_v9 = vadd.f32 %v663_v3, %v662_v5  ;;  %v761_v57 = vadd.f32 %v760_v29, %v759_v37  ;;  %v768_v5 = vsel %vm613_vm2, %v729_v59, 0.0  ;;  %v683_v10 = vsel %vm613_vm2, %v1314_v24, 0.0 }
  0xea   : > { %v733_v31 = vmul.f32 %v1383_v39, %v1383_v39  ;;  %v685_v0 = vsel %vm613_vm2, %v1334_v28, 0.0  ;;  %v734_v35 = vmul.f32 %v1400_v43, %v1400_v43  ;;  %v687_v17 = vsel %vm613_vm2, %v1354_v32, 0.0 }
  0xeb   : > { %v666_v13 = vadd.f32 %v665_v8, %v664_v9  ;;  %v763_v61 = vadd.f32 %v762_v56, %v761_v57  ;;  %v770_v9 = vsel %vm613_vm2, %v730_v49, 0.0  ;;  %v735_v39 = vmul.f32 %v1417_v47, %v1417_v47 }
  0xec   : > { %v776_v20 = vsel %vm613_vm2, %v733_v31, 0.0  ;;  %v736_v43 = vmul.f32 %v1434_v51, %v1434_v51  ;;  %v778_v25 = vsel %vm613_vm2, %v734_v35, 0.0  ;;  %v691_v29 = vsel %vm613_vm2, %v1391_v40, 0.0 }
  0xed   : > { %v668_v18 = vadd.f32 %v667_v11, %v666_v13  ;;  %v765_v3 = vadd.f32 %v764_v45, %v763_v61  ;;  %v772_v13 = vsel %vm613_vm2, %v731_v23, 0.0  ;;  %v737_v47 = vmul.f32 %v1314_v24, %v1314_v24 }
  0xee   : > { %v693_v55 = vsel %vm613_vm2, %v1408_v44, 0.0  ;;  %v738_v51 = vmul.f32 %v1334_v28, %v1334_v28  ;;  %v782_v57 = vsel %vm613_vm2, %v736_v43, 0.0  ;;  %v739_v24 = vmul.f32 %v1354_v32, %v1354_v32 }
  0xef   : > { %v670_v1 = vadd.f32 %v669_v16, %v668_v18  ;;  %v767_v7 = vadd.f32 %v766_v63, %v765_v3  ;;  %v774_v16 = vsel %vm613_vm2, %v732_v27, 0.0  ;;  %v697_v61 = vsel %vm613_vm2, %v1442_v52, 0.0 }
  0xf0   : > { %v740_v28 = vmul.f32 %v1374_v36, %v1374_v36  ;;  %v786_v63 = vsel %vm613_vm2, %v738_v51, 0.0  ;;  %v741_v32 = vmul.f32 %v1391_v40, %v1391_v40  ;;  %v788_v23 = vsel %vm613_vm2, %v739_v24, 0.0 }
  0xf1   : > { %v672_v54 = vadd.f32 %v671_v21, %v670_v1  ;;  %v769_v11 = vadd.f32 %v768_v5, %v767_v7  ;;  %v689_v21 = vsel %vm613_vm2, %v1374_v36, 0.0  ;;  %v701_v5 = vsel %vm613_vm2, %v1341_v30, 0.0 }
  0xf2   : > { %v742_v36 = vmul.f32 %v1408_v44, %v1408_v44  ;;  %v703_v27 = vsel %vm613_vm2, %v1361_v34, 0.0  ;;  %v743_v40 = vmul.f32 %v1425_v48, %v1425_v48  ;;  %v744_v44 = vmul.f32 %v1442_v52, %v1442_v52 }
  0xf3   : > { %v674_v58 = vadd.f32 %v673_v33, %v672_v54  ;;  %v771_v14 = vadd.f32 %v770_v9, %v769_v11  ;;  %v780_v54 = vsel %vm613_vm2, %v735_v39, 0.0  ;;  %v792_v11 = vsel %vm613_vm2, %v741_v32, 0.0 }
  0xf4   : > { %v746_v52 = vmul.f32 %v1341_v30, %v1341_v30  ;;  %v798_v39 = vsel %vm613_vm2, %v744_v44, 0.0  ;;  %v713_v43 = vsel %vm613_vm2, %v1447_v53, 0.0  ;;  %v748_v30 = vmul.f32 %v1379_v38, %v1379_v38 }
  0xf5   : > { %v676_v62 = vadd.f32 %v675_v41, %v674_v58  ;;  %v773_v18 = vadd.f32 %v772_v13, %v771_v14  ;;  %v695_v58 = vsel %vm613_vm2, %v1425_v48, 0.0  ;;  %v707_v14 = vsel %vm613_vm2, %v1396_v42, 0.0 }
  0xf6   : > { %v745_v48 = vmul.f32 %v1321_v26, %v1321_v26  ;;  %vm825_vm4 = vcmask 58368  }
  0xf7   : > { %v678_v4 = vadd.f32 %v677_v60, %v676_v62  ;;  %v775_v22 = vadd.f32 %v774_v16, %v773_v18  ;;  %v784_v60 = vsel %vm613_vm2, %v737_v47, 0.0  ;;  %v796_v16 = vsel %vm613_vm2, %v743_v40, 0.0 }
  0xf9   : > { %v680_v8 = vadd.f32 %v679_v2, %v678_v4  ;;  %v777_v33 = vadd.f32 %v776_v20, %v775_v22  ;;  %v699_v2 = vsel %vm613_vm2, %v1321_v26, 0.0  ;;  %v711_v20 = vsel %vm613_vm2, %v1430_v50, 0.0 }
  0xfa   : > { %v747_v26 = vmul.f32 %v1361_v34, %v1361_v34 }
  0xfb   : > { %v682_v12 = vadd.f32 %v681_v6, %v680_v8  ;;  %v779_v56 = vadd.f32 %v778_v25, %v777_v33  ;;  %v790_v8 = vsel %vm613_vm2, %v740_v28, 0.0  ;;  %v802_v33 = vsel %vm613_vm2, %v746_v52, 0.0 }
  0xfd   : > { %v684_v15 = vadd.f32 %v683_v10, %v682_v12  ;;  %v781_v59 = vadd.f32 %v780_v54, %v779_v56  ;;  %v705_v12 = vsel %vm613_vm2, %v1379_v38, 0.0  ;;  %v749_v54 = vmul.f32 %v1396_v42, %v1396_v42 }
  0xfe   : > { %v750_v56 = vmul.f32 %v1413_v46, %v1413_v46  ;;  %v751_v38 = vmul.f32 %v1430_v50, %v1430_v50 }
  0xff   : > { %v686_v19 = vadd.f32 %v685_v0, %v684_v15  ;;  %v783_v62 = vadd.f32 %v782_v57, %v781_v59  ;;  %v794_v0 = vsel %vm613_vm2, %v742_v36, 0.0 }
 0x100   : > { %v810_v42 = vsel %vm613_vm2, %v750_v56, 0.0 }
 0x101   : > { %v688_v1 = vadd.f32 %v687_v17, %v686_v19  ;;  %v785_v3 = vadd.f32 %v784_v60, %v783_v62  ;;  %v709_v17 = vsel %vm613_vm2, %v1413_v46, 0.0  ;;  %v812_v46 = vsel %vm613_vm2, %v751_v38, 0.0 }
 0x103   : > { %v690_v37 = vadd.f32 %v689_v21, %v688_v1  ;;  %v787_v6 = vadd.f32 %v786_v63, %v785_v3  ;;  %v800_v1 = vsel %vm613_vm2, %v745_v48, 0.0 }
 0x105   : > { %v692_v41 = vadd.f32 %v691_v29, %v690_v37  ;;  %v789_v9 = vadd.f32 %v788_v23, %v787_v6 }
 0x107   : > { %v694_v45 = vadd.f32 %v693_v55, %v692_v41  ;;  %v791_v31 = vadd.f32 %v790_v8, %v789_v9  ;;  %v804_v55 = vsel %vm613_vm2, %v747_v26, 0.0  ;;  %v806_v41 = vsel %vm613_vm2, %v748_v30, 0.0 }
 0x109   : > { %v696_v49 = vadd.f32 %v695_v58, %v694_v45  ;;  %v793_v15 = vadd.f32 %v792_v11, %v791_v31  ;;  %v808_v58 = vsel %vm613_vm2, %v749_v54, 0.0  ;;  %v752_v45 = vmul.f32 %v1447_v53, %v1447_v53 }
 0x10b   : > { %v698_v4 = vadd.f32 %v697_v61, %v696_v49  ;;  %v795_v18 = vadd.f32 %v794_v0, %v793_v15  ;;  %v814_v62 = vsel %vm613_vm2, %v752_v45, 0.0 }
 0x10d   : > { %v700_v7 = vadd.f32 %v699_v2, %v698_v4  ;;  %v797_v21 = vadd.f32 %v796_v16, %v795_v18 }
 0x10f   : > { %v702_v10 = vadd.f32 %v701_v5, %v700_v7  ;;  %v799_v25 = vadd.f32 %v798_v39, %v797_v21  ;;  %v822_v7 = vld [vmem:[%s1186_s26] sm:$0x3] }
 0x111   : > { %v704_v13 = vadd.f32 %v703_v27, %v702_v10  ;;  %v801_v37 = vadd.f32 %v800_v1, %v799_v25 }
 0x113   : > { %v706_v35 = vadd.f32 %v705_v12, %v704_v13  ;;  %v803_v34 = vadd.f32 %v802_v33, %v801_v37 }
 0x115   : > { %v708_v19 = vadd.f32 %v707_v14, %v706_v35  ;;  %v805_v57 = vadd.f32 %v804_v55, %v803_v34 }
 0x117   : > { %v710_v22 = vadd.f32 %v709_v17, %v708_v19  ;;  %v807_v59 = vadd.f32 %v806_v41, %v805_v57 }
 0x119   : > { %v712_v29 = vadd.f32 %v711_v20, %v710_v22  ;;  %v809_v60 = vadd.f32 %v808_v58, %v807_v59 }
 0x11b   : > { %v714_v47 = vadd.f32 %v713_v43, %v712_v29  ;;  %v811_v61 = vadd.f32 %v810_v42, %v809_v60 }
 0x11d   : > { %v715_v51 = vrot.slane %v714_v47, 4  ;;  %v813_v28 = vadd.f32 %v812_v46, %v811_v61 }
 0x11f   : > { %v716_v24 = vadd.f32 %v715_v51, %v714_v47  ;;  %v815_v50 = vadd.f32 %v814_v62, %v813_v28 }
 0x121   : > { %v717_v49 = vrot.slane %v716_v24, 2  ;;  %v816_v2 = vrot.slane %v815_v50, 4 }
 0x123   : > { %v718_v63 = vadd.f32 %v717_v49, %v716_v24  ;;  %v817_v3 = vadd.f32 %v816_v2, %v815_v50 }
 0x125   : > { %v719_v4 = vrot.slane %v718_v63, 1  ;;  %v818_v32 = vrot.slane %v817_v3, 2 }
 0x127   : > { %v819_v53 = vadd.f32 %v818_v32, %v817_v3  ;;  %v720_v23 = vadd.f32 %v719_v4, %v718_v63 }
 0x129   : > { %v820_v5 = vrot.slane %v819_v53, 1 }
 0x12b   : > { %v821_v6 = vadd.f32 %v820_v5, %v819_v53 }
 0x12d   : > { %v823_v36 = vsel %vm520_vm0, %v720_v23, %v821_v6 }
 0x12e   : > { %v824_v8 = vadd.f32 %v823_v36, %v822_v7 }
 0x130   : > { %826 = vst.msk [vmem:[%s1186_s26] sm:$0x3] %vm825_vm4, %v824_v8 }
 0x131 PF: > { %s16_s22 = sadd.s32 1, %s1090_s22   ;;  %s1626_s18 = smov %s1082_s20 }
 0x132   : > { %p13_p8 = scmp.ge.s32.totalorder %s16_s22, 6   ;;  %s1627_s19 = smov %s1086_s21 }
 0x133   : > { %s1628_s20 = smov %s1631_s23  ;;  %s1629_s21 = smov %s1635_s24 }
 0x134   :  { %15 = sbr.rel (!%p13_p8) target bundleno = 3 (0x3), region = 91 }

// kernel: db_head_forward.5
= control target key start
LH: loop header
LB: loop body
LE: loop exit
PB: predicated region body
PF: predicated region fallthrough
CT: control target
= control target key end

     0   :  { %s3502_s18 = smov 0   ;;  %s3504_s19 = smov 0   ;;  %s6031_s0 = inlined_call_operand.vmem [shape: f32[2,512,8], index: 0, kind: input, shape index: {}]   ;;  %s6032_s1 = inlined_call_operand.vmem [shape: f32[2,1,8], index: 1, kind: input, shape index: {}]   ;;  %s6033_s2 = inlined_call_operand.vmem [shape: f32[2,1,8], index: 2, kind: input, shape index: {}]   ;;  %s6034_s3 = inlined_call_operand.vmem [shape: bf16[2,8,16], index: 3, kind: input, shape index: {}]   ;;  %s6035_s4 = inlined_call_operand.vmem [shape: f32[2,1,16], index: 4, kind: input, shape index: {}]   ;;  %s6036_s5 = inlined_call_operand.vmem [shape: f32[512,48], index: 5, kind: output, shape index: {}]  }
   0x1   :  { %s3506_s20 = smov 0  }
   0x2 LB: > { %s2942_s21 = sadd.s32 4294967295, %s3468_s20   ;;  %s3519_s22 = sadd.s32 1, %s3468_s20   ;;  %s3468_s20 = sphi %s3506_s20, %s6238_s20   ;;  %s3464_s19 = sphi %s3504_s19, %s6237_s19   ;;  %s3460_s18 = sphi %s3502_s18, %s6236_s18  }
   0x3   : > { %s19_s23 = ssub.s32 %s3468_s20, %s3519_s22  ;;  %s22_s24 = sadd.s32 1, %s3464_s19 }
   0x4   : > { %p20_p0 = scmp.eq.s32.totalorder %s19_s23, 0  ;;  %p29_p1 = scmp.ne.s32.totalorder %s3464_s19, %s3460_s18 }
   0x5   : > { %p30_p2 = scmp.eq.s32.totalorder %s3468_s20, 0  ;;  %p2945_p4 = scmp.ge.s32.totalorder %s3468_s20, 2 }
   0x6   : > { %s3528_s25 = scalar_select %p20_p0, %s3464_s19, %s22_s24  }
   0x7   : > { %p31_p3 = por %p30_p2, %p29_p1  ;;  %177 = sbr.rel (%p2945_p4) target bundleno = 80 (0x50), region = 32 }
   0xc   : > { %180 = sbr.rel (!%p31_p3) target bundleno = 80 (0x50), region = 36  ;;  %s182_s26 = sand.u32 (%p31_p3), 1, %s3464_s19  }
   0xd   : > { %s3023_s27 = sshll.u32 (%p31_p3), %s3468_s20, 8  ;;  %s2946_s28 = sshll.u32 (%p31_p3), %s182_s26, 9 }
   0xe   : > { %s3536_s6 = scalar_lea.vmem (%p31_p3), %s6031_s0, %s3023_s27  ;;  %s3541_s7 = scalar_lea.vmem (%p31_p3), [#allocation2], %s2946_s28 }
   0xf   : > { %v342_v0 = vld [vmem:[%s3536_s6] sm:$0xff] (%p31_p3)  ;;  %v344_v1 = vld [vmem:[%s3536_s6 + $0x8] sm:$0xff] (%p31_p3)  ;;  %v346_v2 = vld [vmem:[%s3536_s6 + $0x10] sm:$0xff] (%p31_p3) }
  0x10   : > { %343 = vst [vmem:[%s3541_s7] sm:$0xff] (%p31_p3), %v342_v0  ;;  %v348_v3 = vld [vmem:[%s3536_s6 + $0x18] sm:$0xff] (%p31_p3)  ;;  %v350_v4 = vld [vmem:[%s3536_s6 + $0x20] sm:$0xff] (%p31_p3)  ;;  %v352_v5 = vld [vmem:[%s3536_s6 + $0x28] sm:$0xff] (%p31_p3) }
  0x11   : > { %345 = vst [vmem:[%s3541_s7 + $0x8] sm:$0xff] %v344_v1  ;;  %v354_v6 = vld [vmem:[%s3536_s6 + $0x30] sm:$0xff]  ;;  %v356_v7 = vld [vmem:[%s3536_s6 + $0x38] sm:$0xff]  ;;  %v358_v8 = vld [vmem:[%s3536_s6 + $0x40] sm:$0xff] }
  0x12   : > { %347 = vst [vmem:[%s3541_s7 + $0x10] sm:$0xff] %v346_v2  ;;  %v360_v9 = vld [vmem:[%s3536_s6 + $0x48] sm:$0xff]  ;;  %v362_v10 = vld [vmem:[%s3536_s6 + $0x50] sm:$0xff]  ;;  %v364_v11 = vld [vmem:[%s3536_s6 + $0x58] sm:$0xff] }
  0x13   : > { %349 = vst [vmem:[%s3541_s7 + $0x18] sm:$0xff] %v348_v3  ;;  %v366_v12 = vld [vmem:[%s3536_s6 + $0x60] sm:$0xff]  ;;  %v368_v13 = vld [vmem:[%s3536_s6 + $0x68] sm:$0xff]  ;;  %v370_v14 = vld [vmem:[%s3536_s6 + $0x70] sm:$0xff] }
  0x14   : > { %351 = vst [vmem:[%s3541_s7 + $0x20] sm:$0xff] %v350_v4  ;;  %v372_v15 = vld [vmem:[%s3536_s6 + $0x78] sm:$0xff]  ;;  %v374_v16 = vld [vmem:[%s3536_s6 + $0x80] sm:$0xff]  ;;  %v376_v17 = vld [vmem:[%s3536_s6 + $0x88] sm:$0xff] }
  0x15   : > { %353 = vst [vmem:[%s3541_s7 + $0x28] sm:$0xff] %v352_v5  ;;  %v378_v18 = vld [vmem:[%s3536_s6 + $0x90] sm:$0xff]  ;;  %v380_v19 = vld [vmem:[%s3536_s6 + $0x98] sm:$0xff]  ;;  %v382_v20 = vld [vmem:[%s3536_s6 + $0xa0] sm:$0xff] }
  0x16   : > { %355 = vst [vmem:[%s3541_s7 + $0x30] sm:$0xff] %v354_v6  ;;  %v384_v21 = vld [vmem:[%s3536_s6 + $0xa8] sm:$0xff]  ;;  %v386_v22 = vld [vmem:[%s3536_s6 + $0xb0] sm:$0xff]  ;;  %v388_v23 = vld [vmem:[%s3536_s6 + $0xb8] sm:$0xff] }
  0x17   : > { %357 = vst [vmem:[%s3541_s7 + $0x38] sm:$0xff] %v356_v7  ;;  %v390_v24 = vld [vmem:[%s3536_s6 + $0xc0] sm:$0xff]  ;;  %v392_v25 = vld [vmem:[%s3536_s6 + $0xc8] sm:$0xff]  ;;  %v394_v26 = vld [vmem:[%s3536_s6 + $0xd0] sm:$0xff] }
  0x18   : > { %359 = vst [vmem:[%s3541_s7 + $0x40] sm:$0xff] %v358_v8  ;;  %v396_v27 = vld [vmem:[%s3536_s6 + $0xd8] sm:$0xff]  ;;  %v398_v28 = vld [vmem:[%s3536_s6 + $0xe0] sm:$0xff]  ;;  %v400_v29 = vld [vmem:[%s3536_s6 + $0xe8] sm:$0xff] }
  0x19   : > { %361 = vst [vmem:[%s3541_s7 + $0x48] sm:$0xff] %v360_v9  ;;  %v402_v30 = vld [vmem:[%s3536_s6 + $0xf0] sm:$0xff]  ;;  %v404_v31 = vld [vmem:[%s3536_s6 + $0xf8] sm:$0xff]  ;;  %v406_v32 = vld [vmem:[%s3536_s6 + $0x200] sm:$0xff] }
  0x1a   : > { %363 = vst [vmem:[%s3541_s7 + $0x50] sm:$0xff] %v362_v10  ;;  %v408_v33 = vld [vmem:[%s3536_s6 + $0x208] sm:$0xff]  ;;  %v410_v34 = vld [vmem:[%s3536_s6 + $0x210] sm:$0xff]  ;;  %v412_v35 = vld [vmem:[%s3536_s6 + $0x218] sm:$0xff] }
  0x1b   : > { %365 = vst [vmem:[%s3541_s7 + $0x58] sm:$0xff] %v364_v11  ;;  %v414_v36 = vld [vmem:[%s3536_s6 + $0x220] sm:$0xff]  ;;  %v416_v37 = vld [vmem:[%s3536_s6 + $0x228] sm:$0xff]  ;;  %v418_v38 = vld [vmem:[%s3536_s6 + $0x230] sm:$0xff] }
  0x1c   : > { %367 = vst [vmem:[%s3541_s7 + $0x60] sm:$0xff] %v366_v12  ;;  %v420_v39 = vld [vmem:[%s3536_s6 + $0x238] sm:$0xff]  ;;  %v422_v40 = vld [vmem:[%s3536_s6 + $0x240] sm:$0xff]  ;;  %v424_v41 = vld [vmem:[%s3536_s6 + $0x248] sm:$0xff] }
  0x1d   : > { %369 = vst [vmem:[%s3541_s7 + $0x68] sm:$0xff] %v368_v13  ;;  %v426_v42 = vld [vmem:[%s3536_s6 + $0x250] sm:$0xff]  ;;  %v428_v43 = vld [vmem:[%s3536_s6 + $0x258] sm:$0xff]  ;;  %v430_v44 = vld [vmem:[%s3536_s6 + $0x260] sm:$0xff] }
  0x1e   : > { %371 = vst [vmem:[%s3541_s7 + $0x70] sm:$0xff] %v370_v14  ;;  %v432_v45 = vld [vmem:[%s3536_s6 + $0x268] sm:$0xff]  ;;  %v434_v46 = vld [vmem:[%s3536_s6 + $0x270] sm:$0xff]  ;;  %v436_v47 = vld [vmem:[%s3536_s6 + $0x278] sm:$0xff] }
  0x1f   : > { %373 = vst [vmem:[%s3541_s7 + $0x78] sm:$0xff] %v372_v15  ;;  %v438_v48 = vld [vmem:[%s3536_s6 + $0x280] sm:$0xff]  ;;  %v440_v49 = vld [vmem:[%s3536_s6 + $0x288] sm:$0xff]  ;;  %v442_v50 = vld [vmem:[%s3536_s6 + $0x290] sm:$0xff] }
  0x20   : > { %375 = vst [vmem:[%s3541_s7 + $0x80] sm:$0xff] %v374_v16  ;;  %v444_v51 = vld [vmem:[%s3536_s6 + $0x298] sm:$0xff]  ;;  %v446_v52 = vld [vmem:[%s3536_s6 + $0x2a0] sm:$0xff]  ;;  %v448_v53 = vld [vmem:[%s3536_s6 + $0x2a8] sm:$0xff] }
  0x21   : > { %377 = vst [vmem:[%s3541_s7 + $0x88] sm:$0xff] %v376_v17  ;;  %v450_v54 = vld [vmem:[%s3536_s6 + $0x2b0] sm:$0xff]  ;;  %v452_v55 = vld [vmem:[%s3536_s6 + $0x2b8] sm:$0xff]  ;;  %v454_v56 = vld [vmem:[%s3536_s6 + $0x2c0] sm:$0xff] }
  0x22   : > { %379 = vst [vmem:[%s3541_s7 + $0x90] sm:$0xff] %v378_v18  ;;  %v456_v57 = vld [vmem:[%s3536_s6 + $0x2c8] sm:$0xff]  ;;  %v458_v58 = vld [vmem:[%s3536_s6 + $0x2d0] sm:$0xff]  ;;  %v460_v59 = vld [vmem:[%s3536_s6 + $0x2d8] sm:$0xff] }
  0x23   : > { %381 = vst [vmem:[%s3541_s7 + $0x98] sm:$0xff] %v380_v19  ;;  %v462_v60 = vld [vmem:[%s3536_s6 + $0x2e0] sm:$0xff]  ;;  %v464_v61 = vld [vmem:[%s3536_s6 + $0x2e8] sm:$0xff]  ;;  %v466_v62 = vld [vmem:[%s3536_s6 + $0x2f0] sm:$0xff] }
  0x24   : > { %383 = vst [vmem:[%s3541_s7 + $0xa0] sm:$0xff] %v382_v20  ;;  %v468_v63 = vld [vmem:[%s3536_s6 + $0x2f8] sm:$0xff] }
  0x25   : > { %385 = vst [vmem:[%s3541_s7 + $0xa8] sm:$0xff] %v384_v21 }
  0x26   : > { %387 = vst [vmem:[%s3541_s7 + $0xb0] sm:$0xff] %v386_v22 }
  0x27   : > { %389 = vst [vmem:[%s3541_s7 + $0xb8] sm:$0xff] %v388_v23 }
  0x28   : > { %391 = vst [vmem:[%s3541_s7 + $0xc0] sm:$0xff] %v390_v24 }
  0x29   : > { %393 = vst [vmem:[%s3541_s7 + $0xc8] sm:$0xff] %v392_v25 }
  0x2a   : > { %395 = vst [vmem:[%s3541_s7 + $0xd0] sm:$0xff] %v394_v26 }
  0x2b   : > { %397 = vst [vmem:[%s3541_s7 + $0xd8] sm:$0xff] %v396_v27 }
  0x2c   : > { %399 = vst [vmem:[%s3541_s7 + $0xe0] sm:$0xff] %v398_v28 }
  0x2d   : > { %401 = vst [vmem:[%s3541_s7 + $0xe8] sm:$0xff] %v400_v29 }
  0x2e   : > { %403 = vst [vmem:[%s3541_s7 + $0xf0] sm:$0xff] %v402_v30 }
  0x2f   : > { %405 = vst [vmem:[%s3541_s7 + $0xf8] sm:$0xff] %v404_v31 }
  0x30   : > { %407 = vst [vmem:[%s3541_s7 + $0x100] sm:$0xff] %v406_v32 }
  0x31   : > { %409 = vst [vmem:[%s3541_s7 + $0x108] sm:$0xff] %v408_v33 }
  0x32   : > { %411 = vst [vmem:[%s3541_s7 + $0x110] sm:$0xff] %v410_v34 }
  0x33   : > { %413 = vst [vmem:[%s3541_s7 + $0x118] sm:$0xff] %v412_v35 }
  0x34   : > { %415 = vst [vmem:[%s3541_s7 + $0x120] sm:$0xff] %v414_v36 }
  0x35   : > { %417 = vst [vmem:[%s3541_s7 + $0x128] sm:$0xff] %v416_v37 }
  0x36   : > { %419 = vst [vmem:[%s3541_s7 + $0x130] sm:$0xff] %v418_v38 }
  0x37   : > { %421 = vst [vmem:[%s3541_s7 + $0x138] sm:$0xff] %v420_v39 }
  0x38   : > { %423 = vst [vmem:[%s3541_s7 + $0x140] sm:$0xff] %v422_v40 }
  0x39   : > { %425 = vst [vmem:[%s3541_s7 + $0x148] sm:$0xff] %v424_v41 }
  0x3a   : > { %427 = vst [vmem:[%s3541_s7 + $0x150] sm:$0xff] %v426_v42 }
  0x3b   : > { %429 = vst [vmem:[%s3541_s7 + $0x158] sm:$0xff] %v428_v43 }
  0x3c   : > { %431 = vst [vmem:[%s3541_s7 + $0x160] sm:$0xff] %v430_v44 }
  0x3d   : > { %433 = vst [vmem:[%s3541_s7 + $0x168] sm:$0xff] %v432_v45 }
  0x3e   : > { %435 = vst [vmem:[%s3541_s7 + $0x170] sm:$0xff] %v434_v46 }
  0x3f   : > { %437 = vst [vmem:[%s3541_s7 + $0x178] sm:$0xff] %v436_v47 }
  0x40   : > { %439 = vst [vmem:[%s3541_s7 + $0x180] sm:$0xff] %v438_v48 }
  0x41   : > { %441 = vst [vmem:[%s3541_s7 + $0x188] sm:$0xff] %v440_v49 }
  0x42   : > { %443 = vst [vmem:[%s3541_s7 + $0x190] sm:$0xff] %v442_v50 }
  0x43   : > { %445 = vst [vmem:[%s3541_s7 + $0x198] sm:$0xff] %v444_v51 }
  0x44   : > { %447 = vst [vmem:[%s3541_s7 + $0x1a0] sm:$0xff] %v446_v52 }
  0x45   : > { %449 = vst [vmem:[%s3541_s7 + $0x1a8] sm:$0xff] %v448_v53 }
  0x46   : > { %451 = vst [vmem:[%s3541_s7 + $0x1b0] sm:$0xff] %v450_v54 }
  0x47   : > { %453 = vst [vmem:[%s3541_s7 + $0x1b8] sm:$0xff] %v452_v55 }
  0x48   : > { %455 = vst [vmem:[%s3541_s7 + $0x1c0] sm:$0xff] %v454_v56 }
  0x49   : > { %457 = vst [vmem:[%s3541_s7 + $0x1c8] sm:$0xff] %v456_v57 }
  0x4a   : > { %459 = vst [vmem:[%s3541_s7 + $0x1d0] sm:$0xff] %v458_v58 }
  0x4b   : > { %461 = vst [vmem:[%s3541_s7 + $0x1d8] sm:$0xff] %v460_v59 }
  0x4c   : > { %463 = vst [vmem:[%s3541_s7 + $0x1e0] sm:$0xff] %v462_v60 }
  0x4d   : > { %465 = vst [vmem:[%s3541_s7 + $0x1e8] sm:$0xff] %v464_v61 }
  0x4e   : > { %467 = vst [vmem:[%s3541_s7 + $0x1f0] sm:$0xff] %v466_v62 }
  0x4f   : > { %469 = vst [vmem:[%s3541_s7 + $0x1f8] sm:$0xff] %v468_v63 }
  0x50 PF: > { %p2949_p5 = scmp.ge.s32.totalorder %s3468_s20, 1  ;;  %p474_p6 = scmp.lt.s32.totalorder %s3468_s20, 3 }
  0x52   : > { %p475_p7 = pnand %p2949_p5, %p474_p6 }
  0x54   : > { %478 = sbr.rel (%p475_p7) target bundleno = 713 (0x2c9), region = 74 }
  0x59   : > { %v807_v0 = vld [vmem:[%s6034_s3] sm:$0xf]  ;;  %vm861_vm0 = vcmask 1043456   ;;  %v3003_v1 = vld [vmem:[%s6034_s3 + $0x4] sm:$0xf]  ;;  %s481_s12 = sand.u32 1, %s3460_s18  }
  0x5a   : > { %v863_v2 = vsel %vm861_vm0, %v807_v0, 0  ;;  %v1026_v3 = vsel %vm861_vm0, %v3003_v1, 0  ;;  %s2950_s13 = sshll.u32 %s481_s12, 9  ;;  %v3680_v4 = vld [vmem:[%s6032_s1] ss:$0 sm:$0xff]  ;;  %vm812_vm1 = vcmask 64512  }
  0x5b   : > { %872 = vmatpush.bf16.msra.mxu0 %v863_v2  ;;  %3024 = vmatpush.bf16.msra.mxu2 %v863_v2  ;;  %s3682_s16 = scalar_lea.vmem [#allocation2], %s2950_s13  ;;  %v3689_v7 = vld [vmem:[%s6033_s2] ss:$0 sm:$0xff]  ;;  %v3702_v16 = vld [vmem:[%s6032_s1 + $0x1] ss:$0 sm:$0xff]  ;;  %s3470_s7 = smov 16  }
  0x5c   : > { %1035 = vmatpush.bf16.msra.mxu1 %v1026_v3  ;;  %3025 = vmatpush.bf16.msra.mxu3 %v1026_v3  ;;  %v516_v5 = vld [vmem:[%s3682_s16] sm:$0xff]  ;;  %v517_v6 = vld [vmem:[%s3682_s16 + $0x8] sm:$0xff]  ;;  %v518_v34 = vld [vmem:[%s3682_s16 + $0x10] sm:$0xff]  ;;  %s3471_s8 = smov 32   ;;  %s5302_s17 = sshll.u32 %s2942_s21, 5 }
  0x5d   : > { %v552_v8 = vmul.f32 %v3680_v4, %v516_v5  ;;  %v553_v9 = vmul.f32 %v3680_v4, %v517_v6  ;;  %v532_v10 = vld [vmem:[%s3682_s16 + $0x80] sm:$0xff]  ;;  %v533_v11 = vld [vmem:[%s3682_s16 + $0x88] sm:$0xff]  ;;  %v519_v35 = vld [vmem:[%s3682_s16 + $0x18] sm:$0xff]  ;;  %v554_v46 = vmul.f32 %v3680_v4, %v518_v34  ;;  %p510_p8 = scmp.lt.s32.totalorder %s5302_s17, 63 }
  0x5e   : > { %v2953_v12 = vld [vmem:[%s3682_s16 + $0x100] sm:$0xff]  ;;  %v568_v13 = vmul.f32 %v3680_v4, %v532_v10  ;;  %v569_v14 = vmul.f32 %v3680_v4, %v533_v11  ;;  %v2954_v15 = vld [vmem:[%s3682_s16 + $0x108] sm:$0xff]  ;;  %v534_v39 = vld [vmem:[%s3682_s16 + $0x90] sm:$0xff]  ;;  %v555_v47 = vmul.f32 %v3680_v4, %v519_v35 }
  0x5f   : > { %v588_v17 = vadd.f32 %v3689_v7, %v552_v8  ;;  %v589_v18 = vadd.f32 %v3689_v7, %v553_v9  ;;  %v3709_v19 = vld [vmem:[%s6033_s2 + $0x1] ss:$0 sm:$0xff]  ;;  %v690_v23 = vmul.f32 %v3702_v16, %v2953_v12  ;;  %v691_v24 = vmul.f32 %v3702_v16, %v2954_v15  ;;  %v2970_v25 = vld [vmem:[%s3682_s16 + $0x188] sm:$0xff]  ;;  %v535_v40 = vld [vmem:[%s3682_s16 + $0x98] sm:$0xff]  ;;  %s6240_s17 = smov (!%p510_p8, %s5302_s17), 63 }
  0x60   : > { %v2969_v20 = vld [vmem:[%s3682_s16 + $0x180] sm:$0xff]  ;;  %v604_v21 = vadd.f32 %v3689_v7, %v568_v13  ;;  %v605_v22 = vadd.f32 %v3689_v7, %v569_v14  ;;  %v707_v29 = vmul.f32 %v3702_v16, %v2970_v25  ;;  %v2955_v48 = vld [vmem:[%s3682_s16 + $0x110] sm:$0xff]  ;;  %v2956_v49 = vld [vmem:[%s3682_s16 + $0x118] sm:$0xff]  ;;  %v570_v51 = vmul.f32 %v3680_v4, %v534_v39  ;;  %s2952_s20 = sshll.u32 %s6240_s17, 3 }
  0x61   : > { %v620_v26 = vmax.f32 %v588_v17, 0.0  ;;  %v621_v27 = vmax.f32 %v589_v18, 0.0  ;;  %v706_v28 = vmul.f32 %v3702_v16, %v2969_v20  ;;  %v727_v32 = vadd.f32 %v3709_v19, %v690_v23  ;;  %v2971_v53 = vld [vmem:[%s3682_s16 + $0x190] sm:$0xff]  ;;  %v2972_v54 = vld [vmem:[%s3682_s16 + $0x198] sm:$0xff]  ;;  %v520_v17 = vld [vmem:[%s3682_s16 + $0x20] sm:$0xff]  ;;  %s5417_s23 = scalar_lea.vmem %s6036_s5, %s2952_s20 }
  0x62   : > { %v636_v30 = vmax.f32 %v604_v21, 0.0  ;;  %v637_v31 = vmax.f32 %v605_v22, 0.0  ;;  %v728_v33 = vadd.f32 %v3709_v19, %v691_v24  ;;  %v744_v38 = vadd.f32 %v3709_v19, %v707_v29  ;;  %v521_v18 = vld [vmem:[%s3682_s16 + $0x28] sm:$0xff]  ;;  %v536_v20 = vld [vmem:[%s3682_s16 + $0xa0] sm:$0xff] }
  0x63   : > { %v791_v36 = vpack.c.bf16 %v621_v27, %v620_v26  ;;  %v743_v37 = vadd.f32 %v3709_v19, %v706_v28  ;;  %v759_v42 = vmax.f32 %v727_v32, 0.0  ;;  %v571_v52 = vmul.f32 %v3680_v4, %v535_v40  ;;  %v537_v21 = vld [vmem:[%s3682_s16 + $0xa8] sm:$0xff]  ;;  %v2957_v26 = vld [vmem:[%s3682_s16 + $0x120] sm:$0xff] }
  0x64   : > { %v799_v41 = vpack.c.bf16 %v637_v31, %v636_v30  ;;  %v760_v43 = vmax.f32 %v728_v33, 0.0  ;;  %v776_v45 = vmax.f32 %v744_v38, 0.0  ;;  %v692_v56 = vmul.f32 %v3702_v16, %v2955_v48  ;;  %v2958_v27 = vld [vmem:[%s3682_s16 + $0x128] sm:$0xff]  ;;  %v2973_v30 = vld [vmem:[%s3682_s16 + $0x1a0] sm:$0xff] }
  0x65   : > { %2987 = vmatmul.msk.bf16.vlgmr.msra.gmra.mxu0 %vm812_vm1, %v791_v36  ;;  %v775_v44 = vmax.f32 %v743_v37, 0.0  ;;  %v693_v57 = vmul.f32 %v3702_v16, %v2956_v49  ;;  %v590_v58 = vadd.f32 %v3689_v7, %v554_v46  ;;  %v591_v59 = vadd.f32 %v3689_v7, %v555_v47  ;;  %v2974_v31 = vld [vmem:[%s3682_s16 + $0x1a8] sm:$0xff] }
  0x66   : > { %2995 = vmatmul.msk.bf16.vlgmr.msra.gmra.mxu2 %vm812_vm1, %v799_v41  ;;  %v954_v50 = vpack.c.bf16 %v760_v43, %v759_v42  ;;  %v708_v60 = vmul.f32 %v3702_v16, %v2971_v53  ;;  %v709_v61 = vmul.f32 %v3702_v16, %v2972_v54  ;;  %v606_v62 = vadd.f32 %v3689_v7, %v570_v51  ;;  %v522_v54 = vld [vmem:[%s3682_s16 + $0x30] sm:$0xff] }
  0x67   : > { %v962_v55 = vpack.c.bf16 %v776_v45, %v775_v44  ;;  %v607_v63 = vadd.f32 %v3689_v7, %v571_v52  ;;  %v729_v0 = vadd.f32 %v3709_v19, %v692_v56  ;;  %v730_v1 = vadd.f32 %v3709_v19, %v693_v57  ;;  %v538_v56 = vld [vmem:[%s3682_s16 + $0xb0] sm:$0xff]  ;;  %v539_v57 = vld [vmem:[%s3682_s16 + $0xb8] sm:$0xff] }
  0x68   : > { %3005 = vmatmul.msk.bf16.vlgmr.msra.gmra.mxu1 %vm812_vm1, %v954_v50  ;;  %v622_v2 = vmax.f32 %v590_v58, 0.0  ;;  %v623_v3 = vmax.f32 %v591_v59, 0.0  ;;  %v745_v5 = vadd.f32 %v3709_v19, %v708_v60  ;;  %v746_v6 = vadd.f32 %v3709_v19, %v709_v61 }
  0x69   : > { %3013 = vmatmul.msk.bf16.vlgmr.msra.gmra.mxu3 %vm812_vm1, %v962_v55  ;;  %v638_v8 = vmax.f32 %v606_v62, 0.0  ;;  %v639_v9 = vmax.f32 %v607_v63, 0.0  ;;  %v761_v10 = vmax.f32 %v729_v0, 0.0  ;;  %v762_v11 = vmax.f32 %v730_v1, 0.0  ;;  %v523_v55 = vld [vmem:[%s3682_s16 + $0x38] sm:$0xff]  ;;  %v2959_v62 = vld [vmem:[%s3682_s16 + $0x130] sm:$0xff] }
  0x6a   : > { %v792_v12 = vpack.c.bf16 %v623_v3, %v622_v2  ;;  %v777_v13 = vmax.f32 %v745_v5, 0.0  ;;  %v778_v14 = vmax.f32 %v746_v6, 0.0  ;;  %v556_v24 = vmul.f32 %v3680_v4, %v520_v17  ;;  %v2960_v63 = vld [vmem:[%s3682_s16 + $0x138] sm:$0xff]  ;;  %v2975_v2 = vld [vmem:[%s3682_s16 + $0x1b0] sm:$0xff] }
  0x6b   : > { %v800_v15 = vpack.c.bf16 %v639_v9, %v638_v8  ;;  %v955_v22 = vpack.c.bf16 %v762_v11, %v761_v10  ;;  %v557_v25 = vmul.f32 %v3680_v4, %v521_v18  ;;  %v572_v28 = vmul.f32 %v3680_v4, %v536_v20  ;;  %v2976_v3 = vld [vmem:[%s3682_s16 + $0x1b8] sm:$0xff] }
  0x6c   : > { %v963_v23 = vpack.c.bf16 %v778_v14, %v777_v13  ;;  %v573_v29 = vmul.f32 %v3680_v4, %v537_v21  ;;  %v694_v32 = vmul.f32 %v3702_v16, %v2957_v26  ;;  %v695_v33 = vmul.f32 %v3702_v16, %v2958_v27 }
  0x6d   : > { %v592_v34 = vadd.f32 %v3689_v7, %v556_v24  ;;  %v593_v35 = vadd.f32 %v3689_v7, %v557_v25  ;;  %v710_v36 = vmul.f32 %v3702_v16, %v2973_v30  ;;  %v711_v37 = vmul.f32 %v3702_v16, %v2974_v31  ;;  %v524_v30 = vld [vmem:[%s3682_s16 + $0x40] sm:$0xff]  ;;  %v525_v31 = vld [vmem:[%s3682_s16 + $0x48] sm:$0xff] }
  0x6e   : > { %v608_v38 = vadd.f32 %v3689_v7, %v572_v28  ;;  %v609_v39 = vadd.f32 %v3689_v7, %v573_v29  ;;  %v731_v40 = vadd.f32 %v3709_v19, %v694_v32  ;;  %v732_v41 = vadd.f32 %v3709_v19, %v695_v33  ;;  %v540_v32 = vld [vmem:[%s3682_s16 + $0xc0] sm:$0xff]  ;;  %v541_v33 = vld [vmem:[%s3682_s16 + $0xc8] sm:$0xff] }
  0x6f   : > { %v624_v42 = vmax.f32 %v592_v34, 0.0  ;;  %v625_v43 = vmax.f32 %v593_v35, 0.0  ;;  %v747_v44 = vadd.f32 %v3709_v19, %v710_v36  ;;  %v748_v45 = vadd.f32 %v3709_v19, %v711_v37 }
  0x70   : > { %v640_v46 = vmax.f32 %v608_v38, 0.0  ;;  %v641_v47 = vmax.f32 %v609_v39, 0.0  ;;  %v763_v48 = vmax.f32 %v731_v40, 0.0  ;;  %v764_v49 = vmax.f32 %v732_v41, 0.0  ;;  %v2961_v38 = vld [vmem:[%s3682_s16 + $0x140] sm:$0xff]  ;;  %v2962_v39 = vld [vmem:[%s3682_s16 + $0x148] sm:$0xff] }
  0x71   : > { %v793_v50 = vpack.c.bf16 %v625_v43, %v624_v42  ;;  %v779_v51 = vmax.f32 %v747_v44, 0.0  ;;  %v780_v52 = vmax.f32 %v748_v45, 0.0  ;;  %v558_v60 = vmul.f32 %v3680_v4, %v522_v54  ;;  %v2977_v42 = vld [vmem:[%s3682_s16 + $0x1c0] sm:$0xff]  ;;  %v2978_v43 = vld [vmem:[%s3682_s16 + $0x1c8] sm:$0xff] }
  0x72   : > { %v801_v53 = vpack.c.bf16 %v641_v47, %v640_v46  ;;  %v956_v58 = vpack.c.bf16 %v764_v49, %v763_v48  ;;  %v559_v61 = vmul.f32 %v3680_v4, %v523_v55  ;;  %v574_v0 = vmul.f32 %v3680_v4, %v538_v56 }
  0x73   : > { %v964_v59 = vpack.c.bf16 %v780_v52, %v779_v51  ;;  %v575_v1 = vmul.f32 %v3680_v4, %v539_v57  ;;  %v696_v5 = vmul.f32 %v3702_v16, %v2959_v62  ;;  %v697_v6 = vmul.f32 %v3702_v16, %v2960_v63 }
  0x74   : > { %v594_v8 = vadd.f32 %v3689_v7, %v558_v60  ;;  %v595_v9 = vadd.f32 %v3689_v7, %v559_v61  ;;  %v712_v10 = vmul.f32 %v3702_v16, %v2975_v2  ;;  %v713_v11 = vmul.f32 %v3702_v16, %v2976_v3  ;;  %v526_v2 = vld [vmem:[%s3682_s16 + $0x50] sm:$0xff]  ;;  %v527_v3 = vld [vmem:[%s3682_s16 + $0x58] sm:$0xff] }
  0x75   : > { %2988 = vmatmul.msk.bf16.gmra.mxu0 %vm812_vm1, %v792_v12  ;;  %v610_v12 = vadd.f32 %v3689_v7, %v574_v0  ;;  %v611_v13 = vadd.f32 %v3689_v7, %v575_v1  ;;  %v733_v14 = vadd.f32 %v3709_v19, %v696_v5  ;;  %v560_v36 = vmul.f32 %v3680_v4, %v524_v30  ;;  %v542_v5 = vld [vmem:[%s3682_s16 + $0xd0] sm:$0xff] }
  0x76   : > { %2996 = vmatmul.msk.bf16.gmra.mxu2 %vm812_vm1, %v800_v15  ;;  %v734_v15 = vadd.f32 %v3709_v19, %v697_v6  ;;  %v626_v17 = vmax.f32 %v594_v8, 0.0  ;;  %v627_v18 = vmax.f32 %v595_v9, 0.0  ;;  %v749_v20 = vadd.f32 %v3709_v19, %v712_v10  ;;  %v543_v6 = vld [vmem:[%s3682_s16 + $0xd8] sm:$0xff] }
  0x77   : > { %v750_v21 = vadd.f32 %v3709_v19, %v713_v11  ;;  %v765_v24 = vmax.f32 %v733_v14, 0.0  ;;  %v561_v37 = vmul.f32 %v3680_v4, %v525_v31  ;;  %v576_v40 = vmul.f32 %v3680_v4, %v540_v32 }
  0x78   : > { %3006 = vmatmul.msk.bf16.gmra.mxu1 %vm812_vm1, %v955_v22  ;;  %v642_v22 = vmax.f32 %v610_v12, 0.0  ;;  %v766_v25 = vmax.f32 %v734_v15, 0.0  ;;  %v794_v26 = vpack.c.bf16 %v627_v18, %v626_v17  ;;  %v781_v27 = vmax.f32 %v749_v20, 0.0  ;;  %v2963_v12 = vld [vmem:[%s3682_s16 + $0x150] sm:$0xff]  ;;  %v2980_v18 = vld [vmem:[%s3682_s16 + $0x1d8] sm:$0xff] }
  0x79   : > { %3014 = vmatmul.msk.bf16.gmra.mxu3 %vm812_vm1, %v963_v23  ;;  %v643_v23 = vmax.f32 %v611_v13, 0.0  ;;  %v782_v28 = vmax.f32 %v750_v21, 0.0  ;;  %v577_v41 = vmul.f32 %v3680_v4, %v541_v33  ;;  %v698_v44 = vmul.f32 %v3702_v16, %v2961_v38  ;;  %v2964_v13 = vld [vmem:[%s3682_s16 + $0x158] sm:$0xff]  ;;  %v2979_v17 = vld [vmem:[%s3682_s16 + $0x1d0] sm:$0xff] }
  0x7a   : > { %v957_v34 = vpack.c.bf16 %v766_v25, %v765_v24  ;;  %v699_v45 = vmul.f32 %v3702_v16, %v2962_v39  ;;  %v596_v46 = vadd.f32 %v3689_v7, %v560_v36  ;;  %v597_v47 = vadd.f32 %v3689_v7, %v561_v37 }
  0x7b   : > { %v802_v29 = vpack.c.bf16 %v643_v23, %v642_v22  ;;  %v965_v35 = vpack.c.bf16 %v782_v28, %v781_v27  ;;  %v714_v48 = vmul.f32 %v3702_v16, %v2977_v42  ;;  %v715_v49 = vmul.f32 %v3702_v16, %v2978_v43  ;;  %v528_v42 = vld [vmem:[%s3682_s16 + $0x60] sm:$0xff]  ;;  %v529_v43 = vld [vmem:[%s3682_s16 + $0x68] sm:$0xff] }
  0x7c   : > { %v613_v51 = vadd.f32 %v3689_v7, %v577_v41  ;;  %v735_v52 = vadd.f32 %v3709_v19, %v698_v44  ;;  %v628_v54 = vmax.f32 %v596_v46, 0.0  ;;  %v629_v55 = vmax.f32 %v597_v47, 0.0  ;;  %v544_v44 = vld [vmem:[%s3682_s16 + $0xe0] sm:$0xff] }
  0x7d   : > { %v751_v56 = vadd.f32 %v3709_v19, %v714_v48  ;;  %v752_v57 = vadd.f32 %v3709_v19, %v715_v49  ;;  %v562_v10 = vmul.f32 %v3680_v4, %v526_v2  ;;  %v563_v11 = vmul.f32 %v3680_v4, %v527_v3 }
  0x7e   : > { %v767_v60 = vmax.f32 %v735_v52, 0.0  ;;  %v795_v62 = vpack.c.bf16 %v629_v55, %v628_v54  ;;  %v578_v14 = vmul.f32 %v3680_v4, %v542_v5  ;;  %v579_v15 = vmul.f32 %v3680_v4, %v543_v6  ;;  %v2981_v54 = vld [vmem:[%s3682_s16 + $0x1e0] sm:$0xff]  ;;  %v2982_v55 = vld [vmem:[%s3682_s16 + $0x1e8] sm:$0xff] }
  0x7f   : > { %v783_v63 = vmax.f32 %v751_v56, 0.0  ;;  %v784_v0 = vmax.f32 %v752_v57, 0.0  ;;  %v700_v20 = vmul.f32 %v3702_v16, %v2963_v12  ;;  %v701_v21 = vmul.f32 %v3702_v16, %v2964_v13 }
  0x80   : > { %v716_v22 = vmul.f32 %v3702_v16, %v2979_v17  ;;  %v717_v23 = vmul.f32 %v3702_v16, %v2980_v18  ;;  %v598_v24 = vadd.f32 %v3689_v7, %v562_v10  ;;  %v599_v25 = vadd.f32 %v3689_v7, %v563_v11  ;;  %v530_v17 = vld [vmem:[%s3682_s16 + $0x70] sm:$0xff]  ;;  %v531_v18 = vld [vmem:[%s3682_s16 + $0x78] sm:$0xff] }
  0x81   : > { %v966_v9 = vpack.c.bf16 %v784_v0, %v783_v63  ;;  %v615_v27 = vadd.f32 %v3689_v7, %v579_v15  ;;  %v737_v28 = vadd.f32 %v3709_v19, %v700_v20  ;;  %v564_v48 = vmul.f32 %v3680_v4, %v528_v42  ;;  %v546_v20 = vld [vmem:[%s3682_s16 + $0xf0] sm:$0xff] }
  0x82   : > { %v753_v30 = vadd.f32 %v3709_v19, %v716_v22  ;;  %v754_v31 = vadd.f32 %v3709_v19, %v717_v23  ;;  %v630_v32 = vmax.f32 %v598_v24, 0.0  ;;  %v631_v33 = vmax.f32 %v599_v25, 0.0 }
  0x83   : > { %v769_v36 = vmax.f32 %v737_v28, 0.0  ;;  %v565_v49 = vmul.f32 %v3680_v4, %v529_v43  ;;  %v580_v52 = vmul.f32 %v3680_v4, %v544_v44  ;;  %v566_v24 = vmul.f32 %v3680_v4, %v530_v17 }
  0x84   : > { %v785_v38 = vmax.f32 %v753_v30, 0.0  ;;  %v786_v39 = vmax.f32 %v754_v31, 0.0  ;;  %v567_v25 = vmul.f32 %v3680_v4, %v531_v18  ;;  %v582_v28 = vmul.f32 %v3680_v4, %v546_v20  ;;  %v2983_v30 = vld [vmem:[%s3682_s16 + $0x1f0] sm:$0xff]  ;;  %v2984_v31 = vld [vmem:[%s3682_s16 + $0x1f8] sm:$0xff] }
  0x85   : > { %2989 = vmatmul.msk.bf16.gmra.mxu0 %vm812_vm1, %v793_v50  ;;  %v612_v50 = vadd.f32 %v3689_v7, %v576_v40  ;;  %v796_v40 = vpack.c.bf16 %v631_v33, %v630_v32 }
  0x86   : > { %2997 = vmatmul.msk.bf16.gmra.mxu2 %vm812_vm1, %v801_v53  ;;  %v736_v53 = vadd.f32 %v3709_v19, %v699_v45  ;;  %v545_v45 = vld [vmem:[%s3682_s16 + $0xe8] sm:$0xff]  ;;  %v967_v47 = vpack.c.bf16 %v786_v39, %v785_v38 }
  0x88   : > { %3007 = vmatmul.msk.bf16.gmra.mxu1 %vm812_vm1, %v956_v58  ;;  %v644_v58 = vmax.f32 %v612_v50, 0.0  ;;  %v768_v61 = vmax.f32 %v736_v53, 0.0  ;;  %v2965_v50 = vld [vmem:[%s3682_s16 + $0x160] sm:$0xff]  ;;  %v581_v53 = vmul.f32 %v3680_v4, %v545_v45 }
  0x89   : > { %3015 = vmatmul.msk.bf16.gmra.mxu3 %vm812_vm1, %v964_v59  ;;  %v645_v59 = vmax.f32 %v613_v51, 0.0  ;;  %v2966_v51 = vld [vmem:[%s3682_s16 + $0x168] sm:$0xff]  ;;  %v702_v56 = vmul.f32 %v3702_v16, %v2965_v50 }
  0x8a   : > { %v958_v8 = vpack.c.bf16 %v768_v61, %v767_v60  ;;  %v703_v57 = vmul.f32 %v3702_v16, %v2966_v51  ;;  %v718_v60 = vmul.f32 %v3702_v16, %v2981_v54  ;;  %v719_v61 = vmul.f32 %v3702_v16, %v2982_v55  ;;  %v3931_v54 = vld [vmem:[%s6035_s4 + $0x1] ss:$0 sm:$0xff] }
  0x8b   : > { %v803_v1 = vpack.c.bf16 %v645_v59, %v644_v58  ;;  %v600_v58 = vadd.f32 %v3689_v7, %v564_v48  ;;  %v601_v59 = vadd.f32 %v3689_v7, %v565_v49  ;;  %v617_v63 = vadd.f32 %v3689_v7, %v581_v53 }
  0x8c   : > { %v739_v0 = vadd.f32 %v3709_v19, %v702_v56  ;;  %v755_v5 = vadd.f32 %v3709_v19, %v718_v60  ;;  %v756_v6 = vadd.f32 %v3709_v19, %v719_v61 }
  0x8d   : > { %v632_v2 = vmax.f32 %v600_v58, 0.0  ;;  %v633_v3 = vmax.f32 %v601_v59, 0.0 }
  0x8e   : > { %v771_v10 = vmax.f32 %v739_v0, 0.0  ;;  %v787_v13 = vmax.f32 %v755_v5, 0.0 }
  0x8f   : > { %v797_v12 = vpack.c.bf16 %v633_v3, %v632_v2 }
  0x95   : > { %2990 = vmatmul.msk.bf16.gmra.mxu0 %vm812_vm1, %v794_v26  ;;  %v614_v26 = vadd.f32 %v3689_v7, %v578_v14  ;;  %v788_v14 = vmax.f32 %v756_v6, 0.0 }
  0x96   : > { %2998 = vmatmul.msk.bf16.gmra.mxu2 %vm812_vm1, %v802_v29  ;;  %v738_v29 = vadd.f32 %v3709_v19, %v701_v21  ;;  %v547_v21 = vld [vmem:[%s3682_s16 + $0xf8] sm:$0xff] }
  0x97   : > { %v968_v23 = vpack.c.bf16 %v788_v14, %v787_v13 }
  0x98   : > { %3008 = vmatmul.msk.bf16.gmra.mxu1 %vm812_vm1, %v957_v34  ;;  %v646_v34 = vmax.f32 %v614_v26, 0.0  ;;  %v770_v37 = vmax.f32 %v738_v29, 0.0  ;;  %v2967_v26 = vld [vmem:[%s3682_s16 + $0x170] sm:$0xff]  ;;  %v583_v29 = vmul.f32 %v3680_v4, %v547_v21  ;;  %v618_v4 = vadd.f32 %v3689_v7, %v582_v28 }
  0x99   : > { %3016 = vmatmul.msk.bf16.gmra.mxu3 %vm812_vm1, %v965_v35  ;;  %v647_v35 = vmax.f32 %v615_v27, 0.0  ;;  %v2968_v27 = vld [vmem:[%s3682_s16 + $0x178] sm:$0xff]  ;;  %v704_v32 = vmul.f32 %v3702_v16, %v2967_v26 }
  0x9a   : > { %v959_v46 = vpack.c.bf16 %v770_v37, %v769_v36  ;;  %v705_v33 = vmul.f32 %v3702_v16, %v2968_v27  ;;  %v602_v36 = vadd.f32 %v3689_v7, %v566_v24  ;;  %v603_v37 = vadd.f32 %v3689_v7, %v567_v25 }
  0x9b   : > { %v804_v41 = vpack.c.bf16 %v647_v35, %v646_v34  ;;  %v720_v34 = vmul.f32 %v3702_v16, %v2983_v30  ;;  %v721_v35 = vmul.f32 %v3702_v16, %v2984_v31  ;;  %v619_v38 = vadd.f32 %v3689_v7, %v583_v29 }
  0x9c   : > { %v741_v39 = vadd.f32 %v3709_v19, %v704_v32  ;;  %v634_v43 = vmax.f32 %v602_v36, 0.0  ;;  %v635_v44 = vmax.f32 %v603_v37, 0.0  ;;  %v650_v45 = vmax.f32 %v618_v4, 0.0 }
  0x9d   : > { %v758_v42 = vadd.f32 %v3709_v19, %v721_v35  ;;  %v651_v16 = vmax.f32 %v619_v38, 0.0 }
  0x9e   : > { %v798_v50 = vpack.c.bf16 %v635_v44, %v634_v43 }
  0x9f   : > { %v790_v49 = vmax.f32 %v758_v42, 0.0  ;;  %v806_v51 = vpack.c.bf16 %v651_v16, %v650_v45 }
  0xa5   : > { %2991 = vmatmul.msk.bf16.gmra.mxu0 %vm812_vm1, %v795_v62  ;;  %v616_v62 = vadd.f32 %v3689_v7, %v580_v52 }
  0xa6   : > { %2999 = vmatmul.msk.bf16.gmra.mxu2 %vm812_vm1, %v803_v1  ;;  %v740_v1 = vadd.f32 %v3709_v19, %v703_v57 }
  0xa8   : > { %3009 = vmatmul.msk.bf16.gmra.mxu1 %vm812_vm1, %v958_v8  ;;  %v648_v8 = vmax.f32 %v616_v62, 0.0  ;;  %v772_v11 = vmax.f32 %v740_v1, 0.0 }
  0xa9   : > { %3017 = vmatmul.msk.bf16.gmra.mxu3 %vm812_vm1, %v966_v9  ;;  %v649_v9 = vmax.f32 %v617_v63, 0.0 }
  0xaa   : > { %v960_v22 = vpack.c.bf16 %v772_v11, %v771_v10 }
  0xab   : > { %v805_v15 = vpack.c.bf16 %v649_v9, %v648_v8 }
  0xb5   : > { %2992 = vmatmul.msk.bf16.gmra.mxu0 %vm812_vm1, %v796_v40  ;;  %v742_v40 = vadd.f32 %v3709_v19, %v705_v33 }
  0xb6   : > { %3000 = vmatmul.msk.bf16.gmra.mxu2 %vm812_vm1, %v804_v41  ;;  %v757_v41 = vadd.f32 %v3709_v19, %v720_v34  ;;  %v3926_v19 = vld [vmem:[%s6035_s4] ss:$0 sm:$0xff] }
  0xb8   : > { %3010 = vmatmul.msk.bf16.gmra.mxu1 %vm812_vm1, %v959_v46  ;;  %v773_v46 = vmax.f32 %v741_v39, 0.0  ;;  %v789_v48 = vmax.f32 %v757_v41, 0.0 }
  0xb9   : > { %3018 = vmatmul.msk.bf16.gmra.mxu3 %vm812_vm1, %v967_v47  ;;  %v774_v47 = vmax.f32 %v742_v40, 0.0 }
  0xba   : > { %v969_v7 = vpack.c.bf16 %v790_v49, %v789_v48 }
  0xbb   : > { %v961_v52 = vpack.c.bf16 %v774_v47, %v773_v46 }
  0xc5   : > { %2993 = vmatmul.msk.bf16.gmra.mxu0 %vm812_vm1, %v797_v12 }
  0xc6   : > { %3001 = vmatmul.msk.bf16.gmra.mxu2 %vm812_vm1, %v805_v15 }
  0xc8   : > { %3011 = vmatmul.msk.bf16.gmra.mxu1 %vm812_vm1, %v960_v22 }
  0xc9   : > { %3019 = vmatmul.msk.bf16.gmra.mxu3 %vm812_vm1, %v968_v23 }
  0xd5   : > { %2994 = vmatmul.msk.bf16.gmra.mxu0 %vm812_vm1, %v798_v50 }
  0xd6   : > { %3002 = vmatmul.msk.bf16.gmra.mxu2 %vm812_vm1, %v806_v51 }
  0xd8   : > { %3012 = vmatmul.msk.bf16.gmra.mxu1 %vm812_vm1, %v961_v52 }
  0xd9   : > { %3020 = vmatmul.msk.bf16.gmra.mxu3 %vm812_vm1, %v969_v7 }
  0xe2   : > { %v874_v53 = vpop.f32.mrf.mxu0 }
  0xe3   : > { %v875_v55 = vadd.f32 %v3926_v19, %v874_v53 }
  0xe5   : > { %v1117_v56 = vsub.f32 0.0, %v875_v55  ;;  %v1037_v57 = vpop.f32.mrf.mxu1 }
  0xe6   : > { %v1038_v58 = vadd.f32 %v3931_v54, %v1037_v57 }
  0xe7   : > { %v1149_v59 = vmul.f32 1.442695, %v1117_v56 }
  0xe8   : > { %v1725_v60 = vsub.f32 0.0, %v1038_v58 }
  0xe9   : > { %3058 = vpow2.f32 %v1149_v59  ;;  %v914_v61 = vpop.f32.mrf.mxu2 }
  0xea   : > { %v1757_v62 = vmul.f32 1.442695, %v1725_v60  ;;  %v915_v63 = vadd.f32 %v3926_v19, %v914_v61  ;;  %v876_v0 = vpop.f32.mrf.mxu0 }
  0xeb   : > { %v877_v1 = vadd.f32 %v3926_v19, %v876_v0 }
  0xec   : > { %3060 = vpow2.f32 %v1757_v62  ;;  %v1133_v2 = vsub.f32 0.0, %v915_v63  ;;  %v1077_v3 = vpop.f32.mrf.mxu3 }
  0xed   : > { %v1078_v5 = vadd.f32 %v3931_v54, %v1077_v3  ;;  %v1118_v6 = vsub.f32 0.0, %v877_v1  ;;  %v1039_v8 = vpop.f32.mrf.mxu1 }
  0xee   : > { %v1181_v9 = vmul.f32 1.442695, %v1133_v2  ;;  %v1040_v10 = vadd.f32 %v3931_v54, %v1039_v8 }
  0xef   : > { %v3059_v11 = vpop.eup %3058  ;;  %v1741_v12 = vsub.f32 0.0, %v1078_v5  ;;  %v1151_v13 = vmul.f32 1.442695, %v1118_v6 }
  0xf0   : > { %v3939_v14 = vadd.f32 1.0, %v3059_v11  ;;  %3062 = vpow2.f32 %v1181_v9  ;;  %v1726_v15 = vsub.f32 0.0, %v1040_v10 }
  0xf1   : > { %v1789_v17 = vmul.f32 1.442695, %v1741_v12  ;;  %3064 = vpow2.f32 %v1151_v13  ;;  %v916_v18 = vpop.f32.mrf.mxu2 }
  0xf2   : > { %v3061_v20 = vpop.eup %3060  ;;  %3066 = vrcp.f32 %v3939_v14  ;;  %v1759_v21 = vmul.f32 1.442695, %v1726_v15  ;;  %v917_v22 = vadd.f32 %v3926_v19, %v916_v18  ;;  %v879_v23 = vpop.f32.mrf.mxu0  ;;  %v1254_v35 = vand.u32 2147483647, %v3939_v14 }
  0xf3   : > { %v3943_v24 = vadd.f32 1.0, %v3061_v20  ;;  %3068 = vpow2.f32 %v1789_v17  ;;  %v880_v25 = vadd.f32 %v3926_v19, %v879_v23  ;;  %vm1250_vm2 = vweird.f32 %v3939_v14 }
  0xf4   : > { %3070 = vpow2.f32 %v1759_v21  ;;  %v1134_v26 = vsub.f32 0.0, %v917_v22  ;;  %v1079_v27 = vpop.f32.mrf.mxu3  ;;  %v1256_v39 = vand.u32 2147483648, %v3939_v14  ;;  %vm3975_vm4 = vcmp.eq.f32.partialorder %v1254_v35, 8.507059e+37 }
  0xf5   : > { %3072 = vrcp.f32 %v3943_v24  ;;  %v1080_v28 = vadd.f32 %v3931_v54, %v1079_v27  ;;  %v1119_v29 = vsub.f32 0.0, %v880_v25  ;;  %v1042_v30 = vpop.f32.mrf.mxu1  ;;  %v1864_v34 = vand.u32 2147483648, %v3943_v24 }
  0xf6   : > { %v3063_v31 = vpop.eup %3062  ;;  %v1183_v32 = vmul.f32 1.442695, %v1134_v26  ;;  %v1043_v33 = vadd.f32 %v3931_v54, %v1042_v30  ;;  %v1862_v38 = vand.u32 2147483647, %v3943_v24  ;;  %vm1858_vm3 = vweird.f32 %v3943_v24 }
  0xf7   : > { %v3065_v36 = vpop.eup %3064  ;;  %v3951_v37 = vadd.f32 1.0, %v3063_v31  ;;  %v1742_v4 = vsub.f32 0.0, %v1080_v28  ;;  %v1153_v42 = vmul.f32 1.442695, %v1119_v29  ;;  %v3961_v46 = vor.u32 1.1754944e-38, %v1864_v34 }
  0xf8   : > { %v3956_v40 = vpop.eup %3066  ;;  %v3958_v41 = vadd.f32 1.0, %v3065_v36  ;;  %3074 = vpow2.f32 %v1183_v32  ;;  %v1727_v43 = vsub.f32 0.0, %v1043_v33  ;;  %vm3991_vm6 = vcmp.eq.f32.partialorder %v1862_v38, 8.507059e+37 }
  0xf9   : > { %v3069_v44 = vpop.eup %3068  ;;  %3076 = vrcp.f32 %v3951_v37  ;;  %v1791_v45 = vmul.f32 1.442695, %v1742_v4  ;;  %v919_v16 = vpop.f32.mrf.mxu2  ;;  %v1246_v47 = vmul.f32 %v3956_v40, %v3939_v14  ;;  %vm1251_vm7 = vweird.f32 %v3956_v40 }
  0xfa   : > { %v3071_v48 = vpop.eup %3070  ;;  %v3965_v49 = vadd.f32 1.0, %v3069_v44  ;;  %3078 = vrcp.f32 %v3958_v41  ;;  %v1761_v50 = vmul.f32 1.442695, %v1727_v43  ;;  %v920_v51 = vadd.f32 %v3926_v19, %v919_v16  ;;  %v881_v52 = vpop.f32.mrf.mxu0  ;;  %vm1252_vm8 = vmor %vm1250_vm2, %vm1251_vm7 }
  0xfb   : > { %v3970_v7 = vpop.eup %3072  ;;  %v3972_v53 = vadd.f32 1.0, %v3071_v48  ;;  %3080 = vpow2.f32 %v1791_v45  ;;  %v882_v55 = vadd.f32 %v3926_v19, %v881_v52  ;;  %v1247_v56 = vsub.f32 1.0, %v1246_v47 }
  0xfc   : > { %3082 = vrcp.f32 %v3965_v49  ;;  %v1135_v58 = vsub.f32 0.0, %v920_v51  ;;  %v1082_v59 = vpop.f32.mrf.mxu3  ;;  %v1854_v60 = vmul.f32 %v3970_v7, %v3943_v24  ;;  %vm1859_vm5 = vweird.f32 %v3970_v7 }
  0xfd   : > { %3084 = vrcp.f32 %v3972_v53  ;;  %v1083_v61 = vadd.f32 %v3931_v54, %v1082_v59  ;;  %v1120_v62 = vsub.f32 0.0, %v882_v55  ;;  %v1044_v63 = vpop.f32.mrf.mxu1  ;;  %v1248_v0 = vmul.f32 %v3956_v40, %v1247_v56  ;;  %vm1860_vm9 = vmor %vm1858_vm3, %vm1859_vm5 }
  0xfe   : > { %v3075_v1 = vpop.eup %3074  ;;  %3086 = vpow2.f32 %v1153_v42  ;;  %v1185_v2 = vmul.f32 1.442695, %v1135_v58  ;;  %v1045_v3 = vadd.f32 %v3931_v54, %v1044_v63  ;;  %v1855_v5 = vsub.f32 1.0, %v1854_v60 }
  0xff   : > { %v3987_v6 = vpop.eup %3076  ;;  %v3989_v8 = vadd.f32 1.0, %v3075_v1  ;;  %3088 = vpow2.f32 %v1761_v50  ;;  %v1743_v9 = vsub.f32 0.0, %v1083_v61  ;;  %v1155_v10 = vmul.f32 1.442695, %v1120_v62 }
 0x100   : > { %v3995_v12 = vpop.eup %3078  ;;  %3090 = vpow2.f32 %v1185_v2  ;;  %v1728_v13 = vsub.f32 0.0, %v1045_v3  ;;  %v1856_v15 = vmul.f32 %v3970_v7, %v1855_v5  ;;  %v1249_v17 = vadd.f32 %v3956_v40, %v1248_v0 }
 0x101   : > { %v3081_v18 = vpop.eup %3080  ;;  %3092 = vrcp.f32 %v3989_v8  ;;  %v1793_v20 = vmul.f32 1.442695, %v1743_v9  ;;  %v921_v21 = vpop.f32.mrf.mxu2  ;;  %v1257_v22 = vor.u32 1.1754944e-38, %v1256_v39  ;;  %vm2098_vm10 = vweird.f32 %v3965_v49 }
 0x102   : > { %v4001_v23 = vpop.eup %3082  ;;  %v4003_v25 = vadd.f32 1.0, %v3081_v18  ;;  %3094 = vpow2.f32 %v1155_v10  ;;  %v1763_v26 = vmul.f32 1.442695, %v1728_v13  ;;  %v922_v27 = vadd.f32 %v3926_v19, %v921_v21  ;;  %v884_v28 = vpop.f32.mrf.mxu0 }
 0x103   : > { %v4008_v29 = vpop.eup %3084  ;;  %3096 = vpow2.f32 %v1793_v20  ;;  %v885_v30 = vadd.f32 %v3926_v19, %v884_v28  ;;  %v1857_v31 = vadd.f32 %v3970_v7, %v1856_v15  ;;  %v1253_v32 = vsel %vm1252_vm8, %v3956_v40, %v1249_v17 }
 0x104   : > { %v3087_v33 = vpop.eup %3086  ;;  %3098 = vrcp.f32 %v4003_v25  ;;  %v1136_v34 = vsub.f32 0.0, %v922_v27  ;;  %v1084_v35 = vpop.f32.mrf.mxu3  ;;  %v4016_v36 = vsel %vm3975_vm4, %v1257_v22, %v1253_v32  ;;  %v2094_v14 = vmul.f32 %v4001_v23, %v3965_v49 }
 0x105   : > { %v3089_v4 = vpop.eup %3088  ;;  %v4020_v38 = vadd.f32 1.0, %v3087_v33  ;;  %3100 = vpow2.f32 %v1763_v26  ;;  %v1085_v39 = vadd.f32 %v3931_v54, %v1084_v35  ;;  %v1121_v42 = vsub.f32 0.0, %v885_v30  ;;  %v1047_v40 = vpop.f32.mrf.mxu1 }
 0x106   : > { %v3091_v43 = vpop.eup %3090  ;;  %v4027_v44 = vadd.f32 1.0, %v3089_v4  ;;  %v1187_v45 = vmul.f32 1.442695, %v1136_v34  ;;  %v1048_v16 = vadd.f32 %v3931_v54, %v1047_v40  ;;  %v1861_v47 = vsel %vm1860_vm9, %v3970_v7, %v1857_v31 }
 0x107   : > { %v4031_v48 = vpop.eup %3092  ;;  %3102 = vrcp.f32 %v4020_v38  ;;  %v4034_v50 = vadd.f32 1.0, %v3091_v43  ;;  %v1744_v51 = vsub.f32 0.0, %v1085_v39  ;;  %v1157_v52 = vmul.f32 1.442695, %v1121_v42 }
 0x108   : > { %v3095_v55 = vpop.eup %3094  ;;  %3104 = vrcp.f32 %v4027_v44  ;;  %v1729_v24 = vsub.f32 0.0, %v1048_v16  ;;  %v1866_v56 = vsel %vm3991_vm6, %v3961_v46, %v1861_v47  ;;  %v2095_v57 = vsub.f32 1.0, %v2094_v14 }
 0x109   : > { %v3097_v58 = vpop.eup %3096  ;;  %3106 = vrcp.f32 %v4034_v50  ;;  %v4041_v7 = vadd.f32 1.0, %v3095_v55  ;;  %v1795_v59 = vmul.f32 1.442695, %v1744_v51  ;;  %2557 = vrot.lane.b32.xlu0 %v1866_v56, %s3470_s7  ;;  %v2333_v60 = vsub.f32 %v4016_v36, %v1866_v56  ;;  %v924_v61 = vpop.f32.mrf.mxu2 }
 0x10a   : > { %v4045_v62 = vpop.eup %3098  ;;  %v4047_v63 = vadd.f32 1.0, %v3097_v58  ;;  %3108 = vpow2.f32 %v1187_v45  ;;  %v1765_v0 = vmul.f32 1.442695, %v1729_v24  ;;  %v925_v46 = vadd.f32 %v3926_v19, %v924_v61  ;;  %v886_v34 = vpop.f32.mrf.mxu0 }
 0x10b   : > { %v3101_v1 = vpop.eup %3100  ;;  %3110 = vrcp.f32 %v4041_v7  ;;  %v2365_v2 = vmul.f32 -50.0, %v2333_v60  ;;  %v2096_v3 = vmul.f32 %v4001_v23, %v2095_v57  ;;  %vm2099_vm11 = vweird.f32 %v4001_v23 }
 0x10c   : > { %3112 = vrcp.f32 %v4047_v63  ;;  %v4054_v5 = vadd.f32 1.0, %v3101_v1  ;;  %v1137_v9 = vsub.f32 0.0, %v925_v46  ;;  %v1087_v10 = vpop.f32.mrf.mxu3  ;;  %vm4064_vm12 = vmor %vm2098_vm10, %vm2099_vm11  ;;  %v2102_v22 = vand.u32 2147483647, %v3965_v49 }
 0x10d   : > { %v4057_v11 = vpop.eup %3102  ;;  %3114 = vpow2.f32 %v1795_v59  ;;  %v2397_v13 = vmul.f32 1.442695, %v2365_v2  ;;  %v1088_v15 = vadd.f32 %v3931_v54, %v1087_v10  ;;  %v2097_v17 = vadd.f32 %v4001_v23, %v2096_v3  ;;  %v1049_v39 = vpop.f32.mrf.mxu1 }
 0x10e   : > { %v4061_v18 = vpop.eup %3104  ;;  %3116 = vrcp.f32 %v4054_v5  ;;  %v1189_v20 = vmul.f32 1.442695, %v1137_v9  ;;  %v2104_v26 = vand.u32 2147483648, %v3965_v49  ;;  %v1486_v31 = vmul.f32 %v3987_v6, %v3951_v37 }
 0x10f   : > { %v4070_v27 = vpop.eup %3106  ;;  %3118 = vpow2.f32 %v1157_v52  ;;  %v1745_v28 = vsub.f32 0.0, %v1088_v15  ;;  %v2101_v30 = vsel %vm4064_vm12, %v4001_v23, %v2097_v17  ;;  %vm2103_vm13 = vcmp.eq.f32.partialorder %v2102_v22, 8.507059e+37 }
 0x110   : > { %v3109_v32 = vpop.eup %3108  ;;  %3120 = vpow2.f32 %v1765_v0  ;;  %v2105_v33 = vor.u32 1.1754944e-38, %v2104_v26  ;;  %vm1490_vm14 = vweird.f32 %v3951_v37  ;;  %v1487_v4 = vsub.f32 1.0, %v1486_v31 }
 0x111   : > { %v4078_v35 = vpop.eup %3110  ;;  %v4080_v49 = vadd.f32 1.0, %v3109_v32  ;;  %3122 = vpow2.f32 %v2397_v13  ;;  %v1797_v14 = vmul.f32 1.442695, %v1745_v28  ;;  %vm1491_vm15 = vweird.f32 %v3987_v6 }
 0x112   : > { %v4082_v42 = vpop.eup %3112  ;;  %3124 = vpow2.f32 %v1189_v20  ;;  %v2106_v23 = vsel %vm2103_vm13, %v2105_v33, %v2101_v30  ;;  %v1494_v40 = vand.u32 2147483647, %v3951_v37  ;;  %v1488_v45 = vmul.f32 %v3987_v6, %v1487_v4  ;;  %vm1492_vm1 = vmor %vm1490_vm14, %vm1491_vm15 }
 0x113   : > { %v3115_v43 = vpop.eup %3114  ;;  %3126 = vrcp.f32 %v4080_v49  ;;  %2589 = vrot.lane.b32.xlu1 %v2106_v23, %s3470_s7  ;;  %v1496_v16 = vand.u32 2147483648, %v3951_v37  ;;  %v887_v47 = vadd.f32 %v3926_v19, %v886_v34  ;;  %v1050_v24 = vadd.f32 %v3931_v54, %v1049_v39  ;;  %v926_v39 = vpop.f32.mrf.mxu2 }
 0x114   : > { %v4091_v51 = vpop.eup %3116  ;;  %v4093_v52 = vadd.f32 1.0, %v3115_v43  ;;  %3128 = vpow2.f32 %v1797_v14  ;;  %vm4095_vm0 = vcmp.eq.f32.partialorder %v1494_v40, 8.507059e+37  ;;  %v1489_v57 = vadd.f32 %v3987_v6, %v1488_v45  ;;  %v1089_v43 = vpop.f32.mrf.mxu3 }
 0x115   : > { %v3119_v56 = vpop.eup %3118  ;;  %v1497_v58 = vor.u32 1.1754944e-38, %v1496_v16  ;;  %v1122_v59 = vsub.f32 0.0, %v887_v47  ;;  %v1869_v60 = vmul.f32 %v4008_v29, %v3972_v53  ;;  %v1730_v46 = vsub.f32 0.0, %v1050_v24 }
 0x116   : > { %v3121_v61 = vpop.eup %3120  ;;  %3130 = vrcp.f32 %v4093_v52  ;;  %v4104_v0 = vadd.f32 1.0, %v3119_v56  ;;  %vm1873_vm2 = vweird.f32 %v3972_v53  ;;  %v1493_v3 = vsel %vm1492_vm1, %v3987_v6, %v1489_v57 }
 0x117   : > { %v3123_v1 = vpop.eup %3122  ;;  %v4111_v2 = vadd.f32 1.0, %v3121_v61  ;;  %v1159_v9 = vmul.f32 1.442695, %v1122_v59  ;;  %v1870_v10 = vsub.f32 1.0, %v1869_v60  ;;  %v4117_v17 = vsel %vm4095_vm0, %v1497_v58, %v1493_v3 }
 0x118   : > { %v3125_v13 = vpop.eup %3124  ;;  %3132 = vrcp.f32 %v4104_v0  ;;  %v2461_v15 = vadd.f32 1.0, %v3123_v1  ;;  %6062 = vst [vmem:[#allocation3_spill] sm:$0xff] %v4117_v17  ;;  %v1767_v37 = vmul.f32 1.442695, %v1730_v46  ;;  %v2349_v22 = vsub.f32 %v4117_v17, %v2106_v23 }
 0x119   : > { %v4119_v20 = vpop.eup %3126  ;;  %3134 = vrcp.f32 %v4111_v2  ;;  %v4122_v21 = vadd.f32 1.0, %v3125_v13  ;;  %v1871_v6 = vmul.f32 %v4008_v29, %v1870_v10  ;;  %vm1874_vm3 = vweird.f32 %v4008_v29 }
 0x11a   : > { %v3129_v26 = vpop.eup %3128  ;;  %3136 = vrcp.f32 %v2461_v15  ;;  %v1877_v28 = vand.u32 2147483647, %v3972_v53  ;;  %v1879_v30 = vand.u32 2147483648, %v3972_v53  ;;  %v2381_v32 = vmul.f32 -50.0, %v2349_v22  ;;  %vm1875_vm4 = vmor %vm1873_vm2, %vm1874_vm3 }
 0x11b   : > { %3138 = vrcp.f32 %v4122_v21  ;;  %v4130_v31 = vadd.f32 1.0, %v3129_v26  ;;  %v1872_v33 = vadd.f32 %v4008_v29, %v1871_v6  ;;  %v1261_v4 = vmul.f32 %v3995_v12, %v3958_v41 }
 0x11c   : > { %v4133_v34 = vpop.eup %3130  ;;  %3140 = vpow2.f32 %v1159_v9  ;;  %vm1878_vm5 = vcmp.eq.f32.partialorder %v1877_v28, 8.507059e+37  ;;  %v1880_v14 = vor.u32 1.1754944e-38, %v1879_v30  ;;  %v2429_v23 = vmul.f32 1.442695, %v2381_v32 }
 0x11d   : > { %3142 = vrcp.f32 %v4130_v31  ;;  %v1876_v40 = vsel %vm1875_vm4, %v4008_v29, %v1872_v33  ;;  %vm1265_vm6 = vweird.f32 %v3958_v41  ;;  %v1262_v53 = vsub.f32 1.0, %v1261_v4 }
 0x11e   : > { %v4142_v45 = vpop.eup %3132  ;;  %3144 = vpow2.f32 %v1767_v37  ;;  %v1881_v16 = vsel %vm1878_vm5, %v1880_v14, %v1876_v40  ;;  %vm1266_vm7 = vweird.f32 %v3995_v12  ;;  %v1269_v55 = vand.u32 2147483647, %v3958_v41 }
 0x11f   : > { %v4145_v47 = vpop.eup %3134  ;;  %3146 = vpow2.f32 %v2429_v23  ;;  %2559 = vrot.lane.b32.xlu0 %v1881_v16, %s3470_s7  ;;  %v1271_v24 = vand.u32 2147483648, %v3958_v41  ;;  %v927_v29 = vadd.f32 %v3926_v19, %v926_v39  ;;  %v1263_v57 = vmul.f32 %v3995_v12, %v1262_v53  ;;  %vm1267_vm11 = vmor %vm1265_vm6, %vm1266_vm7 }
 0x120   : > { %v4151_v56 = vpop.eup %3136  ;;  %v1090_v58 = vadd.f32 %v3931_v54, %v1089_v43  ;;  %v2109_v59 = vmul.f32 %v4045_v62, %v4003_v25  ;;  %vm2113_vm8 = vweird.f32 %v4003_v25  ;;  %vm4160_vm9 = vcmp.eq.f32.partialorder %v1269_v55, 8.507059e+37 }
 0x121   : > { %v4158_v60 = vpop.eup %3138  ;;  %v1272_v46 = vor.u32 1.1754944e-38, %v1271_v24  ;;  %v1138_v1 = vsub.f32 0.0, %v927_v29  ;;  %vm2114_vm10 = vweird.f32 %v4045_v62  ;;  %v1264_v9 = vadd.f32 %v3995_v12, %v1263_v57  ;;  %v889_v24 = vpop.f32.mrf.mxu0 }
 0x122   : > { %v3141_v3 = vpop.eup %3140  ;;  %v1746_v10 = vsub.f32 0.0, %v1090_v58  ;;  %v2110_v13 = vsub.f32 1.0, %v2109_v59  ;;  %v2117_v15 = vand.u32 2147483647, %v4003_v25  ;;  %v2119_v26 = vand.u32 2147483648, %v4003_v25  ;;  %vm2115_vm13 = vmor %vm2113_vm8, %vm2114_vm10  ;;  %v1052_v29 = vpop.f32.mrf.mxu1 }
 0x123   : > { %v4167_v37 = vpop.eup %3142  ;;  %v4169_v22 = vadd.f32 1.0, %v3141_v3  ;;  %v1191_v6 = vmul.f32 1.442695, %v1138_v1  ;;  %v1501_v28 = vmul.f32 %v4031_v48, %v3989_v8  ;;  %v1268_v32 = vsel %vm1267_vm11, %v3995_v12, %v1264_v9 }
 0x124   : > { %v3145_v30 = vpop.eup %3144  ;;  %v1799_v33 = vmul.f32 1.442695, %v1746_v10  ;;  %v2111_v14 = vmul.f32 %v4045_v62, %v2110_v13  ;;  %vm4180_vm12 = vcmp.eq.f32.partialorder %v2117_v15, 8.507059e+37  ;;  %v4189_v23 = vsel %vm4160_vm9, %v1272_v46, %v1268_v32 }
 0x125   : > { %v3147_v39 = vpop.eup %3146  ;;  %3148 = vrcp.f32 %v4169_v22  ;;  %v4185_v41 = vadd.f32 1.0, %v3145_v30  ;;  %6067 = vst [vmem:[#allocation4_spill] sm:$0xff] %v4189_v23  ;;  %v2120_v40 = vor.u32 1.1754944e-38, %v2119_v26  ;;  %v2334_v12 = vsub.f32 %v4189_v23, %v1881_v16 }
 0x126   : > { %v2477_v43 = vadd.f32 1.0, %v3147_v39  ;;  %3150 = vpow2.f32 %v1191_v6  ;;  %v2112_v53 = vadd.f32 %v4045_v62, %v2111_v14  ;;  %v1502_v55 = vsub.f32 1.0, %v1501_v28 }
 0x127   : > { %3152 = vrcp.f32 %v4185_v41  ;;  %vm1505_vm14 = vweird.f32 %v3989_v8  ;;  %vm1506_vm15 = vweird.f32 %v4031_v48  ;;  %v2366_v57 = vmul.f32 -50.0, %v2334_v12 }
 0x128   : > { %3154 = vrcp.f32 %v2477_v43  ;;  %v2116_v16 = vsel %vm2115_vm13, %v4045_v62, %v2112_v53  ;;  %v1509_v58 = vand.u32 2147483647, %v3989_v8  ;;  %v1503_v25 = vmul.f32 %v4031_v48, %v1502_v55  ;;  %vm1507_vm2 = vmor %vm1505_vm14, %vm1506_vm15 }
 0x129   : > { %3156 = vpow2.f32 %v1799_v33  ;;  %v2121_v59 = vsel %vm4180_vm12, %v2120_v40, %v2116_v16  ;;  %v1511_v61 = vand.u32 2147483648, %v3989_v8  ;;  %v2399_v46 = vmul.f32 1.442695, %v2366_v57 }
 0x12a   : > { %2591 = vrot.lane.b32.xlu2 %v2121_v59, %s3470_s7  ;;  %vm4207_vm0 = vcmp.eq.f32.partialorder %v1509_v58, 8.507059e+37  ;;  %v890_v3 = vadd.f32 %v3926_v19, %v889_v24  ;;  %v1053_v62 = vadd.f32 %v3931_v54, %v1052_v29  ;;  %v1504_v10 = vadd.f32 %v4031_v48, %v1503_v25 }
 0x12b   : > { %v4213_v9 = vpop.eup %3148  ;;  %v1512_v13 = vor.u32 1.1754944e-38, %v1511_v61  ;;  %v1884_v15 = vmul.f32 %v4061_v18, %v4027_v44  ;;  %vm1888_vm1 = vweird.f32 %v4027_v44  ;;  %3158 = vpow2.f32 %v2399_v46 }
 0x12c   : > { %v3151_v6 = vpop.eup %3150  ;;  %v1123_v26 = vsub.f32 0.0, %v890_v3  ;;  %v1731_v28 = vsub.f32 0.0, %v1053_v62  ;;  %vm1889_vm3 = vweird.f32 %v4061_v18  ;;  %v1508_v33 = vsel %vm1507_vm2, %v4031_v48, %v1504_v10  ;;  %v1092_v3 = vpop.f32.mrf.mxu3 }
 0x12d   : > { %v4224_v30 = vpop.eup %3152  ;;  %v4226_v32 = vadd.f32 1.0, %v3151_v6  ;;  %v1885_v14 = vsub.f32 1.0, %v1884_v15  ;;  %v1892_v4 = vand.u32 2147483647, %v4027_v44  ;;  %v4234_v40 = vsel %vm4207_vm0, %v1512_v13, %v1508_v33  ;;  %vm1890_vm6 = vmor %vm1888_vm1, %vm1889_vm3 }
 0x12e   : > { %v4230_v39 = vpop.eup %3154  ;;  %6070 = vst [vmem:[#allocation5_spill] sm:$0xff] %v4234_v40  ;;  %v1161_v8 = vmul.f32 1.442695, %v1123_v26  ;;  %v1769_v43 = vmul.f32 1.442695, %v1731_v28  ;;  %v1894_v12 = vand.u32 2147483648, %v4027_v44  ;;  %v2350_v55 = vsub.f32 %v4234_v40, %v2121_v59  ;;  %v929_v59 = vpop.f32.mrf.mxu2 }
 0x12f   : > { %v3157_v53 = vpop.eup %3156  ;;  %3160 = vrcp.f32 %v4226_v32  ;;  %v1886_v48 = vmul.f32 %v4061_v18, %v1885_v14  ;;  %vm4240_vm4 = vcmp.eq.f32.partialorder %v1892_v4, 8.507059e+37  ;;  %v1276_v16 = vmul.f32 %v4057_v11, %v4020_v38 }
 0x130   : > { %v4244_v29 = vadd.f32 1.0, %v3157_v53  ;;  %3162 = vpow2.f32 %v1161_v8  ;;  %v1895_v57 = vor.u32 1.1754944e-38, %v1894_v12  ;;  %v2382_v58 = vmul.f32 -50.0, %v2350_v55 }
 0x131   : > { %3164 = vpow2.f32 %v1769_v43  ;;  %v1887_v25 = vadd.f32 %v4061_v18, %v1886_v48  ;;  %vm1280_vm5 = vweird.f32 %v4020_v38  ;;  %v3159_v61 = vpop.eup %3158  ;;  %v1277_v46 = vsub.f32 1.0, %v1276_v16 }
 0x132   : > { %3166 = vrcp.f32 %v4244_v29  ;;  %vm1281_vm7 = vweird.f32 %v4057_v11  ;;  %v1284_v1 = vand.u32 2147483647, %v4020_v38  ;;  %2685 = vrot.lane.b32.xlu2 %v4151_v56, %s3471_s8  ;;  %v2462_v62 = vadd.f32 1.0, %v3159_v61 }
 0x133   : > { %v2431_v10 = vmul.f32 1.442695, %v2382_v58  ;;  %v1891_v13 = vsel %vm1890_vm6, %v4061_v18, %v1887_v25  ;;  %v1286_v15 = vand.u32 2147483648, %v4020_v38  ;;  %v1278_v6 = vmul.f32 %v4057_v11, %v1277_v46  ;;  %vm4276_vm9 = vmor %vm1280_vm5, %vm1281_vm7 }
 0x134   : > { %v1896_v44 = vsel %vm4240_vm4, %v1895_v57, %v1891_v13  ;;  %vm4264_vm8 = vcmp.eq.f32.partialorder %v1284_v1, 8.507059e+37  ;;  %v930_v28 = vadd.f32 %v3926_v19, %v929_v59  ;;  %3168 = vrcp.f32 %v2462_v62 }
 0x135   : > { %v4269_v33 = vpop.eup %3160  ;;  %2561 = vrot.lane.b32.xlu1 %v1896_v44, %s3470_s7  ;;  %v1287_v56 = vor.u32 1.1754944e-38, %v1286_v15  ;;  %v1093_v14 = vadd.f32 %v3931_v54, %v1092_v3  ;;  %v2124_v4 = vmul.f32 %v4082_v42, %v4047_v63  ;;  %3170 = vpow2.f32 %v2431_v10  ;;  %v891_v15 = vpop.f32.mrf.mxu0 }
 0x136   : > { %v3163_v8 = vpop.eup %3162  ;;  %v1279_v43 = vadd.f32 %v4057_v11, %v1278_v6  ;;  %v1139_v12 = vsub.f32 0.0, %v930_v28  ;;  %vm2128_vm10 = vweird.f32 %v4047_v63  ;;  %vm2129_vm11 = vweird.f32 %v4082_v42  ;;  %v1054_v28 = vpop.f32.mrf.mxu1 }
 0x137   : > { %v3165_v53 = vpop.eup %3164  ;;  %v4285_v55 = vadd.f32 1.0, %v3163_v8  ;;  %v1747_v38 = vsub.f32 0.0, %v1093_v14  ;;  %v2125_v48 = vsub.f32 1.0, %v2124_v4  ;;  %v2132_v25 = vand.u32 2147483647, %v4047_v63  ;;  %vm2130_vm14 = vmor %vm2128_vm10, %vm2129_vm11 }
 0x138   : > { %v4288_v24 = vpop.eup %3166  ;;  %v4290_v57 = vadd.f32 1.0, %v3165_v53  ;;  %v1283_v16 = vsel %vm4276_vm9, %v4057_v11, %v1279_v43  ;;  %v1193_v58 = vmul.f32 1.442695, %v1139_v12  ;;  %v2134_v11 = vand.u32 2147483648, %v4047_v63 }
 0x139   : > { %3172 = vrcp.f32 %v4285_v55  ;;  %v4299_v59 = vsel %vm4264_vm8, %v1287_v56, %v1283_v16  ;;  %v1801_v61 = vmul.f32 1.442695, %v1747_v38  ;;  %v2126_v46 = vmul.f32 %v4082_v42, %v2125_v48 }
 0x13a   : > { %6077 = vst [vmem:[#allocation6_spill] sm:$0xff] %v4299_v59  ;;  %3174 = vrcp.f32 %v4290_v57  ;;  %v2335_v1 = vsub.f32 %v4299_v59, %v1896_v44  ;;  %vm4304_vm12 = vcmp.eq.f32.partialorder %v2132_v25, 8.507059e+37  ;;  %v4309_v62 = vpop.eup %3168  ;;  %v1516_v13 = vmul.f32 %v4070_v27, %v4034_v50 }
 0x13b   : > { %3176 = vpow2.f32 %v1193_v58  ;;  %v2127_v10 = vadd.f32 %v4082_v42, %v2126_v46  ;;  %vm1520_vm13 = vweird.f32 %v4034_v50  ;;  %v3171_v6 = vpop.eup %3170  ;;  %v2135_v44 = vor.u32 1.1754944e-38, %v2134_v11 }
 0x13c   : > { %v2367_v26 = vmul.f32 -50.0, %v2335_v1  ;;  %3178 = vpow2.f32 %v1801_v61  ;;  %vm1521_vm15 = vweird.f32 %v4070_v27  ;;  %v2478_v18 = vadd.f32 1.0, %v3171_v6 }
 0x13d   : > { %v2131_v56 = vsel %vm2130_vm14, %v4082_v42, %v2127_v10  ;;  %v1517_v14 = vsub.f32 1.0, %v1516_v13  ;;  %v1524_v4 = vand.u32 2147483647, %v4034_v50  ;;  %v1526_v12 = vand.u32 2147483648, %v4034_v50  ;;  %vm1522_vm3 = vmor %vm1520_vm13, %vm1521_vm15 }
 0x13e   : > { %v2401_v8 = vmul.f32 1.442695, %v2367_v26  ;;  %v2136_v43 = vsel %vm4304_vm12, %v2135_v44, %v2131_v56  ;;  %v892_v53 = vadd.f32 %v3926_v19, %v891_v15  ;;  %3180 = vrcp.f32 %v2478_v18 }
 0x13f   : > { %v4326_v63 = vpop.eup %3172  ;;  %2593 = vrot.lane.b32.xlu0 %v2136_v43, %s3470_s7  ;;  %v1518_v38 = vmul.f32 %v4070_v27, %v1517_v14  ;;  %vm4330_vm0 = vcmp.eq.f32.partialorder %v1524_v4, 8.507059e+37  ;;  %v1055_v48 = vadd.f32 %v3931_v54, %v1054_v28  ;;  %v1527_v58 = vor.u32 1.1754944e-38, %v1526_v12 }
 0x140   : > { %v4335_v16 = vpop.eup %3174  ;;  %3182 = vpow2.f32 %v2401_v8  ;;  %v1124_v25 = vsub.f32 0.0, %v892_v53  ;;  %v1899_v61 = vmul.f32 %v4091_v51, %v4054_v5  ;;  %vm1903_vm1 = vweird.f32 %v4054_v5  ;;  %v931_v53 = vpop.f32.mrf.mxu2 }
 0x141   : > { %v3177_v46 = vpop.eup %3176  ;;  %v1519_v1 = vadd.f32 %v4070_v27, %v1518_v38  ;;  %v1732_v3 = vsub.f32 0.0, %v1055_v48  ;;  %vm1904_vm2 = vweird.f32 %v4091_v51  ;;  %v1907_v6 = vand.u32 2147483647, %v4054_v5 }
 0x142   : > { %v3179_v11 = vpop.eup %3178  ;;  %v4342_v10 = vadd.f32 1.0, %v3177_v46  ;;  %v1163_v13 = vmul.f32 1.442695, %v1124_v25  ;;  %v1900_v15 = vsub.f32 1.0, %v1899_v61  ;;  %v1909_v18 = vand.u32 2147483648, %v4054_v5  ;;  %vm1905_vm7 = vmor %vm1903_vm1, %vm1904_vm2  ;;  %v1094_v25 = vpop.f32.mrf.mxu3 }
 0x143   : > { %v4349_v26 = vadd.f32 1.0, %v3179_v11  ;;  %v1523_v44 = vsel %vm1522_vm3, %v4070_v27, %v1519_v1  ;;  %v1771_v28 = vmul.f32 1.442695, %v1732_v3  ;;  %vm4359_vm4 = vcmp.eq.f32.partialorder %v1907_v6, 8.507059e+37  ;;  %v894_v11 = vpop.f32.mrf.mxu0 }
 0x144   : > { %3184 = vrcp.f32 %v4342_v10  ;;  %v4356_v56 = vsel %vm4330_vm0, %v1527_v58, %v1523_v44  ;;  %v1901_v50 = vmul.f32 %v4091_v51, %v1900_v15  ;;  %v4363_v4 = vpop.eup %3180  ;;  %v1910_v8 = vor.u32 1.1754944e-38, %v1909_v18 }
 0x145   : > { %6082 = vst [vmem:[#allocation7_spill] sm:$0xff] %v4356_v56  ;;  %3186 = vrcp.f32 %v4349_v26  ;;  %v2351_v27 = vsub.f32 %v4356_v56, %v2136_v43  ;;  %v1291_v12 = vmul.f32 %v4078_v35, %v4041_v7  ;;  %vm1295_vm5 = vweird.f32 %v4041_v7 }
 0x146   : > { %v3183_v38 = vpop.eup %3182  ;;  %3188 = vpow2.f32 %v1163_v13  ;;  %v1902_v42 = vadd.f32 %v4091_v51, %v1901_v50  ;;  %vm1296_vm6 = vweird.f32 %v4078_v35  ;;  %v1299_v46 = vand.u32 2147483647, %v4041_v7  ;;  %v1057_v13 = vpop.f32.mrf.mxu1 }
 0x147   : > { %v2463_v48 = vadd.f32 1.0, %v3183_v38  ;;  %v2383_v58 = vmul.f32 -50.0, %v2351_v27  ;;  %3190 = vpow2.f32 %v1771_v28  ;;  %v1292_v43 = vsub.f32 1.0, %v1291_v12  ;;  %2717 = vrot.lane.b32.xlu0 %v4230_v39, %s3471_s8  ;;  %vm1297_vm9 = vmor %vm1295_vm5, %vm1296_vm6 }
 0x148   : > { %v1906_v61 = vsel %vm1905_vm7, %v4091_v51, %v1902_v42  ;;  %v1301_v1 = vand.u32 2147483648, %v4041_v7  ;;  %v932_v3 = vadd.f32 %v3926_v19, %v931_v53  ;;  %vm4388_vm8 = vcmp.eq.f32.partialorder %v1299_v46, 8.507059e+37 }
 0x149   : > { %3192 = vrcp.f32 %v2463_v48  ;;  %v2433_v15 = vmul.f32 1.442695, %v2383_v58  ;;  %v1911_v5 = vsel %vm4359_vm4, %v1910_v8, %v1906_v61  ;;  %v1293_v6 = vmul.f32 %v4078_v35, %v1292_v43 }
 0x14a   : > { %v4385_v44 = vpop.eup %3184  ;;  %2563 = vrot.lane.b32.xlu1 %v1911_v5, %s3470_s7  ;;  %v1302_v39 = vor.u32 1.1754944e-38, %v1301_v1  ;;  %v1140_v28 = vsub.f32 0.0, %v932_v3  ;;  %v1095_v18 = vadd.f32 %v3931_v54, %v1094_v25  ;;  %v895_v27 = vadd.f32 %v3926_v19, %v894_v11 }
 0x14b   : > { %v4393_v50 = vpop.eup %3186  ;;  %3194 = vpow2.f32 %v2433_v15  ;;  %v1294_v14 = vadd.f32 %v4078_v35, %v1293_v6  ;;  %v1058_v8 = vadd.f32 %v3931_v54, %v1057_v13  ;;  %v2139_v42 = vmul.f32 %v4133_v34, %v4093_v52 }
 0x14c   : > { %v3189_v12 = vpop.eup %3188  ;;  %v1195_v53 = vmul.f32 1.442695, %v1140_v28  ;;  %v1748_v38 = vsub.f32 0.0, %v1095_v18  ;;  %vm2143_vm10 = vweird.f32 %v4093_v52  ;;  %v1125_v43 = vsub.f32 0.0, %v895_v27 }
 0x14d   : > { %v3191_v48 = vpop.eup %3190  ;;  %v4405_v58 = vadd.f32 1.0, %v3189_v12  ;;  %v1298_v19 = vsel %vm1297_vm9, %v4078_v35, %v1294_v14  ;;  %v1733_v54 = vsub.f32 0.0, %v1058_v8  ;;  %v2140_v35 = vsub.f32 1.0, %v2139_v42 }
 0x14e   : > { %v4408_v25 = vadd.f32 1.0, %v3191_v48  ;;  %v4412_v7 = vsel %vm4388_vm8, %v1302_v39, %v1298_v19  ;;  %3196 = vpow2.f32 %v1195_v53  ;;  %v1803_v61 = vmul.f32 1.442695, %v1748_v38 }
 0x14f   : > { %6087 = vst [vmem:[#allocation8_spill] sm:$0xff] %v4412_v7  ;;  %v4414_v46 = vpop.eup %3192  ;;  %3198 = vrcp.f32 %v4405_v58  ;;  %v2336_v1 = vsub.f32 %v4412_v7, %v1911_v5  ;;  %v1165_v3 = vmul.f32 1.442695, %v1125_v43  ;;  %v1773_v11 = vmul.f32 1.442695, %v1733_v54  ;;  %2687 = vrot.lane.b32.xlu0 %v4309_v62, %s3471_s8 }
 0x150   : > { %3200 = vrcp.f32 %v4408_v25  ;;  %vm2144_vm11 = vweird.f32 %v4133_v34  ;;  %v2147_v13 = vand.u32 2147483647, %v4093_v52  ;;  %v2149_v51 = vand.u32 2147483648, %v4093_v52 }
 0x151   : > { %v3195_v15 = vpop.eup %3194  ;;  %v2368_v6 = vmul.f32 -50.0, %v2336_v1  ;;  %3202 = vpow2.f32 %v1803_v61  ;;  %v1531_v5 = vmul.f32 %v4119_v20, %v4080_v49  ;;  %v2141_v28 = vmul.f32 %v4133_v34, %v2140_v35  ;;  %vm2145_vm15 = vmor %vm2143_vm10, %vm2144_vm11 }
 0x152   : > { %v2479_v39 = vadd.f32 1.0, %v3195_v15  ;;  %3204 = vpow2.f32 %v1165_v3  ;;  %vm4427_vm12 = vcmp.eq.f32.partialorder %v2147_v13, 8.507059e+37  ;;  %v2150_v14 = vor.u32 1.1754944e-38, %v2149_v51 }
 0x153   : > { %v2403_v18 = vmul.f32 1.442695, %v2368_v6  ;;  %3206 = vpow2.f32 %v1773_v11  ;;  %v1532_v27 = vsub.f32 1.0, %v1531_v5  ;;  %v2142_v12 = vadd.f32 %v4133_v34, %v2141_v28  ;;  %v896_v11 = vpop.f32.mrf.mxu0 }
 0x154   : > { %v3197_v8 = vpop.eup %3196  ;;  %3208 = vrcp.f32 %v2479_v39  ;;  %vm1535_vm13 = vweird.f32 %v4080_v49  ;;  %vm1536_vm14 = vweird.f32 %v4119_v20  ;;  %v1539_v48 = vand.u32 2147483647, %v4080_v49 }
 0x155   : > { %v4434_v53 = vpop.eup %3198  ;;  %3210 = vpow2.f32 %v2403_v18  ;;  %v4436_v38 = vadd.f32 1.0, %v3197_v8  ;;  %v1533_v42 = vmul.f32 %v4119_v20, %v1532_v27  ;;  %v2146_v43 = vsel %vm2145_vm15, %v4133_v34, %v2142_v12  ;;  %vm1537_vm2 = vmor %vm1535_vm13, %vm1536_vm14  ;;  %v4527_v12 = vld [vmem:[%s6035_s4 + $0x1] ss:$0 sm:$0xff] }
 0x156   : > { %v4444_v19 = vpop.eup %3200  ;;  %v1541_v54 = vand.u32 2147483648, %v4080_v49  ;;  %v1306_v61 = vmul.f32 %v4142_v45, %v4104_v0  ;;  %vm1310_vm0 = vweird.f32 %v4104_v0  ;;  %v2151_v52 = vsel %vm4427_vm12, %v2150_v14, %v2146_v43 }
 0x157   : > { %v3203_v1 = vpop.eup %3202  ;;  %3212 = vrcp.f32 %v4436_v38  ;;  %v1534_v3 = vadd.f32 %v4119_v20, %v1533_v42  ;;  %vm4455_vm1 = vcmp.eq.f32.partialorder %v1539_v48, 8.507059e+37  ;;  %2595 = vrot.lane.b32.xlu1 %v2151_v52, %s3470_s7  ;;  %vm1311_vm3 = vweird.f32 %v4142_v45 }
 0x158   : > { %v3205_v34 = vpop.eup %3204  ;;  %v4459_v35 = vadd.f32 1.0, %v3203_v1  ;;  %v1542_v13 = vor.u32 1.1754944e-38, %v1541_v54  ;;  %v1307_v15 = vsub.f32 1.0, %v1306_v61  ;;  %v1314_v39 = vand.u32 2147483647, %v4104_v0  ;;  %vm4486_vm4 = vmor %vm1310_vm0, %vm1311_vm3  ;;  %v934_v61 = vpop.f32.mrf.mxu2 }
 0x159   : > { %v3207_v6 = vpop.eup %3206  ;;  %v4467_v51 = vadd.f32 1.0, %v3205_v34  ;;  %v1538_v5 = vsel %vm1537_vm2, %v4119_v20, %v1534_v3  ;;  %v1316_v28 = vand.u32 2147483648, %v4104_v0  ;;  %v1914_v54 = vmul.f32 %v4145_v47, %v4111_v2  ;;  %v1097_v3 = vpop.f32.mrf.mxu3 }
 0x15a   : > { %v4472_v62 = vpop.eup %3208  ;;  %3214 = vrcp.f32 %v4459_v35  ;;  %v4475_v18 = vadd.f32 1.0, %v3207_v6  ;;  %v4479_v49 = vsel %vm4455_vm1, %v1542_v13, %v1538_v5  ;;  %v1308_v14 = vmul.f32 %v4142_v45, %v1307_v15  ;;  %v1059_v6 = vpop.f32.mrf.mxu1 }
 0x15b   : > { %6092 = vst [vmem:[#allocation9_spill] sm:$0xff] %v4479_v49  ;;  %v3211_v27 = vpop.eup %3210  ;;  %3216 = vrcp.f32 %v4467_v51  ;;  %v2352_v20 = vsub.f32 %v4479_v49, %v2151_v52  ;;  %vm4490_vm5 = vcmp.eq.f32.partialorder %v1314_v39, 8.507059e+37  ;;  %v1317_v42 = vor.u32 1.1754944e-38, %v1316_v28 }
 0x15c   : > { %v2464_v48 = vadd.f32 1.0, %v3211_v27  ;;  %3218 = vrcp.f32 %v4475_v18  ;;  %v1309_v43 = vadd.f32 %v4142_v45, %v1308_v14  ;;  %vm1918_vm6 = vweird.f32 %v4111_v2  ;;  %v4518_v14 = vld [vmem:[%s6035_s4] ss:$0 sm:$0xff] }
 0x15d   : > { %v4498_v1 = vpop.eup %3212  ;;  %v2384_v0 = vmul.f32 -50.0, %v2352_v20  ;;  %vm1919_vm7 = vweird.f32 %v4145_v47  ;;  %v1922_v52 = vand.u32 2147483647, %v4111_v2  ;;  %v1915_v13 = vsub.f32 1.0, %v1914_v54 }
 0x15e   : > { %3220 = vrcp.f32 %v2464_v48  ;;  %v1313_v34 = vsel %vm4486_vm4, %v4142_v45, %v1309_v43  ;;  %v1924_v15 = vand.u32 2147483648, %v4111_v2  ;;  %v935_v45 = vadd.f32 %v4518_v14, %v934_v61  ;;  %vm1920_vm10 = vmor %vm1918_vm6, %vm1919_vm7 }
 0x15f   : > { %v2435_v5 = vmul.f32 1.442695, %v2384_v0  ;;  %v4509_v39 = vsel %vm4490_vm5, %v1317_v42, %v1313_v34  ;;  %vm4511_vm8 = vcmp.eq.f32.partialorder %v1922_v52, 8.507059e+37  ;;  %v1916_v20 = vmul.f32 %v4145_v47, %v1915_v13  ;;  %2719 = vrot.lane.b32.xlu1 %v4363_v4, %s3471_s8 }
 0x160   : > { %6097 = vst [vmem:[#allocation10_spill] sm:$0xff] %v4509_v39  ;;  %v4521_v27 = vpop.eup %3214  ;;  %v1925_v8 = vor.u32 1.1754944e-38, %v1924_v15  ;;  %v1098_v42 = vadd.f32 %v4527_v12, %v1097_v3  ;;  %v897_v48 = vadd.f32 %v4518_v14, %v896_v11  ;;  %v1141_v54 = vsub.f32 0.0, %v935_v45 }
 0x161   : > { %v4533_v43 = vpop.eup %3216  ;;  %3222 = vpow2.f32 %v2435_v5  ;;  %v1060_v61 = vadd.f32 %v4527_v12, %v1059_v6  ;;  %v1546_v0 = vmul.f32 %v4158_v60, %v4122_v21  ;;  %v1917_v34 = vadd.f32 %v4145_v47, %v1916_v20 }
 0x162   : > { %v4538_v52 = vpop.eup %3218  ;;  %v1749_v13 = vsub.f32 0.0, %v1098_v42  ;;  %v1126_v3 = vsub.f32 0.0, %v897_v48  ;;  %vm1550_vm9 = vweird.f32 %v4122_v21  ;;  %v1197_v4 = vmul.f32 1.442695, %v1141_v54 }
 0x163   : > { %v1734_v11 = vsub.f32 0.0, %v1060_v61  ;;  %v1547_v15 = vsub.f32 1.0, %v1546_v0  ;;  %vm1551_vm11 = vweird.f32 %v4158_v60  ;;  %v1921_v5 = vsel %vm1920_vm10, %v4145_v47, %v1917_v34 }
 0x164   : > { %v4547_v6 = vpop.eup %3220  ;;  %v1805_v45 = vmul.f32 1.442695, %v1749_v13  ;;  %v1167_v20 = vmul.f32 1.442695, %v1126_v3  ;;  %v1554_v42 = vand.u32 2147483647, %v4122_v21  ;;  %v1926_v48 = vsel %vm4511_vm8, %v1925_v8, %v1921_v5  ;;  %vm4558_vm12 = vmor %vm1550_vm9, %vm1551_vm11 }
 0x165   : > { %3224 = vpow2.f32 %v1197_v4  ;;  %v1775_v49 = vmul.f32 1.442695, %v1734_v11  ;;  %v1548_v2 = vmul.f32 %v4158_v60, %v1547_v15  ;;  %v2337_v54 = vsub.f32 %v4509_v39, %v1926_v48  ;;  %2565 = vrot.lane.b32.xlu2 %v1926_v48, %s3470_s7  ;;  %v936_v11 = vpop.f32.mrf.mxu2  ;;  %v1099_v15 = vpop.f32.mrf.mxu3 }
 0x166   : > { %3226 = vpow2.f32 %v1805_v45  ;;  %vm4562_vm13 = vcmp.eq.f32.partialorder %v1554_v42, 8.507059e+37  ;;  %v1556_v28 = vand.u32 2147483648, %v4122_v21  ;;  %v2154_v34 = vmul.f32 %v4167_v37, %v4130_v31 }
 0x167   : > { %v3223_v8 = vpop.eup %3222  ;;  %3228 = vpow2.f32 %v1167_v20  ;;  %v1549_v0 = vadd.f32 %v4158_v60, %v1548_v2  ;;  %vm2158_vm14 = vweird.f32 %v4130_v31  ;;  %v2369_v3 = vmul.f32 -50.0, %v2337_v54  ;;  %2689 = vrot.lane.b32.xlu1 %v4414_v46, %s3471_s8 }
 0x168   : > { %v2480_v13 = vadd.f32 1.0, %v3223_v8  ;;  %3230 = vpow2.f32 %v1775_v49  ;;  %v1557_v4 = vor.u32 1.1754944e-38, %v1556_v28  ;;  %v2155_v5 = vsub.f32 1.0, %v2154_v34 }
 0x169   : > { %v1553_v21 = vsel %vm4558_vm12, %v4158_v60, %v1549_v0  ;;  %vm2159_vm15 = vweird.f32 %v4167_v37  ;;  %v2162_v45 = vand.u32 2147483647, %v4130_v31  ;;  %v2405_v20 = vmul.f32 1.442695, %v2369_v3 }
 0x16a   : > { %3232 = vrcp.f32 %v2480_v13  ;;  %v4580_v49 = vsel %vm4562_vm13, %v1557_v4, %v1553_v21  ;;  %v2164_v42 = vand.u32 2147483648, %v4130_v31  ;;  %v2156_v46 = vmul.f32 %v4167_v37, %v2155_v5  ;;  %vm2160_vm1 = vmor %vm2158_vm14, %vm2159_vm15 }
 0x16b   : > { %6104 = vst [vmem:[#allocation11_spill] sm:$0xff] %v4580_v49  ;;  %v3225_v48 = vpop.eup %3224  ;;  %vm4584_vm0 = vcmp.eq.f32.partialorder %v2162_v45, 8.507059e+37  ;;  %v937_v60 = vadd.f32 %v4518_v14, %v936_v11  ;;  %v1100_v54 = vadd.f32 %v4527_v12, %v1099_v15  ;;  %3234 = vpow2.f32 %v2405_v20 }
 0x16c   : > { %v3227_v47 = vpop.eup %3226  ;;  %v4590_v28 = vadd.f32 1.0, %v3225_v48  ;;  %v2165_v61 = vor.u32 1.1754944e-38, %v2164_v42  ;;  %v1561_v8 = vmul.f32 %v4269_v33, %v4226_v32  ;;  %v2157_v13 = vadd.f32 %v4167_v37, %v2156_v46 }
 0x16d   : > { %v3229_v0 = vpop.eup %3228  ;;  %v4594_v34 = vadd.f32 1.0, %v3227_v47  ;;  %v1142_v3 = vsub.f32 0.0, %v937_v60  ;;  %v1750_v4 = vsub.f32 0.0, %v1100_v54  ;;  %vm1565_vm2 = vweird.f32 %v4226_v32 }
 0x16e   : > { %v3231_v21 = vpop.eup %3230  ;;  %3236 = vrcp.f32 %v4590_v28  ;;  %v4598_v11 = vadd.f32 1.0, %v3229_v0  ;;  %v1562_v15 = vsub.f32 1.0, %v1561_v8  ;;  %v2161_v45 = vsel %vm2160_vm1, %v4167_v37, %v2157_v13 }
 0x16f   : > { %3238 = vrcp.f32 %v4594_v34  ;;  %v4606_v5 = vadd.f32 1.0, %v3231_v21  ;;  %v1199_v20 = vmul.f32 1.442695, %v1142_v3  ;;  %v2166_v48 = vsel %vm4584_vm0, %v2165_v61, %v2161_v45 }
 0x170   : > { %v4609_v42 = vpop.eup %3232  ;;  %3240 = vrcp.f32 %v4598_v11  ;;  %v1807_v46 = vmul.f32 1.442695, %v1750_v4  ;;  %v1563_v31 = vmul.f32 %v4269_v33, %v1562_v15  ;;  %v2353_v60 = vsub.f32 %v4580_v49, %v2166_v48  ;;  %2597 = vrot.lane.b32.xlu2 %v2166_v48, %s3470_s7  ;;  %v899_v48 = vpop.f32.mrf.mxu0 }
 0x171   : > { %3242 = vrcp.f32 %v4606_v5  ;;  %vm1566_vm3 = vweird.f32 %v4269_v33  ;;  %v1569_v37 = vand.u32 2147483647, %v4226_v32  ;;  %v3235_v54 = vpop.eup %3234  ;;  %v1571_v2 = vand.u32 2147483648, %v4226_v32 }
 0x172   : > { %3244 = vpow2.f32 %v1199_v20  ;;  %v1564_v47 = vadd.f32 %v4269_v33, %v1563_v31  ;;  %v2169_v61 = vmul.f32 %v4288_v24, %v4244_v29  ;;  %v2465_v8 = vadd.f32 1.0, %v3235_v54  ;;  %vm1567_vm4 = vmor %vm1565_vm2, %vm1566_vm3 }
 0x173   : > { %v2385_v0 = vmul.f32 -50.0, %v2353_v60  ;;  %3246 = vpow2.f32 %v1807_v46  ;;  %vm1570_vm5 = vcmp.eq.f32.partialorder %v1569_v37, 8.507059e+37  ;;  %v1572_v4 = vor.u32 1.1754944e-38, %v1571_v2  ;;  %v1062_v37 = vpop.f32.mrf.mxu1 }
 0x174   : > { %v4626_v13 = vpop.eup %3236  ;;  %v1568_v3 = vsel %vm1567_vm4, %v4269_v33, %v1564_v47  ;;  %v2170_v21 = vsub.f32 1.0, %v2169_v61  ;;  %vm2173_vm6 = vweird.f32 %v4244_v29  ;;  %3248 = vrcp.f32 %v2465_v8 }
 0x175   : > { %v4630_v15 = vpop.eup %3238  ;;  %v2437_v45 = vmul.f32 1.442695, %v2385_v0  ;;  %vm2174_vm7 = vweird.f32 %v4288_v24  ;;  %v2177_v20 = vand.u32 2147483647, %v4244_v29  ;;  %v4636_v46 = vsel %vm1570_vm5, %v1572_v4, %v1568_v3 }
 0x176   : > { %v4634_v32 = vpop.eup %3240  ;;  %6107 = vst [vmem:[#allocation12_spill] sm:$0xff] %v4636_v46  ;;  %v2171_v31 = vmul.f32 %v4288_v24, %v2170_v21  ;;  %v2179_v33 = vand.u32 2147483648, %v4244_v29  ;;  %v900_v60 = vadd.f32 %v4518_v14, %v899_v48  ;;  %v1063_v2 = vadd.f32 %v4527_v12, %v1062_v37  ;;  %vm2175_vm10 = vmor %vm2173_vm6, %vm2174_vm7 }
 0x177   : > { %v4641_v54 = vpop.eup %3242  ;;  %3250 = vpow2.f32 %v2437_v45  ;;  %vm4643_vm8 = vcmp.eq.f32.partialorder %v2177_v20, 8.507059e+37  ;;  %v1321_v61 = vmul.f32 %v4213_v9, %v4169_v22  ;;  %vm1325_vm9 = vweird.f32 %v4169_v22 }
 0x178   : > { %v3245_v8 = vpop.eup %3244  ;;  %v2172_v0 = vadd.f32 %v4288_v24, %v2171_v31  ;;  %v2180_v3 = vor.u32 1.1754944e-38, %v2179_v33  ;;  %v1127_v4 = vsub.f32 0.0, %v900_v60  ;;  %v1735_v45 = vsub.f32 0.0, %v1063_v2 }
 0x179   : > { %v3247_v21 = vpop.eup %3246  ;;  %v4652_v48 = vadd.f32 1.0, %v3245_v8  ;;  %v1322_v20 = vsub.f32 1.0, %v1321_v61  ;;  %vm1326_vm11 = vweird.f32 %v4213_v9  ;;  %v1329_v60 = vand.u32 2147483647, %v4169_v22 }
 0x17a   : > { %v4659_v37 = vadd.f32 1.0, %v3247_v21  ;;  %v2176_v31 = vsel %vm2175_vm10, %v4288_v24, %v2172_v0  ;;  %v1169_v33 = vmul.f32 1.442695, %v1127_v4  ;;  %v4663_v49 = vpop.eup %3248  ;;  %v1777_v29 = vmul.f32 1.442695, %v1735_v45  ;;  %vm1327_vm14 = vmor %vm1325_vm9, %vm1326_vm11 }
 0x17b   : > { %3252 = vrcp.f32 %v4652_v48  ;;  %v2181_v8 = vsel %vm4643_vm8, %v2180_v3, %v2176_v31  ;;  %v1323_v2 = vmul.f32 %v4213_v9, %v1322_v20  ;;  %vm4672_vm12 = vcmp.eq.f32.partialorder %v1329_v60, 8.507059e+37 }
 0x17c   : > { %3254 = vrcp.f32 %v4659_v37  ;;  %v2354_v61 = vsub.f32 %v4636_v46, %v2181_v8  ;;  %2599 = vrot.lane.b32.xlu0 %v2181_v8, %s3470_s7  ;;  %v1331_v0 = vand.u32 2147483648, %v4169_v22  ;;  %v1929_v3 = vmul.f32 %v4224_v30, %v4185_v41 }
 0x17d   : > { %v3251_v4 = vpop.eup %3250  ;;  %3256 = vpow2.f32 %v1169_v33  ;;  %v1324_v47 = vadd.f32 %v4213_v9, %v1323_v2  ;;  %vm1933_vm13 = vweird.f32 %v4185_v41  ;;  %vm1934_vm15 = vweird.f32 %v4224_v30 }
 0x17e   : > { %v2481_v21 = vadd.f32 1.0, %v3251_v4  ;;  %v2386_v45 = vmul.f32 -50.0, %v2354_v61  ;;  %3258 = vpow2.f32 %v1777_v29  ;;  %v1332_v20 = vor.u32 1.1754944e-38, %v1331_v0  ;;  %v939_v61 = vpop.f32.mrf.mxu2  ;;  %v1102_v4 = vpop.f32.mrf.mxu3  ;;  %vm1935_vm3 = vmor %vm1933_vm13, %vm1934_vm15 }
 0x17f   : > { %v1328_v31 = vsel %vm1327_vm14, %v4213_v9, %v1324_v47  ;;  %v1930_v60 = vsub.f32 1.0, %v1929_v3  ;;  %v1937_v33 = vand.u32 2147483647, %v4185_v41  ;;  %v1939_v29 = vand.u32 2147483648, %v4185_v41 }
 0x180   : > { %3260 = vrcp.f32 %v2481_v21  ;;  %v2439_v8 = vmul.f32 1.442695, %v2386_v45  ;;  %v4690_v2 = vsel %vm4672_vm12, %v1332_v20, %v1328_v31  ;;  %v940_v47 = vadd.f32 %v4518_v14, %v939_v61 }
 0x181   : > { %6112 = vst [vmem:[#allocation13_spill] sm:$0xff] %v4690_v2  ;;  %v4693_v22 = vpop.eup %3252  ;;  %v1931_v0 = vmul.f32 %v4224_v30, %v1930_v60  ;;  %vm4696_vm0 = vcmp.eq.f32.partialorder %v1937_v33, 8.507059e+37  ;;  %v1103_v3 = vadd.f32 %v4527_v12, %v1102_v4  ;;  %v1940_v24 = vor.u32 1.1754944e-38, %v1939_v29 }
 0x182   : > { %v4702_v21 = vpop.eup %3254  ;;  %3262 = vpow2.f32 %v2439_v8  ;;  %v1336_v45 = vmul.f32 %v4326_v63, %v4285_v55  ;;  %vm1340_vm1 = vweird.f32 %v4285_v55  ;;  %v1143_v60 = vsub.f32 0.0, %v940_v47 }
 0x183   : > { %v3257_v20 = vpop.eup %3256  ;;  %v1932_v31 = vadd.f32 %v4224_v30, %v1931_v0  ;;  %v1751_v33 = vsub.f32 0.0, %v1103_v3  ;;  %vm1341_vm2 = vweird.f32 %v4326_v63  ;;  %v1344_v29 = vand.u32 2147483647, %v4285_v55 }
 0x184   : > { %v3259_v39 = vpop.eup %3258  ;;  %v4709_v61 = vadd.f32 1.0, %v3257_v20  ;;  %v1337_v8 = vsub.f32 1.0, %v1336_v45  ;;  %v1346_v4 = vand.u32 2147483648, %v4285_v55  ;;  %v1201_v47 = vmul.f32 1.442695, %v1143_v60  ;;  %vm4737_vm5 = vmor %vm1340_vm1, %vm1341_vm2 }
 0x185   : > { %v4717_v46 = vadd.f32 1.0, %v3259_v39  ;;  %v1936_v0 = vsel %vm1935_vm3, %v4224_v30, %v1932_v31  ;;  %v1809_v3 = vmul.f32 1.442695, %v1751_v33  ;;  %vm4726_vm4 = vcmp.eq.f32.partialorder %v1344_v29, 8.507059e+37  ;;  %v901_v31 = vpop.f32.mrf.mxu0 }
 0x186   : > { %v4720_v7 = vpop.eup %3260  ;;  %3264 = vrcp.f32 %v4709_v61  ;;  %v1941_v20 = vsel %vm4696_vm0, %v1940_v24, %v1936_v0  ;;  %v1338_v41 = vmul.f32 %v4326_v63, %v1337_v8  ;;  %v1347_v9 = vor.u32 1.1754944e-38, %v1346_v4  ;;  %v1064_v0 = vpop.f32.mrf.mxu1 }
 0x187   : > { %3266 = vrcp.f32 %v4717_v46  ;;  %v2338_v39 = vsub.f32 %v4690_v2, %v1941_v20  ;;  %2567 = vrot.lane.b32.xlu2 %v1941_v20, %s3470_s7  ;;  %v1944_v24 = vmul.f32 %v4335_v16, %v4290_v57  ;;  %vm1948_vm6 = vweird.f32 %v4290_v57 }
 0x188   : > { %v3263_v60 = vpop.eup %3262  ;;  %3268 = vpow2.f32 %v1201_v47  ;;  %v1339_v33 = vadd.f32 %v4326_v63, %v1338_v41  ;;  %vm1949_vm7 = vweird.f32 %v4335_v16  ;;  %v1952_v20 = vand.u32 2147483647, %v4290_v57 }
 0x189   : > { %v2482_v8 = vadd.f32 1.0, %v3263_v60  ;;  %v2370_v29 = vmul.f32 -50.0, %v2338_v39  ;;  %3270 = vpow2.f32 %v1809_v3  ;;  %v1945_v55 = vsub.f32 1.0, %v1944_v24  ;;  %vm1950_vm10 = vmor %vm1948_vm6, %vm1949_vm7 }
 0x18a   : > { %v1343_v4 = vsel %vm4737_vm5, %v4326_v63, %v1339_v33  ;;  %v1954_v2 = vand.u32 2147483648, %v4290_v57  ;;  %v902_v47 = vadd.f32 %v4518_v14, %v901_v31  ;;  %vm4759_vm8 = vcmp.eq.f32.partialorder %v1952_v20, 8.507059e+37 }
 0x18b   : > { %3272 = vrcp.f32 %v2482_v8  ;;  %v2407_v41 = vmul.f32 1.442695, %v2370_v29  ;;  %v4754_v56 = vsel %vm4726_vm4, %v1347_v9, %v1343_v4  ;;  %v1946_v3 = vmul.f32 %v4335_v16, %v1945_v55 }
 0x18c   : > { %6119 = vst [vmem:[#allocation14_spill] sm:$0xff] %v4754_v56  ;;  %v4757_v39 = vpop.eup %3264  ;;  %v1955_v63 = vor.u32 1.1754944e-38, %v1954_v2  ;;  %v1128_v30 = vsub.f32 0.0, %v902_v47  ;;  %v1065_v60 = vadd.f32 %v4527_v12, %v1064_v0  ;;  %v1576_v45 = vmul.f32 %v4385_v44, %v4342_v10 }
 0x18d   : > { %v4764_v33 = vpop.eup %3266  ;;  %3274 = vpow2.f32 %v2407_v41  ;;  %v1947_v31 = vadd.f32 %v4335_v16, %v1946_v3  ;;  %vm1580_vm9 = vweird.f32 %v4342_v10  ;;  %vm1581_vm11 = vweird.f32 %v4385_v44 }
 0x18e   : > { %v3269_v9 = vpop.eup %3268  ;;  %v1171_v2 = vmul.f32 1.442695, %v1128_v30  ;;  %v1736_v8 = vsub.f32 0.0, %v1065_v60  ;;  %v1584_v29 = vand.u32 2147483647, %v4342_v10  ;;  %v1577_v20 = vsub.f32 1.0, %v1576_v45  ;;  %vm4801_vm13 = vmor %vm1580_vm9, %vm1581_vm11  ;;  %v941_v45 = vpop.f32.mrf.mxu2 }
 0x18f   : > { %v3271_v55 = vpop.eup %3270  ;;  %v4776_v0 = vadd.f32 1.0, %v3269_v9  ;;  %v1951_v4 = vsel %vm1950_vm10, %v4335_v16, %v1947_v31  ;;  %v1586_v47 = vand.u32 2147483648, %v4342_v10  ;;  %2721 = vrot.lane.b32.xlu2 %v4472_v62, %s3471_s8  ;;  %vm2188_vm14 = vweird.f32 %v4349_v26  ;;  %v1104_v9 = vpop.f32.mrf.mxu3 }
 0x190   : > { %v4782_v41 = vadd.f32 1.0, %v3271_v55  ;;  %v1956_v57 = vsel %vm4759_vm8, %v1955_v63, %v1951_v4  ;;  %3276 = vpow2.f32 %v1171_v2  ;;  %v1779_v3 = vmul.f32 1.442695, %v1736_v8 }
 0x191   : > { %v4786_v30 = vpop.eup %3272  ;;  %3278 = vrcp.f32 %v4776_v0  ;;  %v2339_v60 = vsub.f32 %v4754_v56, %v1956_v57  ;;  %2569 = vrot.lane.b32.xlu0 %v1956_v57, %s3470_s7  ;;  %v1578_v16 = vmul.f32 %v4385_v44, %v1577_v20  ;;  %vm4792_vm12 = vcmp.eq.f32.partialorder %v1584_v29, 8.507059e+37 }
 0x192   : > { %3280 = vrcp.f32 %v4782_v41  ;;  %v1587_v24 = vor.u32 1.1754944e-38, %v1586_v47  ;;  %v2184_v63 = vmul.f32 %v4393_v50, %v4349_v26  ;;  %vm2189_vm15 = vweird.f32 %v4393_v50 }
 0x193   : > { %v3275_v2 = vpop.eup %3274  ;;  %v2371_v8 = vmul.f32 -50.0, %v2339_v60  ;;  %3282 = vpow2.f32 %v1779_v3  ;;  %v1579_v29 = vadd.f32 %v4385_v44, %v1578_v16  ;;  %v2192_v4 = vand.u32 2147483647, %v4349_v26  ;;  %vm2190_vm1 = vmor %vm2188_vm14, %vm2189_vm15 }
 0x194   : > { %v2466_v10 = vadd.f32 1.0, %v3275_v2  ;;  %v2185_v55 = vsub.f32 1.0, %v2184_v63  ;;  %v2194_v20 = vand.u32 2147483648, %v4349_v26  ;;  %v942_v56 = vadd.f32 %v4518_v14, %v941_v45 }
 0x195   : > { %v2409_v47 = vmul.f32 1.442695, %v2371_v8  ;;  %v1583_v57 = vsel %vm4801_vm13, %v4385_v44, %v1579_v29  ;;  %v1105_v60 = vadd.f32 %v4527_v12, %v1104_v9  ;;  %vm4822_vm0 = vcmp.eq.f32.partialorder %v2192_v4, 8.507059e+37  ;;  %v904_v8 = vpop.f32.mrf.mxu0  ;;  %v1067_v9 = vpop.f32.mrf.mxu1 }
 0x196   : > { %v3277_v3 = vpop.eup %3276  ;;  %3284 = vrcp.f32 %v2466_v10  ;;  %v4819_v16 = vsel %vm4792_vm12, %v1587_v24, %v1583_v57  ;;  %v2186_v63 = vmul.f32 %v4393_v50, %v2185_v55  ;;  %v2195_v62 = vor.u32 1.1754944e-38, %v2194_v20 }
 0x197   : > { %6126 = vst [vmem:[#allocation15_spill] sm:$0xff] %v4819_v16  ;;  %v4826_v59 = vpop.eup %3278  ;;  %3286 = vpow2.f32 %v2409_v47  ;;  %v4828_v44 = vadd.f32 1.0, %v3277_v3  ;;  %v1144_v45 = vsub.f32 0.0, %v942_v56  ;;  %2691 = vrot.lane.b32.xlu2 %v4547_v6, %s3471_s8  ;;  %v1752_v29 = vsub.f32 0.0, %v1105_v60 }
 0x198   : > { %v4832_v31 = vpop.eup %3280  ;;  %v2187_v24 = vadd.f32 %v4393_v50, %v2186_v63  ;;  %v905_v10 = vadd.f32 %v4518_v14, %v904_v8  ;;  %v1068_v55 = vadd.f32 %v4527_v12, %v1067_v9  ;;  %v1351_v6 = vmul.f32 %v4434_v53, %v4405_v58 }
 0x199   : > { %v3283_v4 = vpop.eup %3282  ;;  %3288 = vrcp.f32 %v4828_v44  ;;  %v1203_v56 = vmul.f32 1.442695, %v1144_v45  ;;  %2723 = vrot.lane.b32.xlu0 %v4609_v42, %s3471_s8  ;;  %vm1355_vm2 = vweird.f32 %v4405_v58  ;;  %v1811_v57 = vmul.f32 1.442695, %v1752_v29 }
 0x19a   : > { %v4847_v20 = vadd.f32 1.0, %v3283_v4  ;;  %v2191_v47 = vsel %vm2190_vm1, %v4393_v50, %v2187_v24  ;;  %v1129_v60 = vsub.f32 0.0, %v905_v10  ;;  %v1737_v26 = vsub.f32 0.0, %v1068_v55 }
 0x19b   : > { %v2196_v3 = vsel %vm4822_vm0, %v2195_v62, %v2191_v47  ;;  %3290 = vpow2.f32 %v1203_v56  ;;  %v1352_v63 = vsub.f32 1.0, %v1351_v6  ;;  %vm1356_vm3 = vweird.f32 %v4434_v53 }
 0x19c   : > { %v4852_v8 = vpop.eup %3284  ;;  %3292 = vrcp.f32 %v4847_v20  ;;  %v2355_v42 = vsub.f32 %v4819_v16, %v2196_v3  ;;  %2601 = vrot.lane.b32.xlu1 %v2196_v3, %s3470_s7  ;;  %v1173_v45 = vmul.f32 1.442695, %v1129_v60  ;;  %v1781_v9 = vmul.f32 1.442695, %v1737_v26  ;;  %vm4862_vm4 = vmor %vm1355_vm2, %vm1356_vm3 }
 0x19d   : > { %v3287_v50 = vpop.eup %3286  ;;  %3294 = vpow2.f32 %v1811_v57  ;;  %v1353_v2 = vmul.f32 %v4434_v53, %v1352_v63  ;;  %v1359_v62 = vand.u32 2147483647, %v4405_v58  ;;  %v1361_v55 = vand.u32 2147483648, %v4405_v58  ;;  %v906_v3 = vpop.f32.mrf.mxu0 }
 0x19e   : > { %v2467_v24 = vadd.f32 1.0, %v3287_v50  ;;  %v2387_v29 = vmul.f32 -50.0, %v2355_v42  ;;  %3296 = vpow2.f32 %v1173_v45  ;;  %v1959_v6 = vmul.f32 %v4444_v19, %v4408_v25  ;;  %v1069_v45 = vpop.f32.mrf.mxu1 }
 0x19f   : > { %v4867_v4 = vpop.eup %3288  ;;  %3298 = vpow2.f32 %v1781_v9  ;;  %v1354_v56 = vadd.f32 %v4434_v53, %v1353_v2  ;;  %vm4872_vm5 = vcmp.eq.f32.partialorder %v1359_v62, 8.507059e+37  ;;  %v1362_v60 = vor.u32 1.1754944e-38, %v1361_v55  ;;  %v944_v62 = vpop.f32.mrf.mxu2 }
 0x1a0   : > { %3300 = vrcp.f32 %v2467_v24  ;;  %v2441_v47 = vmul.f32 1.442695, %v2387_v29  ;;  %v1960_v63 = vsub.f32 1.0, %v1959_v6  ;;  %vm1963_vm6 = vweird.f32 %v4408_v25 }
 0x1a1   : > { %v3291_v26 = vpop.eup %3290  ;;  %v1358_v58 = vsel %vm4862_vm4, %v4434_v53, %v1354_v56  ;;  %v1967_v42 = vand.u32 2147483647, %v4408_v25  ;;  %2693 = vrot.lane.b32.xlu0 %v4663_v49, %s3471_s8  ;;  %vm1964_vm7 = vweird.f32 %v4444_v19  ;;  %v1969_v2 = vand.u32 2147483648, %v4408_v25 }
 0x1a2   : > { %v4883_v50 = vpop.eup %3292  ;;  %3302 = vpow2.f32 %v2441_v47  ;;  %v4885_v9 = vadd.f32 1.0, %v3291_v26  ;;  %v4891_v24 = vsel %vm4872_vm5, %v1362_v60, %v1358_v58  ;;  %v1961_v29 = vmul.f32 %v4444_v19, %v1960_v63  ;;  %v1107_v63 = vpop.f32.mrf.mxu3  ;;  %vm1965_vm9 = vmor %vm1963_vm6, %vm1964_vm7 }
 0x1a3   : > { %v3295_v53 = vpop.eup %3294  ;;  %6133 = vst [vmem:[#allocation16_spill] sm:$0xff] %v4891_v24  ;;  %v907_v49 = vadd.f32 %v4518_v14, %v906_v3  ;;  %v945_v10 = vadd.f32 %v4518_v14, %v944_v62  ;;  %vm4899_vm8 = vcmp.eq.f32.partialorder %v1967_v42, 8.507059e+37  ;;  %v1070_v47 = vadd.f32 %v4527_v12, %v1069_v45 }
 0x1a4   : > { %v3297_v55 = vpop.eup %3296  ;;  %3304 = vrcp.f32 %v4885_v9  ;;  %v4897_v56 = vadd.f32 1.0, %v3295_v53  ;;  %v1962_v26 = vadd.f32 %v4444_v19, %v1961_v29  ;;  %v1970_v42 = vor.u32 1.1754944e-38, %v1969_v2 }
 0x1a5   : > { %v3299_v57 = vpop.eup %3298  ;;  %v4904_v60 = vadd.f32 1.0, %v3297_v55  ;;  %v1130_v58 = vsub.f32 0.0, %v907_v49  ;;  %v1145_v3 = vsub.f32 0.0, %v945_v10  ;;  %v1738_v53 = vsub.f32 0.0, %v1070_v47 }
 0x1a6   : > { %v4907_v62 = vpop.eup %3300  ;;  %3306 = vrcp.f32 %v4897_v56  ;;  %v1108_v45 = vadd.f32 %v4527_v12, %v1107_v63  ;;  %v4915_v55 = vadd.f32 1.0, %v3299_v57  ;;  %v1966_v29 = vsel %vm1965_vm9, %v4444_v19, %v1962_v26 }
 0x1a7   : > { %v1175_v49 = vmul.f32 1.442695, %v1130_v58  ;;  %v1205_v10 = vmul.f32 1.442695, %v1145_v3  ;;  %3308 = vrcp.f32 %v4904_v60  ;;  %v1971_v23 = vsel %vm4899_vm8, %v1970_v42, %v1966_v29 }
 0x1a8   : > { %v3303_v16 = vpop.eup %3302  ;;  %v1783_v17 = vmul.f32 1.442695, %v1738_v53  ;;  %v1753_v40 = vsub.f32 0.0, %v1108_v45  ;;  %v2340_v25 = vsub.f32 %v4891_v24, %v1971_v23  ;;  %2571 = vrot.lane.b32.xlu1 %v1971_v23, %s3470_s7  ;;  %v1591_v2 = vmul.f32 %v4498_v1, %v4436_v38 }
 0x1a9   : > { %3310 = vpow2.f32 %v1175_v49  ;;  %v2483_v19 = vadd.f32 1.0, %v3303_v16  ;;  %v1599_v58 = vand.u32 2147483647, %v4436_v38  ;;  %vm1595_vm10 = vweird.f32 %v4436_v38 }
 0x1aa   : > { %v4925_v47 = vpop.eup %3304  ;;  %3312 = vpow2.f32 %v1205_v10  ;;  %v1813_v57 = vmul.f32 1.442695, %v1753_v40  ;;  %v2372_v26 = vmul.f32 -50.0, %v2340_v25  ;;  %v1592_v6 = vsub.f32 1.0, %v1591_v2 }
 0x1ab   : > { %3314 = vrcp.f32 %v4915_v55  ;;  %v1601_v23 = vand.u32 2147483648, %v4436_v38  ;;  %v2199_v63 = vmul.f32 %v4521_v27, %v4459_v35  ;;  %vm1596_vm11 = vweird.f32 %v4498_v1 }
 0x1ac   : > { %v4929_v3 = vpop.eup %3306  ;;  %3316 = vpow2.f32 %v1783_v17  ;;  %v2411_v42 = vmul.f32 1.442695, %v2372_v26  ;;  %v1593_v40 = vmul.f32 %v4498_v1, %v1592_v6  ;;  %vm4939_vm12 = vcmp.eq.f32.partialorder %v1599_v58, 8.507059e+37  ;;  %vm4950_vm14 = vmor %vm1595_vm10, %vm1596_vm11 }
 0x1ad   : > { %3318 = vpow2.f32 %v1813_v57  ;;  %v4937_v16 = vpop.eup %3308  ;;  %v2200_v17 = vsub.f32 1.0, %v2199_v63  ;;  %vm2203_vm13 = vweird.f32 %v4459_v35  ;;  %v1602_v49 = vor.u32 1.1754944e-38, %v1601_v23 }
 0x1ae   : > { %3320 = vrcp.f32 %v2483_v19  ;;  %v1594_v29 = vadd.f32 %v4498_v1, %v1593_v40  ;;  %v2209_v10 = vand.u32 2147483648, %v4459_v35  ;;  %v1606_v25 = vmul.f32 %v4626_v13, %v4590_v28 }
 0x1af   : > { %v3311_v45 = vpop.eup %3310  ;;  %3322 = vpow2.f32 %v2411_v42  ;;  %v2201_v57 = vmul.f32 %v4521_v27, %v2200_v17  ;;  %vm2204_vm15 = vweird.f32 %v4521_v27  ;;  %v2207_v26 = vand.u32 2147483647, %v4459_v35 }
 0x1b0   : > { %v3313_v2 = vpop.eup %3312  ;;  %v4959_v58 = vadd.f32 1.0, %v3311_v45  ;;  %2725 = vrot.lane.b32.xlu1 %v4720_v7, %s3471_s8  ;;  %v1598_v38 = vsel %vm4950_vm14, %v4498_v1, %v1594_v29  ;;  %v1607_v23 = vsub.f32 1.0, %v1606_v25  ;;  %vm1610_vm0 = vweird.f32 %v4590_v28  ;;  %vm2205_vm2 = vmor %vm2203_vm13, %vm2204_vm15 }
 0x1b1   : > { %v4957_v6 = vpop.eup %3314  ;;  %v4967_v42 = vadd.f32 1.0, %v3313_v2  ;;  %v2202_v40 = vadd.f32 %v4521_v27, %v2201_v57  ;;  %v2210_v17 = vor.u32 1.1754944e-38, %v2209_v10  ;;  %vm1611_vm1 = vweird.f32 %v4626_v13 }
 0x1b2   : > { %v3317_v63 = vpop.eup %3316  ;;  %v4975_v7 = vsel %vm4939_vm12, %v1602_v49, %v1598_v38  ;;  %v1608_v1 = vmul.f32 %v4626_v13, %v1607_v23  ;;  %v1614_v29 = vand.u32 2147483647, %v4590_v28  ;;  %vm2208_vm3 = vcmp.eq.f32.partialorder %v2207_v26, 8.507059e+37  ;;  %vm4988_vm4 = vmor %vm1610_vm0, %vm1611_vm1  ;;  %v946_v23 = vpop.f32.mrf.mxu2 }
 0x1b3   : > { %v3319_v45 = vpop.eup %3318  ;;  %v4971_v24 = vadd.f32 1.0, %v3317_v63  ;;  %6140 = vst [vmem:[#allocation17_spill] sm:$0xff] %v4975_v7  ;;  %v2206_v10 = vsel %vm2205_vm2, %v4521_v27, %v2202_v40  ;;  %v1616_v49 = vand.u32 2147483648, %v4590_v28  ;;  %v2214_v35 = vmul.f32 %v4630_v15, %v4594_v34  ;;  %v1109_v28 = vpop.f32.mrf.mxu3 }
 0x1b4   : > { %v4983_v25 = vpop.eup %3320  ;;  %3324 = vrcp.f32 %v4959_v58  ;;  %v2211_v2 = vsel %vm2208_vm3, %v2210_v17, %v2206_v10  ;;  %v1609_v19 = vadd.f32 %v4626_v13, %v1608_v1  ;;  %v4998_v27 = vadd.f32 1.0, %v3319_v45 }
 0x1b5   : > { %v3323_v57 = vpop.eup %3322  ;;  %3326 = vrcp.f32 %v4967_v42  ;;  %v2356_v26 = vsub.f32 %v4975_v7, %v2211_v2  ;;  %2603 = vrot.lane.b32.xlu2 %v2211_v2, %s3470_s7  ;;  %v1617_v38 = vor.u32 1.1754944e-38, %v1616_v49  ;;  %vm1615_vm5 = vcmp.eq.f32.partialorder %v1614_v29, 8.507059e+37 }
 0x1b6   : > { %3328 = vrcp.f32 %v4971_v24  ;;  %v1613_v63 = vsel %vm4988_vm4, %v4626_v13, %v1609_v19  ;;  %v2215_v40 = vsub.f32 1.0, %v2214_v35  ;;  %vm2218_vm6 = vweird.f32 %v4594_v34 }
 0x1b7   : > { %v2388_v17 = vmul.f32 -50.0, %v2356_v26  ;;  %vm2219_vm7 = vweird.f32 %v4630_v15  ;;  %v2222_v45 = vand.u32 2147483647, %v4594_v34  ;;  %v2224_v10 = vand.u32 2147483648, %v4594_v34 }
 0x1b8   : > { %v2216_v1 = vmul.f32 %v4630_v15, %v2215_v40  ;;  %v947_v49 = vadd.f32 %v4518_v14, %v946_v23  ;;  %v1110_v2 = vadd.f32 %v4527_v12, %v1109_v28  ;;  %2695 = vrot.lane.b32.xlu1 %v4852_v8, %s3471_s8  ;;  %v2468_v13 = vadd.f32 1.0, %v3323_v57  ;;  %vm2220_vm9 = vmor %vm2218_vm6, %vm2219_vm7 }
 0x1b9   : > { %v2443_v29 = vmul.f32 1.442695, %v2388_v17  ;;  %v5015_v53 = vsel %vm1615_vm5, %v1617_v38, %v1613_v63  ;;  %v1366_v35 = vmul.f32 %v4533_v43, %v4467_v51  ;;  %vm2223_vm8 = vcmp.eq.f32.partialorder %v2222_v45, 8.507059e+37 }
 0x1ba   : > { %v5019_v19 = vpop.eup %3324  ;;  %v2217_v26 = vadd.f32 %v4630_v15, %v2216_v1  ;;  %v1146_v40 = vsub.f32 0.0, %v947_v49  ;;  %v1754_v7 = vsub.f32 0.0, %v1110_v2  ;;  %v2225_v12 = vor.u32 1.1754944e-38, %v2224_v10 }
 0x1bb   : > { %v5022_v14 = vpop.eup %3326  ;;  %v1367_v8 = vsub.f32 1.0, %v1366_v35  ;;  %vm1370_vm10 = vweird.f32 %v4467_v51  ;;  %vm1371_vm11 = vweird.f32 %v4533_v43  ;;  %3330 = vpow2.f32 %v2443_v29 }
 0x1bc   : > { %v5030_v57 = vpop.eup %3328  ;;  %v2221_v38 = vsel %vm2220_vm9, %v4630_v15, %v2217_v26  ;;  %v1374_v23 = vand.u32 2147483647, %v4467_v51  ;;  %v1376_v28 = vand.u32 2147483648, %v4467_v51  ;;  %v1207_v17 = vmul.f32 1.442695, %v1146_v40  ;;  %vm5043_vm12 = vmor %vm1370_vm10, %vm1371_vm11 }
 0x1bd   : > { %v2226_v63 = vsel %vm2223_vm8, %v2225_v12, %v2221_v38  ;;  %v1368_v34 = vmul.f32 %v4533_v43, %v1367_v8  ;;  %v1974_v45 = vmul.f32 %v4538_v52, %v4475_v18  ;;  %3332 = vrcp.f32 %v4998_v27 }
 0x1be   : > { %v2357_v1 = vsub.f32 %v5015_v53, %v2226_v63  ;;  %2605 = vrot.lane.b32.xlu0 %v2226_v63, %s3470_s7  ;;  %v1815_v10 = vmul.f32 1.442695, %v1754_v7  ;;  %v1377_v49 = vor.u32 1.1754944e-38, %v1376_v28  ;;  %vm1978_vm13 = vweird.f32 %v4475_v18 }
 0x1bf   : > { %v1369_v2 = vadd.f32 %v4533_v43, %v1368_v34  ;;  %v1975_v29 = vsub.f32 1.0, %v1974_v45  ;;  %vm1979_vm14 = vweird.f32 %v4538_v52  ;;  %v1982_v26 = vand.u32 2147483647, %v4475_v18 }
 0x1c0   : > { %v2389_v35 = vmul.f32 -50.0, %v2357_v1  ;;  %v1984_v40 = vand.u32 2147483648, %v4475_v18  ;;  %v1381_v51 = vmul.f32 %v4634_v32, %v4598_v11  ;;  %3334 = vpow2.f32 %v1207_v17  ;;  %vm5058_vm0 = vmor %vm1978_vm13, %vm1979_vm14 }
 0x1c1   : > { %v1373_v7 = vsel %vm5043_vm12, %v4533_v43, %v1369_v2  ;;  %vm1375_vm15 = vcmp.eq.f32.partialorder %v1374_v23, 8.507059e+37  ;;  %v1976_v12 = vmul.f32 %v4538_v52, %v1975_v29  ;;  %v3331_v8 = vpop.eup %3330  ;;  %3336 = vrcp.f32 %v2468_v13 }
 0x1c2   : > { %vm5062_vm1 = vcmp.eq.f32.partialorder %v1982_v26, 8.507059e+37  ;;  %vm1385_vm2 = vweird.f32 %v4598_v11  ;;  %vm1386_vm3 = vweird.f32 %v4634_v32  ;;  %v1985_v43 = vor.u32 1.1754944e-38, %v1984_v40 }
 0x1c3   : > { %v1977_v18 = vadd.f32 %v4538_v52, %v1976_v12  ;;  %v1382_v23 = vsub.f32 1.0, %v1381_v51  ;;  %v1389_v63 = vand.u32 2147483647, %v4598_v11  ;;  %v5070_v17 = vpop.eup %3332  ;;  %v2445_v13 = vmul.f32 1.442695, %v2389_v35  ;;  %vm5087_vm4 = vmor %vm1385_vm2, %vm1386_vm3 }
 0x1c4   : > { %v5072_v34 = vsel %vm1375_vm15, %v1377_v49, %v1373_v7  ;;  %v1391_v45 = vand.u32 2147483648, %v4598_v11  ;;  %v1989_v1 = vmul.f32 %v4641_v54, %v4606_v5  ;;  %3338 = vpow2.f32 %v1815_v10 }
 0x1c5   : > { %6149 = vst [vmem:[#allocation18_spill] sm:$0xff] %v5072_v34  ;;  %v1981_v15 = vsel %vm5058_vm0, %v4538_v52, %v1977_v18  ;;  %v1383_v2 = vmul.f32 %v4634_v32, %v1382_v23  ;;  %v2484_v29 = vadd.f32 1.0, %v3331_v8  ;;  %vm1993_vm5 = vweird.f32 %v4606_v5  ;;  %v909_v8 = vpop.f32.mrf.mxu0 }
 0x1c6   : > { %v1986_v26 = vsel %vm5062_vm1, %v1985_v43, %v1981_v15  ;;  %v1392_v35 = vor.u32 1.1754944e-38, %v1391_v45  ;;  %v3335_v10 = vpop.eup %3334  ;;  %vm1390_vm6 = vcmp.eq.f32.partialorder %v1389_v63, 8.507059e+37  ;;  %v1990_v51 = vsub.f32 1.0, %v1989_v1  ;;  %v5107_v43 = vld [vmem:[%s6035_s4] ss:$0 sm:$0xff]  ;;  %v949_v63 = vpop.f32.mrf.mxu2 }
 0x1c7   : > { %v2341_v52 = vsub.f32 %v5072_v34, %v1986_v26  ;;  %2573 = vrot.lane.b32.xlu2 %v1986_v26, %s3470_s7  ;;  %v1384_v40 = vadd.f32 %v4634_v32, %v1383_v2  ;;  %v5095_v7 = vpop.eup %3336  ;;  %3340 = vpow2.f32 %v2445_v13  ;;  %vm1994_vm7 = vweird.f32 %v4641_v54  ;;  %v1072_v15 = vpop.f32.mrf.mxu1 }
 0x1c8   : > { %v1997_v11 = vand.u32 2147483647, %v4606_v5  ;;  %v1999_v12 = vand.u32 2147483648, %v4606_v5  ;;  %v1991_v18 = vmul.f32 %v4641_v54, %v1990_v51  ;;  %v910_v23 = vadd.f32 %v5107_v43, %v909_v8  ;;  %vm1995_vm9 = vmor %vm1993_vm5, %vm1994_vm7 }
 0x1c9   : > { %v2373_v38 = vmul.f32 -50.0, %v2341_v52  ;;  %v1388_v28 = vsel %vm5087_vm4, %v4634_v32, %v1384_v40  ;;  %v5110_v13 = vadd.f32 1.0, %v3335_v10  ;;  %v950_v32 = vadd.f32 %v5107_v43, %v949_v63  ;;  %v5123_v40 = vld [vmem:[%s6035_s4 + $0x1] ss:$0 sm:$0xff]  ;;  %v1112_v10 = vpop.f32.mrf.mxu3 }
 0x1ca   : > { %v5112_v45 = vsel %vm1390_vm6, %v1392_v35, %v1388_v28  ;;  %vm5114_vm8 = vcmp.eq.f32.partialorder %v1997_v11, 8.507059e+37  ;;  %v3339_v2 = vpop.eup %3338  ;;  %v1992_v49 = vadd.f32 %v4641_v54, %v1991_v18  ;;  %v1131_v52 = vsub.f32 0.0, %v910_v23 }
 0x1cb   : > { %v2413_v26 = vmul.f32 1.442695, %v2373_v38  ;;  %v1073_v35 = vadd.f32 %v5123_v40, %v1072_v15  ;;  %v2000_v51 = vor.u32 1.1754944e-38, %v1999_v12  ;;  %v1147_v11 = vsub.f32 0.0, %v950_v32 }
 0x1cc   : > { %v1113_v8 = vadd.f32 %v5123_v40, %v1112_v10  ;;  %v1621_v38 = vmul.f32 %v4693_v22, %v4652_v48  ;;  %v1996_v28 = vsel %vm1995_vm9, %v4641_v54, %v1992_v49  ;;  %v1177_v18 = vmul.f32 1.442695, %v1131_v52 }
 0x1cd   : > { %3342 = vpow2.f32 %v2413_v26  ;;  %v1739_v23 = vsub.f32 0.0, %v1073_v35  ;;  %v3341_v63 = vpop.eup %3340  ;;  %v2001_v15 = vsel %vm5114_vm8, %v2000_v51, %v1996_v28  ;;  %v1209_v34 = vmul.f32 1.442695, %v1147_v11  ;;  %v911_v35 = vpop.f32.mrf.mxu0 }
 0x1ce   : > { %3344 = vrcp.f32 %v2484_v29  ;;  %v1755_v5 = vsub.f32 0.0, %v1113_v8  ;;  %v2342_v12 = vsub.f32 %v5112_v45, %v2001_v15  ;;  %2575 = vrot.lane.b32.xlu0 %v2001_v15, %s3470_s7  ;;  %v1622_v10 = vsub.f32 1.0, %v1621_v38 }
 0x1cf   : > { %3346 = vpow2.f32 %v1177_v18  ;;  %v1785_v32 = vmul.f32 1.442695, %v1739_v23  ;;  %2727 = vrot.lane.b32.xlu2 %v4786_v30, %s3471_s8  ;;  %v5141_v54 = vadd.f32 1.0, %v3339_v2  ;;  %v2485_v26 = vadd.f32 1.0, %v3341_v63 }
 0x1d0   : > { %3348 = vrcp.f32 %v5110_v13  ;;  %v1817_v29 = vmul.f32 1.442695, %v1755_v5  ;;  %v2374_v1 = vmul.f32 -50.0, %v2342_v12  ;;  %v1623_v49 = vmul.f32 %v4693_v22, %v1622_v10 }
 0x1d1   : > { %3350 = vpow2.f32 %v1209_v34  ;;  %v2229_v52 = vmul.f32 %v4702_v21, %v4659_v37  ;;  %vm1625_vm10 = vweird.f32 %v4652_v48  ;;  %vm1626_vm11 = vweird.f32 %v4693_v22 }
 0x1d2   : > { %3352 = vpow2.f32 %v1785_v32  ;;  %v2415_v11 = vmul.f32 1.442695, %v2374_v1  ;;  %v1629_v34 = vand.u32 2147483647, %v4652_v48  ;;  %v1631_v2 = vand.u32 2147483648, %v4652_v48  ;;  %vm5158_vm12 = vmor %vm1625_vm10, %vm1626_vm11  ;;  %v951_v32 = vpop.f32.mrf.mxu2 }
 0x1d3   : > { %v3343_v51 = vpop.eup %3342  ;;  %3354 = vpow2.f32 %v1817_v29  ;;  %v2230_v8 = vsub.f32 1.0, %v2229_v52  ;;  %v1624_v28 = vadd.f32 %v4693_v22, %v1623_v49  ;;  %v2239_v18 = vand.u32 2147483648, %v4659_v37 }
 0x1d4   : > { %v5148_v30 = vpop.eup %3344  ;;  %3356 = vrcp.f32 %v5141_v54  ;;  %v912_v23 = vadd.f32 %v5107_v43, %v911_v35  ;;  %v2469_v15 = vadd.f32 1.0, %v3343_v51  ;;  %vm2234_vm13 = vweird.f32 %v4702_v21  ;;  %v1074_v35 = vpop.f32.mrf.mxu1 }
 0x1d5   : > { %v3347_v38 = vpop.eup %3346  ;;  %3358 = vrcp.f32 %v2485_v26  ;;  %v2231_v12 = vmul.f32 %v4702_v21, %v2230_v8  ;;  %v2237_v48 = vand.u32 2147483647, %v4659_v37  ;;  %vm2233_vm14 = vweird.f32 %v4659_v37 }
 0x1d6   : > { %v5156_v63 = vpop.eup %3348  ;;  %3360 = vpow2.f32 %v2415_v11  ;;  %2729 = vrot.lane.b32.xlu0 %v4983_v25, %s3471_s8  ;;  %v5170_v26 = vadd.f32 1.0, %v3347_v38  ;;  %vm5172_vm15 = vcmp.eq.f32.partialorder %v1629_v34, 8.507059e+37  ;;  %v1632_v49 = vor.u32 1.1754944e-38, %v1631_v2  ;;  %vm2235_vm0 = vmor %vm2233_vm14, %vm2234_vm13  ;;  %v1114_v38 = vpop.f32.mrf.mxu3 }
 0x1d7   : > { %v3351_v10 = vpop.eup %3350  ;;  %2697 = vrot.lane.b32.xlu2 %v4907_v62, %s3471_s8  ;;  %v2232_v52 = vadd.f32 %v4702_v21, %v2231_v12  ;;  %v1628_v37 = vsel %vm5158_vm12, %v4693_v22, %v1624_v28  ;;  %v2240_v62 = vor.u32 1.1754944e-38, %v2239_v18  ;;  %v1132_v25 = vsub.f32 0.0, %v912_v23 }
 0x1d8   : > { %v3353_v29 = vpop.eup %3352  ;;  %v952_v11 = vadd.f32 %v5107_v43, %v951_v32  ;;  %3362 = vrcp.f32 %v2469_v15  ;;  %v5185_v8 = vadd.f32 1.0, %v3351_v10  ;;  %vm2238_vm1 = vcmp.eq.f32.partialorder %v2237_v48, 8.507059e+37 }
 0x1d9   : > { %v3355_v51 = vpop.eup %3354  ;;  %v2236_v2 = vsel %vm2235_vm0, %v4702_v21, %v2232_v52  ;;  %v5190_v5 = vadd.f32 1.0, %v3353_v29  ;;  %v1075_v28 = vadd.f32 %v5123_v40, %v1074_v35  ;;  %v1396_v18 = vmul.f32 %v4757_v39, %v4709_v61 }
 0x1da   : > { %v5183_v34 = vpop.eup %3356  ;;  %v2241_v22 = vsel %vm2238_vm1, %v2240_v62, %v2236_v2  ;;  %3364 = vrcp.f32 %v5170_v26  ;;  %v5196_v43 = vadd.f32 1.0, %v3355_v51  ;;  %v5200_v23 = vsel %vm5172_vm15, %v1632_v49, %v1628_v37 }
 0x1db   : > { %v5188_v12 = vpop.eup %3358  ;;  %6158 = vst [vmem:[#allocation19_spill] sm:$0xff] %v5200_v23  ;;  %2607 = vrot.lane.b32.xlu1 %v2241_v22, %s3470_s7  ;;  %v1179_v15 = vmul.f32 1.442695, %v1132_v25  ;;  %v1148_v48 = vsub.f32 0.0, %v952_v11  ;;  %v1115_v32 = vadd.f32 %v5123_v40, %v1114_v38  ;;  %v1397_v10 = vsub.f32 1.0, %v1396_v18 }
 0x1dc   : > { %v3361_v21 = vpop.eup %3360  ;;  %3366 = vrcp.f32 %v5185_v8  ;;  %v2358_v29 = vsub.f32 %v5200_v23, %v2241_v22  ;;  %v1740_v52 = vsub.f32 0.0, %v1075_v28  ;;  %v2004_v35 = vmul.f32 %v4764_v33, %v4717_v46 }
 0x1dd   : > { %3368 = vrcp.f32 %v5190_v5  ;;  %v2470_v49 = vadd.f32 1.0, %v3361_v21  ;;  %v1211_v40 = vmul.f32 1.442695, %v1148_v48  ;;  %v1756_v51 = vsub.f32 0.0, %v1115_v32 }
 0x1de   : > { %2699 = vrot.lane.b32.xlu0 %v5095_v7, %s3471_s8  ;;  %v5209_v1 = vpop.eup %3362  ;;  %3370 = vrcp.f32 %v5196_v43  ;;  %v1398_v37 = vmul.f32 %v4757_v39, %v1397_v10  ;;  %v2005_v25 = vsub.f32 1.0, %v2004_v35  ;;  %vm2008_vm2 = vweird.f32 %v4717_v46 }
 0x1df   : > { %3372 = vpow2.f32 %v1179_v15  ;;  %vm2009_vm3 = vweird.f32 %v4764_v33  ;;  %v2012_v7 = vand.u32 2147483647, %v4717_v46  ;;  %v2390_v11 = vmul.f32 -50.0, %v2358_v29 }
 0x1e0   : > { %v5215_v62 = vpop.eup %3364  ;;  %v1787_v2 = vmul.f32 1.442695, %v1740_v52  ;;  %vm1400_vm4 = vweird.f32 %v4709_v61  ;;  %v2014_v38 = vand.u32 2147483648, %v4717_v46  ;;  %3374 = vrcp.f32 %v2470_v49  ;;  %vm5232_vm6 = vmor %vm2008_vm2, %vm2009_vm3 }
 0x1e1   : > { %vm1401_vm5 = vweird.f32 %v4757_v39  ;;  %v1406_v28 = vand.u32 2147483648, %v4709_v61  ;;  %v2006_v18 = vmul.f32 %v4764_v33, %v2005_v25  ;;  %3376 = vpow2.f32 %v1211_v40 }
 0x1e2   : > { %v5222_v22 = vpop.eup %3366  ;;  %v1404_v15 = vand.u32 2147483647, %v4709_v61  ;;  %v2015_v32 = vor.u32 1.1754944e-38, %v2014_v38  ;;  %v1636_v10 = vmul.f32 %v4826_v59, %v4776_v0  ;;  %v1819_v52 = vmul.f32 1.442695, %v1756_v51  ;;  %vm5246_vm8 = vmor %vm1400_vm4, %vm1401_vm5 }
 0x1e3   : > { %v5227_v21 = vpop.eup %3368  ;;  %v1399_v49 = vadd.f32 %v4757_v39, %v1398_v37  ;;  %v2007_v35 = vadd.f32 %v4764_v33, %v2006_v18  ;;  %vm2013_vm7 = vcmp.eq.f32.partialorder %v2012_v7, 8.507059e+37  ;;  %v2447_v25 = vmul.f32 1.442695, %v2390_v11 }
 0x1e4   : > { %v5238_v29 = vpop.eup %3370  ;;  %3378 = vpow2.f32 %v1787_v2  ;;  %v1637_v38 = vsub.f32 1.0, %v1636_v10  ;;  %v2244_v51 = vmul.f32 %v4832_v31, %v4782_v41  ;;  %v1407_v23 = vor.u32 1.1754944e-38, %v1406_v28 }
 0x1e5   : > { %v3373_v40 = vpop.eup %3372  ;;  %v2011_v37 = vsel %vm5232_vm6, %v4764_v33, %v2007_v35  ;;  %vm1640_vm9 = vweird.f32 %v4776_v0  ;;  %vm1641_vm10 = vweird.f32 %v4826_v59  ;;  %v1644_v11 = vand.u32 2147483647, %v4776_v0 }
 0x1e6   : > { %v5257_v7 = vsel %vm2013_vm7, %v2015_v32, %v2011_v37  ;;  %v1638_v61 = vmul.f32 %v4826_v59, %v1637_v38  ;;  %v1646_v2 = vand.u32 2147483648, %v4776_v0  ;;  %v5262_v18 = vpop.eup %3374  ;;  %3380 = vpow2.f32 %v1819_v52  ;;  %vm5272_vm12 = vmor %vm1640_vm9, %vm1641_vm10  ;;  %v2558_v0 = vpop.permute.xlu0 %2557 }
 0x1e7   : > { %v1403_v28 = vsel %vm5246_vm8, %v4757_v39, %v1399_v49  ;;  %vm1405_vm11 = vcmp.eq.f32.partialorder %v1404_v15, 8.507059e+37  ;;  %2577 = vrot.lane.b32.xlu1 %v5257_v7, %s3470_s7  ;;  %v2245_v33 = vsub.f32 1.0, %v2244_v51  ;;  %v3377_v48 = vpop.eup %3376  ;;  %3382 = vpow2.f32 %v2447_v25 }
 0x1e8   : > { %v1639_v32 = vadd.f32 %v4826_v59, %v1638_v61  ;;  %vm2248_vm13 = vweird.f32 %v4782_v41  ;;  %vm2249_vm14 = vweird.f32 %v4832_v31  ;;  %v5278_v39 = vadd.f32 1.0, %v3373_v40 }
 0x1e9   : > { %v2246_v15 = vmul.f32 %v4832_v31, %v2245_v33  ;;  %v2252_v52 = vand.u32 2147483647, %v4782_v41  ;;  %v2254_v49 = vand.u32 2147483648, %v4782_v41  ;;  %v5283_v25 = vsel %vm1405_vm11, %v1407_v23, %v1403_v28  ;;  %vm5289_vm0 = vmor %vm2248_vm13, %vm2249_vm14 }
 0x1ea   : > { %v3379_v35 = vpop.eup %3378  ;;  %vm5285_vm15 = vcmp.eq.f32.partialorder %v1644_v11, 8.507059e+37  ;;  %v1647_v46 = vor.u32 1.1754944e-38, %v1646_v2  ;;  %v1651_v40 = vmul.f32 %v4925_v47, %v4885_v9  ;;  %v1643_v51 = vsel %vm5272_vm12, %v4826_v59, %v1639_v32 }
 0x1eb   : > { %v2247_v41 = vadd.f32 %v4832_v31, %v2246_v15  ;;  %vm2253_vm1 = vcmp.eq.f32.partialorder %v2252_v52, 8.507059e+37  ;;  %vm1655_vm2 = vweird.f32 %v4885_v9  ;;  %v2255_v23 = vor.u32 1.1754944e-38, %v2254_v49 }
 0x1ec   : > { %v1652_v37 = vsub.f32 1.0, %v1651_v40  ;;  %vm1656_vm3 = vweird.f32 %v4925_v47  ;;  %v1659_v61 = vand.u32 2147483647, %v4885_v9  ;;  %v5306_v11 = vpop.eup %3380  ;;  %3384 = vrcp.f32 %v5278_v39 }
 0x1ed   : > { %v2251_v59 = vsel %vm5289_vm0, %v4832_v31, %v2247_v41  ;;  %v1661_v2 = vand.u32 2147483648, %v4885_v9  ;;  %v2259_v28 = vmul.f32 %v4929_v3, %v4897_v56  ;;  %v5315_v33 = vpop.eup %3382  ;;  %v5317_v32 = vadd.f32 1.0, %v3377_v48  ;;  %vm5336_vm4 = vmor %vm1655_vm2, %vm1656_vm3 }
 0x1ee   : > { %v5319_v10 = vadd.f32 1.0, %v3379_v35  ;;  %v2256_v15 = vsel %vm2253_vm1, %v2255_v23, %v2251_v59  ;;  %v1653_v52 = vmul.f32 %v4925_v47, %v1652_v37  ;;  %v2343_v49 = vsub.f32 %v5283_v25, %v5257_v7 }
 0x1ef   : > { %2731 = vrot.lane.b32.xlu1 %v5148_v30, %s3471_s8  ;;  %v5329_v31 = vsel %vm5285_vm15, %v1647_v46, %v1643_v51  ;;  %2609 = vrot.lane.b32.xlu2 %v2256_v15, %s3470_s7  ;;  %v2260_v35 = vsub.f32 1.0, %v2259_v28  ;;  %vm2263_vm5 = vweird.f32 %v4897_v56  ;;  %v5341_v30 = vpop.permute.xlu2 %2591  ;;  %vm5344_vm6 = vcmp.eq.f32.partialorder %v1659_v61, 8.507059e+37 }
 0x1f0   : > { %v1654_v7 = vadd.f32 %v4925_v47, %v1653_v52  ;;  %v2269_v46 = vand.u32 2147483648, %v4897_v56  ;;  %v1411_v9 = vmul.f32 %v4867_v4, %v4828_v44  ;;  %vm2781_vm7 = vcmask 130048  }
 0x1f1   : > { %v1662_v38 = vor.u32 1.1754944e-38, %v1661_v2  ;;  %v2261_v40 = vmul.f32 %v4929_v3, %v2260_v35  ;;  %vm2264_vm8 = vweird.f32 %v4929_v3  ;;  %v2267_v51 = vand.u32 2147483647, %v4897_v56 }
 0x1f2   : > { %v1658_v41 = vsel %vm5336_vm4, %v4925_v47, %v1654_v7  ;;  %v1412_v23 = vsub.f32 1.0, %v1411_v9  ;;  %vm1415_vm9 = vweird.f32 %v4828_v44  ;;  %vm1416_vm10 = vweird.f32 %v4867_v4  ;;  %v5364_v37 = vpop.eup %3384  ;;  %vm2265_vm11 = vmor %vm2263_vm5, %vm2264_vm8 }
 0x1f3   : > { %3386 = vrcp.f32 %v5317_v32  ;;  %v2375_v61 = vmul.f32 -50.0, %v2343_v49  ;;  %v2262_v59 = vadd.f32 %v4929_v3, %v2261_v40  ;;  %v1421_v2 = vand.u32 2147483648, %v4828_v44  ;;  %vm5385_vm13 = vmor %vm1415_vm9, %vm1416_vm10 }
 0x1f4   : > { %v2270_v47 = vor.u32 1.1754944e-38, %v2269_v46  ;;  %v1413_v28 = vmul.f32 %v4867_v4, %v1412_v23  ;;  %v1419_v52 = vand.u32 2147483647, %v4828_v44  ;;  %v2019_v48 = vmul.f32 %v4883_v50, %v4847_v20 }
 0x1f5   : > { %v2359_v35 = vsub.f32 %v5329_v31, %v2256_v15  ;;  %v5378_v49 = vsel %vm5344_vm6, %v1662_v38, %v1658_v41  ;;  %v2266_v7 = vsel %vm2265_vm11, %v4929_v3, %v2262_v59  ;;  %vm2268_vm12 = vcmp.eq.f32.partialorder %v2267_v51, 8.507059e+37 }
 0x1f6   : > { %v2271_v46 = vsel %vm2268_vm12, %v2270_v47, %v2266_v7  ;;  %v1414_v9 = vadd.f32 %v4867_v4, %v1413_v28  ;;  %v2020_v40 = vsub.f32 1.0, %v2019_v48  ;;  %vm2023_vm14 = vweird.f32 %v4847_v20 }
 0x1f7   : > { %2611 = vrot.lane.b32.xlu0 %v2271_v46, %s3470_s7  ;;  %2701 = vrot.lane.b32.xlu1 %v5209_v1, %s3471_s8  ;;  %v1422_v3 = vor.u32 1.1754944e-38, %v1421_v2  ;;  %vm2024_vm15 = vweird.f32 %v4883_v50  ;;  %v2027_v44 = vand.u32 2147483647, %v4847_v20  ;;  %v2029_v15 = vand.u32 2147483648, %v4847_v20  ;;  %v2686_v28 = vpop.permute.xlu2 %2685 }
 0x1f8   : > { %v1418_v38 = vsel %vm5385_vm13, %v4867_v4, %v1414_v9  ;;  %vm5401_vm0 = vcmp.eq.f32.partialorder %v1419_v52, 8.507059e+37  ;;  %v2021_v41 = vmul.f32 %v4883_v50, %v2020_v40  ;;  %vm2814_vm1 = vcmask 261120   ;;  %vm5410_vm2 = vmor %vm2023_vm14, %vm2024_vm15 }
 0x1f9   : > { %v5406_v1 = vpop.eup %3386  ;;  %v2417_v23 = vmul.f32 1.442695, %v2375_v61  ;;  %v2391_v59 = vmul.f32 -50.0, %v2359_v35  ;;  %v2030_v47 = vor.u32 1.1754944e-38, %v2029_v15  ;;  %vm2847_vm3 = vcmask 392192  }
 0x1fa   : > { %v2022_v4 = vadd.f32 %v4883_v50, %v2021_v41  ;;  %vm2028_vm4 = vcmp.eq.f32.partialorder %v2027_v44, 8.507059e+37  ;;  %v2782_v61 = vsel %vm2781_vm7, %v4016_v36, %v2558_v0  ;;  %v1426_v20 = vmul.f32 %v4937_v16, %v4904_v60 }
 0x1fb   : > { %v2360_v52 = vsub.f32 %v5378_v49, %v2271_v46  ;;  %v5427_v48 = vsel %vm5401_vm0, %v1422_v3, %v1418_v38  ;;  %v2815_v35 = vsel %vm2814_vm1, %v2782_v61, %v2686_v28  ;;  %vm1430_vm5 = vweird.f32 %v4904_v60 }
 0x1fc   : > { %v2026_v7 = vsel %vm5410_vm2, %v4883_v50, %v2022_v4  ;;  %2848 = vst.msk [vmem:[%s5417_s23] sm:$0xff] %vm2847_vm3, %v2815_v35  ;;  %v1427_v36 = vsub.f32 1.0, %v1426_v20  ;;  %vm1431_vm6 = vweird.f32 %v4937_v16  ;;  %v1436_v56 = vand.u32 2147483648, %v4904_v60 }
 0x1fd   : > { %v2486_v46 = vadd.f32 1.0, %v5315_v33  ;;  %v2031_v9 = vsel %vm2028_vm4, %v2030_v47, %v2026_v7  ;;  %v1434_v40 = vand.u32 2147483647, %v4904_v60  ;;  %v2034_v3 = vmul.f32 %v4957_v6, %v4915_v55  ;;  %vm5447_vm8 = vmor %vm1430_vm5, %vm1431_vm6 }
 0x1fe   : > { %3388 = vpow2.f32 %v2417_v23  ;;  %v2449_v44 = vmul.f32 1.442695, %v2391_v59  ;;  %v2344_v15 = vsub.f32 %v5427_v48, %v2031_v9  ;;  %2579 = vrot.lane.b32.xlu2 %v2031_v9, %s3470_s7  ;;  %v1428_v50 = vmul.f32 %v4937_v16, %v1427_v36 }
 0x1ff   : > { %v2035_v33 = vsub.f32 1.0, %v2034_v3  ;;  %vm2038_vm9 = vweird.f32 %v4915_v55  ;;  %vm2039_vm10 = vweird.f32 %v4957_v6  ;;  %v2042_v38 = vand.u32 2147483647, %v4915_v55 }
 0x200   : > { %v2392_v51 = vmul.f32 -50.0, %v2360_v52  ;;  %v1429_v41 = vadd.f32 %v4937_v16, %v1428_v50  ;;  %v1437_v23 = vor.u32 1.1754944e-38, %v1436_v56  ;;  %v2044_v59 = vand.u32 2147483648, %v4915_v55  ;;  %vm5462_vm12 = vmor %vm2038_vm9, %vm2039_vm10 }
 0x201   : > { %v2376_v2 = vmul.f32 -50.0, %v2344_v15  ;;  %vm1435_vm11 = vcmp.eq.f32.partialorder %v1434_v40, 8.507059e+37  ;;  %v2036_v60 = vmul.f32 %v4957_v6, %v2035_v33  ;;  %v1666_v47 = vmul.f32 %v5022_v14, %v4967_v42 }
 0x202   : > { %3390 = vpow2.f32 %v2449_v44  ;;  %v1433_v4 = vsel %vm5447_vm8, %v4937_v16, %v1429_v41  ;;  %vm2043_vm13 = vcmp.eq.f32.partialorder %v2042_v38, 8.507059e+37  ;;  %v2045_v61 = vor.u32 1.1754944e-38, %v2044_v59 }
 0x203   : > { %v2037_v55 = vadd.f32 %v4957_v6, %v2036_v60  ;;  %v1667_v20 = vsub.f32 1.0, %v1666_v47  ;;  %vm1670_vm14 = vweird.f32 %v4967_v42  ;;  %vm1671_vm15 = vweird.f32 %v5022_v14 }
 0x204   : > { %v3389_v52 = vpop.eup %3388  ;;  %v5469_v35 = vsel %vm1435_vm11, %v1437_v23, %v1433_v4  ;;  %v1674_v7 = vand.u32 2147483647, %v4967_v42  ;;  %v1676_v16 = vand.u32 2147483648, %v4967_v42  ;;  %v2274_v36 = vmul.f32 %v5070_v17, %v4998_v27  ;;  %vm5479_vm0 = vmor %vm1670_vm14, %vm1671_vm15  ;;  %v5486_v42 = vpop.permute.xlu2 %2565 }
 0x205   : > { %v2451_v56 = vmul.f32 1.442695, %v2392_v51  ;;  %v2419_v9 = vmul.f32 1.442695, %v2376_v2  ;;  %v2041_v40 = vsel %vm5462_vm12, %v4957_v6, %v2037_v55  ;;  %v1668_v3 = vmul.f32 %v5022_v14, %v1667_v20  ;;  %v5490_v6 = vpop.permute.xlu1 %2589  ;;  %v5511_v55 = vpop.permute.xlu0 %2559 }
 0x206   : > { %v2046_v44 = vsel %vm2043_vm13, %v2045_v61, %v2041_v40  ;;  %v1677_v50 = vor.u32 1.1754944e-38, %v1676_v16  ;;  %v2275_v0 = vsub.f32 1.0, %v2274_v36  ;;  %vm2278_vm2 = vweird.f32 %v4998_v27  ;;  %2733 = vrot.lane.b32.xlu2 %v5188_v12, %s3471_s8 }
 0x207   : > { %v2345_v33 = vsub.f32 %v5469_v35, %v2046_v44  ;;  %2581 = vrot.lane.b32.xlu0 %v2046_v44, %s3470_s7  ;;  %v1669_v38 = vadd.f32 %v5022_v14, %v1668_v3  ;;  %vm2279_vm4 = vweird.f32 %v5070_v17  ;;  %v2282_v51 = vand.u32 2147483647, %v4998_v27 }
 0x208   : > { %v3391_v41 = vpop.eup %3390  ;;  %3392 = vrcp.f32 %v2486_v46  ;;  %vm1675_vm5 = vcmp.eq.f32.partialorder %v1674_v7, 8.507059e+37  ;;  %v2276_v23 = vmul.f32 %v5070_v17, %v2275_v0  ;;  %v2284_v12 = vand.u32 2147483648, %v4998_v27  ;;  %vm5502_vm6 = vmor %vm2278_vm2, %vm2279_vm4 }
 0x209   : > { %v2471_v59 = vadd.f32 1.0, %v3389_v52  ;;  %v2377_v2 = vmul.f32 -50.0, %v2345_v33  ;;  %v1673_v60 = vsel %vm5479_vm0, %v5022_v14, %v1669_v38  ;;  %v1441_v46 = vmul.f32 %v5019_v19, %v4959_v58 }
 0x20a   : > { %3394 = vpow2.f32 %v2451_v56  ;;  %v2277_v4 = vadd.f32 %v5070_v17, %v2276_v23  ;;  %vm2283_vm8 = vcmp.eq.f32.partialorder %v2282_v51, 8.507059e+37  ;;  %v2285_v28 = vor.u32 1.1754944e-38, %v2284_v12 }
 0x20b   : > { %3396 = vpow2.f32 %v2419_v9  ;;  %v5509_v61 = vsel %vm1675_vm5, %v1677_v50, %v1673_v60  ;;  %v1442_v14 = vsub.f32 1.0, %v1441_v46  ;;  %vm1445_vm9 = vweird.f32 %v4959_v58 }
 0x20c   : > { %v2421_v27 = vmul.f32 1.442695, %v2377_v2  ;;  %v2281_v20 = vsel %vm5502_vm6, %v5070_v17, %v2277_v4  ;;  %vm1446_vm10 = vweird.f32 %v5019_v19  ;;  %v2049_v52 = vmul.f32 %v5030_v57, %v4971_v24  ;;  %v5546_v51 = vpop.permute.xlu2 %2597  ;;  %v6193_v4 = vld [vmem:[#allocation5_spill] sm:$0xff] }
 0x20d   : > { %v2286_v7 = vsel %vm2283_vm8, %v2285_v28, %v2281_v20  ;;  %v1443_v16 = vmul.f32 %v5019_v19, %v1442_v14  ;;  %v1449_v36 = vand.u32 2147483647, %v4959_v58  ;;  %v1451_v56 = vand.u32 2147483648, %v4959_v58  ;;  %vm5537_vm12 = vmor %vm1445_vm9, %vm1446_vm10  ;;  %v5543_v50 = vpop.permute.xlu1 %2561  ;;  %v2594_v14 = vpop.permute.xlu0 %2593 }
 0x20e   : > { %v3393_v9 = vpop.eup %3392  ;;  %v5524_v40 = vadd.f32 1.0, %v5306_v11  ;;  %3398 = vrcp.f32 %v2471_v59  ;;  %v2361_v3 = vsub.f32 %v5509_v61, %v2286_v7  ;;  %2613 = vrot.lane.b32.xlu1 %v2286_v7, %s3470_s7  ;;  %vm2053_vm11 = vweird.f32 %v4971_v24  ;;  %2703 = vrot.lane.b32.xlu2 %v5262_v18, %s3471_s8 }
 0x20f   : > { %2735 = vrot.lane.b32.xlu0 %v3393_v9, %s3471_s8  ;;  %v1444_v17 = vadd.f32 %v5019_v19, %v1443_v16  ;;  %v2050_v44 = vsub.f32 1.0, %v2049_v52  ;;  %vm2054_vm13 = vweird.f32 %v5030_v57  ;;  %v2057_v15 = vand.u32 2147483647, %v4971_v24 }
 0x210   : > { %v3395_v18 = vpop.eup %3394  ;;  %v2487_v0 = vadd.f32 1.0, %v3391_v41  ;;  %3400 = vpow2.f32 %v2421_v27  ;;  %v2393_v33 = vmul.f32 -50.0, %v2361_v3  ;;  %v2059_v38 = vand.u32 2147483648, %v4971_v24  ;;  %vm5561_vm15 = vmor %vm2053_vm11, %vm2054_vm13 }
 0x211   : > { %v3397_v58 = vpop.eup %3396  ;;  %3402 = vrcp.f32 %v5319_v10  ;;  %vm5549_vm14 = vcmp.eq.f32.partialorder %v1449_v36, 8.507059e+37  ;;  %v1452_v12 = vor.u32 1.1754944e-38, %v1451_v56  ;;  %v2051_v59 = vmul.f32 %v5030_v57, %v2050_v44 }
 0x212   : > { %v2453_v2 = vmul.f32 1.442695, %v2393_v33  ;;  %v1448_v41 = vsel %vm5537_vm12, %v5019_v19, %v1444_v17  ;;  %v2060_v47 = vor.u32 1.1754944e-38, %v2059_v38  ;;  %v1681_v46 = vmul.f32 %v5156_v63, %v5110_v13 }
 0x213   : > { %3404 = vrcp.f32 %v5524_v40  ;;  %v5571_v28 = vsel %vm2781_vm7, %v6193_v4, %v5341_v30  ;;  %v2052_v19 = vadd.f32 %v5030_v57, %v2051_v59  ;;  %vm2058_vm0 = vcmp.eq.f32.partialorder %v2057_v15, 8.507059e+37 }
 0x214   : > { %v3399_v24 = vpop.eup %3398  ;;  %3406 = vrcp.f32 %v2487_v0  ;;  %v2488_v27 = vadd.f32 1.0, %v3395_v18  ;;  %v1682_v20 = vsub.f32 1.0, %v1681_v46  ;;  %v2289_v52 = vmul.f32 %v5183_v34, %v5141_v54 }
 0x215   : > { %v2472_v7 = vadd.f32 1.0, %v3397_v58  ;;  %3408 = vpow2.f32 %v2453_v2  ;;  %v5578_v16 = vsel %vm5549_vm14, %v1452_v12, %v1448_v41  ;;  %v2056_v30 = vsel %vm5561_vm15, %v5030_v57, %v2052_v19  ;;  %v2564_v23 = vpop.permute.xlu1 %2563  ;;  %v6197_v19 = vld [vmem:[#allocation4_spill] sm:$0xff] }
 0x216   : > { %v3401_v36 = vpop.eup %3400  ;;  %v2061_v56 = vsel %vm2058_vm0, %v2060_v47, %v2056_v30  ;;  %v1683_v9 = vmul.f32 %v5156_v63, %v1682_v20  ;;  %v2290_v3 = vsub.f32 1.0, %v2289_v52  ;;  %vm2293_vm2 = vweird.f32 %v5141_v54  ;;  %v5610_v47 = vpop.permute.xlu2 %2567 }
 0x217   : > { %v5585_v17 = vpop.eup %3402  ;;  %2583 = vrot.lane.b32.xlu1 %v2061_v56, %s3470_s7  ;;  %2705 = vrot.lane.b32.xlu0 %v3399_v24, %s3471_s8  ;;  %vm1685_vm4 = vweird.f32 %v5110_v13  ;;  %vm1686_vm5 = vweird.f32 %v5156_v63  ;;  %vm2294_vm6 = vweird.f32 %v5183_v34  ;;  %v2297_v57 = vand.u32 2147483647, %v5141_v54 }
 0x218   : > { %v2346_v11 = vsub.f32 %v5578_v16, %v2061_v56  ;;  %v1689_v44 = vand.u32 2147483647, %v5110_v13  ;;  %v2291_v15 = vmul.f32 %v5183_v34, %v2290_v3  ;;  %v2299_v18 = vand.u32 2147483648, %v5141_v54  ;;  %vm5602_vm8 = vmor %vm2293_vm2, %vm2294_vm6  ;;  %v6196_v54 = vld [vmem:[#allocation3_spill] sm:$0xff]  ;;  %v2718_v3 = vpop.permute.xlu0 %2717 }
 0x219   : > { %v5597_v0 = vpop.eup %3404  ;;  %3410 = vrcp.f32 %v2488_v27  ;;  %v2473_v33 = vadd.f32 1.0, %v3401_v36  ;;  %v1691_v38 = vand.u32 2147483648, %v5110_v13  ;;  %v1696_v12 = vmul.f32 %v5222_v22, %v5185_v8  ;;  %v6198_v27 = vld [vmem:[#allocation6_spill] sm:$0xff]  ;;  %vm5629_vm10 = vmor %vm1685_vm4, %vm1686_vm5 }
 0x21a   : > { %v3407_v59 = vpop.eup %3406  ;;  %v1684_v2 = vadd.f32 %v5156_v63, %v1683_v9  ;;  %v2292_v41 = vadd.f32 %v5183_v34, %v2291_v15  ;;  %vm2298_vm9 = vcmp.eq.f32.partialorder %v2297_v57, 8.507059e+37  ;;  %v2300_v60 = vor.u32 1.1754944e-38, %v2299_v18  ;;  %v6204_v57 = vld [vmem:[#allocation8_spill] sm:$0xff] }
 0x21b   : > { %v3409_v46 = vpop.eup %3408  ;;  %3412 = vrcp.f32 %v2472_v7  ;;  %v2798_v4 = vsel %vm2781_vm7, %v6196_v54, %v5490_v6  ;;  %v5618_v24 = vsel %vm2781_vm7, %v6197_v19, %v5511_v55  ;;  %v5623_v20 = vsel %vm2781_vm7, %v6198_v27, %v5543_v50  ;;  %v6201_v6 = vld [vmem:[#allocation7_spill] sm:$0xff] }
 0x21c   : > { %v2378_v7 = vmul.f32 -50.0, %v2346_v11  ;;  %v5635_v30 = vsel %vm2781_vm7, %v6201_v6, %v2594_v14  ;;  %vm5637_vm11 = vcmp.eq.f32.partialorder %v1689_v44, 8.507059e+37  ;;  %v2296_v50 = vsel %vm5602_vm8, %v5183_v34, %v2292_v41 }
 0x21d   : > { %v1692_v36 = vor.u32 1.1754944e-38, %v1691_v38  ;;  %v2301_v56 = vsel %vm2298_vm9, %v2300_v60, %v2296_v50  ;;  %v1697_v13 = vsub.f32 1.0, %v1696_v12  ;;  %v2304_v9 = vmul.f32 %v5238_v29, %v5196_v43 }
 0x21e   : > { %3414 = vrcp.f32 %v2473_v33  ;;  %v1688_v14 = vsel %vm5629_vm10, %v5156_v63, %v1684_v2  ;;  %2615 = vrot.lane.b32.xlu2 %v2301_v56, %s3470_s7  ;;  %v5652_v11 = vsel %vm2781_vm7, %v6204_v57, %v2564_v23  ;;  %vm1700_vm12 = vweird.f32 %v5185_v8  ;;  %v2722_v55 = vpop.permute.xlu2 %2721 }
 0x21f   : > { %v5655_v34 = vpop.eup %3410  ;;  %v5657_v44 = vadd.f32 1.0, %v3409_v46  ;;  %2737 = vrot.lane.b32.xlu1 %v3407_v59, %s3471_s8  ;;  %v2305_v15 = vsub.f32 1.0, %v2304_v9  ;;  %vm2308_vm13 = vweird.f32 %v5196_v43  ;;  %vm2309_vm14 = vweird.f32 %v5238_v29 }
 0x220   : > { %v5662_v63 = vmul.f32 1.442695, %v2378_v7  ;;  %v2312_v18 = vand.u32 2147483647, %v5196_v43  ;;  %v2314_v33 = vand.u32 2147483648, %v5196_v43  ;;  %v2831_v38 = vsel %vm2814_vm1, %v2798_v4, %v2718_v3  ;;  %vm5679_vm0 = vmor %vm2308_vm13, %vm2309_vm14  ;;  %v5686_v4 = vpop.permute.xlu1 %2595 }
 0x221   : > { %v3413_v58 = vpop.eup %3412  ;;  %v5669_v23 = vsel %vm5637_vm11, %v1692_v36, %v1688_v14  ;;  %v1698_v12 = vmul.f32 %v5222_v22, %v1697_v13  ;;  %v2306_v59 = vmul.f32 %v5238_v29, %v2305_v15  ;;  %2864 = vst.msk [vmem:[%s5417_s23 + $0x80] sm:$0xff] %vm2847_vm3, %v2831_v38  ;;  %v1456_v2 = vmul.f32 %v5215_v62, %v5170_v26 }
 0x222   : > { %vm1701_vm15 = vweird.f32 %v5222_v22  ;;  %v1704_v43 = vand.u32 2147483647, %v5185_v8  ;;  %v2315_v60 = vor.u32 1.1754944e-38, %v2314_v33  ;;  %vm1460_vm2 = vweird.f32 %v5170_v26 }
 0x223   : > { %v2307_v46 = vadd.f32 %v5238_v29, %v2306_v59  ;;  %vm2313_vm4 = vcmp.eq.f32.partialorder %v2312_v18, 8.507059e+37  ;;  %v1457_v54 = vsub.f32 1.0, %v1456_v2  ;;  %vm1461_vm5 = vweird.f32 %v5215_v62  ;;  %vm5715_vm10 = vmor %vm1700_vm12, %vm1701_vm15 }
 0x224   : > { %v5688_v19 = vpop.eup %3414  ;;  %v1706_v27 = vand.u32 2147483648, %v5185_v8  ;;  %v1464_v52 = vand.u32 2147483647, %v5170_v26  ;;  %v1466_v7 = vand.u32 2147483648, %v5170_v26  ;;  %v2064_v6 = vmul.f32 %v5227_v21, %v5190_v5  ;;  %vm5705_vm6 = vmor %vm1460_vm2, %vm1461_vm5 }
 0x225   : > { %v2362_v50 = vsub.f32 %v5669_v23, %v2301_v56  ;;  %v1699_v36 = vadd.f32 %v5222_v22, %v1698_v12  ;;  %v2311_v13 = vsel %vm5679_vm0, %v5238_v29, %v2307_v46  ;;  %v1458_v9 = vmul.f32 %v5215_v62, %v1457_v54 }
 0x226   : > { %v5701_v3 = vsel %vm2313_vm4, %v2315_v60, %v2311_v13  ;;  %v2065_v57 = vsub.f32 1.0, %v2064_v6  ;;  %vm2068_vm8 = vweird.f32 %v5190_v5  ;;  %vm2069_vm9 = vweird.f32 %v5227_v21  ;;  %v2688_v6 = vpop.permute.xlu0 %2687 }
 0x227   : > { %vm5719_vm11 = vcmp.eq.f32.partialorder %v1704_v43, 8.507059e+37  ;;  %2617 = vrot.lane.b32.xlu0 %v5701_v3, %s3470_s7  ;;  %2707 = vrot.lane.b32.xlu1 %v3413_v58, %s3471_s8  ;;  %v1459_v56 = vadd.f32 %v5215_v62, %v1458_v9  ;;  %v1467_v15 = vor.u32 1.1754944e-38, %v1466_v7  ;;  %v2072_v18 = vand.u32 2147483647, %v5190_v5  ;;  %vm5739_vm12 = vmor %vm2068_vm8, %vm2069_vm9 }
 0x228   : > { %vm1465_vm13 = vcmp.eq.f32.partialorder %v1464_v52, 8.507059e+37  ;;  %v2066_v8 = vmul.f32 %v5227_v21, %v2065_v57  ;;  %v2074_v33 = vand.u32 2147483648, %v5190_v5  ;;  %v2833_v38 = vsel %vm2814_vm1, %v5635_v30, %v2722_v55  ;;  %v2720_v55 = vpop.permute.xlu1 %2719 }
 0x229   : > { %v2394_v12 = vmul.f32 -50.0, %v2362_v50  ;;  %v1707_v59 = vor.u32 1.1754944e-38, %v1706_v27  ;;  %v1463_v2 = vsel %vm5705_vm6, %v5215_v62, %v1459_v56  ;;  %2866 = vst.msk [vmem:[%s5417_s23 + $0x90] sm:$0xff] %vm2847_vm3, %v2833_v38  ;;  %v1471_v43 = vmul.f32 %v5364_v37, %v5278_v39 }
 0x22a   : > { %v1703_v30 = vsel %vm5715_vm10, %v5222_v22, %v1699_v36  ;;  %v2067_v41 = vadd.f32 %v5227_v21, %v2066_v8  ;;  %vm2073_vm14 = vcmp.eq.f32.partialorder %v2072_v18, 8.507059e+37  ;;  %v2075_v62 = vor.u32 1.1754944e-38, %v2074_v33  ;;  %v2692_v36 = vpop.permute.xlu2 %2691 }
 0x22b   : > { %v5751_v60 = vsel %vm1465_vm13, %v1467_v15, %v1463_v2  ;;  %v1472_v5 = vsub.f32 1.0, %v1471_v43  ;;  %vm1475_vm15 = vweird.f32 %v5278_v39  ;;  %vm1476_vm0 = vweird.f32 %v5364_v37 }
 0x22c   : > { %3416 = vrcp.f32 %v5657_v44  ;;  %v2071_v46 = vsel %vm5739_vm12, %v5227_v21, %v2067_v41  ;;  %v1481_v54 = vand.u32 2147483648, %v5278_v39  ;;  %v2079_v22 = vmul.f32 %v5585_v17, %v5319_v10  ;;  %vm5775_vm2 = vmor %vm1475_vm15, %vm1476_vm0 }
 0x22d   : > { %3418 = vpow2.f32 %v5662_v63  ;;  %v2076_v27 = vsel %vm2073_vm14, %v2075_v62, %v2071_v46  ;;  %v1473_v52 = vmul.f32 %v5364_v37, %v1472_v5  ;;  %v1479_v7 = vand.u32 2147483647, %v5278_v39 }
 0x22e   : > { %v2455_v50 = vmul.f32 1.442695, %v2394_v12  ;;  %v5767_v44 = vsel %vm5719_vm11, %v1707_v59, %v1703_v30  ;;  %v2347_v21 = vsub.f32 %v5751_v60, %v2076_v27  ;;  %2585 = vrot.lane.b32.xlu2 %v2076_v27, %s3470_s7  ;;  %vm2083_vm4 = vweird.f32 %v5319_v10  ;;  %v5821_v46 = vpop.permute.xlu0 %2599 }
 0x22f   : > { %v1474_v13 = vadd.f32 %v5364_v37, %v1473_v52  ;;  %v2080_v9 = vsub.f32 1.0, %v2079_v22  ;;  %vm2084_vm5 = vweird.f32 %v5585_v17  ;;  %v2087_v14 = vand.u32 2147483647, %v5319_v10 }
 0x230   : > { %v2379_v57 = vmul.f32 -50.0, %v2347_v21  ;;  %v1482_v29 = vor.u32 1.1754944e-38, %v1481_v54  ;;  %v2089_v26 = vand.u32 2147483648, %v5319_v10  ;;  %v1711_v39 = vmul.f32 %v5406_v1, %v5317_v32  ;;  %vm5795_vm9 = vmor %vm2083_vm4, %vm2084_vm5  ;;  %v2690_v54 = vpop.permute.xlu1 %2689 }
 0x231   : > { %v1478_v56 = vsel %vm5775_vm2, %v5364_v37, %v1474_v13  ;;  %vm1480_vm6 = vcmp.eq.f32.partialorder %v1479_v7, 8.507059e+37  ;;  %v2081_v15 = vmul.f32 %v5585_v17, %v2080_v9  ;;  %vm1715_vm8 = vweird.f32 %v5317_v32 }
 0x232   : > { %v5791_v18 = vpop.eup %3416  ;;  %v2425_v8 = vmul.f32 1.442695, %v2379_v57  ;;  %v2090_v38 = vor.u32 1.1754944e-38, %v2089_v26  ;;  %v1712_v12 = vsub.f32 1.0, %v1711_v39  ;;  %vm1716_vm10 = vweird.f32 %v5406_v1 }
 0x233   : > { %v3419_v59 = vpop.eup %3418  ;;  %v2082_v37 = vadd.f32 %v5585_v17, %v2081_v15  ;;  %vm2088_vm11 = vcmp.eq.f32.partialorder %v2087_v14, 8.507059e+37  ;;  %v1721_v2 = vand.u32 2147483648, %v5317_v32  ;;  %v2319_v58 = vmul.f32 %v5597_v0, %v5524_v40  ;;  %vm5815_vm13 = vmor %vm1715_vm8, %vm1716_vm10 }
 0x234   : > { %3420 = vpow2.f32 %v2425_v8  ;;  %v5804_v43 = vsel %vm1480_vm6, %v1482_v29, %v1478_v56  ;;  %v1713_v10 = vmul.f32 %v5406_v1, %v1712_v12  ;;  %v1719_v30 = vand.u32 2147483647, %v5317_v32  ;;  %v5827_v32 = vpop.permute.xlu2 %2603 }
 0x235   : > { %v2363_v41 = vsub.f32 %v5767_v44, %v5701_v3  ;;  %v2086_v62 = vsel %vm5795_vm9, %v5585_v17, %v2082_v37  ;;  %vm2323_vm12 = vweird.f32 %v5524_v40  ;;  %vm2324_vm14 = vweird.f32 %v5597_v0 }
 0x236   : > { %v2091_v22 = vsel %vm2088_vm11, %v2090_v38, %v2086_v62  ;;  %v1714_v3 = vadd.f32 %v5406_v1, %v1713_v10  ;;  %v2320_v27 = vsub.f32 1.0, %v2319_v58  ;;  %v2327_v17 = vand.u32 2147483647, %v5524_v40  ;;  %2739 = vrot.lane.b32.xlu2 %v5655_v34, %s3471_s8  ;;  %vm5850_vm0 = vmor %vm2323_vm12, %vm2324_vm14  ;;  %v2570_v15 = vpop.permute.xlu0 %2569  ;;  %v6225_v10 = vld [vmem:[#allocation9_spill] sm:$0xff]  ;;  %v6228_v34 = vld [vmem:[#allocation11_spill] sm:$0xff] }
 0x237   : > { %v2348_v52 = vsub.f32 %v5804_v43, %v2091_v22  ;;  %2587 = vrot.lane.b32.xlu0 %v2091_v22, %s3470_s7  ;;  %v1722_v7 = vor.u32 1.1754944e-38, %v1721_v2  ;;  %v2329_v21 = vand.u32 2147483648, %v5524_v40  ;;  %v2816_v63 = vsel %vm2814_vm1, %v5618_v24, %v2688_v6 }
 0x238   : > { %v1718_v13 = vsel %vm5815_vm13, %v5406_v1, %v1714_v3  ;;  %vm5837_vm15 = vcmp.eq.f32.partialorder %v1719_v30, 8.507059e+37  ;;  %v2321_v9 = vmul.f32 %v5597_v0, %v2320_v27  ;;  %2849 = vst.msk [vmem:[%s5417_s23 + $0x8] sm:$0xff] %vm2847_vm3, %v2816_v63  ;;  %v2832_v14 = vsel %vm2814_vm1, %v5571_v28, %v2720_v55  ;;  %v5872_v8 = vpop.permute.xlu1 %2601  ;;  %v6227_v63 = vld [vmem:[#allocation10_spill] sm:$0xff] }
 0x239   : > { %3422 = vpow2.f32 %v2455_v50  ;;  %v2380_v57 = vmul.f32 -50.0, %v2348_v52  ;;  %v2330_v24 = vor.u32 1.1754944e-38, %v2329_v21  ;;  %2865 = vst.msk [vmem:[%s5417_s23 + $0x88] sm:$0xff] %vm2847_vm3, %v2832_v14  ;;  %v2818_v6 = vsel %vm2814_vm1, %v5652_v11, %v2692_v36  ;;  %v6229_v1 = vld [vmem:[#allocation14_spill] sm:$0xff] }
 0x23a   : > { %v3421_v29 = vpop.eup %3420  ;;  %v2395_v26 = vmul.f32 -50.0, %v2363_v41  ;;  %v2322_v28 = vadd.f32 %v5597_v0, %v2321_v9  ;;  %vm2328_vm2 = vcmp.eq.f32.partialorder %v2327_v17, 8.507059e+37  ;;  %2851 = vst.msk [vmem:[%s5417_s23 + $0x18] sm:$0xff] %vm2847_vm3, %v2818_v6  ;;  %v2817_v40 = vsel %vm2814_vm1, %v5623_v20, %v2690_v54 }
 0x23b   : > { %v2475_v55 = vadd.f32 1.0, %v3421_v29  ;;  %v2427_v50 = vmul.f32 1.442695, %v2380_v57  ;;  %v5865_v39 = vsel %vm5837_vm15, %v1722_v7, %v1718_v13  ;;  %2850 = vst.msk [vmem:[%s5417_s23 + $0x10] sm:$0xff] %vm2847_vm3, %v2817_v40  ;;  %v2474_v56 = vadd.f32 1.0, %v3419_v59  ;;  %v6230_v40 = vld [vmem:[#allocation13_spill] sm:$0xff] }
 0x23c   : > { %v2326_v11 = vsel %vm5850_vm0, %v5597_v0, %v2322_v28  ;;  %v2457_v33 = vmul.f32 1.442695, %v2395_v26  ;;  %v5878_v38 = vpop.permute.xlu2 %2573  ;;  %v2786_v13 = vsel %vm2781_vm7, %v6227_v63, %v5486_v42  ;;  %v2802_v9 = vsel %vm2781_vm7, %v6228_v34, %v5546_v51 }
 0x23d   : > { %v2331_v36 = vsel %vm2328_vm2, %v2330_v24, %v2326_v11  ;;  %3424 = vpow2.f32 %v2427_v50  ;;  %v2788_v24 = vsel %vm2781_vm7, %v6229_v1, %v2570_v15 }
 0x23e   : > { %v2364_v20 = vsub.f32 %v5865_v39, %v2331_v36  ;;  %2619 = vrot.lane.b32.xlu1 %v2331_v36, %s3470_s7  ;;  %2709 = vrot.lane.b32.xlu2 %v5688_v19, %s3471_s8  ;;  %3426 = vrcp.f32 %v2475_v55  ;;  %v2801_v19 = vsel %vm2781_vm7, %v6225_v10, %v5686_v4  ;;  %v2724_v41 = vpop.permute.xlu0 %2723  ;;  %v2787_v55 = vsel %vm2781_vm7, %v6230_v40, %v5610_v47 }
 0x23f   : > { %v3423_v12 = vpop.eup %3422  ;;  %2741 = vrot.lane.b32.xlu0 %v5791_v18, %s3471_s8  ;;  %3428 = vrcp.f32 %v2474_v56  ;;  %v6226_v18 = vld [vmem:[#allocation12_spill] sm:$0xff]  ;;  %v2834_v22 = vsel %vm2814_vm1, %v2801_v19, %v2724_v41  ;;  %v6232_v19 = vld [vmem:[#allocation17_spill] sm:$0xff] }
 0x240   : > { %v2396_v0 = vmul.f32 -50.0, %v2364_v20  ;;  %v2490_v59 = vadd.f32 1.0, %v3423_v12  ;;  %3430 = vpow2.f32 %v2457_v33  ;;  %v2572_v62 = vpop.permute.xlu1 %2571  ;;  %v2803_v54 = vsel %vm2781_vm7, %v6226_v18, %v5821_v46  ;;  %2867 = vst.msk [vmem:[%s5417_s23 + $0x98] sm:$0xff] %vm2847_vm3, %v2834_v22  ;;  %v6231_v12 = vld [vmem:[#allocation15_spill] sm:$0xff] }
 0x242   : > { %v2459_v37 = vmul.f32 1.442695, %v2396_v0  ;;  %v2804_v0 = vsel %vm2781_vm7, %v6231_v12, %v5872_v8  ;;  %v2805_v8 = vsel %vm2781_vm7, %v6232_v19, %v5827_v32  ;;  %v6234_v32 = vld [vmem:[#allocation18_spill] sm:$0xff] }
 0x243   : > { %v3425_v2 = vpop.eup %3424 }
 0x244   : > { %3432 = vpow2.f32 %v2459_v37  ;;  %v3427_v58 = vpop.eup %3426  ;;  %v2476_v30 = vadd.f32 1.0, %v3425_v2  ;;  %v2728_v3 = vpop.permute.xlu2 %2727 }
 0x245   : > { %v3429_v5 = vpop.eup %3428  ;;  %3434 = vrcp.f32 %v2490_v59  ;;  %v2836_v4 = vsel %vm2814_vm1, %v2803_v54, %v2728_v3 }
 0x246   : > { %2713 = vrot.lane.b32.xlu1 %v3427_v58, %s3471_s8  ;;  %3436 = vrcp.f32 %v2476_v30  ;;  %v3431_v27 = vpop.eup %3430  ;;  %2869 = vst.msk [vmem:[%s5417_s23 + $0xa8] sm:$0xff] %vm2847_vm3, %v2836_v4  ;;  %v2694_v14 = vpop.permute.xlu0 %2693  ;;  %v6233_v30 = vld [vmem:[#allocation16_spill] sm:$0xff] }
 0x247   : > { %2711 = vrot.lane.b32.xlu0 %v3429_v5, %s3471_s8  ;;  %v2491_v52 = vadd.f32 1.0, %v3431_v27  ;;  %v2819_v6 = vsel %vm2814_vm1, %v2786_v13, %v2694_v14  ;;  %v2789_v41 = vsel %vm2781_vm7, %v6233_v30, %v2572_v62  ;;  %v2790_v62 = vsel %vm2781_vm7, %v6234_v32, %v5878_v38 }
 0x248   : > { %v2726_v57 = vpop.permute.xlu1 %2725  ;;  %2852 = vst.msk [vmem:[%s5417_s23 + $0x20] sm:$0xff] %vm2847_vm3, %v2819_v6 }
 0x249   : > { %v2835_v29 = vsel %vm2814_vm1, %v2802_v9, %v2726_v57 }
 0x24a   : > { %v3433_v17 = vpop.eup %3432  ;;  %2868 = vst.msk [vmem:[%s5417_s23 + $0xa0] sm:$0xff] %vm2847_vm3, %v2835_v29 }
 0x24b   : > { %v2492_v7 = vadd.f32 1.0, %v3433_v17  ;;  %v3435_v21 = vpop.eup %3434 }
 0x24c   : > { %v3437_v46 = vpop.eup %3436  ;;  %v2698_v42 = vpop.permute.xlu2 %2697 }
 0x24d   : > { %3438 = vrcp.f32 %v2492_v7  ;;  %2715 = vrot.lane.b32.xlu2 %v3437_v46, %s3471_s8  ;;  %v2821_v51 = vsel %vm2814_vm1, %v2788_v24, %v2698_v42  ;;  %v6235_v46 = vld [vmem:[#allocation19_spill] sm:$0xff] }
 0x24e   : > { %2743 = vrot.lane.b32.xlu1 %v3435_v21, %s3471_s8  ;;  %3440 = vrcp.f32 %v2491_v52  ;;  %2854 = vst.msk [vmem:[%s5417_s23 + $0x30] sm:$0xff] %vm2847_vm3, %v2821_v51  ;;  %v2606_v50 = vpop.permute.xlu0 %2605 }
 0x24f   : > { %v2806_v37 = vsel %vm2781_vm7, %v5015_v53, %v2606_v50 }
 0x250   : > { %v2696_v56 = vpop.permute.xlu1 %2695 }
 0x251   : > { %v2820_v11 = vsel %vm2814_vm1, %v2787_v55, %v2696_v56 }
 0x252   : > { %2853 = vst.msk [vmem:[%s5417_s23 + $0x28] sm:$0xff] %vm2847_vm3, %v2820_v11 }
 0x253   : > { %v3439_v26 = vpop.eup %3438 }
 0x254   : > { %2747 = vrot.lane.b32.xlu0 %v3439_v26, %s3471_s8  ;;  %v3441_v28 = vpop.eup %3440  ;;  %v2610_v36 = vpop.permute.xlu2 %2609 }
 0x255   : > { %2745 = vrot.lane.b32.xlu2 %v3441_v28, %s3471_s8  ;;  %v2808_v29 = vsel %vm2781_vm7, %v5329_v31, %v2610_v36 }
 0x256   : > { %v2576_v15 = vpop.permute.xlu0 %2575 }
 0x257   : > { %v2791_v18 = vsel %vm2781_vm7, %v5112_v45, %v2576_v15 }
 0x258   : > { %v2608_v33 = vpop.permute.xlu1 %2607 }
 0x259   : > { %v2807_v63 = vsel %vm2781_vm7, %v6235_v46, %v2608_v33 }
 0x25c   : > { %v2580_v20 = vpop.permute.xlu2 %2579 }
 0x25e   : > { %v2730_v59 = vpop.permute.xlu0 %2729 }
 0x25f   : > { %v2837_v2 = vsel %vm2814_vm1, %v2804_v0, %v2730_v59 }
 0x260   : > { %v2578_v47 = vpop.permute.xlu1 %2577  ;;  %2870 = vst.msk [vmem:[%s5417_s23 + $0xb0] sm:$0xff] %vm2847_vm3, %v2837_v2 }
 0x261   : > { %v2792_v14 = vsel %vm2781_vm7, %v5283_v25, %v2578_v47 }
 0x264   : > { %v2734_v58 = vpop.permute.xlu2 %2733 }
 0x265   : > { %v2839_v10 = vsel %vm2814_vm1, %v2806_v37, %v2734_v58 }
 0x266   : > { %2872 = vst.msk [vmem:[%s5417_s23 + $0xc0] sm:$0xff] %vm2847_vm3, %v2839_v10  ;;  %v2700_v53 = vpop.permute.xlu0 %2699 }
 0x267   : > { %v2822_v54 = vsel %vm2814_vm1, %v2789_v41, %v2700_v53 }
 0x268   : > { %v2732_v5 = vpop.permute.xlu1 %2731  ;;  %2855 = vst.msk [vmem:[%s5417_s23 + $0x38] sm:$0xff] %vm2847_vm3, %v2822_v54 }
 0x269   : > { %v2838_v22 = vsel %vm2814_vm1, %v2805_v8, %v2732_v5 }
 0x26a   : > { %2871 = vst.msk [vmem:[%s5417_s23 + $0xb8] sm:$0xff] %vm2847_vm3, %v2838_v22 }
 0x26c   : > { %v2704_v3 = vpop.permute.xlu2 %2703 }
 0x26d   : > { %v2824_v4 = vsel %vm2814_vm1, %v2791_v18, %v2704_v3 }
 0x26e   : > { %2857 = vst.msk [vmem:[%s5417_s23 + $0x48] sm:$0xff] %vm2847_vm3, %v2824_v4  ;;  %v2612_v27 = vpop.permute.xlu0 %2611 }
 0x26f   : > { %v2809_v24 = vsel %vm2781_vm7, %v5378_v49, %v2612_v27  ;;  %v2793_v49 = vsel %vm2781_vm7, %v5427_v48, %v2580_v20 }
 0x270   : > { %v2702_v45 = vpop.permute.xlu1 %2701 }
 0x271   : > { %v2823_v17 = vsel %vm2814_vm1, %v2790_v62, %v2702_v45 }
 0x272   : > { %2856 = vst.msk [vmem:[%s5417_s23 + $0x40] sm:$0xff] %vm2847_vm3, %v2823_v17 }
 0x278   : > { %v2616_v7 = vpop.permute.xlu2 %2615 }
 0x279   : > { %v2582_v52 = vpop.permute.xlu0 %2581  ;;  %v2811_v58 = vsel %vm2781_vm7, %v5669_v23, %v2616_v7 }
 0x27a   : > { %v2794_v26 = vsel %vm2781_vm7, %v5469_v35, %v2582_v52 }
 0x280   : > { %v2614_v21 = vpop.permute.xlu1 %2613 }
 0x281   : > { %v2736_v13 = vpop.permute.xlu0 %2735  ;;  %v2810_v20 = vsel %vm2781_vm7, %v5509_v61, %v2614_v21 }
 0x282   : > { %v2840_v34 = vsel %vm2814_vm1, %v2807_v63, %v2736_v13 }
 0x283   : > { %2873 = vst.msk [vmem:[%s5417_s23 + $0xc8] sm:$0xff] %vm2847_vm3, %v2840_v34 }
 0x288   : > { %v2586_v38 = vpop.permute.xlu2 %2585 }
 0x289   : > { %v2584_v9 = vpop.permute.xlu1 %2583  ;;  %v2706_v57 = vpop.permute.xlu0 %2705 }
 0x28a   : > { %v2825_v1 = vsel %vm2814_vm1, %v2792_v14, %v2706_v57  ;;  %v2795_v47 = vsel %vm2781_vm7, %v5578_v16, %v2584_v9 }
 0x28b   : > { %2858 = vst.msk [vmem:[%s5417_s23 + $0x50] sm:$0xff] %vm2847_vm3, %v2825_v1 }
 0x290   : > { %v2740_v6 = vpop.permute.xlu2 %2739 }
 0x291   : > { %v2842_v42 = vsel %vm2814_vm1, %v2809_v24, %v2740_v6  ;;  %v2738_v51 = vpop.permute.xlu1 %2737 }
 0x292   : > { %2875 = vst.msk [vmem:[%s5417_s23 + $0xd8] sm:$0xff] %vm2847_vm3, %v2842_v42  ;;  %v2841_v25 = vsel %vm2814_vm1, %v2808_v29, %v2738_v51 }
 0x293   : > { %2874 = vst.msk [vmem:[%s5417_s23 + $0xd0] sm:$0xff] %vm2847_vm3, %v2841_v25 }
 0x298   : > { %v2710_v28 = vpop.permute.xlu2 %2709 }
 0x299   : > { %v2827_v40 = vsel %vm2814_vm1, %v2794_v26, %v2710_v28  ;;  %v2708_v31 = vpop.permute.xlu1 %2707  ;;  %v2618_v50 = vpop.permute.xlu0 %2617 }
 0x29a   : > { %2860 = vst.msk [vmem:[%s5417_s23 + $0x60] sm:$0xff] %vm2847_vm3, %v2827_v40  ;;  %v2826_v55 = vsel %vm2814_vm1, %v2793_v49, %v2708_v31  ;;  %v2812_v48 = vsel %vm2781_vm7, %v5767_v44, %v2618_v50  ;;  %v2796_v44 = vsel %vm2781_vm7, %v5751_v60, %v2586_v38 }
 0x29b   : > { %2859 = vst.msk [vmem:[%s5417_s23 + $0x58] sm:$0xff] %vm2847_vm3, %v2826_v55 }
 0x2a7   : > { %v2716_v56 = vpop.permute.xlu2 %2715 }
 0x2a9   : > { %v2588_v11 = vpop.permute.xlu0 %2587 }
 0x2aa   : > { %v2797_v35 = vsel %vm2781_vm7, %v5804_v43, %v2588_v11 }
 0x2ab   : > { %v2830_v36 = vsel %vm2814_vm1, %v2797_v35, %v2716_v56 }
 0x2ac   : > { %2863 = vst.msk [vmem:[%s5417_s23 + $0x78] sm:$0xff] %vm2847_vm3, %v2830_v36 }
 0x2af   : > { %v2746_v33 = vpop.permute.xlu2 %2745 }
 0x2b0   : > { %v2620_v15 = vpop.permute.xlu1 %2619  ;;  %v2845_v12 = vsel %vm2814_vm1, %v2812_v48, %v2746_v33 }
 0x2b1   : > { %v2742_v0 = vpop.permute.xlu0 %2741  ;;  %2878 = vst.msk [vmem:[%s5417_s23 + $0xf0] sm:$0xff] %vm2847_vm3, %v2845_v12  ;;  %v2813_v16 = vsel %vm2781_vm7, %v5865_v39, %v2620_v15 }
 0x2b2   : > { %v2843_v43 = vsel %vm2814_vm1, %v2810_v20, %v2742_v0 }
 0x2b3   : > { %2876 = vst.msk [vmem:[%s5417_s23 + $0xe0] sm:$0xff] %vm2847_vm3, %v2843_v43 }
 0x2b8   : > { %v2714_v59 = vpop.permute.xlu1 %2713 }
 0x2b9   : > { %v2829_v61 = vsel %vm2814_vm1, %v2796_v44, %v2714_v59  ;;  %v2712_v37 = vpop.permute.xlu0 %2711 }
 0x2ba   : > { %2862 = vst.msk [vmem:[%s5417_s23 + $0x70] sm:$0xff] %vm2847_vm3, %v2829_v61  ;;  %v2828_v2 = vsel %vm2814_vm1, %v2795_v47, %v2712_v37 }
 0x2bb   : > { %2861 = vst.msk [vmem:[%s5417_s23 + $0x68] sm:$0xff] %vm2847_vm3, %v2828_v2 }
 0x2c0   : > { %v2744_v10 = vpop.permute.xlu1 %2743 }
 0x2c1   : > { %v2844_v19 = vsel %vm2814_vm1, %v2811_v58, %v2744_v10 }
 0x2c2   : > { %2877 = vst.msk [vmem:[%s5417_s23 + $0xe8] sm:$0xff] %vm2847_vm3, %v2844_v19 }
 0x2c6   : > { %v2748_v60 = vpop.permute.xlu0 %2747 }
 0x2c7   : > { %v2846_v8 = vsel %vm2814_vm1, %v2813_v16, %v2748_v60 }
 0x2c8   : > { %2879 = vst.msk [vmem:[%s5417_s23 + $0xf8] sm:$0xff] %vm2847_vm3, %v2846_v8 }
 0x2c9 PF: > { %p12_p9 = scmp.ge.s32.totalorder %s3519_s22, 4   ;;  %s6236_s18 = smov %s3464_s19 }
 0x2ca   : > { %s6237_s19 = smov %s3528_s25  ;;  %s6238_s20 = smov %s3519_s22 }
 0x2cb   :  { %14 = sbr.rel (!%p12_p9) target bundleno = 2 (0x2), region = 118 }

// kernel: db_head_forward.3
= control target key start
LH: loop header
LB: loop body
LE: loop exit
PB: predicated region body
PF: predicated region fallthrough
CT: control target
= control target key end

     0   :  { %s3202_s18 = smov 0   ;;  %s3204_s19 = smov 0   ;;  %s4431_s0 = inlined_call_operand.vmem [shape: bf16[2,16,18,8], index: 0, kind: input, shape index: {}]   ;;  %s4432_s1 = inlined_call_operand.vmem [shape: bf16[2,16,18,8], index: 1, kind: input, shape index: {}]   ;;  %s4433_s2 = inlined_call_operand.vmem [shape: bf16[2,16,18,8], index: 2, kind: input, shape index: {}]   ;;  %s4434_s3 = inlined_call_operand.vmem [shape: bf16[9,8,4], index: 3, kind: input, shape index: {}]   ;;  %s4435_s4 = inlined_call_operand.vmem [shape: f32[2,512,2], index: 4, kind: output, shape index: {0}]   ;;  %s4436_s5 = inlined_call_operand.vmem [shape: f32[2,2,4], index: 5, kind: output, shape index: {1}]  }
   0x1   :  { %s3206_s20 = smov 0   ;;  %s3208_s21 = smov 0  }
   0x2   :  { %s3210_s22 = smov 0   ;;  %s3212_s23 = smov 0  }
   0x3   :  { %s3214_s24 = smov 0  }
   0x4 LB: > { %s25_s25 = sadd.s32 1, %s3160_s22  ;;  %s28_s26 = sadd.s32 1, %s3164_s23  ;;  %s3168_s24 = sphi %s3214_s24, %s16_s24   ;;  %s3164_s23 = sphi %s3212_s23, %s4451_s23   ;;  %s3160_s22 = sphi %s3210_s22, %s4450_s22   ;;  %s3156_s21 = sphi %s3208_s21, %s4449_s21   ;;  %s3152_s20 = sphi %s3206_s20, %s4448_s20   ;;  %s3148_s19 = sphi %s3204_s19, %s4447_s19   ;;  %s3144_s18 = sphi %s3202_s18, %s4446_s18  }
   0x5   : > { %p26_p0 = scmp.ge.s32.totalorder %s25_s25, 2  ;;  %s2788_s27 = sadd.s32 4294967295, %s3168_s24  }
   0x6   : > { %s2790_s28 = sshll.u32 %s3164_s23, 1  ;;  %p154_p1 = scmp.ne.s32.totalorder %s3148_s19, %s3144_s18 }
   0x7   : > { %s4453_s25 = smov (%p26_p0, %s25_s25), 0  ;;  %s4455_s26 = smov (!%p26_p0, %s28_s26), %s3164_s23 }
   0x8   : > { %s138_s29 = sadd.s32 %s3160_s22, %s2790_s28  ;;  %p30_p2 = scmp.ge.s32.totalorder %s4455_s26, 2 }
   0x9   : > { %p155_p3 = scmp.eq.s32.totalorder %s2788_s27, 3  ;;  %p2794_p4 = scmp.ge.s32.totalorder %s3168_s24, 1 }
   0xa   : > { %p250_p5 = scmp.lt.s32.totalorder %s3168_s24, 5  ;;  %s4457_s26 = smov (%p30_p2, %s4455_s26), 0 }
   0xb   : > { %p3251_p6 = por %p155_p3, %p154_p1  ;;  %s2791_s6 = sshll.u32 %s4457_s26, 1 }
   0xc   : > { %p251_p7 = pnand %p2794_p4, %p250_p5  ;;  %s140_s7 = sadd.s32 %s2791_s6, %s4453_s25 }
   0xd   : > { %s141_s8 = ssub.s32 %s138_s29, %s140_s7  ;;  %s144_s9 = sadd.s32 1, %s3148_s19 }
   0xe   : > { %p142_p8 = scmp.eq.s32.totalorder %s141_s8, 0  ;;  %254 = sbr.rel (%p251_p7) target bundleno = 639 (0x27f), region = 36 }
  0x10   : > { %s3259_s10 = scalar_select %p142_p8, %s3148_s19, %s144_s9  }
  0x13   : > { %v2803_v0 = vld [vmem:[%s4434_s3 + $0x4] sm:$0xf]  ;;  %vm666_vm0 = vcmask 1043456   ;;  %s2796_s13 = sshll.u32 %s3152_s20, 3  ;;  %p307_p9 = scmp.lt.s32.totalorder %s3156_s21, 1  ;;  %vm641_vm3 = vcmask 64512  }
  0x14   : > { %v668_v1 = vsel %vm666_vm0, %v2803_v0, 0  ;;  %p309_p10 = scmp.lt.s32.totalorder %s2796_s13, 15  ;;  %v2860_v2 = vld [vmem:[%s4434_s3 + $0x8] sm:$0xf]  ;;  %v2869_v4 = vld [vmem:[%s4434_s3 + $0xc] sm:$0xf] }
  0x15   : > { %3051 = vmatpush.bf16.msra.mxu1 %v668_v1  ;;  %3052 = vmatpush.bf16.msra.mxu2 %v668_v1  ;;  %s308_s14 = scalar_select %p307_p9, %s3156_s21, 1  ;;  %v953_v3 = vsel %vm666_vm0, %v2860_v2, 0  ;;  %v419_v5 = vld [vmem:[%s4434_s3] sm:$0xf]  ;;  %v2910_v6 = vld [vmem:[%s4434_s3 + $0x10] sm:$0xf] }
  0x16   : > { %3053 = vmatpush.bf16.msra.mxu3 %v668_v1  ;;  %677 = vmatpush.bf16.msra.mxu0 %v668_v1  ;;  %s4459_s13 = smov (!%p309_p10, %s2796_s13), 15  ;;  %v1087_v7 = vsel %vm666_vm0, %v2869_v4, 0  ;;  %v784_v8 = vsel %vm666_vm0, %v419_v5, 0  ;;  %v1397_v9 = vsel %vm666_vm0, %v2910_v6, 0  ;;  %vm420_vm1 = vsmask.f32 3328 }
  0x17   : > { %s3055_s17 = smul.u32 48, %s308_s14  ;;  %s2802_s27 = sshll.u32 %s308_s14, 1  ;;  %vm421_vm2 = vsmask.f32 7440  ;;  %vm843_vm5 = vcmask 1042432   ;;  %vm844_vm6 = vcmask 1046532  }
  0x18   : > { %s3054_s28 = smul.u32 3, %s4459_s13  ;;  %s3275_s7 = scalar_lea.vmem %s4436_s5, %s2802_s27  ;;  %vm3333_vm4 = vmor %vm420_vm1, %vm421_vm2  ;;  %vm2272_vm8 = vcmask 15360  }
  0x19   : > { %962 = vmatpush.bf16.msrb.mxu2 %v953_v3  ;;  %793 = vmatpush.bf16.msrb.mxu1 %v784_v8  ;;  %vm3473_vm7 = vmor %vm843_vm5, %vm844_vm6  ;;  %p3019_p11 = scmp.ne.s32.totalorder %s3152_s20, 0 }
  0x1a   : > { %s313_s14 = sadd.s32 %s3055_s17, %s3054_s28  ;;  %1096 = vmatpush.bf16.msrb.mxu3 %v1087_v7  ;;  %1406 = vmatpush.bf16.msrb.mxu0 %v1397_v9 }
  0x1b   : > { %s3289_s13 = sshll.u32 %s313_s14, 2 }
  0x1c   : > { %s3295_s6 = scalar_lea.vmem %s4431_s0, %s3289_s13  ;;  %s3448_s8 = scalar_lea.vmem %s4432_s1, %s3289_s13 }
  0x1d   : > { %v3298_v10 = vld [vmem:[%s3295_s6 + $0x18] sm:$0xf]  ;;  %v3301_v11 = vld [vmem:[%s3295_s6 + $0x1c] sm:$0xf]  ;;  %v3304_v12 = vld [vmem:[%s3295_s6 + $0x20] sm:$0x1]  ;;  %s3722_s9 = scalar_lea.vmem %s4433_s2, %s3289_s13 }
  0x1e   : > { %v472_v13 = vshrl.u32 %v3298_v10, 16  ;;  %v475_v14 = vshll.u32 %v3298_v10, 16  ;;  %v481_v15 = vshll.u32 %v3301_v11, 16  ;;  %v485_v16 = vshrl.u32 %v3301_v11, 16  ;;  %v3311_v17 = vld [vmem:[%s3295_s6 + $0x30] sm:$0xf] }
  0x1f   : > { %v491_v18 = vshll.u32 %v3304_v12, 16  ;;  %v3315_v19 = vld [vmem:[%s3295_s6 + $0x34] sm:$0xf]  ;;  %v3318_v20 = vld [vmem:[%s3295_s6 + $0x38] sm:$0x1]  ;;  %v520_v21 = vshrl.u32 %v3311_v17, 16 }
  0x20   : > { %v474_v22 = vrot.slane %v472_v13, 4  ;;  %v477_v23 = vrot.slane %v475_v14, 5  ;;  %v483_v24 = vrot.slane %v481_v15, 5  ;;  %v487_v25 = vrot.slane %v485_v16, 4  ;;  %v3322_v26 = vld [vmem:[%s3295_s6 + $0x48] sm:$0xf] }
  0x21   : > { %v493_v27 = vrot.slane %v491_v18, 5  ;;  %v522_v28 = vrot.slane %v520_v21, 4  ;;  %v523_v29 = vshll.u32 %v3311_v17, 16  ;;  %v529_v30 = vshll.u32 %v3315_v19, 16  ;;  %v3329_v35 = vld [vmem:[%s3295_s6 + $0x4c] sm:$0xf] }
  0x22   : > { %v478_v31 = vor.u32 %v477_v23, %v474_v22  ;;  %v488_v32 = vor.u32 %v487_v25, %v483_v24  ;;  %v533_v33 = vshrl.u32 %v3315_v19, 16  ;;  %v539_v34 = vshll.u32 %v3318_v20, 16  ;;  %v3340_v46 = vld [vmem:[%s3295_s6 + $0x50] sm:$0x1]  ;;  %v3349_v54 = vld [vmem:[%s3295_s6] sm:$0xf] }
  0x23   : > { %v525_v37 = vrot.slane %v523_v29, 5  ;;  %v531_v38 = vrot.slane %v529_v30, 5  ;;  %v568_v39 = vshrl.u32 %v3322_v26, 16  ;;  %v571_v40 = vshll.u32 %v3322_v26, 16  ;;  %v3355_v2 = vld [vmem:[%s3295_s6 + $0x4] sm:$0xf] }
  0x24   : > { %v479_v41 = vrot.slane %v478_v31, 4  ;;  %v489_v42 = vrot.slane %v488_v32, 4  ;;  %v535_v43 = vrot.slane %v533_v33, 4  ;;  %v541_v44 = vrot.slane %v539_v34, 5  ;;  %v3361_v8 = vld [vmem:[%s3295_s6 + $0x8] sm:$0x1] }
  0x25   : > { %v526_v45 = vor.u32 %v525_v37, %v522_v28  ;;  %v570_v47 = vrot.slane %v568_v39, 4  ;;  %v573_v48 = vrot.slane %v571_v40, 5  ;;  %v577_v49 = vshll.u32 %v3329_v35, 16  ;;  %v3368_v16 = vld [vmem:[%s3295_s6 + $0x24] sm:$0xf]  ;;  %s297_s13 = sand.u32 1, %s3144_s18  }
  0x26   : > { %v484_v50 = vsel %vm3333_vm4, %v479_v41, %v483_v24  ;;  %v494_v51 = vsel %vm3333_vm4, %v489_v42, %v493_v27  ;;  %v536_v52 = vor.u32 %v535_v43, %v531_v38  ;;  %v581_v53 = vshrl.u32 %v3329_v35, 16  ;;  %v3375_v29 = vld [vmem:[%s3295_s6 + $0x28] sm:$0xf]  ;;  %v3380_v33 = vld [vmem:[%s3295_s6 + $0x2c] sm:$0x1] }
  0x27   : > { %v621_v55 = vunpack.c.l.b16 %v484_v50  ;;  %v622_v56 = vunpack.c.l.b16 %v494_v51  ;;  %v527_v57 = vrot.slane %v526_v45, 4  ;;  %v574_v58 = vor.u32 %v573_v48, %v570_v47  ;;  %v3386_v41 = vld [vmem:[%s3295_s6 + $0x3c] sm:$0xf] }
  0x28   : > { %v537_v59 = vrot.slane %v536_v52, 4  ;;  %v579_v60 = vrot.slane %v577_v49, 5  ;;  %v583_v61 = vrot.slane %v581_v53, 4  ;;  %v587_v62 = vshll.u32 %v3340_v46, 16 }
  0x29   : > { %v635_v63 = vpack.c.b16 %v622_v56, %v621_v55  ;;  %v532_v0 = vsel %vm3333_vm4, %v527_v57, %v531_v38  ;;  %v575_v1 = vrot.slane %v574_v58, 4  ;;  %v424_v3 = vshrl.u32 %v3349_v54, 16  ;;  %v3392_v55 = vld [vmem:[%s3295_s6 + $0x40] sm:$0xf] }
  0x2a   : > { %v542_v4 = vsel %vm3333_vm4, %v537_v59, %v541_v44  ;;  %v625_v5 = vunpack.c.l.b16 %v532_v0  ;;  %v584_v6 = vor.u32 %v583_v61, %v579_v60  ;;  %v589_v7 = vrot.slane %v587_v62, 5  ;;  %v3403_v62 = vld [vmem:[%s3295_s6 + $0x54] sm:$0xf] }
  0x2b   : > { %2806 = vmatmul.msk.bf16.vlgmr.msra.gmra.mxu1 %vm641_vm3, %v635_v63  ;;  %v626_v9 = vunpack.c.l.b16 %v542_v4  ;;  %v580_v13 = vsel %vm3333_vm4, %v575_v1, %v579_v60  ;;  %v426_v14 = vrot.slane %v424_v3, 4  ;;  %v427_v15 = vshll.u32 %v3349_v54, 16  ;;  %v3399_v60 = vld [vmem:[%s3295_s6 + $0x44] sm:$0x1] }
  0x2c   : > { %v585_v18 = vrot.slane %v584_v6, 4  ;;  %v629_v21 = vunpack.c.l.b16 %v580_v13  ;;  %v433_v22 = vshll.u32 %v3355_v2, 16  ;;  %v437_v23 = vshrl.u32 %v3355_v2, 16 }
  0x2d   : > { %v637_v24 = vpack.c.b16 %v626_v9, %v625_v5  ;;  %v429_v25 = vrot.slane %v427_v15, 5  ;;  %v443_v27 = vshll.u32 %v3361_v8, 16  ;;  %v851_v28 = vrot.slane %v3361_v8, 5 }
  0x2e   : > { %v590_v30 = vsel %vm3333_vm4, %v585_v18, %v589_v7  ;;  %v435_v31 = vrot.slane %v433_v22, 5  ;;  %v439_v32 = vrot.slane %v437_v23, 4  ;;  %v496_v34 = vshrl.u32 %v3368_v16, 16 }
  0x2f   : > { %2808 = vmatmul.msk.bf16.vlgmr.msra.gmra.mxu2 %vm641_vm3, %v637_v24  ;;  %v630_v37 = vunpack.c.l.b16 %v590_v30  ;;  %v430_v38 = vor.u32 %v429_v25, %v426_v14  ;;  %v445_v39 = vrot.slane %v443_v27, 5  ;;  %v499_v40 = vshll.u32 %v3368_v16, 16  ;;  %v3414_v24 = vld [vmem:[%s3295_s6 + $0x58] sm:$0xf]  ;;  %v3417_v25 = vld [vmem:[%s3295_s6 + $0x5c] sm:$0x1] }
  0x30   : > { %v440_v42 = vor.u32 %v439_v32, %v435_v31  ;;  %v498_v43 = vrot.slane %v496_v34, 4  ;;  %v505_v44 = vshll.u32 %v3375_v29, 16  ;;  %v509_v45 = vshrl.u32 %v3375_v29, 16  ;;  %v3422_v34 = vld [vmem:[%s3295_s6 + $0xc] sm:$0xf] }
  0x31   : > { %v639_v47 = vpack.c.b16 %v630_v37, %v629_v21  ;;  %v431_v48 = vrot.slane %v430_v38, 4  ;;  %v501_v49 = vrot.slane %v499_v40, 5  ;;  %v515_v50 = vshll.u32 %v3380_v33, 16 }
  0x32   : > { %v441_v51 = vrot.slane %v440_v42, 4  ;;  %v507_v52 = vrot.slane %v505_v44, 5  ;;  %v511_v53 = vrot.slane %v509_v45, 4  ;;  %v544_v56 = vshrl.u32 %v3386_v41, 16 }
  0x33   : > { %2810 = vmatmul.msk.bf16.vlgmr.msra.gmra.mxu3 %vm641_vm3, %v639_v47  ;;  %v436_v57 = vsel %vm3333_vm4, %v431_v48, %v435_v31  ;;  %v502_v58 = vor.u32 %v501_v49, %v498_v43  ;;  %v517_v59 = vrot.slane %v515_v50, 5  ;;  %v547_v61 = vshll.u32 %v3386_v41, 16  ;;  %v3432_v50 = vld [vmem:[%s3295_s6 + $0x10] sm:$0xf] }
  0x34   : > { %v446_v63 = vsel %vm3333_vm4, %v441_v51, %v445_v39  ;;  %v617_v0 = vunpack.c.l.b16 %v436_v57  ;;  %v512_v1 = vor.u32 %v511_v53, %v507_v52  ;;  %v546_v3 = vrot.slane %v544_v56, 4 }
  0x35   : > { %v618_v4 = vunpack.c.l.b16 %v446_v63  ;;  %v503_v5 = vrot.slane %v502_v58, 4  ;;  %v549_v6 = vrot.slane %v547_v61, 5  ;;  %v553_v7 = vshll.u32 %v3392_v55, 16  ;;  %v3436_v58 = vld [vmem:[%s3295_s6 + $0x14] sm:$0x1] }
  0x36   : > { %v513_v9 = vrot.slane %v512_v1, 4  ;;  %v557_v13 = vshrl.u32 %v3392_v55, 16  ;;  %v563_v14 = vshll.u32 %v3399_v60, 16  ;;  %v592_v15 = vshrl.u32 %v3403_v62, 16 }
  0x37   : > { %v633_v18 = vpack.c.b16 %v618_v4, %v617_v0  ;;  %v508_v21 = vsel %vm3333_vm4, %v503_v5, %v507_v52  ;;  %v550_v22 = vor.u32 %v549_v6, %v546_v3  ;;  %v555_v23 = vrot.slane %v553_v7, 5 }
  0x38   : > { %v518_v27 = vsel %vm3333_vm4, %v513_v9, %v517_v59  ;;  %v623_v30 = vunpack.c.l.b16 %v508_v21  ;;  %v559_v31 = vrot.slane %v557_v13, 4  ;;  %v565_v32 = vrot.slane %v563_v14, 5 }
  0x39   : > { %2804 = vmatmul.msk.bf16.vlgmr.msra.gmra.mxu0 %vm641_vm3, %v633_v18  ;;  %v624_v37 = vunpack.c.l.b16 %v518_v27  ;;  %v551_v38 = vrot.slane %v550_v22, 4  ;;  %v594_v39 = vrot.slane %v592_v15, 4  ;;  %v595_v40 = vshll.u32 %v3403_v62, 16 }
  0x3a   : > { %v560_v42 = vor.u32 %v559_v31, %v555_v23  ;;  %v601_v43 = vshll.u32 %v3414_v24, 16  ;;  %v605_v44 = vshrl.u32 %v3414_v24, 16  ;;  %v611_v45 = vshll.u32 %v3417_v25, 16  ;;  %v3457_v31 = vld [vmem:[%s3448_s8] sm:$0xf] }
  0x3b   : > { %v636_v47 = vpack.c.b16 %v624_v37, %v623_v30  ;;  %v556_v48 = vsel %vm3333_vm4, %v551_v38, %v555_v23  ;;  %v597_v49 = vrot.slane %v595_v40, 5  ;;  %v448_v51 = vshrl.u32 %v3422_v34, 16  ;;  %v2936_v30 = vld [vmem:[%s4434_s3 + $0x18] sm:$0xf] }
  0x3c   : > { %v561_v52 = vrot.slane %v560_v42, 4  ;;  %v627_v53 = vunpack.c.l.b16 %v556_v48  ;;  %v603_v56 = vrot.slane %v601_v43, 5  ;;  %v607_v57 = vrot.slane %v605_v44, 4 }
  0x3d   : > { %2807 = vmatmul.msk.bf16.gmra.mxu1 %vm641_vm3, %v636_v47  ;;  %v598_v59 = vor.u32 %v597_v49, %v594_v39  ;;  %v613_v61 = vrot.slane %v611_v45, 5  ;;  %v450_v63 = vrot.slane %v448_v51, 4  ;;  %v451_v0 = vshll.u32 %v3422_v34, 16  ;;  %v3466_v47 = vld [vmem:[%s3448_s8 + $0x4] sm:$0xf] }
  0x3e   : > { %v566_v1 = vsel %vm3333_vm4, %v561_v52, %v565_v32  ;;  %v608_v3 = vor.u32 %v607_v57, %v603_v56  ;;  %v457_v4 = vshll.u32 %v3432_v50, 16  ;;  %v461_v5 = vshrl.u32 %v3432_v50, 16 }
  0x3f   : > { %v628_v6 = vunpack.c.l.b16 %v566_v1  ;;  %v599_v7 = vrot.slane %v598_v59, 4  ;;  %v453_v9 = vrot.slane %v451_v0, 5  ;;  %v467_v13 = vshll.u32 %v3436_v58, 16 }
  0x40   : > { %v609_v14 = vrot.slane %v608_v3, 4  ;;  %v459_v15 = vrot.slane %v457_v4, 5  ;;  %v463_v18 = vrot.slane %v461_v5, 4  ;;  %v2852_v42 = vrot.slane %v3349_v54, 9  ;;  %v2927_v3 = vld [vmem:[%s4434_s3 + $0x14] sm:$0xf] }
  0x41   : > { %v638_v21 = vpack.c.b16 %v628_v6, %v627_v53  ;;  %v604_v22 = vsel %vm3333_vm4, %v599_v7, %v603_v56  ;;  %v454_v23 = vor.u32 %v453_v9, %v450_v63  ;;  %v469_v27 = vrot.slane %v467_v13, 5  ;;  %v2994_v9 = vld [vmem:[%s4434_s3 + $0x20] sm:$0xf] }
  0x42   : > { %v614_v32 = vsel %vm3333_vm4, %v609_v14, %v613_v61  ;;  %v631_v37 = vunpack.c.l.b16 %v604_v22  ;;  %v464_v38 = vor.u32 %v463_v18, %v459_v15  ;;  %v848_v43 = vrot.slane %v3355_v2, 5  ;;  %v3478_v2 = vld [vmem:[%s3448_s8 + $0x8] sm:$0x1]  ;;  %v2977_v61 = vld [vmem:[%s4434_s3 + $0x1c] sm:$0xf]  ;;  %v3026_v14 = vld [vmem:[%s3295_s6] sm:$0xff] }
  0x43   : > { %2809 = vmatmul.msk.bf16.gmra.mxu2 %vm641_vm3, %v638_v21  ;;  %v632_v39 = vunpack.c.l.b16 %v614_v32  ;;  %v455_v40 = vrot.slane %v454_v23, 4  ;;  %v1713_v45 = vsel %vm666_vm0, %v2936_v30, 0  ;;  %v1155_v48 = vshrl.u32 %v3457_v31, 16 }
  0x44   : > { %v465_v44 = vrot.slane %v464_v38, 4  ;;  %v1158_v49 = vshll.u32 %v3457_v31, 16  ;;  %v850_v54 = vrot.slane %v848_v43, 4  ;;  %1722 = vmatpush.bf16.msra.mxu2 %v1713_v45  ;;  %v1164_v1 = vshll.u32 %v3466_v47, 16  ;;  %v3507_v38 = vld [vmem:[%s3448_s8 + $0xc] sm:$0xf] }
  0x45   : > { %v640_v51 = vpack.c.b16 %v632_v39, %v631_v37  ;;  %v460_v52 = vsel %vm3333_vm4, %v455_v40, %v459_v15  ;;  %v1157_v59 = vrot.slane %v1155_v48, 4  ;;  %v849_v4 = vsel %vm3473_vm7, %v2852_v42, %v848_v43  ;;  %v3511_v39 = vld [vmem:[%s3448_s8 + $0x10] sm:$0xf] }
  0x46   : > { %v470_v56 = vsel %vm3333_vm4, %v465_v44, %v469_v27  ;;  %v619_v57 = vunpack.c.l.b16 %v460_v52  ;;  %v1160_v0 = vrot.slane %v1158_v49, 5  ;;  %v852_v5 = vsel %vm3473_vm7, %v850_v54, %v851_v28 }
  0x47   : > { %2811 = vmatmul.msk.bf16.gmra.mxu3 %vm641_vm3, %v640_v51  ;;  %v620_v63 = vunpack.c.l.b16 %v470_v56  ;;  %v1168_v6 = vshrl.u32 %v3466_v47, 16  ;;  %v1174_v7 = vshll.u32 %v3478_v2, 16  ;;  %v1166_v18 = vrot.slane %v1164_v1, 5 }
  0x48   : > { %v1161_v15 = vor.u32 %v1160_v0, %v1157_v59  ;;  %v2023_v21 = vsel %vm666_vm0, %v2977_v61, 0  ;;  %v1579_v28 = vsel %vm666_vm0, %v2927_v3, 0  ;;  %v904_v22 = vunpack.c.l.b16 %v849_v4  ;;  %v3034_v0 = vld [vmem:[%s3448_s8] sm:$0xff] }
  0x49   : > { %v634_v13 = vpack.c.b16 %v620_v63, %v619_v57  ;;  %v1170_v8 = vrot.slane %v1168_v6, 4  ;;  %2032 = vmatpush.bf16.msra.mxu3 %v2023_v21  ;;  %v905_v23 = vunpack.c.l.b16 %v852_v5  ;;  %1588 = vmatpush.bf16.msra.mxu1 %v1579_v28  ;;  %v2205_v30 = vsel %vm666_vm0, %v2994_v9, 0 }
  0x4a   : > { %v1162_v27 = vrot.slane %v1161_v15, 4  ;;  %v1176_v37 = vrot.slane %v1174_v7, 5  ;;  %2214 = vmatpush.bf16.msra.mxu0 %v2205_v30  ;;  %v855_v42 = vrot.slane %v3432_v50, 5  ;;  %v1179_v45 = vshrl.u32 %v3507_v38, 16  ;;  %v3545_v30 = vld [vmem:[%s3448_s8 + $0x18] sm:$0xf] }
  0x4b   : > { %2805 = vmatmul.msk.bf16.gmra.mxu0 %vm641_vm3, %v634_v13  ;;  %v1171_v32 = vor.u32 %v1170_v8, %v1166_v18  ;;  %v920_v43 = vpack.c.b16 %v905_v23, %v904_v22  ;;  %v1182_v48 = vshll.u32 %v3507_v38, 16  ;;  %v1188_v51 = vshll.u32 %v3511_v39, 16  ;;  %v3027_v8 = vld [vmem:[%s3295_s6 + $0xc] sm:$0xff] }
  0x4c   : > { %v1167_v44 = vsel %vm3333_vm4, %v1162_v27, %v1166_v18  ;;  %v1192_v52 = vshrl.u32 %v3511_v39, 16  ;;  %v2854_v54 = vrot.slane %v3298_v10, 9  ;;  %v2853_v50 = vrot.slane %v3422_v34, 9 }
  0x4d   : > { %2844 = vmatmul.msk.bf16.vlgmr.msrb.gmra.mxu1 %vm641_vm3, %v3026_v14  ;;  %v1172_v40 = vrot.slane %v1171_v32, 4  ;;  %v862_v56 = vrot.slane %v3301_v11, 5  ;;  %v1348_v57 = vunpack.c.l.b16 %v1167_v44  ;;  %v857_v59 = vrot.slane %v855_v42, 4  ;;  %v3532_v11 = vld [vmem:[%s3448_s8 + $0x14] sm:$0x1] }
  0x4e   : > { %v858_v61 = vrot.slane %v3436_v58, 5  ;;  %v865_v63 = vrot.slane %v3304_v12, 5  ;;  %v1181_v3 = vrot.slane %v1179_v45, 4  ;;  %v1184_v4 = vrot.slane %v1182_v48, 5 }
  0x4f   : > { %v1177_v49 = vsel %vm3333_vm4, %v1172_v40, %v1176_v37  ;;  %v863_v10 = vsel %vm3473_vm7, %v2854_v54, %v862_v56  ;;  %v1190_v5 = vrot.slane %v1188_v51, 5  ;;  %v1194_v34 = vrot.slane %v1192_v52, 4  ;;  %v3549_v40 = vld [vmem:[%s3448_s8 + $0x1c] sm:$0xf] }
  0x50   : > { %v1349_v1 = vunpack.c.l.b16 %v1177_v49  ;;  %v864_v6 = vrot.slane %v862_v56, 4  ;;  %v908_v7 = vunpack.c.l.b16 %v863_v10  ;;  %v856_v12 = vsel %vm3473_vm7, %v2853_v50, %v855_v42 }
  0x51   : > { %v859_v13 = vsel %vm3473_vm7, %v857_v59, %v858_v61  ;;  %v1185_v14 = vor.u32 %v1184_v4, %v1181_v3  ;;  %v1195_v18 = vor.u32 %v1194_v34, %v1190_v5  ;;  %v1198_v21 = vshll.u32 %v3532_v11, 16  ;;  %v3035_v59 = vld [vmem:[%s3448_s8 + $0xc] sm:$0xff] }
  0x52   : > { %v866_v58 = vsel %vm3473_vm7, %v864_v6, %v865_v63  ;;  %v1364_v9 = vpack.c.b16 %v1349_v1, %v1348_v57  ;;  %v906_v22 = vunpack.c.l.b16 %v856_v12  ;;  %v907_v23 = vunpack.c.l.b16 %v859_v13  ;;  %v3579_v13 = vld [vmem:[%s3448_s8 + $0x28] sm:$0xf] }
  0x53   : > { %2861 = vmatmul.msk.bf16.vlgmr.msrb.gmra.mxu2 %vm641_vm3, %v920_v43  ;;  %v909_v15 = vunpack.c.l.b16 %v866_v58  ;;  %v1186_v27 = vrot.slane %v1185_v14, 4  ;;  %v1196_v32 = vrot.slane %v1195_v18, 4  ;;  %v1200_v37 = vrot.slane %v1198_v21, 5  ;;  %v3028_v58 = vld [vmem:[%s3295_s6 + $0x18] sm:$0xff] }
  0x54   : > { %v2855_v42 = vrot.slane %v3368_v16, 9  ;;  %v869_v43 = vrot.slane %v3375_v29, 5  ;;  %v921_v44 = vpack.c.b16 %v907_v23, %v906_v22  ;;  %v1203_v45 = vshrl.u32 %v3545_v30, 16 }
  0x55   : > { %v922_v28 = vpack.c.b16 %v909_v15, %v908_v7  ;;  %v872_v48 = vrot.slane %v3380_v33, 5  ;;  %v1191_v49 = vsel %vm3333_vm4, %v1186_v27, %v1190_v5  ;;  %v1206_v51 = vshll.u32 %v3545_v30, 16  ;;  %v3569_v5 = vld [vmem:[%s3448_s8 + $0x20] sm:$0x1] }
  0x56   : > { %v870_v52 = vsel %vm3473_vm7, %v2855_v42, %v869_v43  ;;  %v871_v54 = vrot.slane %v869_v43, 4  ;;  %v1201_v16 = vsel %vm3333_vm4, %v1196_v32, %v1200_v37  ;;  %v1212_v29 = vshll.u32 %v3549_v40, 16 }
  0x57   : > { %2902 = vmatmul.msk.bf16.vlgmr.msrb.gmra.mxu3 %vm641_vm3, %v3034_v0  ;;  %v1216_v50 = vshrl.u32 %v3549_v40, 16  ;;  %v910_v56 = vunpack.c.l.b16 %v870_v52  ;;  %v1350_v61 = vunpack.c.l.b16 %v1191_v49  ;;  %v1351_v63 = vunpack.c.l.b16 %v1201_v16 }
  0x58   : > { %v873_v33 = vsel %vm3473_vm7, %v871_v54, %v872_v48  ;;  %v1205_v0 = vrot.slane %v1203_v45, 4  ;;  %v1208_v1 = vrot.slane %v1206_v51, 5  ;;  %v1214_v3 = vrot.slane %v1212_v29, 5  ;;  %v3036_v45 = vld [vmem:[%s3448_s8 + $0x18] sm:$0xff]  ;;  %v3593_v51 = vld [vmem:[%s3448_s8 + $0x2c] sm:$0x1] }
  0x59   : > { %v911_v57 = vunpack.c.l.b16 %v873_v33  ;;  %v1218_v4 = vrot.slane %v1216_v50, 4  ;;  %v1365_v34 = vpack.c.b16 %v1351_v63, %v1350_v61  ;;  %v1222_v12 = vshll.u32 %v3569_v5, 16  ;;  %v3029_v50 = vld [vmem:[%s3295_s6 + $0x24] sm:$0xff] }
  0x5a   : > { %v1209_v6 = vor.u32 %v1208_v1, %v1205_v0  ;;  %v1236_v22 = vshll.u32 %v3579_v13, 16  ;;  %v1240_v23 = vshrl.u32 %v3579_v13, 16  ;;  %v1246_v16 = vshll.u32 %v3593_v51, 16 }
  0x5b   : > { %2911 = vmatmul.msk.bf16.vlgmr.msrb.gmra.mxu0 %vm641_vm3, %v1364_v9  ;;  %v923_v10 = vpack.c.b16 %v911_v57, %v910_v56  ;;  %v1219_v7 = vor.u32 %v1218_v4, %v1214_v3  ;;  %v3576_v9 = vld [vmem:[%s3448_s8 + $0x24] sm:$0xf]  ;;  %v1224_v18 = vrot.slane %v1222_v12, 5  ;;  %v2856_v12 = vrot.slane %v3311_v17, 9 }
  0x5c   : > { %v1210_v14 = vrot.slane %v1209_v6, 4  ;;  %v1227_v21 = vshrl.u32 %v3576_v9, 16  ;;  %v1238_v43 = vrot.slane %v1236_v22, 5  ;;  %v1248_v57 = vrot.slane %v1246_v16, 5 }
  0x5d   : > { %2845 = vmatmul.msk.bf16.gmra.mxu1 %vm641_vm3, %v3027_v8  ;;  %v1220_v15 = vrot.slane %v1219_v7, 4  ;;  %v1230_v8 = vshll.u32 %v3576_v9, 16  ;;  %v879_v22 = vrot.slane %v3318_v20, 5 }
  0x5e   : > { %v1215_v27 = vsel %vm3333_vm4, %v1210_v14, %v1214_v3  ;;  %v1229_v37 = vrot.slane %v1227_v21, 4 }
  0x5f   : > { %v1225_v32 = vsel %vm3333_vm4, %v1220_v15, %v1224_v18  ;;  %v1232_v42 = vrot.slane %v1230_v8, 5  ;;  %v1352_v48 = vunpack.c.l.b16 %v1215_v27 }
  0x60   : > { %v1353_v49 = vunpack.c.l.b16 %v1225_v32 }
  0x61   : > { %v1233_v52 = vor.u32 %v1232_v42, %v1229_v37  ;;  %v3030_v42 = vld [vmem:[%s3295_s6 + $0x30] sm:$0xff] }
  0x62   : > { %v1366_v29 = vpack.c.b16 %v1353_v49, %v1352_v48  ;;  %v3632_v49 = vld [vmem:[%s3448_s8 + $0x3c] sm:$0xf] }
  0x63   : > { %2862 = vmatmul.msk.bf16.gmra.mxu2 %vm641_vm3, %v921_v44  ;;  %v1242_v44 = vrot.slane %v1240_v23, 4  ;;  %v1234_v56 = vrot.slane %v1233_v52, 4  ;;  %v3620_v23 = vld [vmem:[%s3448_s8 + $0x38] sm:$0x1]  ;;  %v3635_v52 = vld [vmem:[%s3448_s8 + $0x40] sm:$0xf] }
  0x64   : > { %v1270_v32 = vshll.u32 %v3620_v23, 16 }
  0x65   : > { %v1243_v54 = vor.u32 %v1242_v44, %v1238_v43  ;;  %v1239_v61 = vsel %vm3333_vm4, %v1234_v56, %v1238_v43  ;;  %v1275_v56 = vshrl.u32 %v3632_v49, 16 }
  0x66   : > { %v1354_v6 = vunpack.c.l.b16 %v1239_v61  ;;  %v1272_v48 = vrot.slane %v1270_v32, 5  ;;  %v1288_v61 = vshrl.u32 %v3635_v52, 16 }
  0x67   : > { %2903 = vmatmul.msk.bf16.gmra.mxu3 %vm641_vm3, %v3035_v59  ;;  %v1244_v33 = vrot.slane %v1243_v54, 4  ;;  %v3603_v59 = vld [vmem:[%s3448_s8 + $0x34] sm:$0xf] }
  0x68   : > { %v1260_v3 = vshll.u32 %v3603_v59, 16  ;;  %v1264_v4 = vshrl.u32 %v3603_v59, 16 }
  0x69   : > { %v1249_v63 = vsel %vm3333_vm4, %v1244_v33, %v1248_v57  ;;  %v1278_v33 = vshll.u32 %v3632_v49, 16  ;;  %v1284_v57 = vshll.u32 %v3635_v52, 16 }
  0x6a   : > { %v1355_v7 = vunpack.c.l.b16 %v1249_v63  ;;  %v1262_v18 = vrot.slane %v1260_v3, 5  ;;  %v1266_v21 = vrot.slane %v1264_v4, 4  ;;  %v2857_v3 = vrot.slane %v3386_v41, 9 }
  0x6b   : > { %2912 = vmatmul.msk.bf16.gmra.mxu0 %vm641_vm3, %v1365_v34  ;;  %v876_v34 = vrot.slane %v3315_v19, 5 }
  0x6c   : > { %v1367_v27 = vpack.c.b16 %v1355_v7, %v1354_v6  ;;  %v1280_v6 = vrot.slane %v1278_v33, 5  ;;  %v1286_v7 = vrot.slane %v1284_v57, 5 }
  0x6d   : > { %2846 = vmatmul.msk.bf16.gmra.mxu1 %vm641_vm3, %v3028_v58  ;;  %v3037_v58 = vld [vmem:[%s3448_s8 + $0x24] sm:$0xff]  ;;  %v878_v8 = vrot.slane %v876_v34, 4  ;;  %v877_v17 = vsel %vm3473_vm7, %v2856_v12, %v876_v34  ;;  %v1277_v34 = vrot.slane %v1275_v56, 4  ;;  %v1290_v12 = vrot.slane %v1288_v61, 4  ;;  %v3039_v56 = vld [vmem:[%s3448_s8 + $0x3c] sm:$0xff] }
  0x6e   : > { %v912_v43 = vunpack.c.l.b16 %v877_v17  ;;  %v3662_v17 = vld [vmem:[%s3448_s8 + $0x48] sm:$0xf] }
  0x6f   : > { %v880_v37 = vsel %vm3473_vm7, %v878_v8, %v879_v22  ;;  %v3031_v8 = vld [vmem:[%s3295_s6 + $0x3c] sm:$0xff] }
  0x70   : > { %v913_v20 = vunpack.c.l.b16 %v880_v37  ;;  %v3665_v37 = vld [vmem:[%s3448_s8 + $0x4c] sm:$0xf] }
  0x72   : > { %v924_v54 = vpack.c.b16 %v913_v20, %v912_v43  ;;  %v1302_v43 = vshll.u32 %v3662_v17, 16 }
  0x73   : > { %2863 = vmatmul.msk.bf16.gmra.mxu2 %vm641_vm3, %v922_v28  ;;  %v3600_v28 = vld [vmem:[%s3448_s8 + $0x30] sm:$0xf] }
  0x74   : > { %v1251_v0 = vshrl.u32 %v3600_v28, 16  ;;  %v1254_v1 = vshll.u32 %v3600_v28, 16 }
  0x76   : > { %v1253_v14 = vrot.slane %v1251_v0, 4  ;;  %v1256_v15 = vrot.slane %v1254_v1, 5  ;;  %v3038_v0 = vld [vmem:[%s3448_s8 + $0x30] sm:$0xff] }
  0x77   : > { %2904 = vmatmul.msk.bf16.gmra.mxu3 %vm641_vm3, %v3036_v45 }
  0x78   : > { %v1257_v19 = vor.u32 %v1256_v15, %v1253_v14 }
  0x7a   : > { %v1258_v44 = vrot.slane %v1257_v19, 4 }
  0x7b   : > { %2913 = vmatmul.msk.bf16.gmra.mxu0 %vm641_vm3, %v1366_v29 }
  0x7c   : > { %v1263_v16 = vsel %vm3333_vm4, %v1258_v44, %v1262_v18  ;;  %v1308_v44 = vshll.u32 %v3665_v37, 16 }
  0x7d   : > { %2847 = vmatmul.msk.bf16.gmra.mxu1 %vm641_vm3, %v3029_v50  ;;  %v883_v50 = vrot.slane %v3392_v55, 5  ;;  %v1356_v63 = vunpack.c.l.b16 %v1263_v16  ;;  %v886_v55 = vrot.slane %v3399_v60, 5  ;;  %v1312_v16 = vshrl.u32 %v3665_v37, 16 }
  0x7e   : > { %v1310_v61 = vrot.slane %v1308_v44, 5 }
  0x7f   : > { %v885_v4 = vrot.slane %v883_v50, 4  ;;  %v884_v15 = vsel %vm3473_vm7, %v2857_v3, %v883_v50  ;;  %v1304_v50 = vrot.slane %v1302_v43, 5  ;;  %v1314_v3 = vrot.slane %v1312_v16, 4 }
  0x80   : > { %v914_v22 = vunpack.c.l.b16 %v884_v15 }
  0x81   : > { %v887_v41 = vsel %vm3473_vm7, %v885_v4, %v886_v55  ;;  %v3682_v4 = vld [vmem:[%s3448_s8 + $0x50] sm:$0x1] }
  0x83   : > { %2864 = vmatmul.msk.bf16.gmra.mxu2 %vm641_vm3, %v923_v10  ;;  %v1267_v10 = vor.u32 %v1266_v21, %v1262_v18  ;;  %v1281_v18 = vor.u32 %v1280_v6, %v1277_v34  ;;  %v1291_v21 = vor.u32 %v1290_v12, %v1286_v7  ;;  %v3032_v12 = vld [vmem:[%s3295_s6 + $0x48] sm:$0xff] }
  0x85   : > { %v1268_v45 = vrot.slane %v1267_v10, 4  ;;  %v1282_v19 = vrot.slane %v1281_v18, 4  ;;  %v1292_v10 = vrot.slane %v1291_v21, 4 }
  0x87   : > { %2905 = vmatmul.msk.bf16.gmra.mxu3 %vm641_vm3, %v3037_v58  ;;  %v1273_v29 = vsel %vm3333_vm4, %v1268_v45, %v1272_v48  ;;  %v3651_v58 = vld [vmem:[%s3448_s8 + $0x44] sm:$0x1]  ;;  %v1287_v45 = vsel %vm3333_vm4, %v1282_v19, %v1286_v7  ;;  %v1315_v7 = vor.u32 %v1314_v3, %v1310_v61 }
  0x88   : > { %v1357_v1 = vunpack.c.l.b16 %v1273_v29  ;;  %v1294_v60 = vshll.u32 %v3651_v58, 16  ;;  %v1358_v33 = vunpack.c.l.b16 %v1287_v45 }
  0x89   : > { %v1316_v18 = vrot.slane %v1315_v7, 4  ;;  %v3741_v7 = vld [vmem:[%s3722_s9 + $0x4] sm:$0xf] }
  0x8a   : > { %v1368_v14 = vpack.c.b16 %v1357_v1, %v1356_v63  ;;  %v1296_v32 = vrot.slane %v1294_v60, 5  ;;  %v2858_v63 = vrot.slane %v3322_v26, 9  ;;  %v893_v1 = vrot.slane %v3340_v46, 5  ;;  %v3695_v60 = vld [vmem:[%s3448_s8 + $0x54] sm:$0xf] }
  0x8b   : > { %2914 = vmatmul.msk.bf16.gmra.mxu0 %vm641_vm3, %v1367_v27  ;;  %v915_v27 = vunpack.c.l.b16 %v887_v41  ;;  %v1318_v46 = vshll.u32 %v3682_v4, 16  ;;  %v1323_v19 = vshrl.u32 %v3695_v60, 16 }
  0x8c   : > { %v1297_v48 = vsel %vm3333_vm4, %v1292_v10, %v1296_v32  ;;  %v1326_v10 = vshll.u32 %v3695_v60, 16 }
  0x8d   : > { %2848 = vmatmul.msk.bf16.gmra.mxu1 %vm641_vm3, %v3030_v42  ;;  %v1299_v42 = vshrl.u32 %v3662_v17, 16  ;;  %v925_v20 = vpack.c.b16 %v915_v27, %v914_v22  ;;  %v1359_v57 = vunpack.c.l.b16 %v1297_v48  ;;  %v1320_v21 = vrot.slane %v1318_v46, 5  ;;  %v3033_v46 = vld [vmem:[%s3295_s6 + $0x54] sm:$0xff]  ;;  %s2795_s6 = sshll.u32 %s297_s13, 8 }
  0x8e   : > { %s4097_s11 = scalar_lea.vmem [#allocation2], %s2795_s6 }
  0x8f   : > { %v1301_v29 = vrot.slane %v1299_v42, 4  ;;  %v1369_v55 = vpack.c.b16 %v1359_v57, %v1358_v33  ;;  %v1321_v42 = vsel %vm3333_vm4, %v1316_v18, %v1320_v21  ;;  %v2859_v33 = vrot.slane %v3403_v62, 9 }
  0x90   : > { %v1361_v16 = vunpack.c.l.b16 %v1321_v42 }
  0x93   : > { %2865 = vmatmul.msk.bf16.gmra.mxu2 %vm641_vm3, %v924_v54  ;;  %v890_v54 = vrot.slane %v3329_v35, 5  ;;  %v1305_v35 = vor.u32 %v1304_v50, %v1301_v29  ;;  %v1325_v29 = vrot.slane %v1323_v19, 4  ;;  %v1328_v50 = vrot.slane %v1326_v10, 5 }
  0x95   : > { %v891_v6 = vsel %vm3473_vm7, %v2858_v63, %v890_v54  ;;  %v1329_v3 = vor.u32 %v1328_v50, %v1325_v29 }
  0x96   : > { %v916_v15 = vunpack.c.l.b16 %v891_v6 }
  0x97   : > { %2906 = vmatmul.msk.bf16.gmra.mxu3 %vm641_vm3, %v3038_v0  ;;  %v892_v0 = vrot.slane %v890_v54, 4  ;;  %v3040_v54 = vld [vmem:[%s3448_s8 + $0x48] sm:$0xff]  ;;  %v1330_v10 = vrot.slane %v1329_v3, 4 }
  0x99   : > { %v894_v26 = vsel %vm3473_vm7, %v892_v0, %v893_v1 }
  0x9a   : > { %v917_v41 = vunpack.c.l.b16 %v894_v26 }
  0x9b   : > { %2915 = vmatmul.msk.bf16.gmra.mxu0 %vm641_vm3, %v1368_v14  ;;  %v1306_v14 = vrot.slane %v1305_v35, 4  ;;  %v3733_v35 = vld [vmem:[%s3722_s9] sm:$0xf] }
  0x9c   : > { %v926_v27 = vpack.c.b16 %v917_v41, %v916_v15  ;;  %v1781_v15 = vshrl.u32 %v3733_v35, 16  ;;  %v1784_v41 = vshll.u32 %v3733_v35, 16 }
  0x9d   : > { %2849 = vmatmul.msk.bf16.gmra.mxu1 %vm641_vm3, %v3031_v8  ;;  %v3698_v8 = vld [vmem:[%s3448_s8 + $0x58] sm:$0xf]  ;;  %v1311_v22 = vsel %vm3333_vm4, %v1306_v14, %v1310_v61  ;;  %v900_v61 = vrot.slane %v3417_v25, 5  ;;  %v1474_v14 = vrot.slane %v3466_v47, 5  ;;  %v1477_v47 = vrot.slane %v3478_v2, 5 }
  0x9e   : > { %v1332_v32 = vshll.u32 %v3698_v8, 16  ;;  %v1336_v44 = vshrl.u32 %v3698_v8, 16  ;;  %v1360_v45 = vunpack.c.l.b16 %v1311_v22  ;;  %v1790_v22 = vshll.u32 %v3741_v7, 16 }
  0xa0   : > { %v1338_v63 = vrot.slane %v1336_v44, 4  ;;  %v1370_v62 = vpack.c.b16 %v1361_v16, %v1360_v45  ;;  %v2919_v44 = vrot.slane %v3457_v31, 9  ;;  %v1476_v45 = vrot.slane %v1474_v14, 4 }
  0xa1   : > { %v1786_v16 = vrot.slane %v1784_v41, 5  ;;  %v1792_v50 = vrot.slane %v1790_v22, 5 }
  0xa2   : > { %v1475_v31 = vsel %vm3473_vm7, %v2919_v44, %v1474_v14  ;;  %v1478_v3 = vsel %vm3473_vm7, %v1476_v45, %v1477_v47  ;;  %v3781_v47 = vld [vmem:[%s3722_s9 + $0xc] sm:$0xf]  ;;  %v3784_v44 = vld [vmem:[%s3722_s9 + $0x10] sm:$0xf] }
  0xa3   : > { %2866 = vmatmul.msk.bf16.gmra.mxu2 %vm641_vm3, %v925_v20  ;;  %v897_v20 = vrot.slane %v3414_v24, 5  ;;  %v3725_v24 = vld [vmem:[%s3448_s8 + $0x5c] sm:$0x1]  ;;  %v1531_v41 = vunpack.c.l.b16 %v1478_v3  ;;  %v1805_v3 = vshrl.u32 %v3781_v47, 16 }
  0xa4   : > { %v1342_v26 = vshll.u32 %v3725_v24, 16 }
  0xa5   : > { %v899_v57 = vrot.slane %v897_v20, 4  ;;  %v898_v25 = vsel %vm3473_vm7, %v2859_v33, %v897_v20 }
  0xa6   : > { %v918_v18 = vunpack.c.l.b16 %v898_v25  ;;  %v1344_v42 = vrot.slane %v1342_v26, 5 }
  0xa7   : > { %2907 = vmatmul.msk.bf16.gmra.mxu3 %vm641_vm3, %v3039_v56  ;;  %v1334_v56 = vrot.slane %v1332_v32, 5 }
  0xa8   : > { %v3685_v34 = vpop.f32.mrf.mxu1 }
  0xa9   : > { %v1339_v6 = vor.u32 %v1338_v63, %v1334_v56  ;;  %v397_v63 = vld [vmem:[%s3722_s9 + $0x8] sm:$0x1] }
  0xab   : > { %2916 = vmatmul.msk.bf16.gmra.mxu0 %vm641_vm3, %v1369_v55  ;;  %v901_v55 = vsel %vm3473_vm7, %v899_v57, %v900_v61  ;;  %v1340_v32 = vrot.slane %v1339_v6, 4  ;;  %v1335_v61 = vsel %vm3333_vm4, %v1330_v10, %v1334_v56  ;;  %v2100_v10 = vrot.slane %v3741_v7, 5 }
  0xac   : > { %v919_v21 = vunpack.c.l.b16 %v901_v55  ;;  %v3041_v55 = vld [vmem:[%s3448_s8 + $0x54] sm:$0xff]  ;;  %v1362_v6 = vunpack.c.l.b16 %v1335_v61  ;;  %s3170_s8 = smov 126  }
  0xad   : > { %2850 = vmatmul.msk.bf16.gmra.mxu1 %vm641_vm3, %v3032_v12  ;;  %v1345_v2 = vsel %vm3333_vm4, %v1340_v32, %v1344_v42 }
  0xae   : > { %v927_v29 = vpack.c.b16 %v919_v21, %v918_v18  ;;  %v1363_v56 = vunpack.c.l.b16 %v1345_v2  ;;  %v2102_v2 = vrot.slane %v2100_v10, 4 }
  0xb0   : > { %v3708_v43 = vpop.f32.mrf.mxu1  ;;  %v1371_v14 = vpack.c.b16 %v1363_v56, %v1362_v6  ;;  %v1484_v6 = vrot.slane %v3532_v11, 5  ;;  %v3042_v56 = vld [vmem:[%s3722_s9] sm:$0xff] }
  0xb2   : > { %v3712_v48 = vpop.f32.mrf.mxu2 }
  0xb3   : > { %2867 = vmatmul.msk.bf16.gmra.mxu2 %vm641_vm3, %v926_v27  ;;  %v1794_v27 = vshrl.u32 %v3741_v7, 16 }
  0xb5   : > { %v1796_v33 = vrot.slane %v1794_v27, 4 }
  0xb6   : > { %v3727_v0 = vpop.f32.mrf.mxu0  ;;  %v3729_v1 = vpop.f32.mrf.mxu3 }
  0xb7   : > { %2908 = vmatmul.msk.bf16.gmra.mxu3 %vm641_vm3, %v3040_v54  ;;  %v1783_v54 = vrot.slane %v1781_v15, 4  ;;  %v1797_v26 = vor.u32 %v1796_v33, %v1792_v50  ;;  %v1530_v15 = vunpack.c.l.b16 %v1475_v31  ;;  %v1481_v33 = vrot.slane %v3511_v39, 5 }
  0xb8   : > { %v2103_v31 = vrot.slane %v397_v63, 5 }
  0xb9   : > { %v1787_v25 = vor.u32 %v1786_v16, %v1783_v54  ;;  %v1798_v22 = vrot.slane %v1797_v26, 4  ;;  %v1546_v42 = vpack.c.b16 %v1531_v41, %v1530_v15 }
  0xba   : > { %v3744_v12 = vpop.f32.mrf.mxu1  ;;  %v3752_v19 = vpop.f32.mrf.mxu2  ;;  %v2104_v15 = vsel %vm3473_vm7, %v2102_v2, %v2103_v31 }
  0xbb   : > { %2917 = vmatmul.msk.bf16.gmra.mxu0 %vm641_vm3, %v1370_v62  ;;  %v1788_v21 = vrot.slane %v1787_v25, 4  ;;  %v1808_v25 = vshll.u32 %v3781_v47, 16 }
  0xbd   : > { %2851 = vmatmul.msk.bf16.gmra.mxu1 %vm641_vm3, %v3033_v46  ;;  %v1800_v46 = vshll.u32 %v397_v63, 16  ;;  %v1793_v16 = vsel %vm3333_vm4, %v1788_v21, %v1792_v50  ;;  %v1814_v50 = vshll.u32 %v3784_v44, 16  ;;  %v1807_v21 = vrot.slane %v1805_v3, 4 }
  0xbe   : > { %v3756_v20 = vpop.f32.mrf.mxu0  ;;  %v3759_v57 = vpop.f32.mrf.mxu3  ;;  %v1974_v63 = vunpack.c.l.b16 %v1793_v16 }
  0xbf   : > { %v1802_v27 = vrot.slane %v1800_v46, 5 }
  0xc1   : > { %v1803_v61 = vsel %vm3333_vm4, %v1798_v22, %v1802_v27  ;;  %v1816_v22 = vrot.slane %v1814_v50, 5 }
  0xc2   : > { %v3766_v62 = vpop.f32.mrf.mxu1  ;;  %v1975_v26 = vunpack.c.l.b16 %v1803_v61  ;;  %v2157_v61 = vunpack.c.l.b16 %v2104_v15  ;;  %v2987_v15 = vrot.slane %v3781_v47, 9 }
  0xc3   : > { %2868 = vmatmul.msk.bf16.gmra.mxu2 %vm641_vm3, %v927_v29  ;;  %v2986_v29 = vrot.slane %v3733_v35, 9  ;;  %v1818_v35 = vshrl.u32 %v3784_v44, 16 }
  0xc4   : > { %v1990_v16 = vpack.c.b16 %v1975_v26, %v1974_v63 }
  0xc5   : > { %v2101_v46 = vsel %vm3473_vm7, %v2986_v29, %v2100_v10  ;;  %v1820_v27 = vrot.slane %v1818_v35, 4 }
  0xc6   : > { %v3774_v18 = vpop.f32.mrf.mxu2  ;;  %v2156_v29 = vunpack.c.l.b16 %v2101_v46 }
  0xc7   : > { %2909 = vmatmul.msk.bf16.gmra.mxu3 %vm641_vm3, %v3041_v55  ;;  %v1483_v55 = vrot.slane %v1481_v33, 4  ;;  %v1821_v3 = vor.u32 %v1820_v27, %v1816_v22 }
  0xc8   : > { %v3778_v32 = vpop.f32.mrf.mxu0 }
  0xc9   : > { %v1485_v10 = vsel %vm3473_vm7, %v1483_v55, %v1484_v6  ;;  %v3826_v55 = vld [vmem:[%s3722_s9 + $0x1c] sm:$0xf]  ;;  %v1822_v63 = vrot.slane %v1821_v3, 4 }
  0xca   : > { %v3786_v45 = vpop.f32.mrf.mxu3  ;;  %v795_v54 = vpop.f32.mrf.mxu1  ;;  %v1533_v35 = vunpack.c.l.b16 %v1485_v10  ;;  %v1491_v10 = vrot.slane %v3569_v5, 5 }
  0xcb   : > { %4442 = vst [vmem:[#allocation3_spill] sm:$0xff] %v3786_v45  ;;  %2918 = vmatmul.msk.bf16.gmra.mxu0 %vm641_vm3, %v1371_v14  ;;  %v796_v7 = vadd.f32 %v795_v54, %v3727_v0  ;;  %v2920_v0 = vrot.slane %v3507_v38, 9  ;;  %v1810_v14 = vrot.slane %v1808_v25, 5  ;;  %v3822_v45 = vld [vmem:[%s3722_s9 + $0x18] sm:$0xf] }
  0xcd   : > { %2928 = vmatmul.msk.bf16.vlgmr.msra.gmra.mxu1 %vm641_vm3, %v1546_v42  ;;  %v400_v42 = vld [vmem:[%s3722_s9 + $0x14] sm:$0x1]  ;;  %v1482_v54 = vsel %vm3473_vm7, %v2920_v0, %v1481_v33  ;;  %v1811_v31 = vor.u32 %v1810_v14, %v1807_v21  ;;  %v2172_v33 = vpack.c.b16 %v2157_v61, %v2156_v29  ;;  %v1829_v21 = vshrl.u32 %v3822_v45, 16 }
  0xce   : > { %v3801_v39 = vpop.f32.mrf.mxu2  ;;  %v1824_v25 = vshll.u32 %v400_v42, 16  ;;  %v1532_v50 = vunpack.c.l.b16 %v1482_v54  ;;  %v1832_v14 = vshll.u32 %v3822_v45, 16  ;;  %v1488_v54 = vrot.slane %v3549_v40, 5 }
  0xcf   : > { %v2110_v40 = vrot.slane %v400_v42, 5  ;;  %v403_v42 = vld [vmem:[%s3722_s9 + $0x20] sm:$0x1] }
  0xd0   : > { %v3810_v41 = vpop.f32.mrf.mxu0  ;;  %v1826_v26 = vrot.slane %v1824_v25, 5  ;;  %v1547_v46 = vpack.c.b16 %v1533_v35, %v1532_v50  ;;  %v1834_v3 = vrot.slane %v1832_v14, 5  ;;  %v2921_v50 = vrot.slane %v3545_v30, 9 }
  0xd1   : > { %v1490_v35 = vrot.slane %v1488_v54, 4 }
  0xd2   : > { %v3813_v38 = vpop.f32.mrf.mxu3  ;;  %v797_v11 = vpop.f32.mrf.mxu1  ;;  %v1827_v29 = vsel %vm3333_vm4, %v1822_v63, %v1826_v26  ;;  %v1489_v14 = vsel %vm3473_vm7, %v2921_v50, %v1488_v54 }
  0xd3   : > { %4443 = vst [vmem:[#allocation4_spill] sm:$0xff] %v3813_v38  ;;  %2969 = vmatmul.msk.bf16.vlgmr.msra.gmra.mxu2 %vm641_vm3, %v3042_v56  ;;  %v798_v2 = vadd.f32 %v797_v11, %v3756_v20  ;;  %v1812_v56 = vrot.slane %v1811_v31, 4  ;;  %v2107_v20 = vrot.slane %v3784_v44, 5  ;;  %v1831_v31 = vrot.slane %v1829_v21, 4 }
  0xd4   : > { %v1977_v26 = vunpack.c.l.b16 %v1827_v29  ;;  %v1492_v30 = vsel %vm3473_vm7, %v1490_v35, %v1491_v10  ;;  %v1534_v29 = vunpack.c.l.b16 %v1489_v14  ;;  %v2114_v35 = vrot.slane %v3826_v55, 5 }
  0xd5   : > { %v1817_v47 = vsel %vm3333_vm4, %v1812_v56, %v1816_v22  ;;  %v2109_v61 = vrot.slane %v2107_v20, 4  ;;  %v2108_v5 = vsel %vm3473_vm7, %v2987_v15, %v2107_v20  ;;  %v3043_v56 = vld [vmem:[%s3722_s9 + $0xc] sm:$0xff]  ;;  %v1835_v15 = vor.u32 %v1834_v3, %v1831_v31 }
  0xd6   : > { %v964_v38 = vpop.f32.mrf.mxu2  ;;  %v1976_v63 = vunpack.c.l.b16 %v1817_v47  ;;  %v2158_v20 = vunpack.c.l.b16 %v2108_v5  ;;  %v2117_v14 = vrot.slane %v403_v42, 5 }
  0xd7   : > { %2978 = vmatmul.msk.bf16.vlgmr.msra.gmra.mxu3 %vm641_vm3, %v1990_v16  ;;  %v1004_v0 = vadd.f32 %v964_v38, %v796_v7  ;;  %v1838_v7 = vshll.u32 %v3826_v55, 16  ;;  %v1842_v38 = vshrl.u32 %v3826_v55, 16  ;;  %v1836_v5 = vrot.slane %v1835_v15, 4 }
  0xd8   : > { %v1408_v6 = vpop.f32.mrf.mxu0 }
  0xd9   : > { %v1840_v22 = vrot.slane %v1838_v7, 5 }
  0xda   : > { %v1098_v27 = vpop.f32.mrf.mxu3  ;;  %v800_v11 = vpop.f32.mrf.mxu1 }
  0xdb   : > { %2995 = vmatmul.msk.bf16.vlgmr.msra.gmra.mxu0 %vm641_vm3, %v2172_v33  ;;  %v1138_v44 = vadd.f32 %v1098_v27, %v1004_v0  ;;  %v801_v16 = vadd.f32 %v800_v11, %v3778_v32  ;;  %v1844_v33 = vrot.slane %v1842_v38, 4  ;;  %v1991_v38 = vpack.c.b16 %v1977_v26, %v1976_v63 }
  0xdc   : > { %v1841_v26 = vsel %vm3333_vm4, %v1836_v5, %v1840_v22 }
  0xdd   : > { %2929 = vmatmul.msk.bf16.gmra.mxu1 %vm641_vm3, %v1547_v46  ;;  %v3845_v25 = vadd.f32 %v1408_v6, %v1138_v44  ;;  %v2111_v46 = vsel %vm3473_vm7, %v2109_v61, %v2110_v40  ;;  %v1845_v11 = vor.u32 %v1844_v33, %v1840_v22  ;;  %v1535_v61 = vunpack.c.l.b16 %v1492_v30  ;;  %v3863_v33 = vld [vmem:[%s3722_s9 + $0x24] sm:$0xf] }
  0xde   : > { %v966_v32 = vpop.f32.mrf.mxu2  ;;  %v2159_v44 = vunpack.c.l.b16 %v2111_v46  ;;  %v1853_v15 = vshrl.u32 %v3863_v33, 16 }
  0xdf   : > { %v1005_v0 = vadd.f32 %v966_v32, %v798_v2  ;;  %v1848_v2 = vshll.u32 %v403_v42, 16  ;;  %v1846_v31 = vrot.slane %v1845_v11, 4 }
  0xe0   : > { %v1410_v27 = vpop.f32.mrf.mxu0  ;;  %v2173_v10 = vpack.c.b16 %v2159_v44, %v2158_v20 }
  0xe1   : > { %v1850_v54 = vrot.slane %v1848_v2, 5 }
  0xe2   : > { %v1100_v21 = vpop.f32.mrf.mxu3  ;;  %v802_v6 = vpop.f32.mrf.mxu1 }
  0xe3   : > { %v1139_v7 = vadd.f32 %v1100_v21, %v1005_v0  ;;  %2970 = vmatmul.msk.bf16.gmra.mxu2 %vm641_vm3, %v3043_v56  ;;  %v803_v47 = vadd.f32 %v802_v6, %v3810_v41  ;;  %v1548_v0 = vpack.c.b16 %v1535_v61, %v1534_v29  ;;  %v3866_v56 = vld [vmem:[%s3722_s9 + $0x28] sm:$0xf]  ;;  %v1851_v46 = vsel %vm3333_vm4, %v1846_v31, %v1850_v54  ;;  %v3044_v29 = vld [vmem:[%s3722_s9 + $0x18] sm:$0xff] }
  0xe4   : > { %v1856_v21 = vshll.u32 %v3863_v33, 16  ;;  %v2116_v6 = vrot.slane %v2114_v35, 4  ;;  %v1862_v22 = vshll.u32 %v3866_v56, 16  ;;  %v1866_v30 = vshrl.u32 %v3866_v56, 16 }
  0xe5   : > { %v3859_v32 = vadd.f32 %v1410_v27, %v1139_v7  ;;  %v1495_v27 = vrot.slane %v3579_v13, 5  ;;  %v1979_v2 = vunpack.c.l.b16 %v1851_v46  ;;  %v2922_v7 = vrot.slane %v3576_v9, 9 }
  0xe6   : > { %v969_v40 = vpop.f32.mrf.mxu2  ;;  %v1855_v61 = vrot.slane %v1853_v15, 4  ;;  %v1864_v31 = vrot.slane %v1862_v22, 5  ;;  %v1868_v54 = vrot.slane %v1866_v30, 4  ;;  %v2121_v15 = vrot.slane %v3866_v56, 5  ;;  %v3899_v22 = vld [vmem:[%s3722_s9 + $0x30] sm:$0xf] }
  0xe7   : > { %2979 = vmatmul.msk.bf16.gmra.mxu3 %vm641_vm3, %v1991_v38  ;;  %v1006_v3 = vadd.f32 %v969_v40, %v801_v16  ;;  %v2988_v16 = vrot.slane %v3822_v45, 9  ;;  %v1498_v45 = vrot.slane %v3593_v51, 5  ;;  %v1497_v38 = vrot.slane %v1495_v27, 4 }
  0xe8   : > { %v1413_v50 = vpop.f32.mrf.mxu0  ;;  %v1858_v40 = vrot.slane %v1856_v21, 5  ;;  %v2118_v51 = vsel %vm3473_vm7, %v2116_v6, %v2117_v14  ;;  %v2123_v56 = vrot.slane %v2121_v15, 4 }
  0xe9   : > { %v2115_v42 = vsel %vm3473_vm7, %v2988_v16, %v2114_v35  ;;  %v1499_v35 = vsel %vm3473_vm7, %v1497_v38, %v1498_v45  ;;  %v1869_v16 = vor.u32 %v1868_v54, %v1864_v31  ;;  %v2989_v38 = vrot.slane %v3863_v33, 9 }
  0xea   : > { %v1103_v41 = vpop.f32.mrf.mxu3  ;;  %v805_v63 = vpop.f32.mrf.mxu1  ;;  %v1859_v46 = vor.u32 %v1858_v40, %v1855_v61  ;;  %v1537_v6 = vunpack.c.l.b16 %v1499_v35  ;;  %v1880_v61 = vshll.u32 %v3899_v22, 16 }
  0xeb   : > { %2996 = vmatmul.msk.bf16.gmra.mxu0 %vm641_vm3, %v2173_v10  ;;  %v1140_v55 = vadd.f32 %v1103_v41, %v1006_v3  ;;  %v806_v20 = vadd.f32 %v805_v63, %v3685_v34  ;;  %v1978_v34 = vunpack.c.l.b16 %v1841_v26  ;;  %v406_v10 = vld [vmem:[%s3722_s9 + $0x2c] sm:$0x1]  ;;  %v2161_v63 = vunpack.c.l.b16 %v2118_v51 }
  0xec   : > { %v1860_v45 = vrot.slane %v1859_v46, 4 }
  0xed   : > { %2930 = vmatmul.msk.bf16.gmra.mxu1 %vm641_vm3, %v1548_v0  ;;  %v3882_v13 = vadd.f32 %v1413_v50, %v1140_v55  ;;  %v1992_v50 = vpack.c.b16 %v1979_v2, %v1978_v34  ;;  %v2160_v0 = vunpack.c.l.b16 %v2115_v42  ;;  %v1872_v55 = vshll.u32 %v406_v10, 16 }
  0xee   : > { %v971_v11 = vpop.f32.mrf.mxu2  ;;  %v1870_v2 = vrot.slane %v1869_v16, 4  ;;  %v1877_v42 = vshrl.u32 %v3899_v22, 16 }
  0xef   : > { %v1007_v44 = vadd.f32 %v971_v11, %v803_v47  ;;  %v1496_v47 = vsel %vm3473_vm7, %v2922_v7, %v1495_v27  ;;  %v2174_v27 = vpack.c.b16 %v2161_v63, %v2160_v0  ;;  %v3903_v11 = vld [vmem:[%s3722_s9 + $0x34] sm:$0xf]  ;;  %v1874_v7 = vrot.slane %v1872_v55, 5  ;;  %v3045_v55 = vld [vmem:[%s3722_s9 + $0x24] sm:$0xff] }
  0xf0   : > { %v1415_v5 = vpop.f32.mrf.mxu0  ;;  %v1536_v21 = vunpack.c.l.b16 %v1496_v47  ;;  %v1886_v54 = vshll.u32 %v3903_v11, 16  ;;  %v1879_v47 = vrot.slane %v1877_v42, 4 }
  0xf1   : > { %v1875_v0 = vsel %vm3333_vm4, %v1870_v2, %v1874_v7 }
  0xf2   : > { %v1105_v3 = vpop.f32.mrf.mxu3  ;;  %v807_v9 = vpop.f32.mrf.mxu1  ;;  %v3928_v63 = vrot.slane %v1886_v54, 5 }
  0xf3   : > { %v1141_v41 = vadd.f32 %v1105_v3, %v1007_v44  ;;  %2971 = vmatmul.msk.bf16.gmra.mxu2 %vm641_vm3, %v3044_v29  ;;  %v808_v26 = vadd.f32 %v807_v9, %v3708_v43  ;;  %v1549_v44 = vpack.c.b16 %v1537_v6, %v1536_v21  ;;  %v2124_v29 = vrot.slane %v406_v10, 5 }
  0xf4   : > { %v1505_v10 = vrot.slane %v3620_v23, 5  ;;  %v1981_v21 = vunpack.c.l.b16 %v1875_v0  ;;  %v2128_v0 = vrot.slane %v3903_v11, 5 }
  0xf5   : > { %v3905_v34 = vadd.f32 %v1415_v5, %v1141_v41  ;;  %v1890_v5 = vshrl.u32 %v3903_v11, 16  ;;  %v2125_v9 = vsel %vm3473_vm7, %v2123_v56, %v2124_v29  ;;  %v2923_v41 = vrot.slane %v3600_v28, 9 }
  0xf6   : > { %v974_v14 = vpop.f32.mrf.mxu2  ;;  %v2990_v11 = vrot.slane %v3899_v22, 9 }
  0xf7   : > { %2980 = vmatmul.msk.bf16.gmra.mxu3 %vm641_vm3, %v1992_v50  ;;  %v1008_v30 = vadd.f32 %v974_v14, %v806_v20  ;;  %v1502_v20 = vrot.slane %v3603_v59, 5  ;;  %v1865_v50 = vsel %vm3333_vm4, %v1860_v45, %v1864_v31  ;;  %v2122_v59 = vsel %vm3473_vm7, %v2989_v38, %v2121_v15  ;;  %v409_v14 = vld [vmem:[%s3722_s9 + $0x38] sm:$0x1] }
  0xf8   : > { %v1418_v43 = vpop.f32.mrf.mxu0  ;;  %v1892_v46 = vrot.slane %v1890_v5, 4  ;;  %v1980_v15 = vunpack.c.l.b16 %v1865_v50  ;;  %v1896_v29 = vshll.u32 %v409_v14, 16 }
  0xf9   : > { %v1504_v31 = vrot.slane %v1502_v20, 4  ;;  %v1503_v2 = vsel %vm3473_vm7, %v2923_v41, %v1502_v20 }
  0xfa   : > { %v1108_v40 = vpop.f32.mrf.mxu3  ;;  %v810_v51 = vpop.f32.mrf.mxu1  ;;  %v1993_v56 = vpack.c.b16 %v1981_v21, %v1980_v15  ;;  %v1538_v42 = vunpack.c.l.b16 %v1503_v2  ;;  %v1898_v50 = vrot.slane %v1896_v29, 5  ;;  %v2130_v21 = vrot.slane %v2128_v0, 4 }
  0xfb   : > { %2997 = vmatmul.msk.bf16.gmra.mxu0 %vm641_vm3, %v2174_v27  ;;  %v1142_v3 = vadd.f32 %v1108_v40, %v1008_v30  ;;  %v811_v33 = vadd.f32 %v810_v51, %v3744_v12  ;;  %v1882_v12 = vrot.slane %v1880_v61, 5  ;;  %v2162_v27 = vunpack.c.l.b16 %v2122_v59  ;;  %v3940_v40 = vld [vmem:[%s3722_s9 + $0x3c] sm:$0xf]  ;;  %v3943_v51 = vld [vmem:[%s3722_s9 + $0x40] sm:$0xf] }
  0xfc   : > { %v2163_v30 = vunpack.c.l.b16 %v2125_v9  ;;  %v1506_v28 = vsel %vm3473_vm7, %v1504_v31, %v1505_v10  ;;  %v1901_v9 = vshrl.u32 %v3940_v40, 16  ;;  %v2924_v2 = vrot.slane %v3632_v49, 9 }
  0xfd   : > { %2931 = vmatmul.msk.bf16.gmra.mxu1 %vm641_vm3, %v1549_v44  ;;  %v3925_v35 = vadd.f32 %v1418_v43, %v1142_v3  ;;  %v1883_v7 = vor.u32 %v1882_v12, %v1879_v47  ;;  %v1539_v61 = vunpack.c.l.b16 %v1506_v28  ;;  %v1904_v47 = vshll.u32 %v3940_v40, 16 }
  0xfe   : > { %v976_v23 = vpop.f32.mrf.mxu2  ;;  %v2175_v20 = vpack.c.b16 %v2163_v30, %v2162_v27  ;;  %v1910_v12 = vshll.u32 %v3943_v51, 16  ;;  %v1903_v27 = vrot.slane %v1901_v9, 4 }
  0xff   : > { %v1009_v16 = vadd.f32 %v976_v23, %v808_v26  ;;  %v1893_v26 = vor.u32 %v1892_v46, %v3928_v63  ;;  %v1884_v5 = vrot.slane %v1883_v7, 4  ;;  %v1914_v23 = vshrl.u32 %v3943_v51, 16  ;;  %v3967_v7 = vld [vmem:[%s3722_s9 + $0x44] sm:$0x1] }
 0x100   : > { %v1420_v6 = vpop.f32.mrf.mxu0  ;;  %v1550_v41 = vpack.c.b16 %v1539_v61, %v1538_v42  ;;  %v1906_v30 = vrot.slane %v1904_v47, 5  ;;  %v2129_v42 = vsel %vm3473_vm7, %v2990_v11, %v2128_v0  ;;  %v2135_v11 = vrot.slane %v3943_v51, 5 }
 0x101   : > { %v1894_v3 = vrot.slane %v1893_v26, 4  ;;  %v2164_v0 = vunpack.c.l.b16 %v2129_v42  ;;  %v2991_v51 = vrot.slane %v3940_v40, 9  ;;  %v1519_v40 = vrot.slane %v3682_v4, 5  ;;  %v3047_v4 = vld [vmem:[%s3722_s9 + $0x3c] sm:$0xff] }
 0x102   : > { %v1110_v45 = vpop.f32.mrf.mxu3  ;;  %v812_v43 = vpop.f32.mrf.mxu1 }
 0x103   : > { %v1143_v38 = vadd.f32 %v1110_v45, %v1009_v16  ;;  %2972 = vmatmul.msk.bf16.gmra.mxu2 %vm641_vm3, %v3045_v55  ;;  %v813_v44 = vadd.f32 %v812_v43, %v3766_v62  ;;  %v1509_v16 = vrot.slane %v3635_v52, 5  ;;  %v1899_v15 = vsel %vm3333_vm4, %v1894_v3, %v1898_v50 }
 0x104   : > { %v1912_v45 = vrot.slane %v1910_v12, 5  ;;  %v1916_v43 = vrot.slane %v1914_v23, 4  ;;  %v1512_v52 = vrot.slane %v3651_v58, 5  ;;  %v1920_v58 = vshll.u32 %v3967_v7, 16 }
 0x105   : > { %v3947_v59 = vadd.f32 %v1420_v6, %v1143_v38  ;;  %v2131_v6 = vrot.slane %v409_v14, 5  ;;  %v1511_v28 = vrot.slane %v1509_v16, 4  ;;  %v3046_v38 = vld [vmem:[%s3722_s9 + $0x30] sm:$0xff]  ;;  %v1983_v14 = vunpack.c.l.b16 %v1899_v15  ;;  %v3984_v15 = vld [vmem:[%s3722_s9 + $0x48] sm:$0xf] }
 0x106   : > { %v979_v54 = vpop.f32.mrf.mxu2  ;;  %v1510_v3 = vsel %vm3473_vm7, %v2924_v2, %v1509_v16  ;;  %v1516_v2 = vrot.slane %v3665_v37, 5 }
 0x107   : > { %2981 = vmatmul.msk.bf16.gmra.mxu3 %vm641_vm3, %v1993_v56  ;;  %v1010_v10 = vadd.f32 %v979_v54, %v811_v33  ;;  %v1889_v33 = vsel %vm3333_vm4, %v1884_v5, %v3928_v63  ;;  %v2132_v61 = vsel %vm3473_vm7, %v2130_v21, %v2131_v6  ;;  %v1917_v54 = vor.u32 %v1916_v43, %v1912_v45 }
 0x108   : > { %v1423_v62 = vpop.f32.mrf.mxu0  ;;  %v1982_v56 = vunpack.c.l.b16 %v1889_v33  ;;  %v1540_v23 = vunpack.c.l.b16 %v1510_v3 }
 0x109   : > { %v1918_v47 = vrot.slane %v1917_v54, 4  ;;  %v2925_v54 = vrot.slane %v3662_v17, 9 }
 0x10a   : > { %v1113_v31 = vpop.f32.mrf.mxu3  ;;  %v815_v46 = vpop.f32.mrf.mxu1  ;;  %v1994_v50 = vpack.c.b16 %v1983_v14, %v1982_v56  ;;  %v2138_v56 = vrot.slane %v3967_v7, 5 }
 0x10b   : > { %2998 = vmatmul.msk.bf16.gmra.mxu0 %vm641_vm3, %v2175_v20  ;;  %v1144_v55 = vadd.f32 %v1113_v31, %v1010_v10  ;;  %v1907_v20 = vor.u32 %v1906_v30, %v1903_v27  ;;  %v816_v12 = vadd.f32 %v815_v46, %v3712_v48  ;;  %v1922_v31 = vrot.slane %v1920_v58, 5  ;;  %v3989_v27 = vld [vmem:[%s3722_s9 + $0x4c] sm:$0xf] }
 0x10c   : > { %v1938_v14 = vshrl.u32 %v3989_v27, 16  ;;  %v1518_v58 = vrot.slane %v1516_v2, 4 }
 0x10d   : > { %2932 = vmatmul.msk.bf16.gmra.mxu1 %vm641_vm3, %v1550_v41  ;;  %v3962_v63 = vadd.f32 %v1423_v62, %v1144_v55  ;;  %v2165_v62 = vunpack.c.l.b16 %v2132_v61  ;;  %v1908_v9 = vrot.slane %v1907_v20, 4  ;;  %v1923_v46 = vsel %vm3333_vm4, %v1918_v47, %v1922_v31 }
 0x10e   : > { %v981_v22 = vpop.f32.mrf.mxu2  ;;  %v1985_v37 = vunpack.c.l.b16 %v1923_v46  ;;  %v2136_v61 = vsel %vm3473_vm7, %v2991_v51, %v2135_v11  ;;  %v1520_v17 = vsel %vm3473_vm7, %v1518_v58, %v1519_v40 }
 0x10f   : > { %v1011_v26 = vadd.f32 %v981_v22, %v813_v44  ;;  %v1513_v44 = vsel %vm3473_vm7, %v1511_v28, %v1512_v52  ;;  %v2176_v16 = vpack.c.b16 %v2165_v62, %v2164_v0  ;;  %v1913_v48 = vsel %vm3333_vm4, %v1908_v9, %v1912_v45  ;;  %v415_v0 = vld [vmem:[%s3722_s9 + $0x50] sm:$0x1] }
 0x110   : > { %v1425_v29 = vpop.f32.mrf.mxu0  ;;  %v1541_v41 = vunpack.c.l.b16 %v1513_v44  ;;  %v2137_v22 = vrot.slane %v2135_v11, 4  ;;  %v1925_v28 = vshrl.u32 %v3984_v15, 16  ;;  %v1934_v45 = vshll.u32 %v3989_v27, 16 }
 0x111   : > { %v2166_v62 = vunpack.c.l.b16 %v2136_v61  ;;  %v2145_v58 = vrot.slane %v415_v0, 5 }
 0x112   : > { %v1115_v5 = vpop.f32.mrf.mxu3  ;;  %v817_v49 = vpop.f32.mrf.mxu1  ;;  %v1551_v30 = vpack.c.b16 %v1541_v41, %v1540_v23  ;;  %v1517_v23 = vsel %vm3473_vm7, %v2925_v54, %v1516_v2 }
 0x113   : > { %v1145_v10 = vadd.f32 %v1115_v5, %v1011_v26  ;;  %2973 = vmatmul.msk.bf16.gmra.mxu2 %vm641_vm3, %v3046_v38  ;;  %v1928_v26 = vshll.u32 %v3984_v15, 16  ;;  %v818_v42 = vadd.f32 %v817_v49, %v3752_v19  ;;  %v1927_v5 = vrot.slane %v1925_v28, 4 }
 0x114   : > { %v2139_v19 = vsel %vm3473_vm7, %v2137_v22, %v2138_v56  ;;  %v1936_v49 = vrot.slane %v1934_v45, 5  ;;  %v4026_v56 = vld [vmem:[%s3722_s9 + $0x54] sm:$0xf] }
 0x115   : > { %v3986_v21 = vadd.f32 %v1425_v29, %v1145_v10  ;;  %v1984_v29 = vunpack.c.l.b16 %v1913_v48  ;;  %v1930_v3 = vrot.slane %v1928_v26, 5  ;;  %v1940_v10 = vrot.slane %v1938_v14, 4  ;;  %v4029_v14 = vld [vmem:[%s3722_s9 + $0x58] sm:$0xf] }
 0x116   : > { %v984_v33 = vpop.f32.mrf.mxu2  ;;  %v2167_v47 = vunpack.c.l.b16 %v2139_v19  ;;  %v1949_v61 = vshrl.u32 %v4026_v56, 16 }
 0x117   : > { %2982 = vmatmul.msk.bf16.gmra.mxu3 %vm641_vm3, %v1994_v50  ;;  %v1012_v55 = vadd.f32 %v984_v33, %v816_v12  ;;  %v1931_v41 = vor.u32 %v1930_v3, %v1927_v5  ;;  %v1995_v33 = vpack.c.b16 %v1985_v37, %v1984_v29  ;;  %v1941_v11 = vor.u32 %v1940_v10, %v1936_v49 }
 0x118   : > { %v1428_v6 = vpop.f32.mrf.mxu0  ;;  %v2177_v48 = vpack.c.b16 %v2167_v47, %v2166_v62  ;;  %v2992_v29 = vrot.slane %v3984_v15, 9  ;;  %v1958_v5 = vshll.u32 %v4029_v14, 16  ;;  %v1962_v3 = vshrl.u32 %v4029_v14, 16  ;;  %v3048_v62 = vld [vmem:[%s3722_s9 + $0x48] sm:$0xff] }
 0x119   : > { %v1932_v51 = vrot.slane %v1931_v41, 4  ;;  %v1942_v22 = vrot.slane %v1941_v11, 4  ;;  %v1526_v15 = vrot.slane %v3725_v24, 5  ;;  %v2926_v10 = vrot.slane %v3695_v60, 9  ;;  %v418_v41 = vld [vmem:[%s3722_s9 + $0x5c] sm:$0x1] }
 0x11a   : > { %v1118_v43 = vpop.f32.mrf.mxu3  ;;  %v820_v52 = vpop.f32.mrf.mxu1  ;;  %v1951_v47 = vrot.slane %v1949_v61, 4 }
 0x11b   : > { %2999 = vmatmul.msk.bf16.gmra.mxu0 %vm641_vm3, %v2176_v16  ;;  %v1146_v38 = vadd.f32 %v1118_v43, %v1012_v55  ;;  %v1944_v16 = vshll.u32 %v415_v0, 16  ;;  %v821_v55 = vadd.f32 %v820_v52, %v3774_v18  ;;  %v1937_v40 = vsel %vm3333_vm4, %v1932_v51, %v1936_v49 }
 0x11c   : > { %v1986_v19 = vunpack.c.l.b16 %v1937_v40  ;;  %v1968_v51 = vshll.u32 %v418_v41, 16 }
 0x11d   : > { %2933 = vmatmul.msk.bf16.gmra.mxu1 %vm641_vm3, %v1551_v30  ;;  %v4008_v20 = vadd.f32 %v1428_v6, %v1146_v38  ;;  %v1542_v6 = vunpack.c.l.b16 %v1517_v23  ;;  %v1543_v30 = vunpack.c.l.b16 %v1520_v17  ;;  %v1946_v2 = vrot.slane %v1944_v16, 5 }
 0x11e   : > { %v986_v7 = vpop.f32.mrf.mxu2  ;;  %v2142_v38 = vrot.slane %v3989_v27, 5  ;;  %v1964_v17 = vrot.slane %v1962_v3, 4 }
 0x11f   : > { %v1013_v44 = vadd.f32 %v986_v7, %v818_v42  ;;  %v1552_v45 = vpack.c.b16 %v1543_v30, %v1542_v6  ;;  %v1523_v42 = vrot.slane %v3698_v8, 5  ;;  %v1947_v27 = vsel %vm3333_vm4, %v1942_v22, %v1946_v2 }
 0x120   : > { %v1430_v50 = vpop.f32.mrf.mxu0  ;;  %v1952_v7 = vshll.u32 %v4026_v56, 16  ;;  %v2144_v54 = vrot.slane %v2142_v38, 4  ;;  %v1987_v49 = vunpack.c.l.b16 %v1947_v27  ;;  %v2149_v27 = vrot.slane %v4029_v14, 5 }
 0x121   : > { %v1524_v60 = vsel %vm3473_vm7, %v2926_v10, %v1523_v42 }
 0x122   : > { %v1120_v9 = vpop.f32.mrf.mxu3  ;;  %v822_v12 = vpop.f32.mrf.mxu1  ;;  %v1954_v24 = vrot.slane %v1952_v7, 5  ;;  %v1996_v6 = vpack.c.b16 %v1987_v49, %v1986_v19  ;;  %v1544_v22 = vunpack.c.l.b16 %v1524_v60  ;;  %v2151_v3 = vrot.slane %v2149_v27, 4  ;;  %v3049_v49 = vld [vmem:[%s3722_s9 + $0x54] sm:$0xff] }
 0x123   : > { %v1147_v31 = vadd.f32 %v1120_v9, %v1013_v44  ;;  %2974 = vmatmul.msk.bf16.gmra.mxu2 %vm641_vm3, %v3047_v4  ;;  %v823_v8 = vadd.f32 %v822_v12, %v3801_v39  ;;  %v2143_v9 = vsel %vm3473_vm7, %v2992_v29, %v2142_v38  ;;  %v2146_v39 = vsel %vm3473_vm7, %v2144_v54, %v2145_v58 }
 0x124   : > { %v1960_v12 = vrot.slane %v1958_v5, 5  ;;  %v2169_v30 = vunpack.c.l.b16 %v2146_v39  ;;  %v2993_v5 = vrot.slane %v4026_v56, 9  ;;  %v4444_v39 = vld [vmem:[#allocation3_spill] sm:$0xff] }
 0x125   : > { %v4022_v28 = vadd.f32 %v1430_v50, %v1147_v31  ;;  %v1525_v50 = vrot.slane %v1523_v42, 4 }
 0x126   : > { %v989_v46 = vpop.f32.mrf.mxu2  ;;  %v2150_v36 = vsel %vm3473_vm7, %v2993_v5, %v2149_v27 }
 0x127   : > { %2983 = vmatmul.msk.bf16.gmra.mxu3 %vm641_vm3, %v1995_v33  ;;  %v1014_v43 = vadd.f32 %v989_v46, %v821_v55  ;;  %v2168_v33 = vunpack.c.l.b16 %v2143_v9  ;;  %v1527_v16 = vsel %vm3473_vm7, %v1525_v50, %v1526_v15  ;;  %v1965_v46 = vor.u32 %v1964_v17, %v1960_v12 }
 0x128   : > { %v1433_v26 = vpop.f32.mrf.mxu0  ;;  %v1545_v2 = vunpack.c.l.b16 %v1527_v16  ;;  %v2152_v15 = vrot.slane %v418_v41, 5 }
 0x129   : > { %v1966_v42 = vrot.slane %v1965_v46, 4 }
 0x12a   : > { %v1123_v18 = vpop.f32.mrf.mxu3  ;;  %v825_v52 = vpop.f32.mrf.mxu1  ;;  %v1553_v61 = vpack.c.b16 %v1545_v2, %v1544_v22  ;;  %v2153_v56 = vsel %vm3473_vm7, %v2151_v3, %v2152_v15 }
 0x12b   : > { %3000 = vmatmul.msk.bf16.gmra.mxu0 %vm641_vm3, %v2177_v48  ;;  %v1148_v37 = vadd.f32 %v1123_v18, %v1014_v43  ;;  %v1955_v48 = vor.u32 %v1954_v24, %v1951_v47  ;;  %v826_v43 = vadd.f32 %v825_v52, %v3729_v1  ;;  %v2170_v24 = vunpack.c.l.b16 %v2150_v36 }
 0x12d   : > { %2934 = vmatmul.msk.bf16.gmra.mxu1 %vm641_vm3, %v1552_v45  ;;  %v4045_v44 = vadd.f32 %v1433_v26, %v1148_v37  ;;  %v2178_v45 = vpack.c.b16 %v2169_v30, %v2168_v33  ;;  %v1956_v40 = vrot.slane %v1955_v48, 4  ;;  %v1970_v37 = vrot.slane %v1968_v51, 5 }
 0x12e   : > { %v991_v4 = vpop.f32.mrf.mxu2 }
 0x12f   : > { %v1015_v0 = vadd.f32 %v991_v4, %v823_v8  ;;  %v1961_v52 = vsel %vm3333_vm4, %v1956_v40, %v1960_v12  ;;  %v1971_v58 = vsel %vm3333_vm4, %v1966_v42, %v1970_v37 }
 0x130   : > { %v1435_v23 = vpop.f32.mrf.mxu0  ;;  %v1988_v10 = vunpack.c.l.b16 %v1961_v52  ;;  %v1989_v50 = vunpack.c.l.b16 %v1971_v58 }
 0x132   : > { %v1125_v31 = vpop.f32.mrf.mxu3  ;;  %v827_v11 = vpop.f32.mrf.mxu1 }
 0x133   : > { %v1149_v55 = vadd.f32 %v1125_v31, %v1015_v0  ;;  %2975 = vmatmul.msk.bf16.gmra.mxu2 %vm641_vm3, %v3048_v62  ;;  %v828_v8 = vadd.f32 %v827_v11, %v3759_v57  ;;  %v1997_v57 = vpack.c.b16 %v1989_v50, %v1988_v10 }
 0x135   : > { %v4060_v26 = vadd.f32 %v1435_v23, %v1149_v55  ;;  %v2171_v23 = vunpack.c.l.b16 %v2153_v56  ;;  %v4445_v55 = vld [vmem:[#allocation4_spill] sm:$0xff] }
 0x136   : > { %v994_v38 = vpop.f32.mrf.mxu2 }
 0x137   : > { %2984 = vmatmul.msk.bf16.gmra.mxu3 %vm641_vm3, %v1996_v6  ;;  %v1016_v18 = vadd.f32 %v994_v38, %v826_v43  ;;  %v2179_v31 = vpack.c.b16 %v2171_v23, %v2170_v24 }
 0x138   : > { %v1438_v29 = vpop.f32.mrf.mxu0 }
 0x13a   : > { %v1128_v7 = vpop.f32.mrf.mxu3  ;;  %v830_v54 = vpop.f32.mrf.mxu1 }
 0x13b   : > { %3001 = vmatmul.msk.bf16.gmra.mxu0 %vm641_vm3, %v2178_v45  ;;  %v1150_v1 = vadd.f32 %v1128_v7, %v1016_v18  ;;  %v831_v12 = vadd.f32 %v830_v54, %v4444_v39 }
 0x13d   : > { %2935 = vmatmul.msk.bf16.gmra.mxu1 %vm641_vm3, %v1553_v61  ;;  %v4072_v14 = vadd.f32 %v1438_v29, %v1150_v1 }
 0x13e   : > { %v996_v4 = vpop.f32.mrf.mxu2 }
 0x13f   : > { %v1017_v19 = vadd.f32 %v996_v4, %v828_v8 }
 0x140   : > { %v1440_v0 = vpop.f32.mrf.mxu0 }
 0x142   : > { %v1130_v62 = vpop.f32.mrf.mxu3  ;;  %v832_v9 = vpop.f32.mrf.mxu1 }
 0x143   : > { %v1151_v47 = vadd.f32 %v1130_v62, %v1017_v19  ;;  %2976 = vmatmul.msk.bf16.gmra.mxu2 %vm641_vm3, %v3049_v49  ;;  %v833_v6 = vadd.f32 %v832_v9, %v4445_v55 }
 0x145   : > { %v4081_v17 = vadd.f32 %v1440_v0, %v1151_v47 }
 0x146   : > { %v999_v41 = vpop.f32.mrf.mxu2 }
 0x147   : > { %2985 = vmatmul.msk.bf16.gmra.mxu3 %vm641_vm3, %v1997_v57  ;;  %v1018_v33 = vadd.f32 %v999_v41, %v831_v12 }
 0x148   : > { %v1443_v11 = vpop.f32.mrf.mxu0 }
 0x14a   : > { %v1133_v53 = vpop.f32.mrf.mxu3  ;;  %v1590_v60 = vpop.f32.mrf.mxu1 }
 0x14b   : > { %3002 = vmatmul.msk.bf16.gmra.mxu0 %vm641_vm3, %v2179_v31  ;;  %v1152_v16 = vadd.f32 %v1133_v53, %v1018_v33  ;;  %v1630_v38 = vadd.f32 %v1590_v60, %v3845_v25 }
 0x14d   : > { %v4086_v30 = vadd.f32 %v1443_v11, %v1152_v16 }
 0x14e   : > { %v1001_v48 = vpop.f32.mrf.mxu2 }
 0x14f   : > { %v1019_v46 = vadd.f32 %v1001_v48, %v833_v6 }
 0x150   : > { %v1445_v51 = vpop.f32.mrf.mxu0 }
 0x152   : > { %v1135_v43 = vpop.f32.mrf.mxu3  ;;  %v1592_v22 = vpop.f32.mrf.mxu1 }
 0x153   : > { %v1153_v2 = vadd.f32 %v1135_v43, %v1019_v46  ;;  %v1631_v61 = vadd.f32 %v1592_v22, %v3859_v32 }
 0x155   : > { %v4089_v45 = vadd.f32 %v1445_v51, %v1153_v2 }
 0x156   : > { %v1724_v18 = vpop.f32.mrf.mxu2 }
 0x157   : > { %v1764_v40 = vadd.f32 %v1724_v18, %v1630_v38 }
 0x158   : > { %v2216_v29 = vpop.f32.mrf.mxu0 }
 0x15a   : > { %v2034_v42 = vpop.f32.mrf.mxu3  ;;  %v1595_v37 = vpop.f32.mrf.mxu1 }
 0x15b   : > { %v2074_v27 = vadd.f32 %v2034_v42, %v1764_v40  ;;  %v1632_v3 = vadd.f32 %v1595_v37, %v3882_v13 }
 0x15d   : > { %v4093_v7 = vadd.f32 %v2216_v29, %v2074_v27 }
 0x15e   : > { %v1726_v54 = vpop.f32.mrf.mxu2 }
 0x15f   : > { %2305 = vrot.lane.b32.xlu0 %v4093_v7, %s3170_s8  ;;  %2273 = vst.msk [vmem:[%s4097_s11] sm:$0xff] %vm2272_vm8, %v4093_v7  ;;  %v1765_v25 = vadd.f32 %v1726_v54, %v1631_v61 }
 0x160   : > { %v2218_v1 = vpop.f32.mrf.mxu0 }
 0x162   : > { %v2036_v52 = vpop.f32.mrf.mxu3  ;;  %v1597_v58 = vpop.f32.mrf.mxu1 }
 0x163   : > { %v2075_v32 = vadd.f32 %v2036_v52, %v1765_v25  ;;  %v1633_v50 = vadd.f32 %v1597_v58, %v3905_v34 }
 0x165   : > { %v4102_v5 = vadd.f32 %v2218_v1, %v2075_v32 }
 0x166   : > { %v1729_v15 = vpop.f32.mrf.mxu2 }
 0x167   : > { %2274 = vst.msk [vmem:[%s4097_s11 + $0x8] sm:$0xff] %vm2272_vm8, %v4102_v5  ;;  %2307 = vrot.lane.b32.xlu0 %v4102_v5, %s3170_s8  ;;  %v1766_v8 = vadd.f32 %v1729_v15, %v1632_v3 }
 0x168   : > { %v2221_v4 = vpop.f32.mrf.mxu0 }
 0x16a   : > { %v2039_v19 = vpop.f32.mrf.mxu3  ;;  %v1600_v49 = vpop.f32.mrf.mxu1 }
 0x16b   : > { %v2076_v10 = vadd.f32 %v2039_v19, %v1766_v8  ;;  %v1634_v24 = vadd.f32 %v1600_v49, %v3925_v35 }
 0x16d   : > { %v4111_v0 = vadd.f32 %v2221_v4, %v2076_v10 }
 0x16e   : > { %v1731_v36 = vpop.f32.mrf.mxu2 }
 0x16f   : > { %2309 = vrot.lane.b32.xlu1 %v4111_v0, %s3170_s8  ;;  %2275 = vst.msk [vmem:[%s4097_s11 + $0x10] sm:$0xff] %vm2272_vm8, %v4111_v0  ;;  %v1767_v13 = vadd.f32 %v1731_v36, %v1633_v50 }
 0x170   : > { %v2223_v56 = vpop.f32.mrf.mxu0 }
 0x172   : > { %v2041_v62 = vpop.f32.mrf.mxu3  ;;  %v1602_v9 = vpop.f32.mrf.mxu1 }
 0x173   : > { %v2077_v47 = vadd.f32 %v2041_v62, %v1767_v13  ;;  %v1635_v33 = vadd.f32 %v1602_v9, %v3947_v59 }
 0x175   : > { %v4118_v57 = vadd.f32 %v2223_v56, %v2077_v47 }
 0x176   : > { %v1734_v34 = vpop.f32.mrf.mxu2 }
 0x177   : > { %2276 = vst.msk [vmem:[%s4097_s11 + $0x18] sm:$0xff] %vm2272_vm8, %v4118_v57  ;;  %2311 = vrot.lane.b32.xlu1 %v4118_v57, %s3170_s8  ;;  %v1768_v23 = vadd.f32 %v1734_v34, %v1634_v24 }
 0x178   : > { %v2226_v39 = vpop.f32.mrf.mxu0 }
 0x17a   : > { %v2044_v12 = vpop.f32.mrf.mxu3  ;;  %v1605_v41 = vpop.f32.mrf.mxu1 }
 0x17b   : > { %v2078_v31 = vadd.f32 %v2044_v12, %v1768_v23  ;;  %v1636_v46 = vadd.f32 %v1605_v41, %v3962_v63 }
 0x17d   : > { %v4127_v11 = vadd.f32 %v2226_v39, %v2078_v31 }
 0x17e   : > { %v1736_v53 = vpop.f32.mrf.mxu2 }
 0x17f   : > { %2313 = vrot.lane.b32.xlu2 %v4127_v11, %s3170_s8  ;;  %2277 = vst.msk [vmem:[%s4097_s11 + $0x20] sm:$0xff] %vm2272_vm8, %v4127_v11  ;;  %v1769_v35 = vadd.f32 %v1736_v53, %v1635_v33 }
 0x180   : > { %v2228_v60 = vpop.f32.mrf.mxu0 }
 0x182   : > { %v2046_v16 = vpop.f32.mrf.mxu3  ;;  %v1607_v55 = vpop.f32.mrf.mxu1 }
 0x183   : > { %v2079_v6 = vadd.f32 %v2046_v16, %v1769_v35  ;;  %v1637_v40 = vadd.f32 %v1607_v55, %v3986_v21 }
 0x185   : > { %v4134_v48 = vadd.f32 %v2228_v60, %v2079_v6 }
 0x186   : > { %v1739_v59 = vpop.f32.mrf.mxu2 }
 0x187   : > { %2278 = vst.msk [vmem:[%s4097_s11 + $0x28] sm:$0xff] %vm2272_vm8, %v4134_v48  ;;  %2315 = vrot.lane.b32.xlu2 %v4134_v48, %s3170_s8  ;;  %v1770_v51 = vadd.f32 %v1739_v59, %v1636_v46 }
 0x188   : > { %v2231_v43 = vpop.f32.mrf.mxu0 }
 0x18a   : > { %v2049_v22 = vpop.f32.mrf.mxu3  ;;  %v1610_v2 = vpop.f32.mrf.mxu1 }
 0x18b   : > { %v2080_v38 = vadd.f32 %v2049_v22, %v1770_v51  ;;  %v1638_v25 = vadd.f32 %v1610_v2, %v4008_v20 }
 0x18d   : > { %v4142_v18 = vadd.f32 %v2231_v43, %v2080_v38 }
 0x18e   : > { %v1741_v29 = vpop.f32.mrf.mxu2 }
 0x18f   : > { %2279 = vst.msk [vmem:[%s4097_s11 + $0x30] sm:$0xff] %vm2272_vm8, %v4142_v18  ;;  %2317 = vrot.lane.b32.xlu0 %v4142_v18, %s3170_s8  ;;  %v1771_v63 = vadd.f32 %v1741_v29, %v1637_v40 }
 0x190   : > { %v2233_v42 = vpop.f32.mrf.mxu0 }
 0x192   : > { %v2051_v37 = vpop.f32.mrf.mxu3  ;;  %v1612_v27 = vpop.f32.mrf.mxu1 }
 0x193   : > { %v2081_v61 = vadd.f32 %v2051_v37, %v1771_v63  ;;  %v1639_v8 = vadd.f32 %v1612_v27, %v4022_v28 }
 0x195   : > { %v4150_v54 = vadd.f32 %v2233_v42, %v2081_v61 }
 0x196   : > { %v1744_v1 = vpop.f32.mrf.mxu2 }
 0x197   : > { %2280 = vst.msk [vmem:[%s4097_s11 + $0x38] sm:$0xff] %vm2272_vm8, %v4150_v54  ;;  %2319 = vrot.lane.b32.xlu1 %v4150_v54, %s3170_s8  ;;  %v1772_v21 = vadd.f32 %v1744_v1, %v1638_v25 }
 0x198   : > { %v2236_v52 = vpop.f32.mrf.mxu0 }
 0x19a   : > { %v2054_v58 = vpop.f32.mrf.mxu3  ;;  %v1615_v32 = vpop.f32.mrf.mxu1 }
 0x19b   : > { %v2082_v3 = vadd.f32 %v2054_v58, %v1772_v21  ;;  %v1640_v13 = vadd.f32 %v1615_v32, %v4045_v44 }
 0x19d   : > { %v4158_v15 = vadd.f32 %v2236_v52, %v2082_v3 }
 0x19e   : > { %v1746_v4 = vpop.f32.mrf.mxu2 }
 0x19f   : > { %2281 = vst.msk [vmem:[%s4097_s11 + $0x40] sm:$0xff] %vm2272_vm8, %v4158_v15  ;;  %2321 = vrot.lane.b32.xlu2 %v4158_v15, %s3170_s8  ;;  %v1773_v20 = vadd.f32 %v1746_v4, %v1639_v8 }
 0x1a0   : > { %v2238_v19 = vpop.f32.mrf.mxu0 }
 0x1a2   : > { %v2056_v49 = vpop.f32.mrf.mxu3  ;;  %v1617_v10 = vpop.f32.mrf.mxu1 }
 0x1a3   : > { %v2083_v50 = vadd.f32 %v2056_v49, %v1773_v20  ;;  %v1641_v23 = vadd.f32 %v1617_v10, %v4060_v26 }
 0x1a5   : > { %v4166_v36 = vadd.f32 %v2238_v19, %v2083_v50 }
 0x1a6   : > { %v1749_v56 = vpop.f32.mrf.mxu2 }
 0x1a7   : > { %2282 = vst.msk [vmem:[%s4097_s11 + $0x48] sm:$0xff] %vm2272_vm8, %v4166_v36  ;;  %2323 = vrot.lane.b32.xlu0 %v4166_v36, %s3170_s8  ;;  %v1774_v28 = vadd.f32 %v1749_v56, %v1640_v13 }
 0x1a8   : > { %v2241_v62 = vpop.f32.mrf.mxu0 }
 0x1aa   : > { %v2059_v9 = vpop.f32.mrf.mxu3  ;;  %v1620_v24 = vpop.f32.mrf.mxu1 }
 0x1ab   : > { %v2084_v47 = vadd.f32 %v2059_v9, %v1774_v28  ;;  %v1642_v53 = vadd.f32 %v1620_v24, %v4072_v14 }
 0x1ad   : > { %v4174_v34 = vadd.f32 %v2241_v62, %v2084_v47 }
 0x1ae   : > { %v1751_v39 = vpop.f32.mrf.mxu2 }
 0x1af   : > { %2283 = vst.msk [vmem:[%s4097_s11 + $0x50] sm:$0xff] %vm2272_vm8, %v4174_v34  ;;  %2325 = vrot.lane.b32.xlu1 %v4174_v34, %s3170_s8  ;;  %v1775_v44 = vadd.f32 %v1751_v39, %v1641_v23 }
 0x1b0   : > { %v2243_v12 = vpop.f32.mrf.mxu0 }
 0x1b2   : > { %v2061_v41 = vpop.f32.mrf.mxu3  ;;  %v1622_v35 = vpop.f32.mrf.mxu1 }
 0x1b3   : > { %v2085_v31 = vadd.f32 %v2061_v41, %v1775_v44  ;;  %v1643_v59 = vadd.f32 %v1622_v35, %v4081_v17 }
 0x1b5   : > { %v4182_v33 = vadd.f32 %v2243_v12, %v2085_v31 }
 0x1b6   : > { %v1754_v60 = vpop.f32.mrf.mxu2 }
 0x1b7   : > { %2284 = vst.msk [vmem:[%s4097_s11 + $0x58] sm:$0xff] %vm2272_vm8, %v4182_v33  ;;  %2327 = vrot.lane.b32.xlu2 %v4182_v33, %s3170_s8  ;;  %v1776_v26 = vadd.f32 %v1754_v60, %v1642_v53 }
 0x1b8   : > { %v2246_v16 = vpop.f32.mrf.mxu0 }
 0x1ba   : > { %v2064_v55 = vpop.f32.mrf.mxu3  ;;  %v1625_v43 = vpop.f32.mrf.mxu1 }
 0x1bb   : > { %v2086_v6 = vadd.f32 %v2064_v55, %v1776_v26  ;;  %v1644_v29 = vadd.f32 %v1625_v43, %v4086_v30 }
 0x1bd   : > { %v4190_v46 = vadd.f32 %v2246_v16, %v2086_v6 }
 0x1be   : > { %v1756_v51 = vpop.f32.mrf.mxu2 }
 0x1bf   : > { %2285 = vst.msk [vmem:[%s4097_s11 + $0x60] sm:$0xff] %vm2272_vm8, %v4190_v46  ;;  %2329 = vrot.lane.b32.xlu0 %v4190_v46, %s3170_s8  ;;  %v1777_v14 = vadd.f32 %v1756_v51, %v1643_v59 }
 0x1c0   : > { %v2248_v22 = vpop.f32.mrf.mxu0 }
 0x1c2   : > { %v2066_v2 = vpop.f32.mrf.mxu3  ;;  %v1627_v42 = vpop.f32.mrf.mxu1 }
 0x1c3   : > { %v2087_v38 = vadd.f32 %v2066_v2, %v1777_v14  ;;  %v1645_v1 = vadd.f32 %v1627_v42, %v4089_v45 }
 0x1c5   : > { %v4198_v40 = vadd.f32 %v2248_v22, %v2087_v38 }
 0x1c6   : > { %v1759_v63 = vpop.f32.mrf.mxu2 }
 0x1c7   : > { %2286 = vst.msk [vmem:[%s4097_s11 + $0x68] sm:$0xff] %vm2272_vm8, %v4198_v40  ;;  %2331 = vrot.lane.b32.xlu1 %v4198_v40, %s3170_s8  ;;  %v1778_v17 = vadd.f32 %v1759_v63, %v1644_v29 }
 0x1c8   : > { %v2251_v37 = vpop.f32.mrf.mxu0 }
 0x1ca   : > { %v2069_v27 = vpop.f32.mrf.mxu3 }
 0x1cb   : > { %v2088_v61 = vadd.f32 %v2069_v27, %v1778_v17 }
 0x1cd   : > { %v4206_v25 = vadd.f32 %v2251_v37, %v2088_v61 }
 0x1ce   : > { %v1761_v30 = vpop.f32.mrf.mxu2 }
 0x1cf   : > { %2287 = vst.msk [vmem:[%s4097_s11 + $0x70] sm:$0xff] %vm2272_vm8, %v4206_v25  ;;  %2333 = vrot.lane.b32.xlu2 %v4206_v25, %s3170_s8  ;;  %v1779_v21 = vadd.f32 %v1761_v30, %v1645_v1 }
 0x1d0   : > { %v2253_v3 = vpop.f32.mrf.mxu0 }
 0x1d1   : > { %v2306_v52 = vpop.permute.xlu0 %2305 }
 0x1d2   : > { %v2071_v58 = vpop.f32.mrf.mxu3  ;;  %3003 = vst.msk [vmem:[%s4097_s11 + $0x80] sm:$0xff] %vm2272_vm8, %v2306_v52 }
 0x1d3   : > { %v2089_v32 = vadd.f32 %v2071_v58, %v1779_v21 }
 0x1d5   : > { %v4216_v45 = vadd.f32 %v2253_v3, %v2089_v32 }
 0x1d7   : > { %2288 = vst.msk [vmem:[%s4097_s11 + $0x78] sm:$0xff] %vm2272_vm8, %v4216_v45  ;;  %2335 = vrot.lane.b32.xlu0 %v4216_v45, %s3170_s8 }
 0x1d9   : > { %v2308_v8 = vpop.permute.xlu0 %2307  ;;  %v2314_v4 = vpop.permute.xlu2 %2313 }
 0x1da   : > { %3004 = vst.msk [vmem:[%s4097_s11 + $0x88] sm:$0xff] %vm2272_vm8, %v2308_v8 }
 0x1db   : > { %3007 = vst.msk [vmem:[%s4097_s11 + $0xa0] sm:$0xff] %vm2272_vm8, %v2314_v4 }
 0x1e1   : > { %v2310_v20 = vpop.permute.xlu1 %2309  ;;  %v2316_v19 = vpop.permute.xlu2 %2315 }
 0x1e2   : > { %3005 = vst.msk [vmem:[%s4097_s11 + $0x90] sm:$0xff] %vm2272_vm8, %v2310_v20 }
 0x1e3   : > { %3008 = vst.msk [vmem:[%s4097_s11 + $0xa8] sm:$0xff] %vm2272_vm8, %v2316_v19 }
 0x1e9   : > { %v2312_v49 = vpop.permute.xlu1 %2311 }
 0x1ea   : > { %3006 = vst.msk [vmem:[%s4097_s11 + $0x98] sm:$0xff] %vm2272_vm8, %v2312_v49 }
 0x1f9   : > { %v2322_v10 = vpop.permute.xlu2 %2321 }
 0x1fa   : > { %3011 = vst.msk [vmem:[%s4097_s11 + $0xc0] sm:$0xff] %vm2272_vm8, %v2322_v10 }
 0x201   : > { %v2318_v50 = vpop.permute.xlu0 %2317 }
 0x202   : > { %3009 = vst.msk [vmem:[%s4097_s11 + $0xb0] sm:$0xff] %vm2272_vm8, %v2318_v50 }
 0x209   : > { %v2320_v13 = vpop.permute.xlu1 %2319 }
 0x20a   : > { %3010 = vst.msk [vmem:[%s4097_s11 + $0xb8] sm:$0xff] %vm2272_vm8, %v2320_v13 }
 0x211   : > { %v2328_v56 = vpop.permute.xlu2 %2327 }
 0x212   : > { %3014 = vst.msk [vmem:[%s4097_s11 + $0xd8] sm:$0xff] %vm2272_vm8, %v2328_v56 }
 0x219   : > { %v2324_v28 = vpop.permute.xlu0 %2323 }
 0x21a   : > { %3012 = vst.msk [vmem:[%s4097_s11 + $0xc8] sm:$0xff] %vm2272_vm8, %v2324_v28 }
 0x221   : > { %v2326_v62 = vpop.permute.xlu1 %2325 }
 0x222   : > { %3013 = vst.msk [vmem:[%s4097_s11 + $0xd0] sm:$0xff] %vm2272_vm8, %v2326_v62 }
 0x229   : > { %v2334_v9 = vpop.permute.xlu2 %2333 }
 0x22a   : > { %3017 = vst.msk [vmem:[%s4097_s11 + $0xf0] sm:$0xff] %vm2272_vm8, %v2334_v9 }
 0x231   : > { %v2330_v47 = vpop.permute.xlu0 %2329 }
 0x232   : > { %3015 = vst.msk [vmem:[%s4097_s11 + $0xe0] sm:$0xff] %vm2272_vm8, %v2330_v47 }
 0x239   : > { %v2332_v24 = vpop.permute.xlu1 %2331 }
 0x23a   : > { %3016 = vst.msk [vmem:[%s4097_s11 + $0xe8] sm:$0xff] %vm2272_vm8, %v2332_v24 }
 0x246   : > { %2373 = sbr.rel (%p3019_p11) target bundleno = 589 (0x24d), region = 40 }
 0x249   : > { %v2336_v23 = vpop.permute.xlu0 %2335 }
 0x24a   : > { %3018 = vst.msk [vmem:[%s4097_s11 + $0xf8] sm:$0xff] %vm2272_vm8, %v2336_v23 }
 0x24b   : > { %vm2374_vm9 = vcmask 25600   ;;  %v3171_v39 = vmov 0.0  }
 0x24c   : > { %2375 = vst.msk [vmem:[%s3275_s7] sm:$0x3] %vm2374_vm9, %v3171_v39 }
 0x24d PF: > { %vm2376_vm10 = vcmask 31744   ;;  %v2414_v26 = vmul.f32 %v4093_v7, %v4093_v7  ;;  %v2415_v16 = vmul.f32 %v4102_v5, %v4102_v5  ;;  %v2416_v55 = vmul.f32 %v4111_v0, %v4111_v0  ;;  %s3021_s18 = sshll.u32 (%p3251_p6), %s3156_s21, 1 }
 0x24e   : > { %v2377_v44 = vsel %vm2376_vm10, %v4093_v7, 0.0  ;;  %v2378_v12 = vsel %vm2376_vm10, %v4102_v5, 0.0  ;;  %v2380_v41 = vsel %vm2376_vm10, %v4111_v0, 0.0  ;;  %v2382_v53 = vsel %vm2376_vm10, %v4118_v57, 0.0  ;;  %s2485_s12 = sadd.s32 (%p3251_p6), %s3152_s20, %s3021_s18 }
 0x24f   : > { %v2379_v31 = vadd.f32 %v2378_v12, %v2377_v44  ;;  %v2384_v60 = vsel %vm2376_vm10, %v4127_v11, 0.0  ;;  %v2386_v59 = vsel %vm2376_vm10, %v4134_v48, 0.0  ;;  %v2417_v51 = vmul.f32 %v4118_v57, %v4118_v57  ;;  %s3050_s15 = sshll.u32 (%p3251_p6), %s2485_s12, 7 }
 0x250   : > { %v2388_v43 = vsel %vm2376_vm10, %v4142_v18, 0.0  ;;  %v2418_v7 = vmul.f32 %v4127_v11, %v4127_v11  ;;  %v2430_v22 = vsel %vm2376_vm10, %v2414_v26, 0.0  ;;  %v2431_v5 = vsel %vm2376_vm10, %v2415_v16, 0.0  ;;  %s4346_s30 = scalar_lea.vmem (%p3251_p6), %s4435_s4, %s3050_s15 }
 0x251   : > { %v2381_v35 = vadd.f32 %v2380_v41, %v2379_v31  ;;  %v2433_v0 = vsel %vm2376_vm10, %v2416_v55, 0.0  ;;  %v2432_v38 = vadd.f32 %v2431_v5, %v2430_v22  ;;  %v2390_v29 = vsel %vm2376_vm10, %v4150_v54, 0.0 }
 0x252   : > { %v2419_v57 = vmul.f32 %v4134_v48, %v4134_v48  ;;  %v2435_v63 = vsel %vm2376_vm10, %v2417_v51, 0.0  ;;  %v2392_v11 = vsel %vm2376_vm10, %v4158_v15, 0.0  ;;  %v2420_v37 = vmul.f32 %v4142_v18, %v4142_v18 }
 0x253   : > { %v2383_v6 = vadd.f32 %v2382_v53, %v2381_v35  ;;  %v2434_v42 = vadd.f32 %v2433_v0, %v2432_v38  ;;  %v2437_v27 = vsel %vm2376_vm10, %v2418_v7, 0.0  ;;  %v2394_v30 = vsel %vm2376_vm10, %v4166_v36, 0.0 }
 0x254   : > { %v2421_v48 = vmul.f32 %v4150_v54, %v4150_v54  ;;  %v2439_v21 = vsel %vm2376_vm10, %v2419_v57, 0.0  ;;  %v2396_v32 = vsel %vm2376_vm10, %v4174_v34, 0.0  ;;  %v2422_v18 = vmul.f32 %v4158_v15, %v4158_v15 }
 0x255   : > { %v2385_v14 = vadd.f32 %v2384_v60, %v2383_v6  ;;  %v2436_v1 = vadd.f32 %v2435_v63, %v2434_v42  ;;  %v2441_v3 = vsel %vm2376_vm10, %v2420_v37, 0.0  ;;  %v2398_v20 = vsel %vm2376_vm10, %v4182_v33, 0.0 }
 0x256   : > { %v2423_v54 = vmul.f32 %v4166_v36, %v4166_v36  ;;  %v2443_v19 = vsel %vm2376_vm10, %v2421_v48, 0.0  ;;  %v2400_v50 = vsel %vm2376_vm10, %v4190_v46, 0.0  ;;  %v2424_v15 = vmul.f32 %v4174_v34, %v4174_v34  ;;  %v2585_v48 = vld [vmem:[%s4097_s11 + $0x18] sm:$0xff] (%p3251_p6) }
 0x257   : > { %v2387_v2 = vadd.f32 %v2386_v59, %v2385_v14  ;;  %v2438_v58 = vadd.f32 %v2437_v27, %v2436_v1  ;;  %v2445_v13 = vsel %vm2376_vm10, %v2422_v18, 0.0  ;;  %v2402_v62 = vsel %vm2376_vm10, %v4198_v40, 0.0  ;;  %v2581_v1 = vld [vmem:[%s4097_s11 + $0x8] sm:$0xff] (%p3251_p6)  ;;  %2586 = vst [vmem:[%s4346_s30 + $0x18] sm:$0xff] (%p3251_p6), %v2585_v48  ;;  %v2595_v18 = vld [vmem:[%s4097_s11 + $0x40] sm:$0xff] (%p3251_p6) }
 0x258   : > { %v2425_v36 = vmul.f32 %v4182_v33, %v4182_v33  ;;  %v2447_v9 = vsel %vm2376_vm10, %v2423_v54, 0.0  ;;  %v2404_v23 = vsel %vm2376_vm10, %v4206_v25, 0.0  ;;  %v2426_v34 = vmul.f32 %v4190_v46, %v4190_v46  ;;  %2582 = vst [vmem:[%s4346_s30 + $0x8] sm:$0xff] (%p3251_p6), %v2581_v1  ;;  %v2605_v54 = vld [vmem:[%s4097_s11 + $0x68] sm:$0xff] (%p3251_p6) }
 0x259   : > { %v2389_v17 = vadd.f32 %v2388_v43, %v2387_v2  ;;  %v2440_v4 = vadd.f32 %v2439_v21, %v2438_v58  ;;  %v2449_v39 = vsel %vm2376_vm10, %v2424_v15, 0.0  ;;  %v2406_v41 = vsel %vm2376_vm10, %v4216_v45, 0.0  ;;  %v2587_v21 = vld [vmem:[%s4097_s11 + $0x20] sm:$0xff] (%p3251_p6)  ;;  %v2591_v58 = vld [vmem:[%s4097_s11 + $0x30] sm:$0xff] (%p3251_p6)  ;;  %2596 = vst [vmem:[%s4346_s30 + $0x40] sm:$0xff] (%p3251_p6), %v2595_v18 }
 0x25a   : > { %v2427_v33 = vmul.f32 %v4198_v40, %v4198_v40  ;;  %v2451_v31 = vsel %vm2376_vm10, %v2425_v36, 0.0  ;;  %v2428_v60 = vmul.f32 %v4206_v25, %v4206_v25  ;;  %v2453_v26 = vsel %vm2376_vm10, %v2426_v34, 0.0  ;;  %2588 = vst [vmem:[%s4346_s30 + $0x20] sm:$0xff] (%p3251_p6), %v2587_v21  ;;  %v2615_v15 = vld [vmem:[%s4097_s11 + $0x90] sm:$0xff] (%p3251_p6)  ;;  %v2625_v36 = vld [vmem:[%s4097_s11 + $0xb8] sm:$0xff] (%p3251_p6)  ;;  %v2635_v34 = vld [vmem:[%s4097_s11 + $0xe0] sm:$0xff] (%p3251_p6) }
 0x25b   : > { %v2391_v61 = vadd.f32 %v2390_v29, %v2389_v17  ;;  %v2442_v10 = vadd.f32 %v2441_v3, %v2440_v4  ;;  %v2429_v55 = vmul.f32 %v4216_v45, %v4216_v45  ;;  %vm2468_vm11 = vcmask 1040384   ;;  %2592 = vst [vmem:[%s4346_s30 + $0x30] sm:$0xff] (%p3251_p6), %v2591_v58  ;;  %v2597_v3 = vld [vmem:[%s4097_s11 + $0x48] sm:$0xff] (%p3251_p6)  ;;  %v2601_v4 = vld [vmem:[%s4097_s11 + $0x58] sm:$0xff] (%p3251_p6) }
 0x25c   : > { %v2455_v6 = vsel %vm2376_vm10, %v2427_v33, 0.0  ;;  %v2457_v40 = vsel %vm2376_vm10, %v2428_v60, 0.0  ;;  %vm2471_vm12 = vcmask 25600   ;;  %2598 = vst [vmem:[%s4346_s30 + $0x48] sm:$0xff] (%p3251_p6), %v2597_v3 }
 0x25d   : > { %v2393_v52 = vadd.f32 %v2392_v11, %v2391_v61  ;;  %v2444_v28 = vadd.f32 %v2443_v19, %v2442_v10  ;;  %v2459_v7 = vsel %vm2376_vm10, %v2429_v55, 0.0  ;;  %v2467_v11 = vld [vmem:[%s3275_s7] sm:$0x3]  ;;  %2602 = vst [vmem:[%s4346_s30 + $0x58] sm:$0xff] (%p3251_p6), %v2601_v4  ;;  %v2607_v19 = vld [vmem:[%s4097_s11 + $0x70] sm:$0xff] (%p3251_p6) }
 0x25e   : > { %v2579_v61 = vld [vmem:[%s4097_s11] sm:$0xff] (%p3251_p6)  ;;  %2606 = vst [vmem:[%s4346_s30 + $0x68] sm:$0xff] (%p3251_p6), %v2605_v54 }
 0x25f   : > { %v2395_v8 = vadd.f32 %v2394_v30, %v2393_v52  ;;  %v2446_v24 = vadd.f32 %v2445_v13, %v2444_v28  ;;  %v2583_v30 = vld [vmem:[%s4097_s11 + $0x10] sm:$0xff] (%p3251_p6)  ;;  %2580 = vst [vmem:[%s4346_s30] sm:$0xff] (%p3251_p6), %v2579_v61  ;;  %v2589_v52 = vld [vmem:[%s4097_s11 + $0x28] sm:$0xff] (%p3251_p6)  ;;  %v2611_v10 = vld [vmem:[%s4097_s11 + $0x80] sm:$0xff] (%p3251_p6) }
 0x260   : > { %2584 = vst [vmem:[%s4346_s30 + $0x10] sm:$0xff] (%p3251_p6), %v2583_v30  ;;  %v2617_v13 = vld [vmem:[%s4097_s11 + $0x98] sm:$0xff] (%p3251_p6)  ;;  %v2621_v28 = vld [vmem:[%s4097_s11 + $0xa8] sm:$0xff] (%p3251_p6) }
 0x261   : > { %v2397_v49 = vadd.f32 %v2396_v32, %v2395_v8  ;;  %v2448_v12 = vadd.f32 %v2447_v9, %v2446_v24  ;;  %v2593_v32 = vld [vmem:[%s4097_s11 + $0x38] sm:$0xff] (%p3251_p6)  ;;  %2590 = vst [vmem:[%s4346_s30 + $0x28] sm:$0xff] (%p3251_p6), %v2589_v52  ;;  %v2599_v8 = vld [vmem:[%s4097_s11 + $0x50] sm:$0xff] (%p3251_p6)  ;;  %v2627_v9 = vld [vmem:[%s4097_s11 + $0xc0] sm:$0xff] (%p3251_p6) }
 0x262   : > { %2594 = vst [vmem:[%s4346_s30 + $0x38] sm:$0xff] (%p3251_p6), %v2593_v32  ;;  %v2631_v24 = vld [vmem:[%s4097_s11 + $0xd0] sm:$0xff] (%p3251_p6) }
 0x263   : > { %v2399_v56 = vadd.f32 %v2398_v20, %v2397_v49  ;;  %v2450_v35 = vadd.f32 %v2449_v39, %v2448_v12  ;;  %v2603_v20 = vld [vmem:[%s4097_s11 + $0x60] sm:$0xff] (%p3251_p6)  ;;  %2600 = vst [vmem:[%s4346_s30 + $0x50] sm:$0xff] (%p3251_p6), %v2599_v8  ;;  %v2609_v49 = vld [vmem:[%s4097_s11 + $0x78] sm:$0xff] (%p3251_p6)  ;;  %v2637_v39 = vld [vmem:[%s4097_s11 + $0xe8] sm:$0xff] (%p3251_p6) }
 0x264   : > { %2604 = vst [vmem:[%s4346_s30 + $0x60] sm:$0xff] (%p3251_p6), %v2603_v20  ;;  %v2641_v12 = vld [vmem:[%s4097_s11 + $0xf8] sm:$0xff] (%p3251_p6) }
 0x265   : > { %v2401_v47 = vadd.f32 %v2400_v50, %v2399_v56  ;;  %v2452_v16 = vadd.f32 %v2451_v31, %v2450_v35  ;;  %2608 = vst [vmem:[%s4346_s30 + $0x70] sm:$0xff] (%p3251_p6), %v2607_v19  ;;  %v2613_v50 = vld [vmem:[%s4097_s11 + $0x88] sm:$0xff] (%p3251_p6)  ;;  %v2619_v56 = vld [vmem:[%s4097_s11 + $0xa0] sm:$0xff] (%p3251_p6) }
 0x266   : > { %2610 = vst [vmem:[%s4346_s30 + $0x78] sm:$0xff] (%p3251_p6), %v2609_v49 }
 0x267   : > { %v2403_v44 = vadd.f32 %v2402_v62, %v2401_v47  ;;  %v2454_v51 = vadd.f32 %v2453_v26, %v2452_v16  ;;  %2612 = vst [vmem:[%s4346_s30 + $0x200] sm:$0xff] (%p3251_p6), %v2611_v10  ;;  %v2623_v62 = vld [vmem:[%s4097_s11 + $0xb0] sm:$0xff] (%p3251_p6)  ;;  %v2629_v47 = vld [vmem:[%s4097_s11 + $0xc8] sm:$0xff] (%p3251_p6) }
 0x268   : > { %2614 = vst [vmem:[%s4346_s30 + $0x208] sm:$0xff] (%p3251_p6), %v2613_v50 }
 0x269   : > { %v2405_v53 = vadd.f32 %v2404_v23, %v2403_v44  ;;  %v2456_v43 = vadd.f32 %v2455_v6, %v2454_v51  ;;  %2616 = vst [vmem:[%s4346_s30 + $0x210] sm:$0xff] (%p3251_p6), %v2615_v15  ;;  %v2633_v23 = vld [vmem:[%s4097_s11 + $0xd8] sm:$0xff] (%p3251_p6)  ;;  %v2639_v44 = vld [vmem:[%s4097_s11 + $0xf0] sm:$0xff] (%p3251_p6) }
 0x26a   : > { %2618 = vst [vmem:[%s4346_s30 + $0x218] sm:$0xff] (%p3251_p6), %v2617_v13 }
 0x26b   : > { %v2407_v46 = vadd.f32 %v2406_v41, %v2405_v53  ;;  %v2458_v25 = vadd.f32 %v2457_v40, %v2456_v43  ;;  %2620 = vst [vmem:[%s4346_s30 + $0x220] sm:$0xff] (%p3251_p6), %v2619_v56 }
 0x26c   : > { %2622 = vst [vmem:[%s4346_s30 + $0x228] sm:$0xff] (%p3251_p6), %v2621_v28 }
 0x26d   : > { %v2408_v59 = vrot.slane %v2407_v46, 4  ;;  %v2460_v5 = vadd.f32 %v2459_v7, %v2458_v25  ;;  %2624 = vst [vmem:[%s4346_s30 + $0x230] sm:$0xff] (%p3251_p6), %v2623_v62 }
 0x26e   : > { %2626 = vst [vmem:[%s4346_s30 + $0x238] sm:$0xff] (%p3251_p6), %v2625_v36 }
 0x26f   : > { %v2409_v14 = vadd.f32 %v2408_v59, %v2407_v46  ;;  %v2461_v2 = vrot.slane %v2460_v5, 4  ;;  %2628 = vst [vmem:[%s4346_s30 + $0x240] sm:$0xff] (%p3251_p6), %v2627_v9 }
 0x270   : > { %2630 = vst [vmem:[%s4346_s30 + $0x248] sm:$0xff] (%p3251_p6), %v2629_v47 }
 0x271   : > { %v2410_v22 = vrot.slane %v2409_v14, 2  ;;  %v2462_v38 = vadd.f32 %v2461_v2, %v2460_v5  ;;  %2632 = vst [vmem:[%s4346_s30 + $0x250] sm:$0xff] (%p3251_p6), %v2631_v24 }
 0x272   : > { %2634 = vst [vmem:[%s4346_s30 + $0x258] sm:$0xff] (%p3251_p6), %v2633_v23 }
 0x273   : > { %v2411_v0 = vadd.f32 %v2410_v22, %v2409_v14  ;;  %v2463_v45 = vrot.slane %v2462_v38, 2  ;;  %2636 = vst [vmem:[%s4346_s30 + $0x260] sm:$0xff] (%p3251_p6), %v2635_v34 }
 0x274   : > { %2638 = vst [vmem:[%s4346_s30 + $0x268] sm:$0xff] (%p3251_p6), %v2637_v39 }
 0x275   : > { %v2412_v29 = vrot.slane %v2411_v0, 1  ;;  %v2464_v57 = vadd.f32 %v2463_v45, %v2462_v38  ;;  %2640 = vst [vmem:[%s4346_s30 + $0x270] sm:$0xff] (%p3251_p6), %v2639_v44 }
 0x276   : > { %2642 = vst [vmem:[%s4346_s30 + $0x278] sm:$0xff] (%p3251_p6), %v2641_v12 }
 0x277   : > { %v2413_v63 = vadd.f32 %v2412_v29, %v2411_v0  ;;  %v2465_v17 = vrot.slane %v2464_v57, 1 }
 0x279   : > { %v2466_v42 = vadd.f32 %v2465_v17, %v2464_v57 }
 0x27a   : > { %2483 = sbr.rel (!%p3251_p6) target bundleno = 639 (0x27f), region = 44 }
 0x27b   : > { %v2469_v37 = vsel %vm2468_vm11, %v2413_v63, %v2466_v42 }
 0x27c   : > { %v2470_v27 = vadd.f32 %v2469_v37, %v2467_v11 }
 0x27e   : > { %2472 = vst.msk [vmem:[%s3275_s7] sm:$0x3] %vm2471_vm12, %v2470_v27 }
 0x27f PF: > { %s16_s24 = sadd.s32 1, %s3168_s24   ;;  %s4446_s18 = smov %s3148_s19 }
 0x280   : > { %p13_p12 = scmp.ge.s32.totalorder %s16_s24, 6   ;;  %s4447_s19 = smov %s3259_s10 }
 0x281   : > { %s4448_s20 = smov %s3160_s22  ;;  %s4449_s21 = smov %s3164_s23 }
 0x282   : > { %s4450_s22 = smov %s4453_s25  ;;  %s4451_s23 = smov %s4457_s26 }
 0x283   :  { %15 = sbr.rel (!%p13_p12) target bundleno = 4 (0x4), region = 135 }

</bundles_post_ra>
